<compile_context>
chip_gen: v5e
topology: v5e:2x2
jax: 0.10.0
libtpu: 0.0.40
codegen_flags: <defaults>
</compile_context>

<pallas_src>
import math
import functools

import jax
import jax.numpy as jnp
from jax import lax
from jax.experimental import pallas as pl
from jax.experimental.pallas import tpu as pltpu

HEADS = 8
NUM_BUCKETS = 32
MAX_DISTANCE = 128


def _bucket_intervals(num_buckets: int, max_distance: int):
    """Integer |d| intervals [lo[g], hi[g]] covered by bucket g (0 <= g < nb).

    hi[g] is None for the last (clamped) bucket.  The thresholds are the exact
    points where floor(log(|d|/max_exact)/log(max_distance/max_exact)*(nb-max_exact))
    increments, computed in float64 from the closed-form inverse with an epsilon
    guard so power-of-two boundaries land exactly.
    """
    nb = num_buckets // 2          # matches `num_buckets //= 2` in the torch code
    me = nb // 2                   # max_exact
    nlog = nb - me
    ratio = max_distance / me
    lo = list(range(me)) + [me] + [
        int(math.ceil(me * ratio ** (k / nlog) - 1e-9)) for k in range(1, nlog)
    ]
    hi = [lo[g + 1] - 1 for g in range(nb - 1)] + [None]
    assert len(lo) == nb and all(lo[g] < lo[g + 1] for g in range(nb - 1))
    return lo, hi


def _make_rpb_kernel(heads: int, num_buckets: int, max_distance: int, ti: int, tj: int):
    """Build the kernel closure with all hyper-parameters static."""
    nb = num_buckets // 2
    lo, hi = _bucket_intervals(num_buckets, max_distance)
    clamp = lo[-1]                 # smallest |d| whose bucket clamps (91 for defaults)
    R = min(8, ti)                 # sublane-aligned row strip

    def _side_masks(negative: bool):
        """(bucket_id, mask_fn(d)) for one sign of d.  Bucket nb (negative, |d|=0)
        is unreachable in the torch formula and is skipped; bucket 0 (d == 0) is
        the accumulator init value."""
        out = []
        for g in range(1, nb):
            l, h = lo[g], hi[g]
            if not negative:
                if h is None:
                    out.append((g, lambda d, l=l: d >= l))
                elif l == h:
                    out.append((g, lambda d, l=l: d == l))
                else:
                    out.append((g, lambda d, l=l, h=h: jnp.logical_and(d >= l, d <= h)))
            else:
                if h is None:
                    out.append((nb + g, lambda d, l=l: d <= -l))
                elif l == h:
                    out.append((nb + g, lambda d, l=l: d == -l))
                else:
                    out.append((nb + g, lambda d, l=l, h=h: jnp.logical_and(d <= -l, d >= -h)))
        return out

    pos_masks = _side_masks(False)
    neg_masks = _side_masks(True)

    def kernel(table_ref, out_ref):
        # table_ref: SMEM (num_buckets * heads,) f32 — flattened embedding weight.
        # out_ref  : VMEM (heads, ti, tj) f32 tile at block position (0, gi, gj).
        i0 = pl.program_id(0) * ti
        j0 = pl.program_id(1) * tj
        d_base = i0 - j0                        # d = i - j at the tile's (0, 0) corner
        d_min = d_base - (tj - 1)
        d_max = d_base + (ti - 1)

        def splat(bucket):
            for h in range(heads):
                out_ref[h] = jnp.full((ti, tj), table_ref[bucket * heads + h], jnp.float32)

        # ---- constant-tile fast paths: whole tile clamps to a single bucket ----
        far_pos = d_min >= clamp                # every d >= clamp  -> bucket nb-1
        far_neg = d_max <= -clamp               # every d <= -clamp -> bucket 2*nb-1

        @pl.when(far_pos)
        def _():
            splat(nb - 1)

        @pl.when(far_neg)
        def _():
            splat(2 * nb - 1)

        # ---- general path: 8-row strips, SSA select chain, one store/head/strip ----
        def emit(masks):
            # (r - c) offset template; loop-invariant across strips.
            rel = (lax.broadcasted_iota(jnp.int32, (R, tj), 0)
                   - lax.broadcasted_iota(jnp.int32, (R, tj), 1))

            def one_strip(r0, rows, rel_rc):
                d = rel_rc + (d_base + r0)
                # Init with bucket 0 (d == 0); every other d is overwritten by the
                # (unique) bucket whose interval it falls in.
                accs = [jnp.full((rows, tj), table_ref[h], jnp.float32)
                        for h in range(heads)]
                # Bucket-outer / head-inner: each mask is computed once and reused
                # across all heads; only the `heads` accumulators stay live
                # (8 x 4 vregs at tj=512), so nothing spills and nothing round-trips
                # through VMEM until the single store per head.
                for b, mask_fn in masks:
                    m = mask_fn(d)
                    accs = [jnp.where(m, table_ref[b * heads + h], accs[h])
                            for h in range(heads)]
                for h in range(heads):
                    out_ref[h, pl.ds(r0, rows), :] = accs[h]

            n_full = ti // R
            if n_full > 0:
                @pl.loop(0, n_full)
                def _(s):
                    one_strip(pl.multiple_of(s * R, R), R, rel)
            rem = ti - n_full * R
            if rem:
                rel_rem = (lax.broadcasted_iota(jnp.int32, (rem, tj), 0)
                           - lax.broadcasted_iota(jnp.int32, (rem, tj), 1))
                one_strip(n_full * R, rem, rel_rem)

        near = jnp.logical_not(jnp.logical_or(far_pos, far_neg))

        @pl.when(jnp.logical_and(near, d_min >= 0))                    # all d >= 0
        def _():
            emit(pos_masks)

        @pl.when(jnp.logical_and(near, jnp.logical_and(d_min < 0, d_max <= 0)))  # all d <= 0
        def _():
            emit(neg_masks)

        @pl.when(jnp.logical_and(near, jnp.logical_and(d_min < 0, d_max > 0)))   # mixed
        def _():
            emit(pos_masks + neg_masks)

    return kernel


@functools.partial(jax.jit, static_argnames=("n", "block_rows", "block_cols"))
def relative_position_bias(table: jax.Array, n: int,
                           block_rows: int | None = None,
                           block_cols: int | None = None) -> jax.Array:
    """table: (num_buckets, heads) f32 embedding weight. Returns (heads, n, n) f32."""
    num_buckets, heads = table.shape

    if block_cols is None:
        tj = n if n <= 512 else 512            # lane-dense output tile
    else:
        tj = block_cols
    if block_rows is None:
        ti = n if n <= 256 else 256
        # v7x has 2 TensorCores: keep >= 2 blocks on the leading "parallel" axis
        # whenever the halved tile stays sublane-aligned (no-op on v5e/v6e).
        if pl.cdiv(n, ti) < 2 and ti % 16 == 0:
            ti //= 2
    else:
        ti = block_rows

    assert ti == n or ti % 8 == 0, "block_rows must be a multiple of 8 or equal n"
    assert tj == n or tj % 128 == 0, "block_cols must be a multiple of 128 or equal n"

    grid = (pl.cdiv(n, ti), pl.cdiv(n, tj))
    kernel = _make_rpb_kernel(heads, num_buckets, MAX_DISTANCE, ti, tj)

    block_bytes = heads * ti * tj * 4          # 4 MiB for the default (8, 256, 512)
    # Double-buffered output block + headroom; kept <= 32 MiB for v7x's scoped VMEM,
    # explicit because v5e's default scoped limit (16 MiB) is otherwise marginal.
    vmem_limit = int(min(max(4 * block_bytes + (8 << 20), 16 << 20), 32 << 20))
    cost = pl.CostEstimate(
        flops=64 * n * min(n, 4 * MAX_DISTANCE),       # select work ~ diagonal band only
        transcendentals=0,                             # integer thresholds, no log
        bytes_accessed=4 * heads * n * n + 4 * num_buckets * heads,
    )

    return pl.pallas_call(
        kernel,
        out_shape=jax.ShapeDtypeStruct((heads, n, n), jnp.float32),
        grid_spec=pltpu.PrefetchScalarGridSpec(
            num_scalar_prefetch=0,
            grid=grid,
            in_specs=[pl.BlockSpec(memory_space=pltpu.MemorySpace.SMEM)],
            out_specs=pl.BlockSpec((heads, ti, tj), lambda gi, gj: (0, gi, gj)),
        ),
        compiler_params=pltpu.CompilerParams(
            dimension_semantics=("parallel", "parallel"),
            vmem_limit_bytes=vmem_limit,
        ),
        cost_estimate=cost,
    )(table.reshape(-1))


# ----------------------------- references ------------------------------------

def _reference(table: jax.Array, n: int) -> jax.Array:
    """Pure-JAX reference (integer-threshold form).

    For integer relative positions, the torch log-bucket expression is a step
    function whose steps sit exactly at the integer thresholds returned by
    _bucket_intervals, so summing (|d| >= t) reproduces it without float
    transcendentals (and is bit-identical to the kernel's logic)."""
    num_buckets, heads = table.shape
    lo, _ = _bucket_intervals(num_buckets, MAX_DISTANCE)
    nb = num_buckets // 2
    me = nb // 2
    q = jnp.arange(n, dtype=jnp.int32)
    d = q[:, None] - q[None, :]                       # i - j  (== -(k_pos - q_pos))
    a = jnp.abs(d)
    large = me + sum((a >= v).astype(jnp.int32) for v in lo[me + 1:])
    bucket = jnp.where(d < 0, nb, 0) + jnp.where(a < me, a, large)
    return jnp.transpose(table[bucket], (2, 0, 1))    # (heads, n, n)


def _reference_log(table: jax.Array, n: int) -> jax.Array:
    """Literal float32-log port of the PyTorch forward."""
    num_buckets, heads = table.shape
    nb = num_buckets // 2
    me = nb // 2
    q = jnp.arange(n, dtype=jnp.int32)
    rel = q[None, :] - q[:, None]                     # k_pos - q_pos
    d = -rel
    ret = (d < 0).astype(jnp.int32) * nb
    a = jnp.abs(d)
    is_small = a < me
    val = me + (jnp.log(jnp.maximum(a, 1).astype(jnp.float32) / me)
                / math.log(MAX_DISTANCE / me) * (nb - me)).astype(jnp.int32)
    val = jnp.minimum(val, nb - 1)
    bucket = ret + jnp.where(is_small, a, val)
    return jnp.transpose(table[bucket], (2, 0, 1))


def _ambiguous_distances(num_buckets: int, max_distance: int):
    """|i-j| values where the real-valued log expression lands exactly on an
    integer, so 1-ulp float32 log rounding can legitimately flip the bucket."""
    nb = num_buckets // 2
    me = nb // 2
    out = []
    for v in range(me, max_distance + 1):
        x = math.log(v / me) / math.log(max_distance / me) * (nb - me)
        if abs(x - round(x)) < 1e-6:
            out.append(v)
    return out


if __name__ == "__main__":
    key = jax.random.PRNGKey(0)
    # nn.Embedding(num_buckets, heads) weight: default init ~ N(0, 1)
    emb_weight = jax.random.normal(key, (NUM_BUCKETS, HEADS), dtype=jnp.float32)

    ambiguous = _ambiguous_distances(NUM_BUCKETS, MAX_DISTANCE)

    # (n, block_rows, block_cols):
    #  * n=64  : full-dim blocks, leading axis auto-split to 2 tiles (v7x).
    #  * n=256 : small explicit tiles so the constant / one-sided / mixed paths
    #            are all exercised at a small shape.
    #  * n=512 : default multi-tile path.
    cases = [(64, None, None), (256, 32, 128), (512, None, None)]
    for n, br, bc in cases:
        out = relative_position_bias(emb_weight, n, block_rows=br, block_cols=bc)
        out = jax.block_until_ready(out)
        assert out.shape == (HEADS, n, n) and out.dtype == jnp.float32

        ref = _reference(emb_weight, n)
        assert jnp.allclose(out, ref, atol=0.0, rtol=0.0), f"mismatch vs reference at n={n}"

        # Cross-check vs the literal float32-log port of the torch formula,
        # ignoring the few |i-j| diagonals where that formula itself sits on a
        # floor() boundary (there, any 1-ulp log difference moves the bucket).
        ref_log = _reference_log(emb_weight, n)
        idx = jnp.arange(n, dtype=jnp.int32)
        dist = jnp.abs(idx[:, None] - idx[None, :])
        safe = jnp.ones((n, n), dtype=bool)
        for v in ambiguous:
            safe = jnp.logical_and(safe, dist != v)
        mismatch = jnp.logical_and(out != ref_log, safe[None, :, :])
        assert not bool(jnp.any(mismatch)), f"mismatch vs log-formula reference at n={n}"

    print("KERNEL_OK")
</pallas_src>

<mosaic_0001>
module attributes {stable_mosaic.version = 11 : i64} {
  func.func @kernel(%arg0: i32, %arg1: i32, %arg2: memref<256xf32, #tpu.memory_space<smem>>, %arg3: memref<8x32x64xf32, #tpu.memory_space<vmem>>) attributes {dimension_semantics = [#tpu.dimension_semantics<parallel>, #tpu.dimension_semantics<parallel>], iteration_bounds = array<i64: 2, 1>, scalar_prefetch = 0 : i64, scratch_operands = 0 : i64, tpu.core_type = #tpu.core_type<tc>, window_params = [{transform_indices = @transform_0, window_bounds = array<i64: 256>}, {transform_indices = @transform_1, window_bounds = array<i64: 8, 32, 64>}]} {
    %c32_i32 = arith.constant 32 : i32
    %0 = arith.muli %arg0, %c32_i32 : i32
    %c64_i32 = arith.constant 64 : i32
    %1 = arith.muli %arg1, %c64_i32 : i32
    %2 = arith.subi %0, %1 : i32
    %c63_i32 = arith.constant 63 : i32
    %3 = arith.subi %2, %c63_i32 : i32
    %c31_i32 = arith.constant 31 : i32
    %4 = arith.addi %2, %c31_i32 : i32
    %c91_i32 = arith.constant 91 : i32
    %5 = arith.cmpi sge, %3, %c91_i32 : i32
    %c-91_i32 = arith.constant -91 : i32
    %6 = arith.cmpi sle, %4, %c-91_i32 : i32
    %7 = arith.extui %5 : i1 to i32
    %c0_i32 = arith.constant 0 : i32
    %8 = arith.cmpi ne, %7, %c0_i32 : i32
    scf.if %8 {
      %c120 = arith.constant 120 : index
      %29 = memref.load %arg2[%c120] : memref<256xf32, #tpu.memory_space<smem>>
      %30 = vector.broadcast %29 : f32 to vector<32x64xf32>
      %c0 = arith.constant 0 : index
      %c0_9 = arith.constant 0 : index
      %c0_10 = arith.constant 0 : index
      %31 = vector.load %arg3[%c0, %c0_9, %c0_10] : memref<8x32x64xf32, #tpu.memory_space<vmem>>, vector<1x32x64xf32>
      %32 = vector.shape_cast %31 : vector<1x32x64xf32> to vector<32x64xf32>
      %33 = vector.shape_cast %30 : vector<32x64xf32> to vector<1x32x64xf32>
      tpu.vector_store %arg3[%c0, %c0_9, %c0_10], %33 {strides = array<i32>} : memref<8x32x64xf32, #tpu.memory_space<vmem>>, vector<1x32x64xf32>,
      %c121 = arith.constant 121 : index
      %34 = memref.load %arg2[%c121] : memref<256xf32, #tpu.memory_space<smem>>
      %35 = vector.broadcast %34 : f32 to vector<32x64xf32>
      %c1 = arith.constant 1 : index
      %c0_11 = arith.constant 0 : index
      %c0_12 = arith.constant 0 : index
      %36 = vector.load %arg3[%c1, %c0_11, %c0_12] : memref<8x32x64xf32, #tpu.memory_space<vmem>>, vector<1x32x64xf32>
      %37 = vector.shape_cast %36 : vector<1x32x64xf32> to vector<32x64xf32>
      %38 = vector.shape_cast %35 : vector<32x64xf32> to vector<1x32x64xf32>
      tpu.vector_store %arg3[%c1, %c0_11, %c0_12], %38 {strides = array<i32>} : memref<8x32x64xf32, #tpu.memory_space<vmem>>, vector<1x32x64xf32>,
      %c122 = arith.constant 122 : index
      %39 = memref.load %arg2[%c122] : memref<256xf32, #tpu.memory_space<smem>>
      %40 = vector.broadcast %39 : f32 to vector<32x64xf32>
      %c2 = arith.constant 2 : index
      %c0_13 = arith.constant 0 : index
      %c0_14 = arith.constant 0 : index
      %41 = vector.load %arg3[%c2, %c0_13, %c0_14] : memref<8x32x64xf32, #tpu.memory_space<vmem>>, vector<1x32x64xf32>
      %42 = vector.shape_cast %41 : vector<1x32x64xf32> to vector<32x64xf32>
      %43 = vector.shape_cast %40 : vector<32x64xf32> to vector<1x32x64xf32>
      tpu.vector_store %arg3[%c2, %c0_13, %c0_14], %43 {strides = array<i32>} : memref<8x32x64xf32, #tpu.memory_space<vmem>>, vector<1x32x64xf32>,
      %c123 = arith.constant 123 : index
      %44 = memref.load %arg2[%c123] : memref<256xf32, #tpu.memory_space<smem>>
      %45 = vector.broadcast %44 : f32 to vector<32x64xf32>
      %c3 = arith.constant 3 : index
      %c0_15 = arith.constant 0 : index
      %c0_16 = arith.constant 0 : index
      %46 = vector.load %arg3[%c3, %c0_15, %c0_16] : memref<8x32x64xf32, #tpu.memory_space<vmem>>, vector<1x32x64xf32>
      %47 = vector.shape_cast %46 : vector<1x32x64xf32> to vector<32x64xf32>
      %48 = vector.shape_cast %45 : vector<32x64xf32> to vector<1x32x64xf32>
      tpu.vector_store %arg3[%c3, %c0_15, %c0_16], %48 {strides = array<i32>} : memref<8x32x64xf32, #tpu.memory_space<vmem>>, vector<1x32x64xf32>,
      %c124 = arith.constant 124 : index
      %49 = memref.load %arg2[%c124] : memref<256xf32, #tpu.memory_space<smem>>
      %50 = vector.broadcast %49 : f32 to vector<32x64xf32>
      %c4 = arith.constant 4 : index
      %c0_17 = arith.constant 0 : index
      %c0_18 = arith.constant 0 : index
      %51 = vector.load %arg3[%c4, %c0_17, %c0_18] : memref<8x32x64xf32, #tpu.memory_space<vmem>>, vector<1x32x64xf32>
      %52 = vector.shape_cast %51 : vector<1x32x64xf32> to vector<32x64xf32>
      %53 = vector.shape_cast %50 : vector<32x64xf32> to vector<1x32x64xf32>
      tpu.vector_store %arg3[%c4, %c0_17, %c0_18], %53 {strides = array<i32>} : memref<8x32x64xf32, #tpu.memory_space<vmem>>, vector<1x32x64xf32>,
      %c125 = arith.constant 125 : index
      %54 = memref.load %arg2[%c125] : memref<256xf32, #tpu.memory_space<smem>>
      %55 = vector.broadcast %54 : f32 to vector<32x64xf32>
      %c5 = arith.constant 5 : index
      %c0_19 = arith.constant 0 : index
      %c0_20 = arith.constant 0 : index
      %56 = vector.load %arg3[%c5, %c0_19, %c0_20] : memref<8x32x64xf32, #tpu.memory_space<vmem>>, vector<1x32x64xf32>
      %57 = vector.shape_cast %56 : vector<1x32x64xf32> to vector<32x64xf32>
      %58 = vector.shape_cast %55 : vector<32x64xf32> to vector<1x32x64xf32>
      tpu.vector_store %arg3[%c5, %c0_19, %c0_20], %58 {strides = array<i32>} : memref<8x32x64xf32, #tpu.memory_space<vmem>>, vector<1x32x64xf32>,
      %c126 = arith.constant 126 : index
      %59 = memref.load %arg2[%c126] : memref<256xf32, #tpu.memory_space<smem>>
      %60 = vector.broadcast %59 : f32 to vector<32x64xf32>
      %c6 = arith.constant 6 : index
      %c0_21 = arith.constant 0 : index
      %c0_22 = arith.constant 0 : index
      %61 = vector.load %arg3[%c6, %c0_21, %c0_22] : memref<8x32x64xf32, #tpu.memory_space<vmem>>, vector<1x32x64xf32>
      %62 = vector.shape_cast %61 : vector<1x32x64xf32> to vector<32x64xf32>
      %63 = vector.shape_cast %60 : vector<32x64xf32> to vector<1x32x64xf32>
      tpu.vector_store %arg3[%c6, %c0_21, %c0_22], %63 {strides = array<i32>} : memref<8x32x64xf32, #tpu.memory_space<vmem>>, vector<1x32x64xf32>,
      %c127 = arith.constant 127 : index
      %64 = memref.load %arg2[%c127] : memref<256xf32, #tpu.memory_space<smem>>
      %65 = vector.broadcast %64 : f32 to vector<32x64xf32>
      %c7 = arith.constant 7 : index
      %c0_23 = arith.constant 0 : index
      %c0_24 = arith.constant 0 : index
      %66 = vector.load %arg3[%c7, %c0_23, %c0_24] : memref<8x32x64xf32, #tpu.memory_space<vmem>>, vector<1x32x64xf32>
      %67 = vector.shape_cast %66 : vector<1x32x64xf32> to vector<32x64xf32>
      %68 = vector.shape_cast %65 : vector<32x64xf32> to vector<1x32x64xf32>
      tpu.vector_store %arg3[%c7, %c0_23, %c0_24], %68 {strides = array<i32>} : memref<8x32x64xf32, #tpu.memory_space<vmem>>, vector<1x32x64xf32>,
    } else {
    }
    %9 = arith.extui %6 : i1 to i32
    %c0_i32_0 = arith.constant 0 : i32
    %10 = arith.cmpi ne, %9, %c0_i32_0 : i32
    scf.if %10 {
      %c248 = arith.constant 248 : index
      %29 = memref.load %arg2[%c248] : memref<256xf32, #tpu.memory_space<smem>>
      %30 = vector.broadcast %29 : f32 to vector<32x64xf32>
      %c0 = arith.constant 0 : index
      %c0_9 = arith.constant 0 : index
      %c0_10 = arith.constant 0 : index
      %31 = vector.load %arg3[%c0, %c0_9, %c0_10] : memref<8x32x64xf32, #tpu.memory_space<vmem>>, vector<1x32x64xf32>
      %32 = vector.shape_cast %31 : vector<1x32x64xf32> to vector<32x64xf32>
      %33 = vector.shape_cast %30 : vector<32x64xf32> to vector<1x32x64xf32>
      tpu.vector_store %arg3[%c0, %c0_9, %c0_10], %33 {strides = array<i32>} : memref<8x32x64xf32, #tpu.memory_space<vmem>>, vector<1x32x64xf32>,
      %c249 = arith.constant 249 : index
      %34 = memref.load %arg2[%c249] : memref<256xf32, #tpu.memory_space<smem>>
      %35 = vector.broadcast %34 : f32 to vector<32x64xf32>
      %c1 = arith.constant 1 : index
      %c0_11 = arith.constant 0 : index
      %c0_12 = arith.constant 0 : index
      %36 = vector.load %arg3[%c1, %c0_11, %c0_12] : memref<8x32x64xf32, #tpu.memory_space<vmem>>, vector<1x32x64xf32>
      %37 = vector.shape_cast %36 : vector<1x32x64xf32> to vector<32x64xf32>
      %38 = vector.shape_cast %35 : vector<32x64xf32> to vector<1x32x64xf32>
      tpu.vector_store %arg3[%c1, %c0_11, %c0_12], %38 {strides = array<i32>} : memref<8x32x64xf32, #tpu.memory_space<vmem>>, vector<1x32x64xf32>,
      %c250 = arith.constant 250 : index
      %39 = memref.load %arg2[%c250] : memref<256xf32, #tpu.memory_space<smem>>
      %40 = vector.broadcast %39 : f32 to vector<32x64xf32>
      %c2 = arith.constant 2 : index
      %c0_13 = arith.constant 0 : index
      %c0_14 = arith.constant 0 : index
      %41 = vector.load %arg3[%c2, %c0_13, %c0_14] : memref<8x32x64xf32, #tpu.memory_space<vmem>>, vector<1x32x64xf32>
      %42 = vector.shape_cast %41 : vector<1x32x64xf32> to vector<32x64xf32>
      %43 = vector.shape_cast %40 : vector<32x64xf32> to vector<1x32x64xf32>
      tpu.vector_store %arg3[%c2, %c0_13, %c0_14], %43 {strides = array<i32>} : memref<8x32x64xf32, #tpu.memory_space<vmem>>, vector<1x32x64xf32>,
      %c251 = arith.constant 251 : index
      %44 = memref.load %arg2[%c251] : memref<256xf32, #tpu.memory_space<smem>>
      %45 = vector.broadcast %44 : f32 to vector<32x64xf32>
      %c3 = arith.constant 3 : index
      %c0_15 = arith.constant 0 : index
      %c0_16 = arith.constant 0 : index
      %46 = vector.load %arg3[%c3, %c0_15, %c0_16] : memref<8x32x64xf32, #tpu.memory_space<vmem>>, vector<1x32x64xf32>
      %47 = vector.shape_cast %46 : vector<1x32x64xf32> to vector<32x64xf32>
      %48 = vector.shape_cast %45 : vector<32x64xf32> to vector<1x32x64xf32>
      tpu.vector_store %arg3[%c3, %c0_15, %c0_16], %48 {strides = array<i32>} : memref<8x32x64xf32, #tpu.memory_space<vmem>>, vector<1x32x64xf32>,
      %c252 = arith.constant 252 : index
      %49 = memref.load %arg2[%c252] : memref<256xf32, #tpu.memory_space<smem>>
      %50 = vector.broadcast %49 : f32 to vector<32x64xf32>
      %c4 = arith.constant 4 : index
      %c0_17 = arith.constant 0 : index
      %c0_18 = arith.constant 0 : index
      %51 = vector.load %arg3[%c4, %c0_17, %c0_18] : memref<8x32x64xf32, #tpu.memory_space<vmem>>, vector<1x32x64xf32>
      %52 = vector.shape_cast %51 : vector<1x32x64xf32> to vector<32x64xf32>
      %53 = vector.shape_cast %50 : vector<32x64xf32> to vector<1x32x64xf32>
      tpu.vector_store %arg3[%c4, %c0_17, %c0_18], %53 {strides = array<i32>} : memref<8x32x64xf32, #tpu.memory_space<vmem>>, vector<1x32x64xf32>,
      %c253 = arith.constant 253 : index
      %54 = memref.load %arg2[%c253] : memref<256xf32, #tpu.memory_space<smem>>
      %55 = vector.broadcast %54 : f32 to vector<32x64xf32>
      %c5 = arith.constant 5 : index
      %c0_19 = arith.constant 0 : index
      %c0_20 = arith.constant 0 : index
      %56 = vector.load %arg3[%c5, %c0_19, %c0_20] : memref<8x32x64xf32, #tpu.memory_space<vmem>>, vector<1x32x64xf32>
      %57 = vector.shape_cast %56 : vector<1x32x64xf32> to vector<32x64xf32>
      %58 = vector.shape_cast %55 : vector<32x64xf32> to vector<1x32x64xf32>
      tpu.vector_store %arg3[%c5, %c0_19, %c0_20], %58 {strides = array<i32>} : memref<8x32x64xf32, #tpu.memory_space<vmem>>, vector<1x32x64xf32>,
      %c254 = arith.constant 254 : index
      %59 = memref.load %arg2[%c254] : memref<256xf32, #tpu.memory_space<smem>>
      %60 = vector.broadcast %59 : f32 to vector<32x64xf32>
      %c6 = arith.constant 6 : index
      %c0_21 = arith.constant 0 : index
      %c0_22 = arith.constant 0 : index
      %61 = vector.load %arg3[%c6, %c0_21, %c0_22] : memref<8x32x64xf32, #tpu.memory_space<vmem>>, vector<1x32x64xf32>
      %62 = vector.shape_cast %61 : vector<1x32x64xf32> to vector<32x64xf32>
      %63 = vector.shape_cast %60 : vector<32x64xf32> to vector<1x32x64xf32>
      tpu.vector_store %arg3[%c6, %c0_21, %c0_22], %63 {strides = array<i32>} : memref<8x32x64xf32, #tpu.memory_space<vmem>>, vector<1x32x64xf32>,
      %c255 = arith.constant 255 : index
      %64 = memref.load %arg2[%c255] : memref<256xf32, #tpu.memory_space<smem>>
      %65 = vector.broadcast %64 : f32 to vector<32x64xf32>
      %c7 = arith.constant 7 : index
      %c0_23 = arith.constant 0 : index
      %c0_24 = arith.constant 0 : index
      %66 = vector.load %arg3[%c7, %c0_23, %c0_24] : memref<8x32x64xf32, #tpu.memory_space<vmem>>, vector<1x32x64xf32>
      %67 = vector.shape_cast %66 : vector<1x32x64xf32> to vector<32x64xf32>
      %68 = vector.shape_cast %65 : vector<32x64xf32> to vector<1x32x64xf32>
      tpu.vector_store %arg3[%c7, %c0_23, %c0_24], %68 {strides = array<i32>} : memref<8x32x64xf32, #tpu.memory_space<vmem>>, vector<1x32x64xf32>,
    } else {
    }
    %11 = arith.ori %5, %6 : i1
    %true = arith.constant true
    %12 = arith.xori %11, %true : i1
    %c0_i32_1 = arith.constant 0 : i32
    %13 = arith.cmpi sge, %3, %c0_i32_1 : i32
    %14 = arith.andi %12, %13 : i1
    %15 = arith.extui %14 : i1 to i32
    %c0_i32_2 = arith.constant 0 : i32
    %16 = arith.cmpi ne, %15, %c0_i32_2 : i32
    scf.if %16 {
      %29 = tpu.iota {dimensions = array<i32: 0>} : vector<8x64xi32>
      %30 = tpu.iota {dimensions = array<i32: 1>} : vector<8x64xi32>
      %31 = arith.subi %29, %30 : vector<8x64xi32>
      %c0_i32_9 = arith.constant 0 : i32
      %c4_i32 = arith.constant 4 : i32
      %32 = arith.addi %c0_i32_9, %c4_i32 : i32
      %c1_i32 = arith.constant 1 : i32
      scf.for %arg4 = %c0_i32_9 to %32 step %c1_i32  : i32 {
        %c1_i32_11 = arith.constant 1 : i32
        %33 = arith.muli %arg4, %c1_i32_11 : i32
        %c0_i32_12 = arith.constant 0 : i32
        %34 = arith.addi %c0_i32_12, %33 : i32
        %c8_i32 = arith.constant 8 : i32
        %35 = arith.muli %34, %c8_i32 : i32
        %36 = tpu.assume_multiple %35, 8 : i32
        %37 = arith.addi %2, %36 : i32
        %38 = vector.broadcast %37 : i32 to vector<8x64xi32>
        %39 = arith.addi %31, %38 : vector<8x64xi32>
        %c0 = arith.constant 0 : index
        %40 = memref.load %arg2[%c0] : memref<256xf32, #tpu.memory_space<smem>>
        %41 = vector.broadcast %40 : f32 to vector<8x64xf32>
        %c1 = arith.constant 1 : index
        %42 = memref.load %arg2[%c1] : memref<256xf32, #tpu.memory_space<smem>>
        %43 = vector.broadcast %42 : f32 to vector<8x64xf32>
        %c2 = arith.constant 2 : index
        %44 = memref.load %arg2[%c2] : memref<256xf32, #tpu.memory_space<smem>>
        %45 = vector.broadcast %44 : f32 to vector<8x64xf32>
        %c3 = arith.constant 3 : index
        %46 = memref.load %arg2[%c3] : memref<256xf32, #tpu.memory_space<smem>>
        %47 = vector.broadcast %46 : f32 to vector<8x64xf32>
        %c4 = arith.constant 4 : index
        %48 = memref.load %arg2[%c4] : memref<256xf32, #tpu.memory_space<smem>>
        %49 = vector.broadcast %48 : f32 to vector<8x64xf32>
        %c5 = arith.constant 5 : index
        %50 = memref.load %arg2[%c5] : memref<256xf32, #tpu.memory_space<smem>>
        %51 = vector.broadcast %50 : f32 to vector<8x64xf32>
        %c6 = arith.constant 6 : index
        %52 = memref.load %arg2[%c6] : memref<256xf32, #tpu.memory_space<smem>>
        %53 = vector.broadcast %52 : f32 to vector<8x64xf32>
        %c7 = arith.constant 7 : index
        %54 = memref.load %arg2[%c7] : memref<256xf32, #tpu.memory_space<smem>>
        %55 = vector.broadcast %54 : f32 to vector<8x64xf32>
        %c1_i32_13 = arith.constant 1 : i32
        %56 = vector.broadcast %c1_i32_13 : i32 to vector<8x64xi32>
        %57 = arith.cmpi eq, %39, %56 : vector<8x64xi32>
        %c8 = arith.constant 8 : index
        %58 = memref.load %arg2[%c8] : memref<256xf32, #tpu.memory_space<smem>>
        %59 = vector.broadcast %58 : f32 to vector<8x64xf32>
        %60 = arith.select %57, %59, %41 : vector<8x64xi1>, vector<8x64xf32>
        %c9 = arith.constant 9 : index
        %61 = memref.load %arg2[%c9] : memref<256xf32, #tpu.memory_space<smem>>
        %62 = vector.broadcast %61 : f32 to vector<8x64xf32>
        %63 = arith.select %57, %62, %43 : vector<8x64xi1>, vector<8x64xf32>
        %c10 = arith.constant 10 : index
        %64 = memref.load %arg2[%c10] : memref<256xf32, #tpu.memory_space<smem>>
        %65 = vector.broadcast %64 : f32 to vector<8x64xf32>
        %66 = arith.select %57, %65, %45 : vector<8x64xi1>, vector<8x64xf32>
        %c11 = arith.constant 11 : index
        %67 = memref.load %arg2[%c11] : memref<256xf32, #tpu.memory_space<smem>>
        %68 = vector.broadcast %67 : f32 to vector<8x64xf32>
        %69 = arith.select %57, %68, %47 : vector<8x64xi1>, vector<8x64xf32>
        %c12 = arith.constant 12 : index
        %70 = memref.load %arg2[%c12] : memref<256xf32, #tpu.memory_space<smem>>
        %71 = vector.broadcast %70 : f32 to vector<8x64xf32>
        %72 = arith.select %57, %71, %49 : vector<8x64xi1>, vector<8x64xf32>
        %c13 = arith.constant 13 : index
        %73 = memref.load %arg2[%c13] : memref<256xf32, #tpu.memory_space<smem>>
        %74 = vector.broadcast %73 : f32 to vector<8x64xf32>
        %75 = arith.select %57, %74, %51 : vector<8x64xi1>, vector<8x64xf32>
        %c14 = arith.constant 14 : index
        %76 = memref.load %arg2[%c14] : memref<256xf32, #tpu.memory_space<smem>>
        %77 = vector.broadcast %76 : f32 to vector<8x64xf32>
        %78 = arith.select %57, %77, %53 : vector<8x64xi1>, vector<8x64xf32>
        %c15 = arith.constant 15 : index
        %79 = memref.load %arg2[%c15] : memref<256xf32, #tpu.memory_space<smem>>
        %80 = vector.broadcast %79 : f32 to vector<8x64xf32>
        %81 = arith.select %57, %80, %55 : vector<8x64xi1>, vector<8x64xf32>
        %c2_i32 = arith.constant 2 : i32
        %82 = vector.broadcast %c2_i32 : i32 to vector<8x64xi32>
        %83 = arith.cmpi eq, %39, %82 : vector<8x64xi32>
        %c16 = arith.constant 16 : index
        %84 = memref.load %arg2[%c16] : memref<256xf32, #tpu.memory_space<smem>>
        %85 = vector.broadcast %84 : f32 to vector<8x64xf32>
        %86 = arith.select %83, %85, %60 : vector<8x64xi1>, vector<8x64xf32>
        %c17 = arith.constant 17 : index
        %87 = memref.load %arg2[%c17] : memref<256xf32, #tpu.memory_space<smem>>
        %88 = vector.broadcast %87 : f32 to vector<8x64xf32>
        %89 = arith.select %83, %88, %63 : vector<8x64xi1>, vector<8x64xf32>
        %c18 = arith.constant 18 : index
        %90 = memref.load %arg2[%c18] : memref<256xf32, #tpu.memory_space<smem>>
        %91 = vector.broadcast %90 : f32 to vector<8x64xf32>
        %92 = arith.select %83, %91, %66 : vector<8x64xi1>, vector<8x64xf32>
        %c19 = arith.constant 19 : index
        %93 = memref.load %arg2[%c19] : memref<256xf32, #tpu.memory_space<smem>>
        %94 = vector.broadcast %93 : f32 to vector<8x64xf32>
        %95 = arith.select %83, %94, %69 : vector<8x64xi1>, vector<8x64xf32>
        %c20 = arith.constant 20 : index
        %96 = memref.load %arg2[%c20] : memref<256xf32, #tpu.memory_space<smem>>
        %97 = vector.broadcast %96 : f32 to vector<8x64xf32>
        %98 = arith.select %83, %97, %72 : vector<8x64xi1>, vector<8x64xf32>
        %c21 = arith.constant 21 : index
        %99 = memref.load %arg2[%c21] : memref<256xf32, #tpu.memory_space<smem>>
        %100 = vector.broadcast %99 : f32 to vector<8x64xf32>
        %101 = arith.select %83, %100, %75 : vector<8x64xi1>, vector<8x64xf32>
        %c22 = arith.constant 22 : index
        %102 = memref.load %arg2[%c22] : memref<256xf32, #tpu.memory_space<smem>>
        %103 = vector.broadcast %102 : f32 to vector<8x64xf32>
        %104 = arith.select %83, %103, %78 : vector<8x64xi1>, vector<8x64xf32>
        %c23 = arith.constant 23 : index
        %105 = memref.load %arg2[%c23] : memref<256xf32, #tpu.memory_space<smem>>
        %106 = vector.broadcast %105 : f32 to vector<8x64xf32>
        %107 = arith.select %83, %106, %81 : vector<8x64xi1>, vector<8x64xf32>
        %c3_i32 = arith.constant 3 : i32
        %108 = vector.broadcast %c3_i32 : i32 to vector<8x64xi32>
        %109 = arith.cmpi eq, %39, %108 : vector<8x64xi32>
        %c24 = arith.constant 24 : index
        %110 = memref.load %arg2[%c24] : memref<256xf32, #tpu.memory_space<smem>>
        %111 = vector.broadcast %110 : f32 to vector<8x64xf32>
        %112 = arith.select %109, %111, %86 : vector<8x64xi1>, vector<8x64xf32>
        %c25 = arith.constant 25 : index
        %113 = memref.load %arg2[%c25] : memref<256xf32, #tpu.memory_space<smem>>
        %114 = vector.broadcast %113 : f32 to vector<8x64xf32>
        %115 = arith.select %109, %114, %89 : vector<8x64xi1>, vector<8x64xf32>
        %c26 = arith.constant 26 : index
        %116 = memref.load %arg2[%c26] : memref<256xf32, #tpu.memory_space<smem>>
        %117 = vector.broadcast %116 : f32 to vector<8x64xf32>
        %118 = arith.select %109, %117, %92 : vector<8x64xi1>, vector<8x64xf32>
        %c27 = arith.constant 27 : index
        %119 = memref.load %arg2[%c27] : memref<256xf32, #tpu.memory_space<smem>>
        %120 = vector.broadcast %119 : f32 to vector<8x64xf32>
        %121 = arith.select %109, %120, %95 : vector<8x64xi1>, vector<8x64xf32>
        %c28 = arith.constant 28 : index
        %122 = memref.load %arg2[%c28] : memref<256xf32, #tpu.memory_space<smem>>
        %123 = vector.broadcast %122 : f32 to vector<8x64xf32>
        %124 = arith.select %109, %123, %98 : vector<8x64xi1>, vector<8x64xf32>
        %c29 = arith.constant 29 : index
        %125 = memref.load %arg2[%c29] : memref<256xf32, #tpu.memory_space<smem>>
        %126 = vector.broadcast %125 : f32 to vector<8x64xf32>
        %127 = arith.select %109, %126, %101 : vector<8x64xi1>, vector<8x64xf32>
        %c30 = arith.constant 30 : index
        %128 = memref.load %arg2[%c30] : memref<256xf32, #tpu.memory_space<smem>>
        %129 = vector.broadcast %128 : f32 to vector<8x64xf32>
        %130 = arith.select %109, %129, %104 : vector<8x64xi1>, vector<8x64xf32>
        %c31 = arith.constant 31 : index
        %131 = memref.load %arg2[%c31] : memref<256xf32, #tpu.memory_space<smem>>
        %132 = vector.broadcast %131 : f32 to vector<8x64xf32>
        %133 = arith.select %109, %132, %107 : vector<8x64xi1>, vector<8x64xf32>
        %c4_i32_14 = arith.constant 4 : i32
        %134 = vector.broadcast %c4_i32_14 : i32 to vector<8x64xi32>
        %135 = arith.cmpi eq, %39, %134 : vector<8x64xi32>
        %c32 = arith.constant 32 : index
        %136 = memref.load %arg2[%c32] : memref<256xf32, #tpu.memory_space<smem>>
        %137 = vector.broadcast %136 : f32 to vector<8x64xf32>
        %138 = arith.select %135, %137, %112 : vector<8x64xi1>, vector<8x64xf32>
        %c33 = arith.constant 33 : index
        %139 = memref.load %arg2[%c33] : memref<256xf32, #tpu.memory_space<smem>>
        %140 = vector.broadcast %139 : f32 to vector<8x64xf32>
        %141 = arith.select %135, %140, %115 : vector<8x64xi1>, vector<8x64xf32>
        %c34 = arith.constant 34 : index
        %142 = memref.load %arg2[%c34] : memref<256xf32, #tpu.memory_space<smem>>
        %143 = vector.broadcast %142 : f32 to vector<8x64xf32>
        %144 = arith.select %135, %143, %118 : vector<8x64xi1>, vector<8x64xf32>
        %c35 = arith.constant 35 : index
        %145 = memref.load %arg2[%c35] : memref<256xf32, #tpu.memory_space<smem>>
        %146 = vector.broadcast %145 : f32 to vector<8x64xf32>
        %147 = arith.select %135, %146, %121 : vector<8x64xi1>, vector<8x64xf32>
        %c36 = arith.constant 36 : index
        %148 = memref.load %arg2[%c36] : memref<256xf32, #tpu.memory_space<smem>>
        %149 = vector.broadcast %148 : f32 to vector<8x64xf32>
        %150 = arith.select %135, %149, %124 : vector<8x64xi1>, vector<8x64xf32>
        %c37 = arith.constant 37 : index
        %151 = memref.load %arg2[%c37] : memref<256xf32, #tpu.memory_space<smem>>
        %152 = vector.broadcast %151 : f32 to vector<8x64xf32>
        %153 = arith.select %135, %152, %127 : vector<8x64xi1>, vector<8x64xf32>
        %c38 = arith.constant 38 : index
        %154 = memref.load %arg2[%c38] : memref<256xf32, #tpu.memory_space<smem>>
        %155 = vector.broadcast %154 : f32 to vector<8x64xf32>
        %156 = arith.select %135, %155, %130 : vector<8x64xi1>, vector<8x64xf32>
        %c39 = arith.constant 39 : index
        %157 = memref.load %arg2[%c39] : memref<256xf32, #tpu.memory_space<smem>>
        %158 = vector.broadcast %157 : f32 to vector<8x64xf32>
        %159 = arith.select %135, %158, %133 : vector<8x64xi1>, vector<8x64xf32>
        %c5_i32 = arith.constant 5 : i32
        %160 = vector.broadcast %c5_i32 : i32 to vector<8x64xi32>
        %161 = arith.cmpi eq, %39, %160 : vector<8x64xi32>
        %c40 = arith.constant 40 : index
        %162 = memref.load %arg2[%c40] : memref<256xf32, #tpu.memory_space<smem>>
        %163 = vector.broadcast %162 : f32 to vector<8x64xf32>
        %164 = arith.select %161, %163, %138 : vector<8x64xi1>, vector<8x64xf32>
        %c41 = arith.constant 41 : index
        %165 = memref.load %arg2[%c41] : memref<256xf32, #tpu.memory_space<smem>>
        %166 = vector.broadcast %165 : f32 to vector<8x64xf32>
        %167 = arith.select %161, %166, %141 : vector<8x64xi1>, vector<8x64xf32>
        %c42 = arith.constant 42 : index
        %168 = memref.load %arg2[%c42] : memref<256xf32, #tpu.memory_space<smem>>
        %169 = vector.broadcast %168 : f32 to vector<8x64xf32>
        %170 = arith.select %161, %169, %144 : vector<8x64xi1>, vector<8x64xf32>
        %c43 = arith.constant 43 : index
        %171 = memref.load %arg2[%c43] : memref<256xf32, #tpu.memory_space<smem>>
        %172 = vector.broadcast %171 : f32 to vector<8x64xf32>
        %173 = arith.select %161, %172, %147 : vector<8x64xi1>, vector<8x64xf32>
        %c44 = arith.constant 44 : index
        %174 = memref.load %arg2[%c44] : memref<256xf32, #tpu.memory_space<smem>>
        %175 = vector.broadcast %174 : f32 to vector<8x64xf32>
        %176 = arith.select %161, %175, %150 : vector<8x64xi1>, vector<8x64xf32>
        %c45 = arith.constant 45 : index
        %177 = memref.load %arg2[%c45] : memref<256xf32, #tpu.memory_space<smem>>
        %178 = vector.broadcast %177 : f32 to vector<8x64xf32>
        %179 = arith.select %161, %178, %153 : vector<8x64xi1>, vector<8x64xf32>
        %c46 = arith.constant 46 : index
        %180 = memref.load %arg2[%c46] : memref<256xf32, #tpu.memory_space<smem>>
        %181 = vector.broadcast %180 : f32 to vector<8x64xf32>
        %182 = arith.select %161, %181, %156 : vector<8x64xi1>, vector<8x64xf32>
        %c47 = arith.constant 47 : index
        %183 = memref.load %arg2[%c47] : memref<256xf32, #tpu.memory_space<smem>>
        %184 = vector.broadcast %183 : f32 to vector<8x64xf32>
        %185 = arith.select %161, %184, %159 : vector<8x64xi1>, vector<8x64xf32>
        %c6_i32 = arith.constant 6 : i32
        %186 = vector.broadcast %c6_i32 : i32 to vector<8x64xi32>
        %187 = arith.cmpi eq, %39, %186 : vector<8x64xi32>
        %c48 = arith.constant 48 : index
        %188 = memref.load %arg2[%c48] : memref<256xf32, #tpu.memory_space<smem>>
        %189 = vector.broadcast %188 : f32 to vector<8x64xf32>
        %190 = arith.select %187, %189, %164 : vector<8x64xi1>, vector<8x64xf32>
        %c49 = arith.constant 49 : index
        %191 = memref.load %arg2[%c49] : memref<256xf32, #tpu.memory_space<smem>>
        %192 = vector.broadcast %191 : f32 to vector<8x64xf32>
        %193 = arith.select %187, %192, %167 : vector<8x64xi1>, vector<8x64xf32>
        %c50 = arith.constant 50 : index
        %194 = memref.load %arg2[%c50] : memref<256xf32, #tpu.memory_space<smem>>
        %195 = vector.broadcast %194 : f32 to vector<8x64xf32>
        %196 = arith.select %187, %195, %170 : vector<8x64xi1>, vector<8x64xf32>
        %c51 = arith.constant 51 : index
        %197 = memref.load %arg2[%c51] : memref<256xf32, #tpu.memory_space<smem>>
        %198 = vector.broadcast %197 : f32 to vector<8x64xf32>
        %199 = arith.select %187, %198, %173 : vector<8x64xi1>, vector<8x64xf32>
        %c52 = arith.constant 52 : index
        %200 = memref.load %arg2[%c52] : memref<256xf32, #tpu.memory_space<smem>>
        %201 = vector.broadcast %200 : f32 to vector<8x64xf32>
        %202 = arith.select %187, %201, %176 : vector<8x64xi1>, vector<8x64xf32>
        %c53 = arith.constant 53 : index
        %203 = memref.load %arg2[%c53] : memref<256xf32, #tpu.memory_space<smem>>
        %204 = vector.broadcast %203 : f32 to vector<8x64xf32>
        %205 = arith.select %187, %204, %179 : vector<8x64xi1>, vector<8x64xf32>
        %c54 = arith.constant 54 : index
        %206 = memref.load %arg2[%c54] : memref<256xf32, #tpu.memory_space<smem>>
        %207 = vector.broadcast %206 : f32 to vector<8x64xf32>
        %208 = arith.select %187, %207, %182 : vector<8x64xi1>, vector<8x64xf32>
        %c55 = arith.constant 55 : index
        %209 = memref.load %arg2[%c55] : memref<256xf32, #tpu.memory_space<smem>>
        %210 = vector.broadcast %209 : f32 to vector<8x64xf32>
        %211 = arith.select %187, %210, %185 : vector<8x64xi1>, vector<8x64xf32>
        %c7_i32 = arith.constant 7 : i32
        %212 = vector.broadcast %c7_i32 : i32 to vector<8x64xi32>
        %213 = arith.cmpi eq, %39, %212 : vector<8x64xi32>
        %c56 = arith.constant 56 : index
        %214 = memref.load %arg2[%c56] : memref<256xf32, #tpu.memory_space<smem>>
        %215 = vector.broadcast %214 : f32 to vector<8x64xf32>
        %216 = arith.select %213, %215, %190 : vector<8x64xi1>, vector<8x64xf32>
        %c57 = arith.constant 57 : index
        %217 = memref.load %arg2[%c57] : memref<256xf32, #tpu.memory_space<smem>>
        %218 = vector.broadcast %217 : f32 to vector<8x64xf32>
        %219 = arith.select %213, %218, %193 : vector<8x64xi1>, vector<8x64xf32>
        %c58 = arith.constant 58 : index
        %220 = memref.load %arg2[%c58] : memref<256xf32, #tpu.memory_space<smem>>
        %221 = vector.broadcast %220 : f32 to vector<8x64xf32>
        %222 = arith.select %213, %221, %196 : vector<8x64xi1>, vector<8x64xf32>
        %c59 = arith.constant 59 : index
        %223 = memref.load %arg2[%c59] : memref<256xf32, #tpu.memory_space<smem>>
        %224 = vector.broadcast %223 : f32 to vector<8x64xf32>
        %225 = arith.select %213, %224, %199 : vector<8x64xi1>, vector<8x64xf32>
        %c60 = arith.constant 60 : index
        %226 = memref.load %arg2[%c60] : memref<256xf32, #tpu.memory_space<smem>>
        %227 = vector.broadcast %226 : f32 to vector<8x64xf32>
        %228 = arith.select %213, %227, %202 : vector<8x64xi1>, vector<8x64xf32>
        %c61 = arith.constant 61 : index
        %229 = memref.load %arg2[%c61] : memref<256xf32, #tpu.memory_space<smem>>
        %230 = vector.broadcast %229 : f32 to vector<8x64xf32>
        %231 = arith.select %213, %230, %205 : vector<8x64xi1>, vector<8x64xf32>
        %c62 = arith.constant 62 : index
        %232 = memref.load %arg2[%c62] : memref<256xf32, #tpu.memory_space<smem>>
        %233 = vector.broadcast %232 : f32 to vector<8x64xf32>
        %234 = arith.select %213, %233, %208 : vector<8x64xi1>, vector<8x64xf32>
        %c63 = arith.constant 63 : index
        %235 = memref.load %arg2[%c63] : memref<256xf32, #tpu.memory_space<smem>>
        %236 = vector.broadcast %235 : f32 to vector<8x64xf32>
        %237 = arith.select %213, %236, %211 : vector<8x64xi1>, vector<8x64xf32>
        %c8_i32_15 = arith.constant 8 : i32
        %238 = vector.broadcast %c8_i32_15 : i32 to vector<8x64xi32>
        %239 = arith.cmpi sge, %39, %238 : vector<8x64xi32>
        %c11_i32 = arith.constant 11 : i32
        %240 = vector.broadcast %c11_i32 : i32 to vector<8x64xi32>
        %241 = arith.cmpi sle, %39, %240 : vector<8x64xi32>
        %242 = arith.andi %239, %241 : vector<8x64xi1>
        %c64 = arith.constant 64 : index
        %243 = memref.load %arg2[%c64] : memref<256xf32, #tpu.memory_space<smem>>
        %244 = vector.broadcast %243 : f32 to vector<8x64xf32>
        %245 = arith.select %242, %244, %216 : vector<8x64xi1>, vector<8x64xf32>
        %c65 = arith.constant 65 : index
        %246 = memref.load %arg2[%c65] : memref<256xf32, #tpu.memory_space<smem>>
        %247 = vector.broadcast %246 : f32 to vector<8x64xf32>
        %248 = arith.select %242, %247, %219 : vector<8x64xi1>, vector<8x64xf32>
        %c66 = arith.constant 66 : index
        %249 = memref.load %arg2[%c66] : memref<256xf32, #tpu.memory_space<smem>>
        %250 = vector.broadcast %249 : f32 to vector<8x64xf32>
        %251 = arith.select %242, %250, %222 : vector<8x64xi1>, vector<8x64xf32>
        %c67 = arith.constant 67 : index
        %252 = memref.load %arg2[%c67] : memref<256xf32, #tpu.memory_space<smem>>
        %253 = vector.broadcast %252 : f32 to vector<8x64xf32>
        %254 = arith.select %242, %253, %225 : vector<8x64xi1>, vector<8x64xf32>
        %c68 = arith.constant 68 : index
        %255 = memref.load %arg2[%c68] : memref<256xf32, #tpu.memory_space<smem>>
        %256 = vector.broadcast %255 : f32 to vector<8x64xf32>
        %257 = arith.select %242, %256, %228 : vector<8x64xi1>, vector<8x64xf32>
        %c69 = arith.constant 69 : index
        %258 = memref.load %arg2[%c69] : memref<256xf32, #tpu.memory_space<smem>>
        %259 = vector.broadcast %258 : f32 to vector<8x64xf32>
        %260 = arith.select %242, %259, %231 : vector<8x64xi1>, vector<8x64xf32>
        %c70 = arith.constant 70 : index
        %261 = memref.load %arg2[%c70] : memref<256xf32, #tpu.memory_space<smem>>
        %262 = vector.broadcast %261 : f32 to vector<8x64xf32>
        %263 = arith.select %242, %262, %234 : vector<8x64xi1>, vector<8x64xf32>
        %c71 = arith.constant 71 : index
        %264 = memref.load %arg2[%c71] : memref<256xf32, #tpu.memory_space<smem>>
        %265 = vector.broadcast %264 : f32 to vector<8x64xf32>
        %266 = arith.select %242, %265, %237 : vector<8x64xi1>, vector<8x64xf32>
        %c12_i32 = arith.constant 12 : i32
        %267 = vector.broadcast %c12_i32 : i32 to vector<8x64xi32>
        %268 = arith.cmpi sge, %39, %267 : vector<8x64xi32>
        %c15_i32 = arith.constant 15 : i32
        %269 = vector.broadcast %c15_i32 : i32 to vector<8x64xi32>
        %270 = arith.cmpi sle, %39, %269 : vector<8x64xi32>
        %271 = arith.andi %268, %270 : vector<8x64xi1>
        %c72 = arith.constant 72 : index
        %272 = memref.load %arg2[%c72] : memref<256xf32, #tpu.memory_space<smem>>
        %273 = vector.broadcast %272 : f32 to vector<8x64xf32>
        %274 = arith.select %271, %273, %245 : vector<8x64xi1>, vector<8x64xf32>
        %c73 = arith.constant 73 : index
        %275 = memref.load %arg2[%c73] : memref<256xf32, #tpu.memory_space<smem>>
        %276 = vector.broadcast %275 : f32 to vector<8x64xf32>
        %277 = arith.select %271, %276, %248 : vector<8x64xi1>, vector<8x64xf32>
        %c74 = arith.constant 74 : index
        %278 = memref.load %arg2[%c74] : memref<256xf32, #tpu.memory_space<smem>>
        %279 = vector.broadcast %278 : f32 to vector<8x64xf32>
        %280 = arith.select %271, %279, %251 : vector<8x64xi1>, vector<8x64xf32>
        %c75 = arith.constant 75 : index
        %281 = memref.load %arg2[%c75] : memref<256xf32, #tpu.memory_space<smem>>
        %282 = vector.broadcast %281 : f32 to vector<8x64xf32>
        %283 = arith.select %271, %282, %254 : vector<8x64xi1>, vector<8x64xf32>
        %c76 = arith.constant 76 : index
        %284 = memref.load %arg2[%c76] : memref<256xf32, #tpu.memory_space<smem>>
        %285 = vector.broadcast %284 : f32 to vector<8x64xf32>
        %286 = arith.select %271, %285, %257 : vector<8x64xi1>, vector<8x64xf32>
        %c77 = arith.constant 77 : index
        %287 = memref.load %arg2[%c77] : memref<256xf32, #tpu.memory_space<smem>>
        %288 = vector.broadcast %287 : f32 to vector<8x64xf32>
        %289 = arith.select %271, %288, %260 : vector<8x64xi1>, vector<8x64xf32>
        %c78 = arith.constant 78 : index
        %290 = memref.load %arg2[%c78] : memref<256xf32, #tpu.memory_space<smem>>
        %291 = vector.broadcast %290 : f32 to vector<8x64xf32>
        %292 = arith.select %271, %291, %263 : vector<8x64xi1>, vector<8x64xf32>
        %c79 = arith.constant 79 : index
        %293 = memref.load %arg2[%c79] : memref<256xf32, #tpu.memory_space<smem>>
        %294 = vector.broadcast %293 : f32 to vector<8x64xf32>
        %295 = arith.select %271, %294, %266 : vector<8x64xi1>, vector<8x64xf32>
        %c16_i32 = arith.constant 16 : i32
        %296 = vector.broadcast %c16_i32 : i32 to vector<8x64xi32>
        %297 = arith.cmpi sge, %39, %296 : vector<8x64xi32>
        %c22_i32 = arith.constant 22 : i32
        %298 = vector.broadcast %c22_i32 : i32 to vector<8x64xi32>
        %299 = arith.cmpi sle, %39, %298 : vector<8x64xi32>
        %300 = arith.andi %297, %299 : vector<8x64xi1>
        %c80 = arith.constant 80 : index
        %301 = memref.load %arg2[%c80] : memref<256xf32, #tpu.memory_space<smem>>
        %302 = vector.broadcast %301 : f32 to vector<8x64xf32>
        %303 = arith.select %300, %302, %274 : vector<8x64xi1>, vector<8x64xf32>
        %c81 = arith.constant 81 : index
        %304 = memref.load %arg2[%c81] : memref<256xf32, #tpu.memory_space<smem>>
        %305 = vector.broadcast %304 : f32 to vector<8x64xf32>
        %306 = arith.select %300, %305, %277 : vector<8x64xi1>, vector<8x64xf32>
        %c82 = arith.constant 82 : index
        %307 = memref.load %arg2[%c82] : memref<256xf32, #tpu.memory_space<smem>>
        %308 = vector.broadcast %307 : f32 to vector<8x64xf32>
        %309 = arith.select %300, %308, %280 : vector<8x64xi1>, vector<8x64xf32>
        %c83 = arith.constant 83 : index
        %310 = memref.load %arg2[%c83] : memref<256xf32, #tpu.memory_space<smem>>
        %311 = vector.broadcast %310 : f32 to vector<8x64xf32>
        %312 = arith.select %300, %311, %283 : vector<8x64xi1>, vector<8x64xf32>
        %c84 = arith.constant 84 : index
        %313 = memref.load %arg2[%c84] : memref<256xf32, #tpu.memory_space<smem>>
        %314 = vector.broadcast %313 : f32 to vector<8x64xf32>
        %315 = arith.select %300, %314, %286 : vector<8x64xi1>, vector<8x64xf32>
        %c85 = arith.constant 85 : index
        %316 = memref.load %arg2[%c85] : memref<256xf32, #tpu.memory_space<smem>>
        %317 = vector.broadcast %316 : f32 to vector<8x64xf32>
        %318 = arith.select %300, %317, %289 : vector<8x64xi1>, vector<8x64xf32>
        %c86 = arith.constant 86 : index
        %319 = memref.load %arg2[%c86] : memref<256xf32, #tpu.memory_space<smem>>
        %320 = vector.broadcast %319 : f32 to vector<8x64xf32>
        %321 = arith.select %300, %320, %292 : vector<8x64xi1>, vector<8x64xf32>
        %c87 = arith.constant 87 : index
        %322 = memref.load %arg2[%c87] : memref<256xf32, #tpu.memory_space<smem>>
        %323 = vector.broadcast %322 : f32 to vector<8x64xf32>
        %324 = arith.select %300, %323, %295 : vector<8x64xi1>, vector<8x64xf32>
        %c23_i32 = arith.constant 23 : i32
        %325 = vector.broadcast %c23_i32 : i32 to vector<8x64xi32>
        %326 = arith.cmpi sge, %39, %325 : vector<8x64xi32>
        %c31_i32_16 = arith.constant 31 : i32
        %327 = vector.broadcast %c31_i32_16 : i32 to vector<8x64xi32>
        %328 = arith.cmpi sle, %39, %327 : vector<8x64xi32>
        %329 = arith.andi %326, %328 : vector<8x64xi1>
        %c88 = arith.constant 88 : index
        %330 = memref.load %arg2[%c88] : memref<256xf32, #tpu.memory_space<smem>>
        %331 = vector.broadcast %330 : f32 to vector<8x64xf32>
        %332 = arith.select %329, %331, %303 : vector<8x64xi1>, vector<8x64xf32>
        %c89 = arith.constant 89 : index
        %333 = memref.load %arg2[%c89] : memref<256xf32, #tpu.memory_space<smem>>
        %334 = vector.broadcast %333 : f32 to vector<8x64xf32>
        %335 = arith.select %329, %334, %306 : vector<8x64xi1>, vector<8x64xf32>
        %c90 = arith.constant 90 : index
        %336 = memref.load %arg2[%c90] : memref<256xf32, #tpu.memory_space<smem>>
        %337 = vector.broadcast %336 : f32 to vector<8x64xf32>
        %338 = arith.select %329, %337, %309 : vector<8x64xi1>, vector<8x64xf32>
        %c91 = arith.constant 91 : index
        %339 = memref.load %arg2[%c91] : memref<256xf32, #tpu.memory_space<smem>>
        %340 = vector.broadcast %339 : f32 to vector<8x64xf32>
        %341 = arith.select %329, %340, %312 : vector<8x64xi1>, vector<8x64xf32>
        %c92 = arith.constant 92 : index
        %342 = memref.load %arg2[%c92] : memref<256xf32, #tpu.memory_space<smem>>
        %343 = vector.broadcast %342 : f32 to vector<8x64xf32>
        %344 = arith.select %329, %343, %315 : vector<8x64xi1>, vector<8x64xf32>
        %c93 = arith.constant 93 : index
        %345 = memref.load %arg2[%c93] : memref<256xf32, #tpu.memory_space<smem>>
        %346 = vector.broadcast %345 : f32 to vector<8x64xf32>
        %347 = arith.select %329, %346, %318 : vector<8x64xi1>, vector<8x64xf32>
        %c94 = arith.constant 94 : index
        %348 = memref.load %arg2[%c94] : memref<256xf32, #tpu.memory_space<smem>>
        %349 = vector.broadcast %348 : f32 to vector<8x64xf32>
        %350 = arith.select %329, %349, %321 : vector<8x64xi1>, vector<8x64xf32>
        %c95 = arith.constant 95 : index
        %351 = memref.load %arg2[%c95] : memref<256xf32, #tpu.memory_space<smem>>
        %352 = vector.broadcast %351 : f32 to vector<8x64xf32>
        %353 = arith.select %329, %352, %324 : vector<8x64xi1>, vector<8x64xf32>
        %c32_i32_17 = arith.constant 32 : i32
        %354 = vector.broadcast %c32_i32_17 : i32 to vector<8x64xi32>
        %355 = arith.cmpi sge, %39, %354 : vector<8x64xi32>
        %c45_i32 = arith.constant 45 : i32
        %356 = vector.broadcast %c45_i32 : i32 to vector<8x64xi32>
        %357 = arith.cmpi sle, %39, %356 : vector<8x64xi32>
        %358 = arith.andi %355, %357 : vector<8x64xi1>
        %c96 = arith.constant 96 : index
        %359 = memref.load %arg2[%c96] : memref<256xf32, #tpu.memory_space<smem>>
        %360 = vector.broadcast %359 : f32 to vector<8x64xf32>
        %361 = arith.select %358, %360, %332 : vector<8x64xi1>, vector<8x64xf32>
        %c97 = arith.constant 97 : index
        %362 = memref.load %arg2[%c97] : memref<256xf32, #tpu.memory_space<smem>>
        %363 = vector.broadcast %362 : f32 to vector<8x64xf32>
        %364 = arith.select %358, %363, %335 : vector<8x64xi1>, vector<8x64xf32>
        %c98 = arith.constant 98 : index
        %365 = memref.load %arg2[%c98] : memref<256xf32, #tpu.memory_space<smem>>
        %366 = vector.broadcast %365 : f32 to vector<8x64xf32>
        %367 = arith.select %358, %366, %338 : vector<8x64xi1>, vector<8x64xf32>
        %c99 = arith.constant 99 : index
        %368 = memref.load %arg2[%c99] : memref<256xf32, #tpu.memory_space<smem>>
        %369 = vector.broadcast %368 : f32 to vector<8x64xf32>
        %370 = arith.select %358, %369, %341 : vector<8x64xi1>, vector<8x64xf32>
        %c100 = arith.constant 100 : index
        %371 = memref.load %arg2[%c100] : memref<256xf32, #tpu.memory_space<smem>>
        %372 = vector.broadcast %371 : f32 to vector<8x64xf32>
        %373 = arith.select %358, %372, %344 : vector<8x64xi1>, vector<8x64xf32>
        %c101 = arith.constant 101 : index
        %374 = memref.load %arg2[%c101] : memref<256xf32, #tpu.memory_space<smem>>
        %375 = vector.broadcast %374 : f32 to vector<8x64xf32>
        %376 = arith.select %358, %375, %347 : vector<8x64xi1>, vector<8x64xf32>
        %c102 = arith.constant 102 : index
        %377 = memref.load %arg2[%c102] : memref<256xf32, #tpu.memory_space<smem>>
        %378 = vector.broadcast %377 : f32 to vector<8x64xf32>
        %379 = arith.select %358, %378, %350 : vector<8x64xi1>, vector<8x64xf32>
        %c103 = arith.constant 103 : index
        %380 = memref.load %arg2[%c103] : memref<256xf32, #tpu.memory_space<smem>>
        %381 = vector.broadcast %380 : f32 to vector<8x64xf32>
        %382 = arith.select %358, %381, %353 : vector<8x64xi1>, vector<8x64xf32>
        %c46_i32 = arith.constant 46 : i32
        %383 = vector.broadcast %c46_i32 : i32 to vector<8x64xi32>
        %384 = arith.cmpi sge, %39, %383 : vector<8x64xi32>
        %c63_i32_18 = arith.constant 63 : i32
        %385 = vector.broadcast %c63_i32_18 : i32 to vector<8x64xi32>
        %386 = arith.cmpi sle, %39, %385 : vector<8x64xi32>
        %387 = arith.andi %384, %386 : vector<8x64xi1>
        %c104 = arith.constant 104 : index
        %388 = memref.load %arg2[%c104] : memref<256xf32, #tpu.memory_space<smem>>
        %389 = vector.broadcast %388 : f32 to vector<8x64xf32>
        %390 = arith.select %387, %389, %361 : vector<8x64xi1>, vector<8x64xf32>
        %c105 = arith.constant 105 : index
        %391 = memref.load %arg2[%c105] : memref<256xf32, #tpu.memory_space<smem>>
        %392 = vector.broadcast %391 : f32 to vector<8x64xf32>
        %393 = arith.select %387, %392, %364 : vector<8x64xi1>, vector<8x64xf32>
        %c106 = arith.constant 106 : index
        %394 = memref.load %arg2[%c106] : memref<256xf32, #tpu.memory_space<smem>>
        %395 = vector.broadcast %394 : f32 to vector<8x64xf32>
        %396 = arith.select %387, %395, %367 : vector<8x64xi1>, vector<8x64xf32>
        %c107 = arith.constant 107 : index
        %397 = memref.load %arg2[%c107] : memref<256xf32, #tpu.memory_space<smem>>
        %398 = vector.broadcast %397 : f32 to vector<8x64xf32>
        %399 = arith.select %387, %398, %370 : vector<8x64xi1>, vector<8x64xf32>
        %c108 = arith.constant 108 : index
        %400 = memref.load %arg2[%c108] : memref<256xf32, #tpu.memory_space<smem>>
        %401 = vector.broadcast %400 : f32 to vector<8x64xf32>
        %402 = arith.select %387, %401, %373 : vector<8x64xi1>, vector<8x64xf32>
        %c109 = arith.constant 109 : index
        %403 = memref.load %arg2[%c109] : memref<256xf32, #tpu.memory_space<smem>>
        %404 = vector.broadcast %403 : f32 to vector<8x64xf32>
        %405 = arith.select %387, %404, %376 : vector<8x64xi1>, vector<8x64xf32>
        %c110 = arith.constant 110 : index
        %406 = memref.load %arg2[%c110] : memref<256xf32, #tpu.memory_space<smem>>
        %407 = vector.broadcast %406 : f32 to vector<8x64xf32>
        %408 = arith.select %387, %407, %379 : vector<8x64xi1>, vector<8x64xf32>
        %c111 = arith.constant 111 : index
        %409 = memref.load %arg2[%c111] : memref<256xf32, #tpu.memory_space<smem>>
        %410 = vector.broadcast %409 : f32 to vector<8x64xf32>
        %411 = arith.select %387, %410, %382 : vector<8x64xi1>, vector<8x64xf32>
        %c64_i32_19 = arith.constant 64 : i32
        %412 = vector.broadcast %c64_i32_19 : i32 to vector<8x64xi32>
        %413 = arith.cmpi sge, %39, %412 : vector<8x64xi32>
        %c90_i32 = arith.constant 90 : i32
        %414 = vector.broadcast %c90_i32 : i32 to vector<8x64xi32>
        %415 = arith.cmpi sle, %39, %414 : vector<8x64xi32>
        %416 = arith.andi %413, %415 : vector<8x64xi1>
        %c112 = arith.constant 112 : index
        %417 = memref.load %arg2[%c112] : memref<256xf32, #tpu.memory_space<smem>>
        %418 = vector.broadcast %417 : f32 to vector<8x64xf32>
        %419 = arith.select %416, %418, %390 : vector<8x64xi1>, vector<8x64xf32>
        %c113 = arith.constant 113 : index
        %420 = memref.load %arg2[%c113] : memref<256xf32, #tpu.memory_space<smem>>
        %421 = vector.broadcast %420 : f32 to vector<8x64xf32>
        %422 = arith.select %416, %421, %393 : vector<8x64xi1>, vector<8x64xf32>
        %c114 = arith.constant 114 : index
        %423 = memref.load %arg2[%c114] : memref<256xf32, #tpu.memory_space<smem>>
        %424 = vector.broadcast %423 : f32 to vector<8x64xf32>
        %425 = arith.select %416, %424, %396 : vector<8x64xi1>, vector<8x64xf32>
        %c115 = arith.constant 115 : index
        %426 = memref.load %arg2[%c115] : memref<256xf32, #tpu.memory_space<smem>>
        %427 = vector.broadcast %426 : f32 to vector<8x64xf32>
        %428 = arith.select %416, %427, %399 : vector<8x64xi1>, vector<8x64xf32>
        %c116 = arith.constant 116 : index
        %429 = memref.load %arg2[%c116] : memref<256xf32, #tpu.memory_space<smem>>
        %430 = vector.broadcast %429 : f32 to vector<8x64xf32>
        %431 = arith.select %416, %430, %402 : vector<8x64xi1>, vector<8x64xf32>
        %c117 = arith.constant 117 : index
        %432 = memref.load %arg2[%c117] : memref<256xf32, #tpu.memory_space<smem>>
        %433 = vector.broadcast %432 : f32 to vector<8x64xf32>
        %434 = arith.select %416, %433, %405 : vector<8x64xi1>, vector<8x64xf32>
        %c118 = arith.constant 118 : index
        %435 = memref.load %arg2[%c118] : memref<256xf32, #tpu.memory_space<smem>>
        %436 = vector.broadcast %435 : f32 to vector<8x64xf32>
        %437 = arith.select %416, %436, %408 : vector<8x64xi1>, vector<8x64xf32>
        %c119 = arith.constant 119 : index
        %438 = memref.load %arg2[%c119] : memref<256xf32, #tpu.memory_space<smem>>
        %439 = vector.broadcast %438 : f32 to vector<8x64xf32>
        %440 = arith.select %416, %439, %411 : vector<8x64xi1>, vector<8x64xf32>
        %c91_i32_20 = arith.constant 91 : i32
        %441 = vector.broadcast %c91_i32_20 : i32 to vector<8x64xi32>
        %442 = arith.cmpi sge, %39, %441 : vector<8x64xi32>
        %c120 = arith.constant 120 : index
        %443 = memref.load %arg2[%c120] : memref<256xf32, #tpu.memory_space<smem>>
        %444 = vector.broadcast %443 : f32 to vector<8x64xf32>
        %445 = arith.select %442, %444, %419 : vector<8x64xi1>, vector<8x64xf32>
        %c121 = arith.constant 121 : index
        %446 = memref.load %arg2[%c121] : memref<256xf32, #tpu.memory_space<smem>>
        %447 = vector.broadcast %446 : f32 to vector<8x64xf32>
        %448 = arith.select %442, %447, %422 : vector<8x64xi1>, vector<8x64xf32>
        %c122 = arith.constant 122 : index
        %449 = memref.load %arg2[%c122] : memref<256xf32, #tpu.memory_space<smem>>
        %450 = vector.broadcast %449 : f32 to vector<8x64xf32>
        %451 = arith.select %442, %450, %425 : vector<8x64xi1>, vector<8x64xf32>
        %c123 = arith.constant 123 : index
        %452 = memref.load %arg2[%c123] : memref<256xf32, #tpu.memory_space<smem>>
        %453 = vector.broadcast %452 : f32 to vector<8x64xf32>
        %454 = arith.select %442, %453, %428 : vector<8x64xi1>, vector<8x64xf32>
        %c124 = arith.constant 124 : index
        %455 = memref.load %arg2[%c124] : memref<256xf32, #tpu.memory_space<smem>>
        %456 = vector.broadcast %455 : f32 to vector<8x64xf32>
        %457 = arith.select %442, %456, %431 : vector<8x64xi1>, vector<8x64xf32>
        %c125 = arith.constant 125 : index
        %458 = memref.load %arg2[%c125] : memref<256xf32, #tpu.memory_space<smem>>
        %459 = vector.broadcast %458 : f32 to vector<8x64xf32>
        %460 = arith.select %442, %459, %434 : vector<8x64xi1>, vector<8x64xf32>
        %c126 = arith.constant 126 : index
        %461 = memref.load %arg2[%c126] : memref<256xf32, #tpu.memory_space<smem>>
        %462 = vector.broadcast %461 : f32 to vector<8x64xf32>
        %463 = arith.select %442, %462, %437 : vector<8x64xi1>, vector<8x64xf32>
        %c127 = arith.constant 127 : index
        %464 = memref.load %arg2[%c127] : memref<256xf32, #tpu.memory_space<smem>>
        %465 = vector.broadcast %464 : f32 to vector<8x64xf32>
        %466 = arith.select %442, %465, %440 : vector<8x64xi1>, vector<8x64xf32>
        %c0_21 = arith.constant 0 : index
        %467 = arith.index_cast %36 : i32 to index
        %c0_22 = arith.constant 0 : index
        %468 = vector.load %arg3[%c0_21, %467, %c0_22] : memref<8x32x64xf32, #tpu.memory_space<vmem>>, vector<1x8x64xf32>
        %469 = vector.shape_cast %468 : vector<1x8x64xf32> to vector<8x64xf32>
        %470 = vector.shape_cast %445 : vector<8x64xf32> to vector<1x8x64xf32>
        tpu.vector_store %arg3[%c0_21, %467, %c0_22], %470 {strides = array<i32>} : memref<8x32x64xf32, #tpu.memory_space<vmem>>, vector<1x8x64xf32>,
        %c1_23 = arith.constant 1 : index
        %471 = arith.index_cast %36 : i32 to index
        %c0_24 = arith.constant 0 : index
        %472 = vector.load %arg3[%c1_23, %471, %c0_24] : memref<8x32x64xf32, #tpu.memory_space<vmem>>, vector<1x8x64xf32>
        %473 = vector.shape_cast %472 : vector<1x8x64xf32> to vector<8x64xf32>
        %474 = vector.shape_cast %448 : vector<8x64xf32> to vector<1x8x64xf32>
        tpu.vector_store %arg3[%c1_23, %471, %c0_24], %474 {strides = array<i32>} : memref<8x32x64xf32, #tpu.memory_space<vmem>>, vector<1x8x64xf32>,
        %c2_25 = arith.constant 2 : index
        %475 = arith.index_cast %36 : i32 to index
        %c0_26 = arith.constant 0 : index
        %476 = vector.load %arg3[%c2_25, %475, %c0_26] : memref<8x32x64xf32, #tpu.memory_space<vmem>>, vector<1x8x64xf32>
        %477 = vector.shape_cast %476 : vector<1x8x64xf32> to vector<8x64xf32>
        %478 = vector.shape_cast %451 : vector<8x64xf32> to vector<1x8x64xf32>
        tpu.vector_store %arg3[%c2_25, %475, %c0_26], %478 {strides = array<i32>} : memref<8x32x64xf32, #tpu.memory_space<vmem>>, vector<1x8x64xf32>,
        %c3_27 = arith.constant 3 : index
        %479 = arith.index_cast %36 : i32 to index
        %c0_28 = arith.constant 0 : index
        %480 = vector.load %arg3[%c3_27, %479, %c0_28] : memref<8x32x64xf32, #tpu.memory_space<vmem>>, vector<1x8x64xf32>
        %481 = vector.shape_cast %480 : vector<1x8x64xf32> to vector<8x64xf32>
        %482 = vector.shape_cast %454 : vector<8x64xf32> to vector<1x8x64xf32>
        tpu.vector_store %arg3[%c3_27, %479, %c0_28], %482 {strides = array<i32>} : memref<8x32x64xf32, #tpu.memory_space<vmem>>, vector<1x8x64xf32>,
        %c4_29 = arith.constant 4 : index
        %483 = arith.index_cast %36 : i32 to index
        %c0_30 = arith.constant 0 : index
        %484 = vector.load %arg3[%c4_29, %483, %c0_30] : memref<8x32x64xf32, #tpu.memory_space<vmem>>, vector<1x8x64xf32>
        %485 = vector.shape_cast %484 : vector<1x8x64xf32> to vector<8x64xf32>
        %486 = vector.shape_cast %457 : vector<8x64xf32> to vector<1x8x64xf32>
        tpu.vector_store %arg3[%c4_29, %483, %c0_30], %486 {strides = array<i32>} : memref<8x32x64xf32, #tpu.memory_space<vmem>>, vector<1x8x64xf32>,
        %c5_31 = arith.constant 5 : index
        %487 = arith.index_cast %36 : i32 to index
        %c0_32 = arith.constant 0 : index
        %488 = vector.load %arg3[%c5_31, %487, %c0_32] : memref<8x32x64xf32, #tpu.memory_space<vmem>>, vector<1x8x64xf32>
        %489 = vector.shape_cast %488 : vector<1x8x64xf32> to vector<8x64xf32>
        %490 = vector.shape_cast %460 : vector<8x64xf32> to vector<1x8x64xf32>
        tpu.vector_store %arg3[%c5_31, %487, %c0_32], %490 {strides = array<i32>} : memref<8x32x64xf32, #tpu.memory_space<vmem>>, vector<1x8x64xf32>,
        %c6_33 = arith.constant 6 : index
        %491 = arith.index_cast %36 : i32 to index
        %c0_34 = arith.constant 0 : index
        %492 = vector.load %arg3[%c6_33, %491, %c0_34] : memref<8x32x64xf32, #tpu.memory_space<vmem>>, vector<1x8x64xf32>
        %493 = vector.shape_cast %492 : vector<1x8x64xf32> to vector<8x64xf32>
        %494 = vector.shape_cast %463 : vector<8x64xf32> to vector<1x8x64xf32>
        tpu.vector_store %arg3[%c6_33, %491, %c0_34], %494 {strides = array<i32>} : memref<8x32x64xf32, #tpu.memory_space<vmem>>, vector<1x8x64xf32>,
        %c7_35 = arith.constant 7 : index
        %495 = arith.index_cast %36 : i32 to index
        %c0_36 = arith.constant 0 : index
        %496 = vector.load %arg3[%c7_35, %495, %c0_36] : memref<8x32x64xf32, #tpu.memory_space<vmem>>, vector<1x8x64xf32>
        %497 = vector.shape_cast %496 : vector<1x8x64xf32> to vector<8x64xf32>
        %498 = vector.shape_cast %466 : vector<8x64xf32> to vector<1x8x64xf32>
        tpu.vector_store %arg3[%c7_35, %495, %c0_36], %498 {strides = array<i32>} : memref<8x32x64xf32, #tpu.memory_space<vmem>>, vector<1x8x64xf32>,
      }
      %c4_i32_10 = arith.constant 4 : i32
    } else {
    }
    %c0_i32_3 = arith.constant 0 : i32
    %17 = arith.cmpi slt, %3, %c0_i32_3 : i32
    %c0_i32_4 = arith.constant 0 : i32
    %18 = arith.cmpi sle, %4, %c0_i32_4 : i32
    %19 = arith.andi %17, %18 : i1
    %20 = arith.andi %12, %19 : i1
    %21 = arith.extui %20 : i1 to i32
    %c0_i32_5 = arith.constant 0 : i32
    %22 = arith.cmpi ne, %21, %c0_i32_5 : i32
    scf.if %22 {
      %29 = tpu.iota {dimensions = array<i32: 0>} : vector<8x64xi32>
      %30 = tpu.iota {dimensions = array<i32: 1>} : vector<8x64xi32>
      %31 = arith.subi %29, %30 : vector<8x64xi32>
      %c0_i32_9 = arith.constant 0 : i32
      %c4_i32 = arith.constant 4 : i32
      %32 = arith.addi %c0_i32_9, %c4_i32 : i32
      %c1_i32 = arith.constant 1 : i32
      scf.for %arg4 = %c0_i32_9 to %32 step %c1_i32  : i32 {
        %c1_i32_11 = arith.constant 1 : i32
        %33 = arith.muli %arg4, %c1_i32_11 : i32
        %c0_i32_12 = arith.constant 0 : i32
        %34 = arith.addi %c0_i32_12, %33 : i32
        %c8_i32 = arith.constant 8 : i32
        %35 = arith.muli %34, %c8_i32 : i32
        %36 = tpu.assume_multiple %35, 8 : i32
        %37 = arith.addi %2, %36 : i32
        %38 = vector.broadcast %37 : i32 to vector<8x64xi32>
        %39 = arith.addi %31, %38 : vector<8x64xi32>
        %c0 = arith.constant 0 : index
        %40 = memref.load %arg2[%c0] : memref<256xf32, #tpu.memory_space<smem>>
        %41 = vector.broadcast %40 : f32 to vector<8x64xf32>
        %c1 = arith.constant 1 : index
        %42 = memref.load %arg2[%c1] : memref<256xf32, #tpu.memory_space<smem>>
        %43 = vector.broadcast %42 : f32 to vector<8x64xf32>
        %c2 = arith.constant 2 : index
        %44 = memref.load %arg2[%c2] : memref<256xf32, #tpu.memory_space<smem>>
        %45 = vector.broadcast %44 : f32 to vector<8x64xf32>
        %c3 = arith.constant 3 : index
        %46 = memref.load %arg2[%c3] : memref<256xf32, #tpu.memory_space<smem>>
        %47 = vector.broadcast %46 : f32 to vector<8x64xf32>
        %c4 = arith.constant 4 : index
        %48 = memref.load %arg2[%c4] : memref<256xf32, #tpu.memory_space<smem>>
        %49 = vector.broadcast %48 : f32 to vector<8x64xf32>
        %c5 = arith.constant 5 : index
        %50 = memref.load %arg2[%c5] : memref<256xf32, #tpu.memory_space<smem>>
        %51 = vector.broadcast %50 : f32 to vector<8x64xf32>
        %c6 = arith.constant 6 : index
        %52 = memref.load %arg2[%c6] : memref<256xf32, #tpu.memory_space<smem>>
        %53 = vector.broadcast %52 : f32 to vector<8x64xf32>
        %c7 = arith.constant 7 : index
        %54 = memref.load %arg2[%c7] : memref<256xf32, #tpu.memory_space<smem>>
        %55 = vector.broadcast %54 : f32 to vector<8x64xf32>
        %c-1_i32 = arith.constant -1 : i32
        %56 = vector.broadcast %c-1_i32 : i32 to vector<8x64xi32>
        %57 = arith.cmpi eq, %39, %56 : vector<8x64xi32>
        %c136 = arith.constant 136 : index
        %58 = memref.load %arg2[%c136] : memref<256xf32, #tpu.memory_space<smem>>
        %59 = vector.broadcast %58 : f32 to vector<8x64xf32>
        %60 = arith.select %57, %59, %41 : vector<8x64xi1>, vector<8x64xf32>
        %c137 = arith.constant 137 : index
        %61 = memref.load %arg2[%c137] : memref<256xf32, #tpu.memory_space<smem>>
        %62 = vector.broadcast %61 : f32 to vector<8x64xf32>
        %63 = arith.select %57, %62, %43 : vector<8x64xi1>, vector<8x64xf32>
        %c138 = arith.constant 138 : index
        %64 = memref.load %arg2[%c138] : memref<256xf32, #tpu.memory_space<smem>>
        %65 = vector.broadcast %64 : f32 to vector<8x64xf32>
        %66 = arith.select %57, %65, %45 : vector<8x64xi1>, vector<8x64xf32>
        %c139 = arith.constant 139 : index
        %67 = memref.load %arg2[%c139] : memref<256xf32, #tpu.memory_space<smem>>
        %68 = vector.broadcast %67 : f32 to vector<8x64xf32>
        %69 = arith.select %57, %68, %47 : vector<8x64xi1>, vector<8x64xf32>
        %c140 = arith.constant 140 : index
        %70 = memref.load %arg2[%c140] : memref<256xf32, #tpu.memory_space<smem>>
        %71 = vector.broadcast %70 : f32 to vector<8x64xf32>
        %72 = arith.select %57, %71, %49 : vector<8x64xi1>, vector<8x64xf32>
        %c141 = arith.constant 141 : index
        %73 = memref.load %arg2[%c141] : memref<256xf32, #tpu.memory_space<smem>>
        %74 = vector.broadcast %73 : f32 to vector<8x64xf32>
        %75 = arith.select %57, %74, %51 : vector<8x64xi1>, vector<8x64xf32>
        %c142 = arith.constant 142 : index
        %76 = memref.load %arg2[%c142] : memref<256xf32, #tpu.memory_space<smem>>
        %77 = vector.broadcast %76 : f32 to vector<8x64xf32>
        %78 = arith.select %57, %77, %53 : vector<8x64xi1>, vector<8x64xf32>
        %c143 = arith.constant 143 : index
        %79 = memref.load %arg2[%c143] : memref<256xf32, #tpu.memory_space<smem>>
        %80 = vector.broadcast %79 : f32 to vector<8x64xf32>
        %81 = arith.select %57, %80, %55 : vector<8x64xi1>, vector<8x64xf32>
        %c-2_i32 = arith.constant -2 : i32
        %82 = vector.broadcast %c-2_i32 : i32 to vector<8x64xi32>
        %83 = arith.cmpi eq, %39, %82 : vector<8x64xi32>
        %c144 = arith.constant 144 : index
        %84 = memref.load %arg2[%c144] : memref<256xf32, #tpu.memory_space<smem>>
        %85 = vector.broadcast %84 : f32 to vector<8x64xf32>
        %86 = arith.select %83, %85, %60 : vector<8x64xi1>, vector<8x64xf32>
        %c145 = arith.constant 145 : index
        %87 = memref.load %arg2[%c145] : memref<256xf32, #tpu.memory_space<smem>>
        %88 = vector.broadcast %87 : f32 to vector<8x64xf32>
        %89 = arith.select %83, %88, %63 : vector<8x64xi1>, vector<8x64xf32>
        %c146 = arith.constant 146 : index
        %90 = memref.load %arg2[%c146] : memref<256xf32, #tpu.memory_space<smem>>
        %91 = vector.broadcast %90 : f32 to vector<8x64xf32>
        %92 = arith.select %83, %91, %66 : vector<8x64xi1>, vector<8x64xf32>
        %c147 = arith.constant 147 : index
        %93 = memref.load %arg2[%c147] : memref<256xf32, #tpu.memory_space<smem>>
        %94 = vector.broadcast %93 : f32 to vector<8x64xf32>
        %95 = arith.select %83, %94, %69 : vector<8x64xi1>, vector<8x64xf32>
        %c148 = arith.constant 148 : index
        %96 = memref.load %arg2[%c148] : memref<256xf32, #tpu.memory_space<smem>>
        %97 = vector.broadcast %96 : f32 to vector<8x64xf32>
        %98 = arith.select %83, %97, %72 : vector<8x64xi1>, vector<8x64xf32>
        %c149 = arith.constant 149 : index
        %99 = memref.load %arg2[%c149] : memref<256xf32, #tpu.memory_space<smem>>
        %100 = vector.broadcast %99 : f32 to vector<8x64xf32>
        %101 = arith.select %83, %100, %75 : vector<8x64xi1>, vector<8x64xf32>
        %c150 = arith.constant 150 : index
        %102 = memref.load %arg2[%c150] : memref<256xf32, #tpu.memory_space<smem>>
        %103 = vector.broadcast %102 : f32 to vector<8x64xf32>
        %104 = arith.select %83, %103, %78 : vector<8x64xi1>, vector<8x64xf32>
        %c151 = arith.constant 151 : index
        %105 = memref.load %arg2[%c151] : memref<256xf32, #tpu.memory_space<smem>>
        %106 = vector.broadcast %105 : f32 to vector<8x64xf32>
        %107 = arith.select %83, %106, %81 : vector<8x64xi1>, vector<8x64xf32>
        %c-3_i32 = arith.constant -3 : i32
        %108 = vector.broadcast %c-3_i32 : i32 to vector<8x64xi32>
        %109 = arith.cmpi eq, %39, %108 : vector<8x64xi32>
        %c152 = arith.constant 152 : index
        %110 = memref.load %arg2[%c152] : memref<256xf32, #tpu.memory_space<smem>>
        %111 = vector.broadcast %110 : f32 to vector<8x64xf32>
        %112 = arith.select %109, %111, %86 : vector<8x64xi1>, vector<8x64xf32>
        %c153 = arith.constant 153 : index
        %113 = memref.load %arg2[%c153] : memref<256xf32, #tpu.memory_space<smem>>
        %114 = vector.broadcast %113 : f32 to vector<8x64xf32>
        %115 = arith.select %109, %114, %89 : vector<8x64xi1>, vector<8x64xf32>
        %c154 = arith.constant 154 : index
        %116 = memref.load %arg2[%c154] : memref<256xf32, #tpu.memory_space<smem>>
        %117 = vector.broadcast %116 : f32 to vector<8x64xf32>
        %118 = arith.select %109, %117, %92 : vector<8x64xi1>, vector<8x64xf32>
        %c155 = arith.constant 155 : index
        %119 = memref.load %arg2[%c155] : memref<256xf32, #tpu.memory_space<smem>>
        %120 = vector.broadcast %119 : f32 to vector<8x64xf32>
        %121 = arith.select %109, %120, %95 : vector<8x64xi1>, vector<8x64xf32>
        %c156 = arith.constant 156 : index
        %122 = memref.load %arg2[%c156] : memref<256xf32, #tpu.memory_space<smem>>
        %123 = vector.broadcast %122 : f32 to vector<8x64xf32>
        %124 = arith.select %109, %123, %98 : vector<8x64xi1>, vector<8x64xf32>
        %c157 = arith.constant 157 : index
        %125 = memref.load %arg2[%c157] : memref<256xf32, #tpu.memory_space<smem>>
        %126 = vector.broadcast %125 : f32 to vector<8x64xf32>
        %127 = arith.select %109, %126, %101 : vector<8x64xi1>, vector<8x64xf32>
        %c158 = arith.constant 158 : index
        %128 = memref.load %arg2[%c158] : memref<256xf32, #tpu.memory_space<smem>>
        %129 = vector.broadcast %128 : f32 to vector<8x64xf32>
        %130 = arith.select %109, %129, %104 : vector<8x64xi1>, vector<8x64xf32>
        %c159 = arith.constant 159 : index
        %131 = memref.load %arg2[%c159] : memref<256xf32, #tpu.memory_space<smem>>
        %132 = vector.broadcast %131 : f32 to vector<8x64xf32>
        %133 = arith.select %109, %132, %107 : vector<8x64xi1>, vector<8x64xf32>
        %c-4_i32 = arith.constant -4 : i32
        %134 = vector.broadcast %c-4_i32 : i32 to vector<8x64xi32>
        %135 = arith.cmpi eq, %39, %134 : vector<8x64xi32>
        %c160 = arith.constant 160 : index
        %136 = memref.load %arg2[%c160] : memref<256xf32, #tpu.memory_space<smem>>
        %137 = vector.broadcast %136 : f32 to vector<8x64xf32>
        %138 = arith.select %135, %137, %112 : vector<8x64xi1>, vector<8x64xf32>
        %c161 = arith.constant 161 : index
        %139 = memref.load %arg2[%c161] : memref<256xf32, #tpu.memory_space<smem>>
        %140 = vector.broadcast %139 : f32 to vector<8x64xf32>
        %141 = arith.select %135, %140, %115 : vector<8x64xi1>, vector<8x64xf32>
        %c162 = arith.constant 162 : index
        %142 = memref.load %arg2[%c162] : memref<256xf32, #tpu.memory_space<smem>>
        %143 = vector.broadcast %142 : f32 to vector<8x64xf32>
        %144 = arith.select %135, %143, %118 : vector<8x64xi1>, vector<8x64xf32>
        %c163 = arith.constant 163 : index
        %145 = memref.load %arg2[%c163] : memref<256xf32, #tpu.memory_space<smem>>
        %146 = vector.broadcast %145 : f32 to vector<8x64xf32>
        %147 = arith.select %135, %146, %121 : vector<8x64xi1>, vector<8x64xf32>
        %c164 = arith.constant 164 : index
        %148 = memref.load %arg2[%c164] : memref<256xf32, #tpu.memory_space<smem>>
        %149 = vector.broadcast %148 : f32 to vector<8x64xf32>
        %150 = arith.select %135, %149, %124 : vector<8x64xi1>, vector<8x64xf32>
        %c165 = arith.constant 165 : index
        %151 = memref.load %arg2[%c165] : memref<256xf32, #tpu.memory_space<smem>>
        %152 = vector.broadcast %151 : f32 to vector<8x64xf32>
        %153 = arith.select %135, %152, %127 : vector<8x64xi1>, vector<8x64xf32>
        %c166 = arith.constant 166 : index
        %154 = memref.load %arg2[%c166] : memref<256xf32, #tpu.memory_space<smem>>
        %155 = vector.broadcast %154 : f32 to vector<8x64xf32>
        %156 = arith.select %135, %155, %130 : vector<8x64xi1>, vector<8x64xf32>
        %c167 = arith.constant 167 : index
        %157 = memref.load %arg2[%c167] : memref<256xf32, #tpu.memory_space<smem>>
        %158 = vector.broadcast %157 : f32 to vector<8x64xf32>
        %159 = arith.select %135, %158, %133 : vector<8x64xi1>, vector<8x64xf32>
        %c-5_i32 = arith.constant -5 : i32
        %160 = vector.broadcast %c-5_i32 : i32 to vector<8x64xi32>
        %161 = arith.cmpi eq, %39, %160 : vector<8x64xi32>
        %c168 = arith.constant 168 : index
        %162 = memref.load %arg2[%c168] : memref<256xf32, #tpu.memory_space<smem>>
        %163 = vector.broadcast %162 : f32 to vector<8x64xf32>
        %164 = arith.select %161, %163, %138 : vector<8x64xi1>, vector<8x64xf32>
        %c169 = arith.constant 169 : index
        %165 = memref.load %arg2[%c169] : memref<256xf32, #tpu.memory_space<smem>>
        %166 = vector.broadcast %165 : f32 to vector<8x64xf32>
        %167 = arith.select %161, %166, %141 : vector<8x64xi1>, vector<8x64xf32>
        %c170 = arith.constant 170 : index
        %168 = memref.load %arg2[%c170] : memref<256xf32, #tpu.memory_space<smem>>
        %169 = vector.broadcast %168 : f32 to vector<8x64xf32>
        %170 = arith.select %161, %169, %144 : vector<8x64xi1>, vector<8x64xf32>
        %c171 = arith.constant 171 : index
        %171 = memref.load %arg2[%c171] : memref<256xf32, #tpu.memory_space<smem>>
        %172 = vector.broadcast %171 : f32 to vector<8x64xf32>
        %173 = arith.select %161, %172, %147 : vector<8x64xi1>, vector<8x64xf32>
        %c172 = arith.constant 172 : index
        %174 = memref.load %arg2[%c172] : memref<256xf32, #tpu.memory_space<smem>>
        %175 = vector.broadcast %174 : f32 to vector<8x64xf32>
        %176 = arith.select %161, %175, %150 : vector<8x64xi1>, vector<8x64xf32>
        %c173 = arith.constant 173 : index
        %177 = memref.load %arg2[%c173] : memref<256xf32, #tpu.memory_space<smem>>
        %178 = vector.broadcast %177 : f32 to vector<8x64xf32>
        %179 = arith.select %161, %178, %153 : vector<8x64xi1>, vector<8x64xf32>
        %c174 = arith.constant 174 : index
        %180 = memref.load %arg2[%c174] : memref<256xf32, #tpu.memory_space<smem>>
        %181 = vector.broadcast %180 : f32 to vector<8x64xf32>
        %182 = arith.select %161, %181, %156 : vector<8x64xi1>, vector<8x64xf32>
        %c175 = arith.constant 175 : index
        %183 = memref.load %arg2[%c175] : memref<256xf32, #tpu.memory_space<smem>>
        %184 = vector.broadcast %183 : f32 to vector<8x64xf32>
        %185 = arith.select %161, %184, %159 : vector<8x64xi1>, vector<8x64xf32>
        %c-6_i32 = arith.constant -6 : i32
        %186 = vector.broadcast %c-6_i32 : i32 to vector<8x64xi32>
        %187 = arith.cmpi eq, %39, %186 : vector<8x64xi32>
        %c176 = arith.constant 176 : index
        %188 = memref.load %arg2[%c176] : memref<256xf32, #tpu.memory_space<smem>>
        %189 = vector.broadcast %188 : f32 to vector<8x64xf32>
        %190 = arith.select %187, %189, %164 : vector<8x64xi1>, vector<8x64xf32>
        %c177 = arith.constant 177 : index
        %191 = memref.load %arg2[%c177] : memref<256xf32, #tpu.memory_space<smem>>
        %192 = vector.broadcast %191 : f32 to vector<8x64xf32>
        %193 = arith.select %187, %192, %167 : vector<8x64xi1>, vector<8x64xf32>
        %c178 = arith.constant 178 : index
        %194 = memref.load %arg2[%c178] : memref<256xf32, #tpu.memory_space<smem>>
        %195 = vector.broadcast %194 : f32 to vector<8x64xf32>
        %196 = arith.select %187, %195, %170 : vector<8x64xi1>, vector<8x64xf32>
        %c179 = arith.constant 179 : index
        %197 = memref.load %arg2[%c179] : memref<256xf32, #tpu.memory_space<smem>>
        %198 = vector.broadcast %197 : f32 to vector<8x64xf32>
        %199 = arith.select %187, %198, %173 : vector<8x64xi1>, vector<8x64xf32>
        %c180 = arith.constant 180 : index
        %200 = memref.load %arg2[%c180] : memref<256xf32, #tpu.memory_space<smem>>
        %201 = vector.broadcast %200 : f32 to vector<8x64xf32>
        %202 = arith.select %187, %201, %176 : vector<8x64xi1>, vector<8x64xf32>
        %c181 = arith.constant 181 : index
        %203 = memref.load %arg2[%c181] : memref<256xf32, #tpu.memory_space<smem>>
        %204 = vector.broadcast %203 : f32 to vector<8x64xf32>
        %205 = arith.select %187, %204, %179 : vector<8x64xi1>, vector<8x64xf32>
        %c182 = arith.constant 182 : index
        %206 = memref.load %arg2[%c182] : memref<256xf32, #tpu.memory_space<smem>>
        %207 = vector.broadcast %206 : f32 to vector<8x64xf32>
        %208 = arith.select %187, %207, %182 : vector<8x64xi1>, vector<8x64xf32>
        %c183 = arith.constant 183 : index
        %209 = memref.load %arg2[%c183] : memref<256xf32, #tpu.memory_space<smem>>
        %210 = vector.broadcast %209 : f32 to vector<8x64xf32>
        %211 = arith.select %187, %210, %185 : vector<8x64xi1>, vector<8x64xf32>
        %c-7_i32 = arith.constant -7 : i32
        %212 = vector.broadcast %c-7_i32 : i32 to vector<8x64xi32>
        %213 = arith.cmpi eq, %39, %212 : vector<8x64xi32>
        %c184 = arith.constant 184 : index
        %214 = memref.load %arg2[%c184] : memref<256xf32, #tpu.memory_space<smem>>
        %215 = vector.broadcast %214 : f32 to vector<8x64xf32>
        %216 = arith.select %213, %215, %190 : vector<8x64xi1>, vector<8x64xf32>
        %c185 = arith.constant 185 : index
        %217 = memref.load %arg2[%c185] : memref<256xf32, #tpu.memory_space<smem>>
        %218 = vector.broadcast %217 : f32 to vector<8x64xf32>
        %219 = arith.select %213, %218, %193 : vector<8x64xi1>, vector<8x64xf32>
        %c186 = arith.constant 186 : index
        %220 = memref.load %arg2[%c186] : memref<256xf32, #tpu.memory_space<smem>>
        %221 = vector.broadcast %220 : f32 to vector<8x64xf32>
        %222 = arith.select %213, %221, %196 : vector<8x64xi1>, vector<8x64xf32>
        %c187 = arith.constant 187 : index
        %223 = memref.load %arg2[%c187] : memref<256xf32, #tpu.memory_space<smem>>
        %224 = vector.broadcast %223 : f32 to vector<8x64xf32>
        %225 = arith.select %213, %224, %199 : vector<8x64xi1>, vector<8x64xf32>
        %c188 = arith.constant 188 : index
        %226 = memref.load %arg2[%c188] : memref<256xf32, #tpu.memory_space<smem>>
        %227 = vector.broadcast %226 : f32 to vector<8x64xf32>
        %228 = arith.select %213, %227, %202 : vector<8x64xi1>, vector<8x64xf32>
        %c189 = arith.constant 189 : index
        %229 = memref.load %arg2[%c189] : memref<256xf32, #tpu.memory_space<smem>>
        %230 = vector.broadcast %229 : f32 to vector<8x64xf32>
        %231 = arith.select %213, %230, %205 : vector<8x64xi1>, vector<8x64xf32>
        %c190 = arith.constant 190 : index
        %232 = memref.load %arg2[%c190] : memref<256xf32, #tpu.memory_space<smem>>
        %233 = vector.broadcast %232 : f32 to vector<8x64xf32>
        %234 = arith.select %213, %233, %208 : vector<8x64xi1>, vector<8x64xf32>
        %c191 = arith.constant 191 : index
        %235 = memref.load %arg2[%c191] : memref<256xf32, #tpu.memory_space<smem>>
        %236 = vector.broadcast %235 : f32 to vector<8x64xf32>
        %237 = arith.select %213, %236, %211 : vector<8x64xi1>, vector<8x64xf32>
        %c-8_i32 = arith.constant -8 : i32
        %238 = vector.broadcast %c-8_i32 : i32 to vector<8x64xi32>
        %239 = arith.cmpi sle, %39, %238 : vector<8x64xi32>
        %c-11_i32 = arith.constant -11 : i32
        %240 = vector.broadcast %c-11_i32 : i32 to vector<8x64xi32>
        %241 = arith.cmpi sge, %39, %240 : vector<8x64xi32>
        %242 = arith.andi %239, %241 : vector<8x64xi1>
        %c192 = arith.constant 192 : index
        %243 = memref.load %arg2[%c192] : memref<256xf32, #tpu.memory_space<smem>>
        %244 = vector.broadcast %243 : f32 to vector<8x64xf32>
        %245 = arith.select %242, %244, %216 : vector<8x64xi1>, vector<8x64xf32>
        %c193 = arith.constant 193 : index
        %246 = memref.load %arg2[%c193] : memref<256xf32, #tpu.memory_space<smem>>
        %247 = vector.broadcast %246 : f32 to vector<8x64xf32>
        %248 = arith.select %242, %247, %219 : vector<8x64xi1>, vector<8x64xf32>
        %c194 = arith.constant 194 : index
        %249 = memref.load %arg2[%c194] : memref<256xf32, #tpu.memory_space<smem>>
        %250 = vector.broadcast %249 : f32 to vector<8x64xf32>
        %251 = arith.select %242, %250, %222 : vector<8x64xi1>, vector<8x64xf32>
        %c195 = arith.constant 195 : index
        %252 = memref.load %arg2[%c195] : memref<256xf32, #tpu.memory_space<smem>>
        %253 = vector.broadcast %252 : f32 to vector<8x64xf32>
        %254 = arith.select %242, %253, %225 : vector<8x64xi1>, vector<8x64xf32>
        %c196 = arith.constant 196 : index
        %255 = memref.load %arg2[%c196] : memref<256xf32, #tpu.memory_space<smem>>
        %256 = vector.broadcast %255 : f32 to vector<8x64xf32>
        %257 = arith.select %242, %256, %228 : vector<8x64xi1>, vector<8x64xf32>
        %c197 = arith.constant 197 : index
        %258 = memref.load %arg2[%c197] : memref<256xf32, #tpu.memory_space<smem>>
        %259 = vector.broadcast %258 : f32 to vector<8x64xf32>
        %260 = arith.select %242, %259, %231 : vector<8x64xi1>, vector<8x64xf32>
        %c198 = arith.constant 198 : index
        %261 = memref.load %arg2[%c198] : memref<256xf32, #tpu.memory_space<smem>>
        %262 = vector.broadcast %261 : f32 to vector<8x64xf32>
        %263 = arith.select %242, %262, %234 : vector<8x64xi1>, vector<8x64xf32>
        %c199 = arith.constant 199 : index
        %264 = memref.load %arg2[%c199] : memref<256xf32, #tpu.memory_space<smem>>
        %265 = vector.broadcast %264 : f32 to vector<8x64xf32>
        %266 = arith.select %242, %265, %237 : vector<8x64xi1>, vector<8x64xf32>
        %c-12_i32 = arith.constant -12 : i32
        %267 = vector.broadcast %c-12_i32 : i32 to vector<8x64xi32>
        %268 = arith.cmpi sle, %39, %267 : vector<8x64xi32>
        %c-15_i32 = arith.constant -15 : i32
        %269 = vector.broadcast %c-15_i32 : i32 to vector<8x64xi32>
        %270 = arith.cmpi sge, %39, %269 : vector<8x64xi32>
        %271 = arith.andi %268, %270 : vector<8x64xi1>
        %c200 = arith.constant 200 : index
        %272 = memref.load %arg2[%c200] : memref<256xf32, #tpu.memory_space<smem>>
        %273 = vector.broadcast %272 : f32 to vector<8x64xf32>
        %274 = arith.select %271, %273, %245 : vector<8x64xi1>, vector<8x64xf32>
        %c201 = arith.constant 201 : index
        %275 = memref.load %arg2[%c201] : memref<256xf32, #tpu.memory_space<smem>>
        %276 = vector.broadcast %275 : f32 to vector<8x64xf32>
        %277 = arith.select %271, %276, %248 : vector<8x64xi1>, vector<8x64xf32>
        %c202 = arith.constant 202 : index
        %278 = memref.load %arg2[%c202] : memref<256xf32, #tpu.memory_space<smem>>
        %279 = vector.broadcast %278 : f32 to vector<8x64xf32>
        %280 = arith.select %271, %279, %251 : vector<8x64xi1>, vector<8x64xf32>
        %c203 = arith.constant 203 : index
        %281 = memref.load %arg2[%c203] : memref<256xf32, #tpu.memory_space<smem>>
        %282 = vector.broadcast %281 : f32 to vector<8x64xf32>
        %283 = arith.select %271, %282, %254 : vector<8x64xi1>, vector<8x64xf32>
        %c204 = arith.constant 204 : index
        %284 = memref.load %arg2[%c204] : memref<256xf32, #tpu.memory_space<smem>>
        %285 = vector.broadcast %284 : f32 to vector<8x64xf32>
        %286 = arith.select %271, %285, %257 : vector<8x64xi1>, vector<8x64xf32>
        %c205 = arith.constant 205 : index
        %287 = memref.load %arg2[%c205] : memref<256xf32, #tpu.memory_space<smem>>
        %288 = vector.broadcast %287 : f32 to vector<8x64xf32>
        %289 = arith.select %271, %288, %260 : vector<8x64xi1>, vector<8x64xf32>
        %c206 = arith.constant 206 : index
        %290 = memref.load %arg2[%c206] : memref<256xf32, #tpu.memory_space<smem>>
        %291 = vector.broadcast %290 : f32 to vector<8x64xf32>
        %292 = arith.select %271, %291, %263 : vector<8x64xi1>, vector<8x64xf32>
        %c207 = arith.constant 207 : index
        %293 = memref.load %arg2[%c207] : memref<256xf32, #tpu.memory_space<smem>>
        %294 = vector.broadcast %293 : f32 to vector<8x64xf32>
        %295 = arith.select %271, %294, %266 : vector<8x64xi1>, vector<8x64xf32>
        %c-16_i32 = arith.constant -16 : i32
        %296 = vector.broadcast %c-16_i32 : i32 to vector<8x64xi32>
        %297 = arith.cmpi sle, %39, %296 : vector<8x64xi32>
        %c-22_i32 = arith.constant -22 : i32
        %298 = vector.broadcast %c-22_i32 : i32 to vector<8x64xi32>
        %299 = arith.cmpi sge, %39, %298 : vector<8x64xi32>
        %300 = arith.andi %297, %299 : vector<8x64xi1>
        %c208 = arith.constant 208 : index
        %301 = memref.load %arg2[%c208] : memref<256xf32, #tpu.memory_space<smem>>
        %302 = vector.broadcast %301 : f32 to vector<8x64xf32>
        %303 = arith.select %300, %302, %274 : vector<8x64xi1>, vector<8x64xf32>
        %c209 = arith.constant 209 : index
        %304 = memref.load %arg2[%c209] : memref<256xf32, #tpu.memory_space<smem>>
        %305 = vector.broadcast %304 : f32 to vector<8x64xf32>
        %306 = arith.select %300, %305, %277 : vector<8x64xi1>, vector<8x64xf32>
        %c210 = arith.constant 210 : index
        %307 = memref.load %arg2[%c210] : memref<256xf32, #tpu.memory_space<smem>>
        %308 = vector.broadcast %307 : f32 to vector<8x64xf32>
        %309 = arith.select %300, %308, %280 : vector<8x64xi1>, vector<8x64xf32>
        %c211 = arith.constant 211 : index
        %310 = memref.load %arg2[%c211] : memref<256xf32, #tpu.memory_space<smem>>
        %311 = vector.broadcast %310 : f32 to vector<8x64xf32>
        %312 = arith.select %300, %311, %283 : vector<8x64xi1>, vector<8x64xf32>
        %c212 = arith.constant 212 : index
        %313 = memref.load %arg2[%c212] : memref<256xf32, #tpu.memory_space<smem>>
        %314 = vector.broadcast %313 : f32 to vector<8x64xf32>
        %315 = arith.select %300, %314, %286 : vector<8x64xi1>, vector<8x64xf32>
        %c213 = arith.constant 213 : index
        %316 = memref.load %arg2[%c213] : memref<256xf32, #tpu.memory_space<smem>>
        %317 = vector.broadcast %316 : f32 to vector<8x64xf32>
        %318 = arith.select %300, %317, %289 : vector<8x64xi1>, vector<8x64xf32>
        %c214 = arith.constant 214 : index
        %319 = memref.load %arg2[%c214] : memref<256xf32, #tpu.memory_space<smem>>
        %320 = vector.broadcast %319 : f32 to vector<8x64xf32>
        %321 = arith.select %300, %320, %292 : vector<8x64xi1>, vector<8x64xf32>
        %c215 = arith.constant 215 : index
        %322 = memref.load %arg2[%c215] : memref<256xf32, #tpu.memory_space<smem>>
        %323 = vector.broadcast %322 : f32 to vector<8x64xf32>
        %324 = arith.select %300, %323, %295 : vector<8x64xi1>, vector<8x64xf32>
        %c-23_i32 = arith.constant -23 : i32
        %325 = vector.broadcast %c-23_i32 : i32 to vector<8x64xi32>
        %326 = arith.cmpi sle, %39, %325 : vector<8x64xi32>
        %c-31_i32 = arith.constant -31 : i32
        %327 = vector.broadcast %c-31_i32 : i32 to vector<8x64xi32>
        %328 = arith.cmpi sge, %39, %327 : vector<8x64xi32>
        %329 = arith.andi %326, %328 : vector<8x64xi1>
        %c216 = arith.constant 216 : index
        %330 = memref.load %arg2[%c216] : memref<256xf32, #tpu.memory_space<smem>>
        %331 = vector.broadcast %330 : f32 to vector<8x64xf32>
        %332 = arith.select %329, %331, %303 : vector<8x64xi1>, vector<8x64xf32>
        %c217 = arith.constant 217 : index
        %333 = memref.load %arg2[%c217] : memref<256xf32, #tpu.memory_space<smem>>
        %334 = vector.broadcast %333 : f32 to vector<8x64xf32>
        %335 = arith.select %329, %334, %306 : vector<8x64xi1>, vector<8x64xf32>
        %c218 = arith.constant 218 : index
        %336 = memref.load %arg2[%c218] : memref<256xf32, #tpu.memory_space<smem>>
        %337 = vector.broadcast %336 : f32 to vector<8x64xf32>
        %338 = arith.select %329, %337, %309 : vector<8x64xi1>, vector<8x64xf32>
        %c219 = arith.constant 219 : index
        %339 = memref.load %arg2[%c219] : memref<256xf32, #tpu.memory_space<smem>>
        %340 = vector.broadcast %339 : f32 to vector<8x64xf32>
        %341 = arith.select %329, %340, %312 : vector<8x64xi1>, vector<8x64xf32>
        %c220 = arith.constant 220 : index
        %342 = memref.load %arg2[%c220] : memref<256xf32, #tpu.memory_space<smem>>
        %343 = vector.broadcast %342 : f32 to vector<8x64xf32>
        %344 = arith.select %329, %343, %315 : vector<8x64xi1>, vector<8x64xf32>
        %c221 = arith.constant 221 : index
        %345 = memref.load %arg2[%c221] : memref<256xf32, #tpu.memory_space<smem>>
        %346 = vector.broadcast %345 : f32 to vector<8x64xf32>
        %347 = arith.select %329, %346, %318 : vector<8x64xi1>, vector<8x64xf32>
        %c222 = arith.constant 222 : index
        %348 = memref.load %arg2[%c222] : memref<256xf32, #tpu.memory_space<smem>>
        %349 = vector.broadcast %348 : f32 to vector<8x64xf32>
        %350 = arith.select %329, %349, %321 : vector<8x64xi1>, vector<8x64xf32>
        %c223 = arith.constant 223 : index
        %351 = memref.load %arg2[%c223] : memref<256xf32, #tpu.memory_space<smem>>
        %352 = vector.broadcast %351 : f32 to vector<8x64xf32>
        %353 = arith.select %329, %352, %324 : vector<8x64xi1>, vector<8x64xf32>
        %c-32_i32 = arith.constant -32 : i32
        %354 = vector.broadcast %c-32_i32 : i32 to vector<8x64xi32>
        %355 = arith.cmpi sle, %39, %354 : vector<8x64xi32>
        %c-45_i32 = arith.constant -45 : i32
        %356 = vector.broadcast %c-45_i32 : i32 to vector<8x64xi32>
        %357 = arith.cmpi sge, %39, %356 : vector<8x64xi32>
        %358 = arith.andi %355, %357 : vector<8x64xi1>
        %c224 = arith.constant 224 : index
        %359 = memref.load %arg2[%c224] : memref<256xf32, #tpu.memory_space<smem>>
        %360 = vector.broadcast %359 : f32 to vector<8x64xf32>
        %361 = arith.select %358, %360, %332 : vector<8x64xi1>, vector<8x64xf32>
        %c225 = arith.constant 225 : index
        %362 = memref.load %arg2[%c225] : memref<256xf32, #tpu.memory_space<smem>>
        %363 = vector.broadcast %362 : f32 to vector<8x64xf32>
        %364 = arith.select %358, %363, %335 : vector<8x64xi1>, vector<8x64xf32>
        %c226 = arith.constant 226 : index
        %365 = memref.load %arg2[%c226] : memref<256xf32, #tpu.memory_space<smem>>
        %366 = vector.broadcast %365 : f32 to vector<8x64xf32>
        %367 = arith.select %358, %366, %338 : vector<8x64xi1>, vector<8x64xf32>
        %c227 = arith.constant 227 : index
        %368 = memref.load %arg2[%c227] : memref<256xf32, #tpu.memory_space<smem>>
        %369 = vector.broadcast %368 : f32 to vector<8x64xf32>
        %370 = arith.select %358, %369, %341 : vector<8x64xi1>, vector<8x64xf32>
        %c228 = arith.constant 228 : index
        %371 = memref.load %arg2[%c228] : memref<256xf32, #tpu.memory_space<smem>>
        %372 = vector.broadcast %371 : f32 to vector<8x64xf32>
        %373 = arith.select %358, %372, %344 : vector<8x64xi1>, vector<8x64xf32>
        %c229 = arith.constant 229 : index
        %374 = memref.load %arg2[%c229] : memref<256xf32, #tpu.memory_space<smem>>
        %375 = vector.broadcast %374 : f32 to vector<8x64xf32>
        %376 = arith.select %358, %375, %347 : vector<8x64xi1>, vector<8x64xf32>
        %c230 = arith.constant 230 : index
        %377 = memref.load %arg2[%c230] : memref<256xf32, #tpu.memory_space<smem>>
        %378 = vector.broadcast %377 : f32 to vector<8x64xf32>
        %379 = arith.select %358, %378, %350 : vector<8x64xi1>, vector<8x64xf32>
        %c231 = arith.constant 231 : index
        %380 = memref.load %arg2[%c231] : memref<256xf32, #tpu.memory_space<smem>>
        %381 = vector.broadcast %380 : f32 to vector<8x64xf32>
        %382 = arith.select %358, %381, %353 : vector<8x64xi1>, vector<8x64xf32>
        %c-46_i32 = arith.constant -46 : i32
        %383 = vector.broadcast %c-46_i32 : i32 to vector<8x64xi32>
        %384 = arith.cmpi sle, %39, %383 : vector<8x64xi32>
        %c-63_i32 = arith.constant -63 : i32
        %385 = vector.broadcast %c-63_i32 : i32 to vector<8x64xi32>
        %386 = arith.cmpi sge, %39, %385 : vector<8x64xi32>
        %387 = arith.andi %384, %386 : vector<8x64xi1>
        %c232 = arith.constant 232 : index
        %388 = memref.load %arg2[%c232] : memref<256xf32, #tpu.memory_space<smem>>
        %389 = vector.broadcast %388 : f32 to vector<8x64xf32>
        %390 = arith.select %387, %389, %361 : vector<8x64xi1>, vector<8x64xf32>
        %c233 = arith.constant 233 : index
        %391 = memref.load %arg2[%c233] : memref<256xf32, #tpu.memory_space<smem>>
        %392 = vector.broadcast %391 : f32 to vector<8x64xf32>
        %393 = arith.select %387, %392, %364 : vector<8x64xi1>, vector<8x64xf32>
        %c234 = arith.constant 234 : index
        %394 = memref.load %arg2[%c234] : memref<256xf32, #tpu.memory_space<smem>>
        %395 = vector.broadcast %394 : f32 to vector<8x64xf32>
        %396 = arith.select %387, %395, %367 : vector<8x64xi1>, vector<8x64xf32>
        %c235 = arith.constant 235 : index
        %397 = memref.load %arg2[%c235] : memref<256xf32, #tpu.memory_space<smem>>
        %398 = vector.broadcast %397 : f32 to vector<8x64xf32>
        %399 = arith.select %387, %398, %370 : vector<8x64xi1>, vector<8x64xf32>
        %c236 = arith.constant 236 : index
        %400 = memref.load %arg2[%c236] : memref<256xf32, #tpu.memory_space<smem>>
        %401 = vector.broadcast %400 : f32 to vector<8x64xf32>
        %402 = arith.select %387, %401, %373 : vector<8x64xi1>, vector<8x64xf32>
        %c237 = arith.constant 237 : index
        %403 = memref.load %arg2[%c237] : memref<256xf32, #tpu.memory_space<smem>>
        %404 = vector.broadcast %403 : f32 to vector<8x64xf32>
        %405 = arith.select %387, %404, %376 : vector<8x64xi1>, vector<8x64xf32>
        %c238 = arith.constant 238 : index
        %406 = memref.load %arg2[%c238] : memref<256xf32, #tpu.memory_space<smem>>
        %407 = vector.broadcast %406 : f32 to vector<8x64xf32>
        %408 = arith.select %387, %407, %379 : vector<8x64xi1>, vector<8x64xf32>
        %c239 = arith.constant 239 : index
        %409 = memref.load %arg2[%c239] : memref<256xf32, #tpu.memory_space<smem>>
        %410 = vector.broadcast %409 : f32 to vector<8x64xf32>
        %411 = arith.select %387, %410, %382 : vector<8x64xi1>, vector<8x64xf32>
        %c-64_i32 = arith.constant -64 : i32
        %412 = vector.broadcast %c-64_i32 : i32 to vector<8x64xi32>
        %413 = arith.cmpi sle, %39, %412 : vector<8x64xi32>
        %c-90_i32 = arith.constant -90 : i32
        %414 = vector.broadcast %c-90_i32 : i32 to vector<8x64xi32>
        %415 = arith.cmpi sge, %39, %414 : vector<8x64xi32>
        %416 = arith.andi %413, %415 : vector<8x64xi1>
        %c240 = arith.constant 240 : index
        %417 = memref.load %arg2[%c240] : memref<256xf32, #tpu.memory_space<smem>>
        %418 = vector.broadcast %417 : f32 to vector<8x64xf32>
        %419 = arith.select %416, %418, %390 : vector<8x64xi1>, vector<8x64xf32>
        %c241 = arith.constant 241 : index
        %420 = memref.load %arg2[%c241] : memref<256xf32, #tpu.memory_space<smem>>
        %421 = vector.broadcast %420 : f32 to vector<8x64xf32>
        %422 = arith.select %416, %421, %393 : vector<8x64xi1>, vector<8x64xf32>
        %c242 = arith.constant 242 : index
        %423 = memref.load %arg2[%c242] : memref<256xf32, #tpu.memory_space<smem>>
        %424 = vector.broadcast %423 : f32 to vector<8x64xf32>
        %425 = arith.select %416, %424, %396 : vector<8x64xi1>, vector<8x64xf32>
        %c243 = arith.constant 243 : index
        %426 = memref.load %arg2[%c243] : memref<256xf32, #tpu.memory_space<smem>>
        %427 = vector.broadcast %426 : f32 to vector<8x64xf32>
        %428 = arith.select %416, %427, %399 : vector<8x64xi1>, vector<8x64xf32>
        %c244 = arith.constant 244 : index
        %429 = memref.load %arg2[%c244] : memref<256xf32, #tpu.memory_space<smem>>
        %430 = vector.broadcast %429 : f32 to vector<8x64xf32>
        %431 = arith.select %416, %430, %402 : vector<8x64xi1>, vector<8x64xf32>
        %c245 = arith.constant 245 : index
        %432 = memref.load %arg2[%c245] : memref<256xf32, #tpu.memory_space<smem>>
        %433 = vector.broadcast %432 : f32 to vector<8x64xf32>
        %434 = arith.select %416, %433, %405 : vector<8x64xi1>, vector<8x64xf32>
        %c246 = arith.constant 246 : index
        %435 = memref.load %arg2[%c246] : memref<256xf32, #tpu.memory_space<smem>>
        %436 = vector.broadcast %435 : f32 to vector<8x64xf32>
        %437 = arith.select %416, %436, %408 : vector<8x64xi1>, vector<8x64xf32>
        %c247 = arith.constant 247 : index
        %438 = memref.load %arg2[%c247] : memref<256xf32, #tpu.memory_space<smem>>
        %439 = vector.broadcast %438 : f32 to vector<8x64xf32>
        %440 = arith.select %416, %439, %411 : vector<8x64xi1>, vector<8x64xf32>
        %c-91_i32_13 = arith.constant -91 : i32
        %441 = vector.broadcast %c-91_i32_13 : i32 to vector<8x64xi32>
        %442 = arith.cmpi sle, %39, %441 : vector<8x64xi32>
        %c248 = arith.constant 248 : index
        %443 = memref.load %arg2[%c248] : memref<256xf32, #tpu.memory_space<smem>>
        %444 = vector.broadcast %443 : f32 to vector<8x64xf32>
        %445 = arith.select %442, %444, %419 : vector<8x64xi1>, vector<8x64xf32>
        %c249 = arith.constant 249 : index
        %446 = memref.load %arg2[%c249] : memref<256xf32, #tpu.memory_space<smem>>
        %447 = vector.broadcast %446 : f32 to vector<8x64xf32>
        %448 = arith.select %442, %447, %422 : vector<8x64xi1>, vector<8x64xf32>
        %c250 = arith.constant 250 : index
        %449 = memref.load %arg2[%c250] : memref<256xf32, #tpu.memory_space<smem>>
        %450 = vector.broadcast %449 : f32 to vector<8x64xf32>
        %451 = arith.select %442, %450, %425 : vector<8x64xi1>, vector<8x64xf32>
        %c251 = arith.constant 251 : index
        %452 = memref.load %arg2[%c251] : memref<256xf32, #tpu.memory_space<smem>>
        %453 = vector.broadcast %452 : f32 to vector<8x64xf32>
        %454 = arith.select %442, %453, %428 : vector<8x64xi1>, vector<8x64xf32>
        %c252 = arith.constant 252 : index
        %455 = memref.load %arg2[%c252] : memref<256xf32, #tpu.memory_space<smem>>
        %456 = vector.broadcast %455 : f32 to vector<8x64xf32>
        %457 = arith.select %442, %456, %431 : vector<8x64xi1>, vector<8x64xf32>
        %c253 = arith.constant 253 : index
        %458 = memref.load %arg2[%c253] : memref<256xf32, #tpu.memory_space<smem>>
        %459 = vector.broadcast %458 : f32 to vector<8x64xf32>
        %460 = arith.select %442, %459, %434 : vector<8x64xi1>, vector<8x64xf32>
        %c254 = arith.constant 254 : index
        %461 = memref.load %arg2[%c254] : memref<256xf32, #tpu.memory_space<smem>>
        %462 = vector.broadcast %461 : f32 to vector<8x64xf32>
        %463 = arith.select %442, %462, %437 : vector<8x64xi1>, vector<8x64xf32>
        %c255 = arith.constant 255 : index
        %464 = memref.load %arg2[%c255] : memref<256xf32, #tpu.memory_space<smem>>
        %465 = vector.broadcast %464 : f32 to vector<8x64xf32>
        %466 = arith.select %442, %465, %440 : vector<8x64xi1>, vector<8x64xf32>
        %c0_14 = arith.constant 0 : index
        %467 = arith.index_cast %36 : i32 to index
        %c0_15 = arith.constant 0 : index
        %468 = vector.load %arg3[%c0_14, %467, %c0_15] : memref<8x32x64xf32, #tpu.memory_space<vmem>>, vector<1x8x64xf32>
        %469 = vector.shape_cast %468 : vector<1x8x64xf32> to vector<8x64xf32>
        %470 = vector.shape_cast %445 : vector<8x64xf32> to vector<1x8x64xf32>
        tpu.vector_store %arg3[%c0_14, %467, %c0_15], %470 {strides = array<i32>} : memref<8x32x64xf32, #tpu.memory_space<vmem>>, vector<1x8x64xf32>,
        %c1_16 = arith.constant 1 : index
        %471 = arith.index_cast %36 : i32 to index
        %c0_17 = arith.constant 0 : index
        %472 = vector.load %arg3[%c1_16, %471, %c0_17] : memref<8x32x64xf32, #tpu.memory_space<vmem>>, vector<1x8x64xf32>
        %473 = vector.shape_cast %472 : vector<1x8x64xf32> to vector<8x64xf32>
        %474 = vector.shape_cast %448 : vector<8x64xf32> to vector<1x8x64xf32>
        tpu.vector_store %arg3[%c1_16, %471, %c0_17], %474 {strides = array<i32>} : memref<8x32x64xf32, #tpu.memory_space<vmem>>, vector<1x8x64xf32>,
        %c2_18 = arith.constant 2 : index
        %475 = arith.index_cast %36 : i32 to index
        %c0_19 = arith.constant 0 : index
        %476 = vector.load %arg3[%c2_18, %475, %c0_19] : memref<8x32x64xf32, #tpu.memory_space<vmem>>, vector<1x8x64xf32>
        %477 = vector.shape_cast %476 : vector<1x8x64xf32> to vector<8x64xf32>
        %478 = vector.shape_cast %451 : vector<8x64xf32> to vector<1x8x64xf32>
        tpu.vector_store %arg3[%c2_18, %475, %c0_19], %478 {strides = array<i32>} : memref<8x32x64xf32, #tpu.memory_space<vmem>>, vector<1x8x64xf32>,
        %c3_20 = arith.constant 3 : index
        %479 = arith.index_cast %36 : i32 to index
        %c0_21 = arith.constant 0 : index
        %480 = vector.load %arg3[%c3_20, %479, %c0_21] : memref<8x32x64xf32, #tpu.memory_space<vmem>>, vector<1x8x64xf32>
        %481 = vector.shape_cast %480 : vector<1x8x64xf32> to vector<8x64xf32>
        %482 = vector.shape_cast %454 : vector<8x64xf32> to vector<1x8x64xf32>
        tpu.vector_store %arg3[%c3_20, %479, %c0_21], %482 {strides = array<i32>} : memref<8x32x64xf32, #tpu.memory_space<vmem>>, vector<1x8x64xf32>,
        %c4_22 = arith.constant 4 : index
        %483 = arith.index_cast %36 : i32 to index
        %c0_23 = arith.constant 0 : index
        %484 = vector.load %arg3[%c4_22, %483, %c0_23] : memref<8x32x64xf32, #tpu.memory_space<vmem>>, vector<1x8x64xf32>
        %485 = vector.shape_cast %484 : vector<1x8x64xf32> to vector<8x64xf32>
        %486 = vector.shape_cast %457 : vector<8x64xf32> to vector<1x8x64xf32>
        tpu.vector_store %arg3[%c4_22, %483, %c0_23], %486 {strides = array<i32>} : memref<8x32x64xf32, #tpu.memory_space<vmem>>, vector<1x8x64xf32>,
        %c5_24 = arith.constant 5 : index
        %487 = arith.index_cast %36 : i32 to index
        %c0_25 = arith.constant 0 : index
        %488 = vector.load %arg3[%c5_24, %487, %c0_25] : memref<8x32x64xf32, #tpu.memory_space<vmem>>, vector<1x8x64xf32>
        %489 = vector.shape_cast %488 : vector<1x8x64xf32> to vector<8x64xf32>
        %490 = vector.shape_cast %460 : vector<8x64xf32> to vector<1x8x64xf32>
        tpu.vector_store %arg3[%c5_24, %487, %c0_25], %490 {strides = array<i32>} : memref<8x32x64xf32, #tpu.memory_space<vmem>>, vector<1x8x64xf32>,
        %c6_26 = arith.constant 6 : index
        %491 = arith.index_cast %36 : i32 to index
        %c0_27 = arith.constant 0 : index
        %492 = vector.load %arg3[%c6_26, %491, %c0_27] : memref<8x32x64xf32, #tpu.memory_space<vmem>>, vector<1x8x64xf32>
        %493 = vector.shape_cast %492 : vector<1x8x64xf32> to vector<8x64xf32>
        %494 = vector.shape_cast %463 : vector<8x64xf32> to vector<1x8x64xf32>
        tpu.vector_store %arg3[%c6_26, %491, %c0_27], %494 {strides = array<i32>} : memref<8x32x64xf32, #tpu.memory_space<vmem>>, vector<1x8x64xf32>,
        %c7_28 = arith.constant 7 : index
        %495 = arith.index_cast %36 : i32 to index
        %c0_29 = arith.constant 0 : index
        %496 = vector.load %arg3[%c7_28, %495, %c0_29] : memref<8x32x64xf32, #tpu.memory_space<vmem>>, vector<1x8x64xf32>
        %497 = vector.shape_cast %496 : vector<1x8x64xf32> to vector<8x64xf32>
        %498 = vector.shape_cast %466 : vector<8x64xf32> to vector<1x8x64xf32>
        tpu.vector_store %arg3[%c7_28, %495, %c0_29], %498 {strides = array<i32>} : memref<8x32x64xf32, #tpu.memory_space<vmem>>, vector<1x8x64xf32>,
      }
      %c4_i32_10 = arith.constant 4 : i32
    } else {
    }
    %c0_i32_6 = arith.constant 0 : i32
    %23 = arith.cmpi slt, %3, %c0_i32_6 : i32
    %c0_i32_7 = arith.constant 0 : i32
    %24 = arith.cmpi sgt, %4, %c0_i32_7 : i32
    %25 = arith.andi %23, %24 : i1
    %26 = arith.andi %12, %25 : i1
    %27 = arith.extui %26 : i1 to i32
    %c0_i32_8 = arith.constant 0 : i32
    %28 = arith.cmpi ne, %27, %c0_i32_8 : i32
    scf.if %28 {
      %29 = tpu.iota {dimensions = array<i32: 0>} : vector<8x64xi32>
      %30 = tpu.iota {dimensions = array<i32: 1>} : vector<8x64xi32>
      %31 = arith.subi %29, %30 : vector<8x64xi32>
      %c0_i32_9 = arith.constant 0 : i32
      %c4_i32 = arith.constant 4 : i32
      %32 = arith.addi %c0_i32_9, %c4_i32 : i32
      %c1_i32 = arith.constant 1 : i32
      scf.for %arg4 = %c0_i32_9 to %32 step %c1_i32  : i32 {
        %c1_i32_11 = arith.constant 1 : i32
        %33 = arith.muli %arg4, %c1_i32_11 : i32
        %c0_i32_12 = arith.constant 0 : i32
        %34 = arith.addi %c0_i32_12, %33 : i32
        %c8_i32 = arith.constant 8 : i32
        %35 = arith.muli %34, %c8_i32 : i32
        %36 = tpu.assume_multiple %35, 8 : i32
        %37 = arith.addi %2, %36 : i32
        %38 = vector.broadcast %37 : i32 to vector<8x64xi32>
        %39 = arith.addi %31, %38 : vector<8x64xi32>
        %c0 = arith.constant 0 : index
        %40 = memref.load %arg2[%c0] : memref<256xf32, #tpu.memory_space<smem>>
        %41 = vector.broadcast %40 : f32 to vector<8x64xf32>
        %c1 = arith.constant 1 : index
        %42 = memref.load %arg2[%c1] : memref<256xf32, #tpu.memory_space<smem>>
        %43 = vector.broadcast %42 : f32 to vector<8x64xf32>
        %c2 = arith.constant 2 : index
        %44 = memref.load %arg2[%c2] : memref<256xf32, #tpu.memory_space<smem>>
        %45 = vector.broadcast %44 : f32 to vector<8x64xf32>
        %c3 = arith.constant 3 : index
        %46 = memref.load %arg2[%c3] : memref<256xf32, #tpu.memory_space<smem>>
        %47 = vector.broadcast %46 : f32 to vector<8x64xf32>
        %c4 = arith.constant 4 : index
        %48 = memref.load %arg2[%c4] : memref<256xf32, #tpu.memory_space<smem>>
        %49 = vector.broadcast %48 : f32 to vector<8x64xf32>
        %c5 = arith.constant 5 : index
        %50 = memref.load %arg2[%c5] : memref<256xf32, #tpu.memory_space<smem>>
        %51 = vector.broadcast %50 : f32 to vector<8x64xf32>
        %c6 = arith.constant 6 : index
        %52 = memref.load %arg2[%c6] : memref<256xf32, #tpu.memory_space<smem>>
        %53 = vector.broadcast %52 : f32 to vector<8x64xf32>
        %c7 = arith.constant 7 : index
        %54 = memref.load %arg2[%c7] : memref<256xf32, #tpu.memory_space<smem>>
        %55 = vector.broadcast %54 : f32 to vector<8x64xf32>
        %c1_i32_13 = arith.constant 1 : i32
        %56 = vector.broadcast %c1_i32_13 : i32 to vector<8x64xi32>
        %57 = arith.cmpi eq, %39, %56 : vector<8x64xi32>
        %c8 = arith.constant 8 : index
        %58 = memref.load %arg2[%c8] : memref<256xf32, #tpu.memory_space<smem>>
        %59 = vector.broadcast %58 : f32 to vector<8x64xf32>
        %60 = arith.select %57, %59, %41 : vector<8x64xi1>, vector<8x64xf32>
        %c9 = arith.constant 9 : index
        %61 = memref.load %arg2[%c9] : memref<256xf32, #tpu.memory_space<smem>>
        %62 = vector.broadcast %61 : f32 to vector<8x64xf32>
        %63 = arith.select %57, %62, %43 : vector<8x64xi1>, vector<8x64xf32>
        %c10 = arith.constant 10 : index
        %64 = memref.load %arg2[%c10] : memref<256xf32, #tpu.memory_space<smem>>
        %65 = vector.broadcast %64 : f32 to vector<8x64xf32>
        %66 = arith.select %57, %65, %45 : vector<8x64xi1>, vector<8x64xf32>
        %c11 = arith.constant 11 : index
        %67 = memref.load %arg2[%c11] : memref<256xf32, #tpu.memory_space<smem>>
        %68 = vector.broadcast %67 : f32 to vector<8x64xf32>
        %69 = arith.select %57, %68, %47 : vector<8x64xi1>, vector<8x64xf32>
        %c12 = arith.constant 12 : index
        %70 = memref.load %arg2[%c12] : memref<256xf32, #tpu.memory_space<smem>>
        %71 = vector.broadcast %70 : f32 to vector<8x64xf32>
        %72 = arith.select %57, %71, %49 : vector<8x64xi1>, vector<8x64xf32>
        %c13 = arith.constant 13 : index
        %73 = memref.load %arg2[%c13] : memref<256xf32, #tpu.memory_space<smem>>
        %74 = vector.broadcast %73 : f32 to vector<8x64xf32>
        %75 = arith.select %57, %74, %51 : vector<8x64xi1>, vector<8x64xf32>
        %c14 = arith.constant 14 : index
        %76 = memref.load %arg2[%c14] : memref<256xf32, #tpu.memory_space<smem>>
        %77 = vector.broadcast %76 : f32 to vector<8x64xf32>
        %78 = arith.select %57, %77, %53 : vector<8x64xi1>, vector<8x64xf32>
        %c15 = arith.constant 15 : index
        %79 = memref.load %arg2[%c15] : memref<256xf32, #tpu.memory_space<smem>>
        %80 = vector.broadcast %79 : f32 to vector<8x64xf32>
        %81 = arith.select %57, %80, %55 : vector<8x64xi1>, vector<8x64xf32>
        %c2_i32 = arith.constant 2 : i32
        %82 = vector.broadcast %c2_i32 : i32 to vector<8x64xi32>
        %83 = arith.cmpi eq, %39, %82 : vector<8x64xi32>
        %c16 = arith.constant 16 : index
        %84 = memref.load %arg2[%c16] : memref<256xf32, #tpu.memory_space<smem>>
        %85 = vector.broadcast %84 : f32 to vector<8x64xf32>
        %86 = arith.select %83, %85, %60 : vector<8x64xi1>, vector<8x64xf32>
        %c17 = arith.constant 17 : index
        %87 = memref.load %arg2[%c17] : memref<256xf32, #tpu.memory_space<smem>>
        %88 = vector.broadcast %87 : f32 to vector<8x64xf32>
        %89 = arith.select %83, %88, %63 : vector<8x64xi1>, vector<8x64xf32>
        %c18 = arith.constant 18 : index
        %90 = memref.load %arg2[%c18] : memref<256xf32, #tpu.memory_space<smem>>
        %91 = vector.broadcast %90 : f32 to vector<8x64xf32>
        %92 = arith.select %83, %91, %66 : vector<8x64xi1>, vector<8x64xf32>
        %c19 = arith.constant 19 : index
        %93 = memref.load %arg2[%c19] : memref<256xf32, #tpu.memory_space<smem>>
        %94 = vector.broadcast %93 : f32 to vector<8x64xf32>
        %95 = arith.select %83, %94, %69 : vector<8x64xi1>, vector<8x64xf32>
        %c20 = arith.constant 20 : index
        %96 = memref.load %arg2[%c20] : memref<256xf32, #tpu.memory_space<smem>>
        %97 = vector.broadcast %96 : f32 to vector<8x64xf32>
        %98 = arith.select %83, %97, %72 : vector<8x64xi1>, vector<8x64xf32>
        %c21 = arith.constant 21 : index
        %99 = memref.load %arg2[%c21] : memref<256xf32, #tpu.memory_space<smem>>
        %100 = vector.broadcast %99 : f32 to vector<8x64xf32>
        %101 = arith.select %83, %100, %75 : vector<8x64xi1>, vector<8x64xf32>
        %c22 = arith.constant 22 : index
        %102 = memref.load %arg2[%c22] : memref<256xf32, #tpu.memory_space<smem>>
        %103 = vector.broadcast %102 : f32 to vector<8x64xf32>
        %104 = arith.select %83, %103, %78 : vector<8x64xi1>, vector<8x64xf32>
        %c23 = arith.constant 23 : index
        %105 = memref.load %arg2[%c23] : memref<256xf32, #tpu.memory_space<smem>>
        %106 = vector.broadcast %105 : f32 to vector<8x64xf32>
        %107 = arith.select %83, %106, %81 : vector<8x64xi1>, vector<8x64xf32>
        %c3_i32 = arith.constant 3 : i32
        %108 = vector.broadcast %c3_i32 : i32 to vector<8x64xi32>
        %109 = arith.cmpi eq, %39, %108 : vector<8x64xi32>
        %c24 = arith.constant 24 : index
        %110 = memref.load %arg2[%c24] : memref<256xf32, #tpu.memory_space<smem>>
        %111 = vector.broadcast %110 : f32 to vector<8x64xf32>
        %112 = arith.select %109, %111, %86 : vector<8x64xi1>, vector<8x64xf32>
        %c25 = arith.constant 25 : index
        %113 = memref.load %arg2[%c25] : memref<256xf32, #tpu.memory_space<smem>>
        %114 = vector.broadcast %113 : f32 to vector<8x64xf32>
        %115 = arith.select %109, %114, %89 : vector<8x64xi1>, vector<8x64xf32>
        %c26 = arith.constant 26 : index
        %116 = memref.load %arg2[%c26] : memref<256xf32, #tpu.memory_space<smem>>
        %117 = vector.broadcast %116 : f32 to vector<8x64xf32>
        %118 = arith.select %109, %117, %92 : vector<8x64xi1>, vector<8x64xf32>
        %c27 = arith.constant 27 : index
        %119 = memref.load %arg2[%c27] : memref<256xf32, #tpu.memory_space<smem>>
        %120 = vector.broadcast %119 : f32 to vector<8x64xf32>
        %121 = arith.select %109, %120, %95 : vector<8x64xi1>, vector<8x64xf32>
        %c28 = arith.constant 28 : index
        %122 = memref.load %arg2[%c28] : memref<256xf32, #tpu.memory_space<smem>>
        %123 = vector.broadcast %122 : f32 to vector<8x64xf32>
        %124 = arith.select %109, %123, %98 : vector<8x64xi1>, vector<8x64xf32>
        %c29 = arith.constant 29 : index
        %125 = memref.load %arg2[%c29] : memref<256xf32, #tpu.memory_space<smem>>
        %126 = vector.broadcast %125 : f32 to vector<8x64xf32>
        %127 = arith.select %109, %126, %101 : vector<8x64xi1>, vector<8x64xf32>
        %c30 = arith.constant 30 : index
        %128 = memref.load %arg2[%c30] : memref<256xf32, #tpu.memory_space<smem>>
        %129 = vector.broadcast %128 : f32 to vector<8x64xf32>
        %130 = arith.select %109, %129, %104 : vector<8x64xi1>, vector<8x64xf32>
        %c31 = arith.constant 31 : index
        %131 = memref.load %arg2[%c31] : memref<256xf32, #tpu.memory_space<smem>>
        %132 = vector.broadcast %131 : f32 to vector<8x64xf32>
        %133 = arith.select %109, %132, %107 : vector<8x64xi1>, vector<8x64xf32>
        %c4_i32_14 = arith.constant 4 : i32
        %134 = vector.broadcast %c4_i32_14 : i32 to vector<8x64xi32>
        %135 = arith.cmpi eq, %39, %134 : vector<8x64xi32>
        %c32 = arith.constant 32 : index
        %136 = memref.load %arg2[%c32] : memref<256xf32, #tpu.memory_space<smem>>
        %137 = vector.broadcast %136 : f32 to vector<8x64xf32>
        %138 = arith.select %135, %137, %112 : vector<8x64xi1>, vector<8x64xf32>
        %c33 = arith.constant 33 : index
        %139 = memref.load %arg2[%c33] : memref<256xf32, #tpu.memory_space<smem>>
        %140 = vector.broadcast %139 : f32 to vector<8x64xf32>
        %141 = arith.select %135, %140, %115 : vector<8x64xi1>, vector<8x64xf32>
        %c34 = arith.constant 34 : index
        %142 = memref.load %arg2[%c34] : memref<256xf32, #tpu.memory_space<smem>>
        %143 = vector.broadcast %142 : f32 to vector<8x64xf32>
        %144 = arith.select %135, %143, %118 : vector<8x64xi1>, vector<8x64xf32>
        %c35 = arith.constant 35 : index
        %145 = memref.load %arg2[%c35] : memref<256xf32, #tpu.memory_space<smem>>
        %146 = vector.broadcast %145 : f32 to vector<8x64xf32>
        %147 = arith.select %135, %146, %121 : vector<8x64xi1>, vector<8x64xf32>
        %c36 = arith.constant 36 : index
        %148 = memref.load %arg2[%c36] : memref<256xf32, #tpu.memory_space<smem>>
        %149 = vector.broadcast %148 : f32 to vector<8x64xf32>
        %150 = arith.select %135, %149, %124 : vector<8x64xi1>, vector<8x64xf32>
        %c37 = arith.constant 37 : index
        %151 = memref.load %arg2[%c37] : memref<256xf32, #tpu.memory_space<smem>>
        %152 = vector.broadcast %151 : f32 to vector<8x64xf32>
        %153 = arith.select %135, %152, %127 : vector<8x64xi1>, vector<8x64xf32>
        %c38 = arith.constant 38 : index
        %154 = memref.load %arg2[%c38] : memref<256xf32, #tpu.memory_space<smem>>
        %155 = vector.broadcast %154 : f32 to vector<8x64xf32>
        %156 = arith.select %135, %155, %130 : vector<8x64xi1>, vector<8x64xf32>
        %c39 = arith.constant 39 : index
        %157 = memref.load %arg2[%c39] : memref<256xf32, #tpu.memory_space<smem>>
        %158 = vector.broadcast %157 : f32 to vector<8x64xf32>
        %159 = arith.select %135, %158, %133 : vector<8x64xi1>, vector<8x64xf32>
        %c5_i32 = arith.constant 5 : i32
        %160 = vector.broadcast %c5_i32 : i32 to vector<8x64xi32>
        %161 = arith.cmpi eq, %39, %160 : vector<8x64xi32>
        %c40 = arith.constant 40 : index
        %162 = memref.load %arg2[%c40] : memref<256xf32, #tpu.memory_space<smem>>
        %163 = vector.broadcast %162 : f32 to vector<8x64xf32>
        %164 = arith.select %161, %163, %138 : vector<8x64xi1>, vector<8x64xf32>
        %c41 = arith.constant 41 : index
        %165 = memref.load %arg2[%c41] : memref<256xf32, #tpu.memory_space<smem>>
        %166 = vector.broadcast %165 : f32 to vector<8x64xf32>
        %167 = arith.select %161, %166, %141 : vector<8x64xi1>, vector<8x64xf32>
        %c42 = arith.constant 42 : index
        %168 = memref.load %arg2[%c42] : memref<256xf32, #tpu.memory_space<smem>>
        %169 = vector.broadcast %168 : f32 to vector<8x64xf32>
        %170 = arith.select %161, %169, %144 : vector<8x64xi1>, vector<8x64xf32>
        %c43 = arith.constant 43 : index
        %171 = memref.load %arg2[%c43] : memref<256xf32, #tpu.memory_space<smem>>
        %172 = vector.broadcast %171 : f32 to vector<8x64xf32>
        %173 = arith.select %161, %172, %147 : vector<8x64xi1>, vector<8x64xf32>
        %c44 = arith.constant 44 : index
        %174 = memref.load %arg2[%c44] : memref<256xf32, #tpu.memory_space<smem>>
        %175 = vector.broadcast %174 : f32 to vector<8x64xf32>
        %176 = arith.select %161, %175, %150 : vector<8x64xi1>, vector<8x64xf32>
        %c45 = arith.constant 45 : index
        %177 = memref.load %arg2[%c45] : memref<256xf32, #tpu.memory_space<smem>>
        %178 = vector.broadcast %177 : f32 to vector<8x64xf32>
        %179 = arith.select %161, %178, %153 : vector<8x64xi1>, vector<8x64xf32>
        %c46 = arith.constant 46 : index
        %180 = memref.load %arg2[%c46] : memref<256xf32, #tpu.memory_space<smem>>
        %181 = vector.broadcast %180 : f32 to vector<8x64xf32>
        %182 = arith.select %161, %181, %156 : vector<8x64xi1>, vector<8x64xf32>
        %c47 = arith.constant 47 : index
        %183 = memref.load %arg2[%c47] : memref<256xf32, #tpu.memory_space<smem>>
        %184 = vector.broadcast %183 : f32 to vector<8x64xf32>
        %185 = arith.select %161, %184, %159 : vector<8x64xi1>, vector<8x64xf32>
        %c6_i32 = arith.constant 6 : i32
        %186 = vector.broadcast %c6_i32 : i32 to vector<8x64xi32>
        %187 = arith.cmpi eq, %39, %186 : vector<8x64xi32>
        %c48 = arith.constant 48 : index
        %188 = memref.load %arg2[%c48] : memref<256xf32, #tpu.memory_space<smem>>
        %189 = vector.broadcast %188 : f32 to vector<8x64xf32>
        %190 = arith.select %187, %189, %164 : vector<8x64xi1>, vector<8x64xf32>
        %c49 = arith.constant 49 : index
        %191 = memref.load %arg2[%c49] : memref<256xf32, #tpu.memory_space<smem>>
        %192 = vector.broadcast %191 : f32 to vector<8x64xf32>
        %193 = arith.select %187, %192, %167 : vector<8x64xi1>, vector<8x64xf32>
        %c50 = arith.constant 50 : index
        %194 = memref.load %arg2[%c50] : memref<256xf32, #tpu.memory_space<smem>>
        %195 = vector.broadcast %194 : f32 to vector<8x64xf32>
        %196 = arith.select %187, %195, %170 : vector<8x64xi1>, vector<8x64xf32>
        %c51 = arith.constant 51 : index
        %197 = memref.load %arg2[%c51] : memref<256xf32, #tpu.memory_space<smem>>
        %198 = vector.broadcast %197 : f32 to vector<8x64xf32>
        %199 = arith.select %187, %198, %173 : vector<8x64xi1>, vector<8x64xf32>
        %c52 = arith.constant 52 : index
        %200 = memref.load %arg2[%c52] : memref<256xf32, #tpu.memory_space<smem>>
        %201 = vector.broadcast %200 : f32 to vector<8x64xf32>
        %202 = arith.select %187, %201, %176 : vector<8x64xi1>, vector<8x64xf32>
        %c53 = arith.constant 53 : index
        %203 = memref.load %arg2[%c53] : memref<256xf32, #tpu.memory_space<smem>>
        %204 = vector.broadcast %203 : f32 to vector<8x64xf32>
        %205 = arith.select %187, %204, %179 : vector<8x64xi1>, vector<8x64xf32>
        %c54 = arith.constant 54 : index
        %206 = memref.load %arg2[%c54] : memref<256xf32, #tpu.memory_space<smem>>
        %207 = vector.broadcast %206 : f32 to vector<8x64xf32>
        %208 = arith.select %187, %207, %182 : vector<8x64xi1>, vector<8x64xf32>
        %c55 = arith.constant 55 : index
        %209 = memref.load %arg2[%c55] : memref<256xf32, #tpu.memory_space<smem>>
        %210 = vector.broadcast %209 : f32 to vector<8x64xf32>
        %211 = arith.select %187, %210, %185 : vector<8x64xi1>, vector<8x64xf32>
        %c7_i32 = arith.constant 7 : i32
        %212 = vector.broadcast %c7_i32 : i32 to vector<8x64xi32>
        %213 = arith.cmpi eq, %39, %212 : vector<8x64xi32>
        %c56 = arith.constant 56 : index
        %214 = memref.load %arg2[%c56] : memref<256xf32, #tpu.memory_space<smem>>
        %215 = vector.broadcast %214 : f32 to vector<8x64xf32>
        %216 = arith.select %213, %215, %190 : vector<8x64xi1>, vector<8x64xf32>
        %c57 = arith.constant 57 : index
        %217 = memref.load %arg2[%c57] : memref<256xf32, #tpu.memory_space<smem>>
        %218 = vector.broadcast %217 : f32 to vector<8x64xf32>
        %219 = arith.select %213, %218, %193 : vector<8x64xi1>, vector<8x64xf32>
        %c58 = arith.constant 58 : index
        %220 = memref.load %arg2[%c58] : memref<256xf32, #tpu.memory_space<smem>>
        %221 = vector.broadcast %220 : f32 to vector<8x64xf32>
        %222 = arith.select %213, %221, %196 : vector<8x64xi1>, vector<8x64xf32>
        %c59 = arith.constant 59 : index
        %223 = memref.load %arg2[%c59] : memref<256xf32, #tpu.memory_space<smem>>
        %224 = vector.broadcast %223 : f32 to vector<8x64xf32>
        %225 = arith.select %213, %224, %199 : vector<8x64xi1>, vector<8x64xf32>
        %c60 = arith.constant 60 : index
        %226 = memref.load %arg2[%c60] : memref<256xf32, #tpu.memory_space<smem>>
        %227 = vector.broadcast %226 : f32 to vector<8x64xf32>
        %228 = arith.select %213, %227, %202 : vector<8x64xi1>, vector<8x64xf32>
        %c61 = arith.constant 61 : index
        %229 = memref.load %arg2[%c61] : memref<256xf32, #tpu.memory_space<smem>>
        %230 = vector.broadcast %229 : f32 to vector<8x64xf32>
        %231 = arith.select %213, %230, %205 : vector<8x64xi1>, vector<8x64xf32>
        %c62 = arith.constant 62 : index
        %232 = memref.load %arg2[%c62] : memref<256xf32, #tpu.memory_space<smem>>
        %233 = vector.broadcast %232 : f32 to vector<8x64xf32>
        %234 = arith.select %213, %233, %208 : vector<8x64xi1>, vector<8x64xf32>
        %c63 = arith.constant 63 : index
        %235 = memref.load %arg2[%c63] : memref<256xf32, #tpu.memory_space<smem>>
        %236 = vector.broadcast %235 : f32 to vector<8x64xf32>
        %237 = arith.select %213, %236, %211 : vector<8x64xi1>, vector<8x64xf32>
        %c8_i32_15 = arith.constant 8 : i32
        %238 = vector.broadcast %c8_i32_15 : i32 to vector<8x64xi32>
        %239 = arith.cmpi sge, %39, %238 : vector<8x64xi32>
        %c11_i32 = arith.constant 11 : i32
        %240 = vector.broadcast %c11_i32 : i32 to vector<8x64xi32>
        %241 = arith.cmpi sle, %39, %240 : vector<8x64xi32>
        %242 = arith.andi %239, %241 : vector<8x64xi1>
        %c64 = arith.constant 64 : index
        %243 = memref.load %arg2[%c64] : memref<256xf32, #tpu.memory_space<smem>>
        %244 = vector.broadcast %243 : f32 to vector<8x64xf32>
        %245 = arith.select %242, %244, %216 : vector<8x64xi1>, vector<8x64xf32>
        %c65 = arith.constant 65 : index
        %246 = memref.load %arg2[%c65] : memref<256xf32, #tpu.memory_space<smem>>
        %247 = vector.broadcast %246 : f32 to vector<8x64xf32>
        %248 = arith.select %242, %247, %219 : vector<8x64xi1>, vector<8x64xf32>
        %c66 = arith.constant 66 : index
        %249 = memref.load %arg2[%c66] : memref<256xf32, #tpu.memory_space<smem>>
        %250 = vector.broadcast %249 : f32 to vector<8x64xf32>
        %251 = arith.select %242, %250, %222 : vector<8x64xi1>, vector<8x64xf32>
        %c67 = arith.constant 67 : index
        %252 = memref.load %arg2[%c67] : memref<256xf32, #tpu.memory_space<smem>>
        %253 = vector.broadcast %252 : f32 to vector<8x64xf32>
        %254 = arith.select %242, %253, %225 : vector<8x64xi1>, vector<8x64xf32>
        %c68 = arith.constant 68 : index
        %255 = memref.load %arg2[%c68] : memref<256xf32, #tpu.memory_space<smem>>
        %256 = vector.broadcast %255 : f32 to vector<8x64xf32>
        %257 = arith.select %242, %256, %228 : vector<8x64xi1>, vector<8x64xf32>
        %c69 = arith.constant 69 : index
        %258 = memref.load %arg2[%c69] : memref<256xf32, #tpu.memory_space<smem>>
        %259 = vector.broadcast %258 : f32 to vector<8x64xf32>
        %260 = arith.select %242, %259, %231 : vector<8x64xi1>, vector<8x64xf32>
        %c70 = arith.constant 70 : index
        %261 = memref.load %arg2[%c70] : memref<256xf32, #tpu.memory_space<smem>>
        %262 = vector.broadcast %261 : f32 to vector<8x64xf32>
        %263 = arith.select %242, %262, %234 : vector<8x64xi1>, vector<8x64xf32>
        %c71 = arith.constant 71 : index
        %264 = memref.load %arg2[%c71] : memref<256xf32, #tpu.memory_space<smem>>
        %265 = vector.broadcast %264 : f32 to vector<8x64xf32>
        %266 = arith.select %242, %265, %237 : vector<8x64xi1>, vector<8x64xf32>
        %c12_i32 = arith.constant 12 : i32
        %267 = vector.broadcast %c12_i32 : i32 to vector<8x64xi32>
        %268 = arith.cmpi sge, %39, %267 : vector<8x64xi32>
        %c15_i32 = arith.constant 15 : i32
        %269 = vector.broadcast %c15_i32 : i32 to vector<8x64xi32>
        %270 = arith.cmpi sle, %39, %269 : vector<8x64xi32>
        %271 = arith.andi %268, %270 : vector<8x64xi1>
        %c72 = arith.constant 72 : index
        %272 = memref.load %arg2[%c72] : memref<256xf32, #tpu.memory_space<smem>>
        %273 = vector.broadcast %272 : f32 to vector<8x64xf32>
        %274 = arith.select %271, %273, %245 : vector<8x64xi1>, vector<8x64xf32>
        %c73 = arith.constant 73 : index
        %275 = memref.load %arg2[%c73] : memref<256xf32, #tpu.memory_space<smem>>
        %276 = vector.broadcast %275 : f32 to vector<8x64xf32>
        %277 = arith.select %271, %276, %248 : vector<8x64xi1>, vector<8x64xf32>
        %c74 = arith.constant 74 : index
        %278 = memref.load %arg2[%c74] : memref<256xf32, #tpu.memory_space<smem>>
        %279 = vector.broadcast %278 : f32 to vector<8x64xf32>
        %280 = arith.select %271, %279, %251 : vector<8x64xi1>, vector<8x64xf32>
        %c75 = arith.constant 75 : index
        %281 = memref.load %arg2[%c75] : memref<256xf32, #tpu.memory_space<smem>>
        %282 = vector.broadcast %281 : f32 to vector<8x64xf32>
        %283 = arith.select %271, %282, %254 : vector<8x64xi1>, vector<8x64xf32>
        %c76 = arith.constant 76 : index
        %284 = memref.load %arg2[%c76] : memref<256xf32, #tpu.memory_space<smem>>
        %285 = vector.broadcast %284 : f32 to vector<8x64xf32>
        %286 = arith.select %271, %285, %257 : vector<8x64xi1>, vector<8x64xf32>
        %c77 = arith.constant 77 : index
        %287 = memref.load %arg2[%c77] : memref<256xf32, #tpu.memory_space<smem>>
        %288 = vector.broadcast %287 : f32 to vector<8x64xf32>
        %289 = arith.select %271, %288, %260 : vector<8x64xi1>, vector<8x64xf32>
        %c78 = arith.constant 78 : index
        %290 = memref.load %arg2[%c78] : memref<256xf32, #tpu.memory_space<smem>>
        %291 = vector.broadcast %290 : f32 to vector<8x64xf32>
        %292 = arith.select %271, %291, %263 : vector<8x64xi1>, vector<8x64xf32>
        %c79 = arith.constant 79 : index
        %293 = memref.load %arg2[%c79] : memref<256xf32, #tpu.memory_space<smem>>
        %294 = vector.broadcast %293 : f32 to vector<8x64xf32>
        %295 = arith.select %271, %294, %266 : vector<8x64xi1>, vector<8x64xf32>
        %c16_i32 = arith.constant 16 : i32
        %296 = vector.broadcast %c16_i32 : i32 to vector<8x64xi32>
        %297 = arith.cmpi sge, %39, %296 : vector<8x64xi32>
        %c22_i32 = arith.constant 22 : i32
        %298 = vector.broadcast %c22_i32 : i32 to vector<8x64xi32>
        %299 = arith.cmpi sle, %39, %298 : vector<8x64xi32>
        %300 = arith.andi %297, %299 : vector<8x64xi1>
        %c80 = arith.constant 80 : index
        %301 = memref.load %arg2[%c80] : memref<256xf32, #tpu.memory_space<smem>>
        %302 = vector.broadcast %301 : f32 to vector<8x64xf32>
        %303 = arith.select %300, %302, %274 : vector<8x64xi1>, vector<8x64xf32>
        %c81 = arith.constant 81 : index
        %304 = memref.load %arg2[%c81] : memref<256xf32, #tpu.memory_space<smem>>
        %305 = vector.broadcast %304 : f32 to vector<8x64xf32>
        %306 = arith.select %300, %305, %277 : vector<8x64xi1>, vector<8x64xf32>
        %c82 = arith.constant 82 : index
        %307 = memref.load %arg2[%c82] : memref<256xf32, #tpu.memory_space<smem>>
        %308 = vector.broadcast %307 : f32 to vector<8x64xf32>
        %309 = arith.select %300, %308, %280 : vector<8x64xi1>, vector<8x64xf32>
        %c83 = arith.constant 83 : index
        %310 = memref.load %arg2[%c83] : memref<256xf32, #tpu.memory_space<smem>>
        %311 = vector.broadcast %310 : f32 to vector<8x64xf32>
        %312 = arith.select %300, %311, %283 : vector<8x64xi1>, vector<8x64xf32>
        %c84 = arith.constant 84 : index
        %313 = memref.load %arg2[%c84] : memref<256xf32, #tpu.memory_space<smem>>
        %314 = vector.broadcast %313 : f32 to vector<8x64xf32>
        %315 = arith.select %300, %314, %286 : vector<8x64xi1>, vector<8x64xf32>
        %c85 = arith.constant 85 : index
        %316 = memref.load %arg2[%c85] : memref<256xf32, #tpu.memory_space<smem>>
        %317 = vector.broadcast %316 : f32 to vector<8x64xf32>
        %318 = arith.select %300, %317, %289 : vector<8x64xi1>, vector<8x64xf32>
        %c86 = arith.constant 86 : index
        %319 = memref.load %arg2[%c86] : memref<256xf32, #tpu.memory_space<smem>>
        %320 = vector.broadcast %319 : f32 to vector<8x64xf32>
        %321 = arith.select %300, %320, %292 : vector<8x64xi1>, vector<8x64xf32>
        %c87 = arith.constant 87 : index
        %322 = memref.load %arg2[%c87] : memref<256xf32, #tpu.memory_space<smem>>
        %323 = vector.broadcast %322 : f32 to vector<8x64xf32>
        %324 = arith.select %300, %323, %295 : vector<8x64xi1>, vector<8x64xf32>
        %c23_i32 = arith.constant 23 : i32
        %325 = vector.broadcast %c23_i32 : i32 to vector<8x64xi32>
        %326 = arith.cmpi sge, %39, %325 : vector<8x64xi32>
        %c31_i32_16 = arith.constant 31 : i32
        %327 = vector.broadcast %c31_i32_16 : i32 to vector<8x64xi32>
        %328 = arith.cmpi sle, %39, %327 : vector<8x64xi32>
        %329 = arith.andi %326, %328 : vector<8x64xi1>
        %c88 = arith.constant 88 : index
        %330 = memref.load %arg2[%c88] : memref<256xf32, #tpu.memory_space<smem>>
        %331 = vector.broadcast %330 : f32 to vector<8x64xf32>
        %332 = arith.select %329, %331, %303 : vector<8x64xi1>, vector<8x64xf32>
        %c89 = arith.constant 89 : index
        %333 = memref.load %arg2[%c89] : memref<256xf32, #tpu.memory_space<smem>>
        %334 = vector.broadcast %333 : f32 to vector<8x64xf32>
        %335 = arith.select %329, %334, %306 : vector<8x64xi1>, vector<8x64xf32>
        %c90 = arith.constant 90 : index
        %336 = memref.load %arg2[%c90] : memref<256xf32, #tpu.memory_space<smem>>
        %337 = vector.broadcast %336 : f32 to vector<8x64xf32>
        %338 = arith.select %329, %337, %309 : vector<8x64xi1>, vector<8x64xf32>
        %c91 = arith.constant 91 : index
        %339 = memref.load %arg2[%c91] : memref<256xf32, #tpu.memory_space<smem>>
        %340 = vector.broadcast %339 : f32 to vector<8x64xf32>
        %341 = arith.select %329, %340, %312 : vector<8x64xi1>, vector<8x64xf32>
        %c92 = arith.constant 92 : index
        %342 = memref.load %arg2[%c92] : memref<256xf32, #tpu.memory_space<smem>>
        %343 = vector.broadcast %342 : f32 to vector<8x64xf32>
        %344 = arith.select %329, %343, %315 : vector<8x64xi1>, vector<8x64xf32>
        %c93 = arith.constant 93 : index
        %345 = memref.load %arg2[%c93] : memref<256xf32, #tpu.memory_space<smem>>
        %346 = vector.broadcast %345 : f32 to vector<8x64xf32>
        %347 = arith.select %329, %346, %318 : vector<8x64xi1>, vector<8x64xf32>
        %c94 = arith.constant 94 : index
        %348 = memref.load %arg2[%c94] : memref<256xf32, #tpu.memory_space<smem>>
        %349 = vector.broadcast %348 : f32 to vector<8x64xf32>
        %350 = arith.select %329, %349, %321 : vector<8x64xi1>, vector<8x64xf32>
        %c95 = arith.constant 95 : index
        %351 = memref.load %arg2[%c95] : memref<256xf32, #tpu.memory_space<smem>>
        %352 = vector.broadcast %351 : f32 to vector<8x64xf32>
        %353 = arith.select %329, %352, %324 : vector<8x64xi1>, vector<8x64xf32>
        %c32_i32_17 = arith.constant 32 : i32
        %354 = vector.broadcast %c32_i32_17 : i32 to vector<8x64xi32>
        %355 = arith.cmpi sge, %39, %354 : vector<8x64xi32>
        %c45_i32 = arith.constant 45 : i32
        %356 = vector.broadcast %c45_i32 : i32 to vector<8x64xi32>
        %357 = arith.cmpi sle, %39, %356 : vector<8x64xi32>
        %358 = arith.andi %355, %357 : vector<8x64xi1>
        %c96 = arith.constant 96 : index
        %359 = memref.load %arg2[%c96] : memref<256xf32, #tpu.memory_space<smem>>
        %360 = vector.broadcast %359 : f32 to vector<8x64xf32>
        %361 = arith.select %358, %360, %332 : vector<8x64xi1>, vector<8x64xf32>
        %c97 = arith.constant 97 : index
        %362 = memref.load %arg2[%c97] : memref<256xf32, #tpu.memory_space<smem>>
        %363 = vector.broadcast %362 : f32 to vector<8x64xf32>
        %364 = arith.select %358, %363, %335 : vector<8x64xi1>, vector<8x64xf32>
        %c98 = arith.constant 98 : index
        %365 = memref.load %arg2[%c98] : memref<256xf32, #tpu.memory_space<smem>>
        %366 = vector.broadcast %365 : f32 to vector<8x64xf32>
        %367 = arith.select %358, %366, %338 : vector<8x64xi1>, vector<8x64xf32>
        %c99 = arith.constant 99 : index
        %368 = memref.load %arg2[%c99] : memref<256xf32, #tpu.memory_space<smem>>
        %369 = vector.broadcast %368 : f32 to vector<8x64xf32>
        %370 = arith.select %358, %369, %341 : vector<8x64xi1>, vector<8x64xf32>
        %c100 = arith.constant 100 : index
        %371 = memref.load %arg2[%c100] : memref<256xf32, #tpu.memory_space<smem>>
        %372 = vector.broadcast %371 : f32 to vector<8x64xf32>
        %373 = arith.select %358, %372, %344 : vector<8x64xi1>, vector<8x64xf32>
        %c101 = arith.constant 101 : index
        %374 = memref.load %arg2[%c101] : memref<256xf32, #tpu.memory_space<smem>>
        %375 = vector.broadcast %374 : f32 to vector<8x64xf32>
        %376 = arith.select %358, %375, %347 : vector<8x64xi1>, vector<8x64xf32>
        %c102 = arith.constant 102 : index
        %377 = memref.load %arg2[%c102] : memref<256xf32, #tpu.memory_space<smem>>
        %378 = vector.broadcast %377 : f32 to vector<8x64xf32>
        %379 = arith.select %358, %378, %350 : vector<8x64xi1>, vector<8x64xf32>
        %c103 = arith.constant 103 : index
        %380 = memref.load %arg2[%c103] : memref<256xf32, #tpu.memory_space<smem>>
        %381 = vector.broadcast %380 : f32 to vector<8x64xf32>
        %382 = arith.select %358, %381, %353 : vector<8x64xi1>, vector<8x64xf32>
        %c46_i32 = arith.constant 46 : i32
        %383 = vector.broadcast %c46_i32 : i32 to vector<8x64xi32>
        %384 = arith.cmpi sge, %39, %383 : vector<8x64xi32>
        %c63_i32_18 = arith.constant 63 : i32
        %385 = vector.broadcast %c63_i32_18 : i32 to vector<8x64xi32>
        %386 = arith.cmpi sle, %39, %385 : vector<8x64xi32>
        %387 = arith.andi %384, %386 : vector<8x64xi1>
        %c104 = arith.constant 104 : index
        %388 = memref.load %arg2[%c104] : memref<256xf32, #tpu.memory_space<smem>>
        %389 = vector.broadcast %388 : f32 to vector<8x64xf32>
        %390 = arith.select %387, %389, %361 : vector<8x64xi1>, vector<8x64xf32>
        %c105 = arith.constant 105 : index
        %391 = memref.load %arg2[%c105] : memref<256xf32, #tpu.memory_space<smem>>
        %392 = vector.broadcast %391 : f32 to vector<8x64xf32>
        %393 = arith.select %387, %392, %364 : vector<8x64xi1>, vector<8x64xf32>
        %c106 = arith.constant 106 : index
        %394 = memref.load %arg2[%c106] : memref<256xf32, #tpu.memory_space<smem>>
        %395 = vector.broadcast %394 : f32 to vector<8x64xf32>
        %396 = arith.select %387, %395, %367 : vector<8x64xi1>, vector<8x64xf32>
        %c107 = arith.constant 107 : index
        %397 = memref.load %arg2[%c107] : memref<256xf32, #tpu.memory_space<smem>>
        %398 = vector.broadcast %397 : f32 to vector<8x64xf32>
        %399 = arith.select %387, %398, %370 : vector<8x64xi1>, vector<8x64xf32>
        %c108 = arith.constant 108 : index
        %400 = memref.load %arg2[%c108] : memref<256xf32, #tpu.memory_space<smem>>
        %401 = vector.broadcast %400 : f32 to vector<8x64xf32>
        %402 = arith.select %387, %401, %373 : vector<8x64xi1>, vector<8x64xf32>
        %c109 = arith.constant 109 : index
        %403 = memref.load %arg2[%c109] : memref<256xf32, #tpu.memory_space<smem>>
        %404 = vector.broadcast %403 : f32 to vector<8x64xf32>
        %405 = arith.select %387, %404, %376 : vector<8x64xi1>, vector<8x64xf32>
        %c110 = arith.constant 110 : index
        %406 = memref.load %arg2[%c110] : memref<256xf32, #tpu.memory_space<smem>>
        %407 = vector.broadcast %406 : f32 to vector<8x64xf32>
        %408 = arith.select %387, %407, %379 : vector<8x64xi1>, vector<8x64xf32>
        %c111 = arith.constant 111 : index
        %409 = memref.load %arg2[%c111] : memref<256xf32, #tpu.memory_space<smem>>
        %410 = vector.broadcast %409 : f32 to vector<8x64xf32>
        %411 = arith.select %387, %410, %382 : vector<8x64xi1>, vector<8x64xf32>
        %c64_i32_19 = arith.constant 64 : i32
        %412 = vector.broadcast %c64_i32_19 : i32 to vector<8x64xi32>
        %413 = arith.cmpi sge, %39, %412 : vector<8x64xi32>
        %c90_i32 = arith.constant 90 : i32
        %414 = vector.broadcast %c90_i32 : i32 to vector<8x64xi32>
        %415 = arith.cmpi sle, %39, %414 : vector<8x64xi32>
        %416 = arith.andi %413, %415 : vector<8x64xi1>
        %c112 = arith.constant 112 : index
        %417 = memref.load %arg2[%c112] : memref<256xf32, #tpu.memory_space<smem>>
        %418 = vector.broadcast %417 : f32 to vector<8x64xf32>
        %419 = arith.select %416, %418, %390 : vector<8x64xi1>, vector<8x64xf32>
        %c113 = arith.constant 113 : index
        %420 = memref.load %arg2[%c113] : memref<256xf32, #tpu.memory_space<smem>>
        %421 = vector.broadcast %420 : f32 to vector<8x64xf32>
        %422 = arith.select %416, %421, %393 : vector<8x64xi1>, vector<8x64xf32>
        %c114 = arith.constant 114 : index
        %423 = memref.load %arg2[%c114] : memref<256xf32, #tpu.memory_space<smem>>
        %424 = vector.broadcast %423 : f32 to vector<8x64xf32>
        %425 = arith.select %416, %424, %396 : vector<8x64xi1>, vector<8x64xf32>
        %c115 = arith.constant 115 : index
        %426 = memref.load %arg2[%c115] : memref<256xf32, #tpu.memory_space<smem>>
        %427 = vector.broadcast %426 : f32 to vector<8x64xf32>
        %428 = arith.select %416, %427, %399 : vector<8x64xi1>, vector<8x64xf32>
        %c116 = arith.constant 116 : index
        %429 = memref.load %arg2[%c116] : memref<256xf32, #tpu.memory_space<smem>>
        %430 = vector.broadcast %429 : f32 to vector<8x64xf32>
        %431 = arith.select %416, %430, %402 : vector<8x64xi1>, vector<8x64xf32>
        %c117 = arith.constant 117 : index
        %432 = memref.load %arg2[%c117] : memref<256xf32, #tpu.memory_space<smem>>
        %433 = vector.broadcast %432 : f32 to vector<8x64xf32>
        %434 = arith.select %416, %433, %405 : vector<8x64xi1>, vector<8x64xf32>
        %c118 = arith.constant 118 : index
        %435 = memref.load %arg2[%c118] : memref<256xf32, #tpu.memory_space<smem>>
        %436 = vector.broadcast %435 : f32 to vector<8x64xf32>
        %437 = arith.select %416, %436, %408 : vector<8x64xi1>, vector<8x64xf32>
        %c119 = arith.constant 119 : index
        %438 = memref.load %arg2[%c119] : memref<256xf32, #tpu.memory_space<smem>>
        %439 = vector.broadcast %438 : f32 to vector<8x64xf32>
        %440 = arith.select %416, %439, %411 : vector<8x64xi1>, vector<8x64xf32>
        %c91_i32_20 = arith.constant 91 : i32
        %441 = vector.broadcast %c91_i32_20 : i32 to vector<8x64xi32>
        %442 = arith.cmpi sge, %39, %441 : vector<8x64xi32>
        %c120 = arith.constant 120 : index
        %443 = memref.load %arg2[%c120] : memref<256xf32, #tpu.memory_space<smem>>
        %444 = vector.broadcast %443 : f32 to vector<8x64xf32>
        %445 = arith.select %442, %444, %419 : vector<8x64xi1>, vector<8x64xf32>
        %c121 = arith.constant 121 : index
        %446 = memref.load %arg2[%c121] : memref<256xf32, #tpu.memory_space<smem>>
        %447 = vector.broadcast %446 : f32 to vector<8x64xf32>
        %448 = arith.select %442, %447, %422 : vector<8x64xi1>, vector<8x64xf32>
        %c122 = arith.constant 122 : index
        %449 = memref.load %arg2[%c122] : memref<256xf32, #tpu.memory_space<smem>>
        %450 = vector.broadcast %449 : f32 to vector<8x64xf32>
        %451 = arith.select %442, %450, %425 : vector<8x64xi1>, vector<8x64xf32>
        %c123 = arith.constant 123 : index
        %452 = memref.load %arg2[%c123] : memref<256xf32, #tpu.memory_space<smem>>
        %453 = vector.broadcast %452 : f32 to vector<8x64xf32>
        %454 = arith.select %442, %453, %428 : vector<8x64xi1>, vector<8x64xf32>
        %c124 = arith.constant 124 : index
        %455 = memref.load %arg2[%c124] : memref<256xf32, #tpu.memory_space<smem>>
        %456 = vector.broadcast %455 : f32 to vector<8x64xf32>
        %457 = arith.select %442, %456, %431 : vector<8x64xi1>, vector<8x64xf32>
        %c125 = arith.constant 125 : index
        %458 = memref.load %arg2[%c125] : memref<256xf32, #tpu.memory_space<smem>>
        %459 = vector.broadcast %458 : f32 to vector<8x64xf32>
        %460 = arith.select %442, %459, %434 : vector<8x64xi1>, vector<8x64xf32>
        %c126 = arith.constant 126 : index
        %461 = memref.load %arg2[%c126] : memref<256xf32, #tpu.memory_space<smem>>
        %462 = vector.broadcast %461 : f32 to vector<8x64xf32>
        %463 = arith.select %442, %462, %437 : vector<8x64xi1>, vector<8x64xf32>
        %c127 = arith.constant 127 : index
        %464 = memref.load %arg2[%c127] : memref<256xf32, #tpu.memory_space<smem>>
        %465 = vector.broadcast %464 : f32 to vector<8x64xf32>
        %466 = arith.select %442, %465, %440 : vector<8x64xi1>, vector<8x64xf32>
        %c-1_i32 = arith.constant -1 : i32
        %467 = vector.broadcast %c-1_i32 : i32 to vector<8x64xi32>
        %468 = arith.cmpi eq, %39, %467 : vector<8x64xi32>
        %c136 = arith.constant 136 : index
        %469 = memref.load %arg2[%c136] : memref<256xf32, #tpu.memory_space<smem>>
        %470 = vector.broadcast %469 : f32 to vector<8x64xf32>
        %471 = arith.select %468, %470, %445 : vector<8x64xi1>, vector<8x64xf32>
        %c137 = arith.constant 137 : index
        %472 = memref.load %arg2[%c137] : memref<256xf32, #tpu.memory_space<smem>>
        %473 = vector.broadcast %472 : f32 to vector<8x64xf32>
        %474 = arith.select %468, %473, %448 : vector<8x64xi1>, vector<8x64xf32>
        %c138 = arith.constant 138 : index
        %475 = memref.load %arg2[%c138] : memref<256xf32, #tpu.memory_space<smem>>
        %476 = vector.broadcast %475 : f32 to vector<8x64xf32>
        %477 = arith.select %468, %476, %451 : vector<8x64xi1>, vector<8x64xf32>
        %c139 = arith.constant 139 : index
        %478 = memref.load %arg2[%c139] : memref<256xf32, #tpu.memory_space<smem>>
        %479 = vector.broadcast %478 : f32 to vector<8x64xf32>
        %480 = arith.select %468, %479, %454 : vector<8x64xi1>, vector<8x64xf32>
        %c140 = arith.constant 140 : index
        %481 = memref.load %arg2[%c140] : memref<256xf32, #tpu.memory_space<smem>>
        %482 = vector.broadcast %481 : f32 to vector<8x64xf32>
        %483 = arith.select %468, %482, %457 : vector<8x64xi1>, vector<8x64xf32>
        %c141 = arith.constant 141 : index
        %484 = memref.load %arg2[%c141] : memref<256xf32, #tpu.memory_space<smem>>
        %485 = vector.broadcast %484 : f32 to vector<8x64xf32>
        %486 = arith.select %468, %485, %460 : vector<8x64xi1>, vector<8x64xf32>
        %c142 = arith.constant 142 : index
        %487 = memref.load %arg2[%c142] : memref<256xf32, #tpu.memory_space<smem>>
        %488 = vector.broadcast %487 : f32 to vector<8x64xf32>
        %489 = arith.select %468, %488, %463 : vector<8x64xi1>, vector<8x64xf32>
        %c143 = arith.constant 143 : index
        %490 = memref.load %arg2[%c143] : memref<256xf32, #tpu.memory_space<smem>>
        %491 = vector.broadcast %490 : f32 to vector<8x64xf32>
        %492 = arith.select %468, %491, %466 : vector<8x64xi1>, vector<8x64xf32>
        %c-2_i32 = arith.constant -2 : i32
        %493 = vector.broadcast %c-2_i32 : i32 to vector<8x64xi32>
        %494 = arith.cmpi eq, %39, %493 : vector<8x64xi32>
        %c144 = arith.constant 144 : index
        %495 = memref.load %arg2[%c144] : memref<256xf32, #tpu.memory_space<smem>>
        %496 = vector.broadcast %495 : f32 to vector<8x64xf32>
        %497 = arith.select %494, %496, %471 : vector<8x64xi1>, vector<8x64xf32>
        %c145 = arith.constant 145 : index
        %498 = memref.load %arg2[%c145] : memref<256xf32, #tpu.memory_space<smem>>
        %499 = vector.broadcast %498 : f32 to vector<8x64xf32>
        %500 = arith.select %494, %499, %474 : vector<8x64xi1>, vector<8x64xf32>
        %c146 = arith.constant 146 : index
        %501 = memref.load %arg2[%c146] : memref<256xf32, #tpu.memory_space<smem>>
        %502 = vector.broadcast %501 : f32 to vector<8x64xf32>
        %503 = arith.select %494, %502, %477 : vector<8x64xi1>, vector<8x64xf32>
        %c147 = arith.constant 147 : index
        %504 = memref.load %arg2[%c147] : memref<256xf32, #tpu.memory_space<smem>>
        %505 = vector.broadcast %504 : f32 to vector<8x64xf32>
        %506 = arith.select %494, %505, %480 : vector<8x64xi1>, vector<8x64xf32>
        %c148 = arith.constant 148 : index
        %507 = memref.load %arg2[%c148] : memref<256xf32, #tpu.memory_space<smem>>
        %508 = vector.broadcast %507 : f32 to vector<8x64xf32>
        %509 = arith.select %494, %508, %483 : vector<8x64xi1>, vector<8x64xf32>
        %c149 = arith.constant 149 : index
        %510 = memref.load %arg2[%c149] : memref<256xf32, #tpu.memory_space<smem>>
        %511 = vector.broadcast %510 : f32 to vector<8x64xf32>
        %512 = arith.select %494, %511, %486 : vector<8x64xi1>, vector<8x64xf32>
        %c150 = arith.constant 150 : index
        %513 = memref.load %arg2[%c150] : memref<256xf32, #tpu.memory_space<smem>>
        %514 = vector.broadcast %513 : f32 to vector<8x64xf32>
        %515 = arith.select %494, %514, %489 : vector<8x64xi1>, vector<8x64xf32>
        %c151 = arith.constant 151 : index
        %516 = memref.load %arg2[%c151] : memref<256xf32, #tpu.memory_space<smem>>
        %517 = vector.broadcast %516 : f32 to vector<8x64xf32>
        %518 = arith.select %494, %517, %492 : vector<8x64xi1>, vector<8x64xf32>
        %c-3_i32 = arith.constant -3 : i32
        %519 = vector.broadcast %c-3_i32 : i32 to vector<8x64xi32>
        %520 = arith.cmpi eq, %39, %519 : vector<8x64xi32>
        %c152 = arith.constant 152 : index
        %521 = memref.load %arg2[%c152] : memref<256xf32, #tpu.memory_space<smem>>
        %522 = vector.broadcast %521 : f32 to vector<8x64xf32>
        %523 = arith.select %520, %522, %497 : vector<8x64xi1>, vector<8x64xf32>
        %c153 = arith.constant 153 : index
        %524 = memref.load %arg2[%c153] : memref<256xf32, #tpu.memory_space<smem>>
        %525 = vector.broadcast %524 : f32 to vector<8x64xf32>
        %526 = arith.select %520, %525, %500 : vector<8x64xi1>, vector<8x64xf32>
        %c154 = arith.constant 154 : index
        %527 = memref.load %arg2[%c154] : memref<256xf32, #tpu.memory_space<smem>>
        %528 = vector.broadcast %527 : f32 to vector<8x64xf32>
        %529 = arith.select %520, %528, %503 : vector<8x64xi1>, vector<8x64xf32>
        %c155 = arith.constant 155 : index
        %530 = memref.load %arg2[%c155] : memref<256xf32, #tpu.memory_space<smem>>
        %531 = vector.broadcast %530 : f32 to vector<8x64xf32>
        %532 = arith.select %520, %531, %506 : vector<8x64xi1>, vector<8x64xf32>
        %c156 = arith.constant 156 : index
        %533 = memref.load %arg2[%c156] : memref<256xf32, #tpu.memory_space<smem>>
        %534 = vector.broadcast %533 : f32 to vector<8x64xf32>
        %535 = arith.select %520, %534, %509 : vector<8x64xi1>, vector<8x64xf32>
        %c157 = arith.constant 157 : index
        %536 = memref.load %arg2[%c157] : memref<256xf32, #tpu.memory_space<smem>>
        %537 = vector.broadcast %536 : f32 to vector<8x64xf32>
        %538 = arith.select %520, %537, %512 : vector<8x64xi1>, vector<8x64xf32>
        %c158 = arith.constant 158 : index
        %539 = memref.load %arg2[%c158] : memref<256xf32, #tpu.memory_space<smem>>
        %540 = vector.broadcast %539 : f32 to vector<8x64xf32>
        %541 = arith.select %520, %540, %515 : vector<8x64xi1>, vector<8x64xf32>
        %c159 = arith.constant 159 : index
        %542 = memref.load %arg2[%c159] : memref<256xf32, #tpu.memory_space<smem>>
        %543 = vector.broadcast %542 : f32 to vector<8x64xf32>
        %544 = arith.select %520, %543, %518 : vector<8x64xi1>, vector<8x64xf32>
        %c-4_i32 = arith.constant -4 : i32
        %545 = vector.broadcast %c-4_i32 : i32 to vector<8x64xi32>
        %546 = arith.cmpi eq, %39, %545 : vector<8x64xi32>
        %c160 = arith.constant 160 : index
        %547 = memref.load %arg2[%c160] : memref<256xf32, #tpu.memory_space<smem>>
        %548 = vector.broadcast %547 : f32 to vector<8x64xf32>
        %549 = arith.select %546, %548, %523 : vector<8x64xi1>, vector<8x64xf32>
        %c161 = arith.constant 161 : index
        %550 = memref.load %arg2[%c161] : memref<256xf32, #tpu.memory_space<smem>>
        %551 = vector.broadcast %550 : f32 to vector<8x64xf32>
        %552 = arith.select %546, %551, %526 : vector<8x64xi1>, vector<8x64xf32>
        %c162 = arith.constant 162 : index
        %553 = memref.load %arg2[%c162] : memref<256xf32, #tpu.memory_space<smem>>
        %554 = vector.broadcast %553 : f32 to vector<8x64xf32>
        %555 = arith.select %546, %554, %529 : vector<8x64xi1>, vector<8x64xf32>
        %c163 = arith.constant 163 : index
        %556 = memref.load %arg2[%c163] : memref<256xf32, #tpu.memory_space<smem>>
        %557 = vector.broadcast %556 : f32 to vector<8x64xf32>
        %558 = arith.select %546, %557, %532 : vector<8x64xi1>, vector<8x64xf32>
        %c164 = arith.constant 164 : index
        %559 = memref.load %arg2[%c164] : memref<256xf32, #tpu.memory_space<smem>>
        %560 = vector.broadcast %559 : f32 to vector<8x64xf32>
        %561 = arith.select %546, %560, %535 : vector<8x64xi1>, vector<8x64xf32>
        %c165 = arith.constant 165 : index
        %562 = memref.load %arg2[%c165] : memref<256xf32, #tpu.memory_space<smem>>
        %563 = vector.broadcast %562 : f32 to vector<8x64xf32>
        %564 = arith.select %546, %563, %538 : vector<8x64xi1>, vector<8x64xf32>
        %c166 = arith.constant 166 : index
        %565 = memref.load %arg2[%c166] : memref<256xf32, #tpu.memory_space<smem>>
        %566 = vector.broadcast %565 : f32 to vector<8x64xf32>
        %567 = arith.select %546, %566, %541 : vector<8x64xi1>, vector<8x64xf32>
        %c167 = arith.constant 167 : index
        %568 = memref.load %arg2[%c167] : memref<256xf32, #tpu.memory_space<smem>>
        %569 = vector.broadcast %568 : f32 to vector<8x64xf32>
        %570 = arith.select %546, %569, %544 : vector<8x64xi1>, vector<8x64xf32>
        %c-5_i32 = arith.constant -5 : i32
        %571 = vector.broadcast %c-5_i32 : i32 to vector<8x64xi32>
        %572 = arith.cmpi eq, %39, %571 : vector<8x64xi32>
        %c168 = arith.constant 168 : index
        %573 = memref.load %arg2[%c168] : memref<256xf32, #tpu.memory_space<smem>>
        %574 = vector.broadcast %573 : f32 to vector<8x64xf32>
        %575 = arith.select %572, %574, %549 : vector<8x64xi1>, vector<8x64xf32>
        %c169 = arith.constant 169 : index
        %576 = memref.load %arg2[%c169] : memref<256xf32, #tpu.memory_space<smem>>
        %577 = vector.broadcast %576 : f32 to vector<8x64xf32>
        %578 = arith.select %572, %577, %552 : vector<8x64xi1>, vector<8x64xf32>
        %c170 = arith.constant 170 : index
        %579 = memref.load %arg2[%c170] : memref<256xf32, #tpu.memory_space<smem>>
        %580 = vector.broadcast %579 : f32 to vector<8x64xf32>
        %581 = arith.select %572, %580, %555 : vector<8x64xi1>, vector<8x64xf32>
        %c171 = arith.constant 171 : index
        %582 = memref.load %arg2[%c171] : memref<256xf32, #tpu.memory_space<smem>>
        %583 = vector.broadcast %582 : f32 to vector<8x64xf32>
        %584 = arith.select %572, %583, %558 : vector<8x64xi1>, vector<8x64xf32>
        %c172 = arith.constant 172 : index
        %585 = memref.load %arg2[%c172] : memref<256xf32, #tpu.memory_space<smem>>
        %586 = vector.broadcast %585 : f32 to vector<8x64xf32>
        %587 = arith.select %572, %586, %561 : vector<8x64xi1>, vector<8x64xf32>
        %c173 = arith.constant 173 : index
        %588 = memref.load %arg2[%c173] : memref<256xf32, #tpu.memory_space<smem>>
        %589 = vector.broadcast %588 : f32 to vector<8x64xf32>
        %590 = arith.select %572, %589, %564 : vector<8x64xi1>, vector<8x64xf32>
        %c174 = arith.constant 174 : index
        %591 = memref.load %arg2[%c174] : memref<256xf32, #tpu.memory_space<smem>>
        %592 = vector.broadcast %591 : f32 to vector<8x64xf32>
        %593 = arith.select %572, %592, %567 : vector<8x64xi1>, vector<8x64xf32>
        %c175 = arith.constant 175 : index
        %594 = memref.load %arg2[%c175] : memref<256xf32, #tpu.memory_space<smem>>
        %595 = vector.broadcast %594 : f32 to vector<8x64xf32>
        %596 = arith.select %572, %595, %570 : vector<8x64xi1>, vector<8x64xf32>
        %c-6_i32 = arith.constant -6 : i32
        %597 = vector.broadcast %c-6_i32 : i32 to vector<8x64xi32>
        %598 = arith.cmpi eq, %39, %597 : vector<8x64xi32>
        %c176 = arith.constant 176 : index
        %599 = memref.load %arg2[%c176] : memref<256xf32, #tpu.memory_space<smem>>
        %600 = vector.broadcast %599 : f32 to vector<8x64xf32>
        %601 = arith.select %598, %600, %575 : vector<8x64xi1>, vector<8x64xf32>
        %c177 = arith.constant 177 : index
        %602 = memref.load %arg2[%c177] : memref<256xf32, #tpu.memory_space<smem>>
        %603 = vector.broadcast %602 : f32 to vector<8x64xf32>
        %604 = arith.select %598, %603, %578 : vector<8x64xi1>, vector<8x64xf32>
        %c178 = arith.constant 178 : index
        %605 = memref.load %arg2[%c178] : memref<256xf32, #tpu.memory_space<smem>>
        %606 = vector.broadcast %605 : f32 to vector<8x64xf32>
        %607 = arith.select %598, %606, %581 : vector<8x64xi1>, vector<8x64xf32>
        %c179 = arith.constant 179 : index
        %608 = memref.load %arg2[%c179] : memref<256xf32, #tpu.memory_space<smem>>
        %609 = vector.broadcast %608 : f32 to vector<8x64xf32>
        %610 = arith.select %598, %609, %584 : vector<8x64xi1>, vector<8x64xf32>
        %c180 = arith.constant 180 : index
        %611 = memref.load %arg2[%c180] : memref<256xf32, #tpu.memory_space<smem>>
        %612 = vector.broadcast %611 : f32 to vector<8x64xf32>
        %613 = arith.select %598, %612, %587 : vector<8x64xi1>, vector<8x64xf32>
        %c181 = arith.constant 181 : index
        %614 = memref.load %arg2[%c181] : memref<256xf32, #tpu.memory_space<smem>>
        %615 = vector.broadcast %614 : f32 to vector<8x64xf32>
        %616 = arith.select %598, %615, %590 : vector<8x64xi1>, vector<8x64xf32>
        %c182 = arith.constant 182 : index
        %617 = memref.load %arg2[%c182] : memref<256xf32, #tpu.memory_space<smem>>
        %618 = vector.broadcast %617 : f32 to vector<8x64xf32>
        %619 = arith.select %598, %618, %593 : vector<8x64xi1>, vector<8x64xf32>
        %c183 = arith.constant 183 : index
        %620 = memref.load %arg2[%c183] : memref<256xf32, #tpu.memory_space<smem>>
        %621 = vector.broadcast %620 : f32 to vector<8x64xf32>
        %622 = arith.select %598, %621, %596 : vector<8x64xi1>, vector<8x64xf32>
        %c-7_i32 = arith.constant -7 : i32
        %623 = vector.broadcast %c-7_i32 : i32 to vector<8x64xi32>
        %624 = arith.cmpi eq, %39, %623 : vector<8x64xi32>
        %c184 = arith.constant 184 : index
        %625 = memref.load %arg2[%c184] : memref<256xf32, #tpu.memory_space<smem>>
        %626 = vector.broadcast %625 : f32 to vector<8x64xf32>
        %627 = arith.select %624, %626, %601 : vector<8x64xi1>, vector<8x64xf32>
        %c185 = arith.constant 185 : index
        %628 = memref.load %arg2[%c185] : memref<256xf32, #tpu.memory_space<smem>>
        %629 = vector.broadcast %628 : f32 to vector<8x64xf32>
        %630 = arith.select %624, %629, %604 : vector<8x64xi1>, vector<8x64xf32>
        %c186 = arith.constant 186 : index
        %631 = memref.load %arg2[%c186] : memref<256xf32, #tpu.memory_space<smem>>
        %632 = vector.broadcast %631 : f32 to vector<8x64xf32>
        %633 = arith.select %624, %632, %607 : vector<8x64xi1>, vector<8x64xf32>
        %c187 = arith.constant 187 : index
        %634 = memref.load %arg2[%c187] : memref<256xf32, #tpu.memory_space<smem>>
        %635 = vector.broadcast %634 : f32 to vector<8x64xf32>
        %636 = arith.select %624, %635, %610 : vector<8x64xi1>, vector<8x64xf32>
        %c188 = arith.constant 188 : index
        %637 = memref.load %arg2[%c188] : memref<256xf32, #tpu.memory_space<smem>>
        %638 = vector.broadcast %637 : f32 to vector<8x64xf32>
        %639 = arith.select %624, %638, %613 : vector<8x64xi1>, vector<8x64xf32>
        %c189 = arith.constant 189 : index
        %640 = memref.load %arg2[%c189] : memref<256xf32, #tpu.memory_space<smem>>
        %641 = vector.broadcast %640 : f32 to vector<8x64xf32>
        %642 = arith.select %624, %641, %616 : vector<8x64xi1>, vector<8x64xf32>
        %c190 = arith.constant 190 : index
        %643 = memref.load %arg2[%c190] : memref<256xf32, #tpu.memory_space<smem>>
        %644 = vector.broadcast %643 : f32 to vector<8x64xf32>
        %645 = arith.select %624, %644, %619 : vector<8x64xi1>, vector<8x64xf32>
        %c191 = arith.constant 191 : index
        %646 = memref.load %arg2[%c191] : memref<256xf32, #tpu.memory_space<smem>>
        %647 = vector.broadcast %646 : f32 to vector<8x64xf32>
        %648 = arith.select %624, %647, %622 : vector<8x64xi1>, vector<8x64xf32>
        %c-8_i32 = arith.constant -8 : i32
        %649 = vector.broadcast %c-8_i32 : i32 to vector<8x64xi32>
        %650 = arith.cmpi sle, %39, %649 : vector<8x64xi32>
        %c-11_i32 = arith.constant -11 : i32
        %651 = vector.broadcast %c-11_i32 : i32 to vector<8x64xi32>
        %652 = arith.cmpi sge, %39, %651 : vector<8x64xi32>
        %653 = arith.andi %650, %652 : vector<8x64xi1>
        %c192 = arith.constant 192 : index
        %654 = memref.load %arg2[%c192] : memref<256xf32, #tpu.memory_space<smem>>
        %655 = vector.broadcast %654 : f32 to vector<8x64xf32>
        %656 = arith.select %653, %655, %627 : vector<8x64xi1>, vector<8x64xf32>
        %c193 = arith.constant 193 : index
        %657 = memref.load %arg2[%c193] : memref<256xf32, #tpu.memory_space<smem>>
        %658 = vector.broadcast %657 : f32 to vector<8x64xf32>
        %659 = arith.select %653, %658, %630 : vector<8x64xi1>, vector<8x64xf32>
        %c194 = arith.constant 194 : index
        %660 = memref.load %arg2[%c194] : memref<256xf32, #tpu.memory_space<smem>>
        %661 = vector.broadcast %660 : f32 to vector<8x64xf32>
        %662 = arith.select %653, %661, %633 : vector<8x64xi1>, vector<8x64xf32>
        %c195 = arith.constant 195 : index
        %663 = memref.load %arg2[%c195] : memref<256xf32, #tpu.memory_space<smem>>
        %664 = vector.broadcast %663 : f32 to vector<8x64xf32>
        %665 = arith.select %653, %664, %636 : vector<8x64xi1>, vector<8x64xf32>
        %c196 = arith.constant 196 : index
        %666 = memref.load %arg2[%c196] : memref<256xf32, #tpu.memory_space<smem>>
        %667 = vector.broadcast %666 : f32 to vector<8x64xf32>
        %668 = arith.select %653, %667, %639 : vector<8x64xi1>, vector<8x64xf32>
        %c197 = arith.constant 197 : index
        %669 = memref.load %arg2[%c197] : memref<256xf32, #tpu.memory_space<smem>>
        %670 = vector.broadcast %669 : f32 to vector<8x64xf32>
        %671 = arith.select %653, %670, %642 : vector<8x64xi1>, vector<8x64xf32>
        %c198 = arith.constant 198 : index
        %672 = memref.load %arg2[%c198] : memref<256xf32, #tpu.memory_space<smem>>
        %673 = vector.broadcast %672 : f32 to vector<8x64xf32>
        %674 = arith.select %653, %673, %645 : vector<8x64xi1>, vector<8x64xf32>
        %c199 = arith.constant 199 : index
        %675 = memref.load %arg2[%c199] : memref<256xf32, #tpu.memory_space<smem>>
        %676 = vector.broadcast %675 : f32 to vector<8x64xf32>
        %677 = arith.select %653, %676, %648 : vector<8x64xi1>, vector<8x64xf32>
        %c-12_i32 = arith.constant -12 : i32
        %678 = vector.broadcast %c-12_i32 : i32 to vector<8x64xi32>
        %679 = arith.cmpi sle, %39, %678 : vector<8x64xi32>
        %c-15_i32 = arith.constant -15 : i32
        %680 = vector.broadcast %c-15_i32 : i32 to vector<8x64xi32>
        %681 = arith.cmpi sge, %39, %680 : vector<8x64xi32>
        %682 = arith.andi %679, %681 : vector<8x64xi1>
        %c200 = arith.constant 200 : index
        %683 = memref.load %arg2[%c200] : memref<256xf32, #tpu.memory_space<smem>>
        %684 = vector.broadcast %683 : f32 to vector<8x64xf32>
        %685 = arith.select %682, %684, %656 : vector<8x64xi1>, vector<8x64xf32>
        %c201 = arith.constant 201 : index
        %686 = memref.load %arg2[%c201] : memref<256xf32, #tpu.memory_space<smem>>
        %687 = vector.broadcast %686 : f32 to vector<8x64xf32>
        %688 = arith.select %682, %687, %659 : vector<8x64xi1>, vector<8x64xf32>
        %c202 = arith.constant 202 : index
        %689 = memref.load %arg2[%c202] : memref<256xf32, #tpu.memory_space<smem>>
        %690 = vector.broadcast %689 : f32 to vector<8x64xf32>
        %691 = arith.select %682, %690, %662 : vector<8x64xi1>, vector<8x64xf32>
        %c203 = arith.constant 203 : index
        %692 = memref.load %arg2[%c203] : memref<256xf32, #tpu.memory_space<smem>>
        %693 = vector.broadcast %692 : f32 to vector<8x64xf32>
        %694 = arith.select %682, %693, %665 : vector<8x64xi1>, vector<8x64xf32>
        %c204 = arith.constant 204 : index
        %695 = memref.load %arg2[%c204] : memref<256xf32, #tpu.memory_space<smem>>
        %696 = vector.broadcast %695 : f32 to vector<8x64xf32>
        %697 = arith.select %682, %696, %668 : vector<8x64xi1>, vector<8x64xf32>
        %c205 = arith.constant 205 : index
        %698 = memref.load %arg2[%c205] : memref<256xf32, #tpu.memory_space<smem>>
        %699 = vector.broadcast %698 : f32 to vector<8x64xf32>
        %700 = arith.select %682, %699, %671 : vector<8x64xi1>, vector<8x64xf32>
        %c206 = arith.constant 206 : index
        %701 = memref.load %arg2[%c206] : memref<256xf32, #tpu.memory_space<smem>>
        %702 = vector.broadcast %701 : f32 to vector<8x64xf32>
        %703 = arith.select %682, %702, %674 : vector<8x64xi1>, vector<8x64xf32>
        %c207 = arith.constant 207 : index
        %704 = memref.load %arg2[%c207] : memref<256xf32, #tpu.memory_space<smem>>
        %705 = vector.broadcast %704 : f32 to vector<8x64xf32>
        %706 = arith.select %682, %705, %677 : vector<8x64xi1>, vector<8x64xf32>
        %c-16_i32 = arith.constant -16 : i32
        %707 = vector.broadcast %c-16_i32 : i32 to vector<8x64xi32>
        %708 = arith.cmpi sle, %39, %707 : vector<8x64xi32>
        %c-22_i32 = arith.constant -22 : i32
        %709 = vector.broadcast %c-22_i32 : i32 to vector<8x64xi32>
        %710 = arith.cmpi sge, %39, %709 : vector<8x64xi32>
        %711 = arith.andi %708, %710 : vector<8x64xi1>
        %c208 = arith.constant 208 : index
        %712 = memref.load %arg2[%c208] : memref<256xf32, #tpu.memory_space<smem>>
        %713 = vector.broadcast %712 : f32 to vector<8x64xf32>
        %714 = arith.select %711, %713, %685 : vector<8x64xi1>, vector<8x64xf32>
        %c209 = arith.constant 209 : index
        %715 = memref.load %arg2[%c209] : memref<256xf32, #tpu.memory_space<smem>>
        %716 = vector.broadcast %715 : f32 to vector<8x64xf32>
        %717 = arith.select %711, %716, %688 : vector<8x64xi1>, vector<8x64xf32>
        %c210 = arith.constant 210 : index
        %718 = memref.load %arg2[%c210] : memref<256xf32, #tpu.memory_space<smem>>
        %719 = vector.broadcast %718 : f32 to vector<8x64xf32>
        %720 = arith.select %711, %719, %691 : vector<8x64xi1>, vector<8x64xf32>
        %c211 = arith.constant 211 : index
        %721 = memref.load %arg2[%c211] : memref<256xf32, #tpu.memory_space<smem>>
        %722 = vector.broadcast %721 : f32 to vector<8x64xf32>
        %723 = arith.select %711, %722, %694 : vector<8x64xi1>, vector<8x64xf32>
        %c212 = arith.constant 212 : index
        %724 = memref.load %arg2[%c212] : memref<256xf32, #tpu.memory_space<smem>>
        %725 = vector.broadcast %724 : f32 to vector<8x64xf32>
        %726 = arith.select %711, %725, %697 : vector<8x64xi1>, vector<8x64xf32>
        %c213 = arith.constant 213 : index
        %727 = memref.load %arg2[%c213] : memref<256xf32, #tpu.memory_space<smem>>
        %728 = vector.broadcast %727 : f32 to vector<8x64xf32>
        %729 = arith.select %711, %728, %700 : vector<8x64xi1>, vector<8x64xf32>
        %c214 = arith.constant 214 : index
        %730 = memref.load %arg2[%c214] : memref<256xf32, #tpu.memory_space<smem>>
        %731 = vector.broadcast %730 : f32 to vector<8x64xf32>
        %732 = arith.select %711, %731, %703 : vector<8x64xi1>, vector<8x64xf32>
        %c215 = arith.constant 215 : index
        %733 = memref.load %arg2[%c215] : memref<256xf32, #tpu.memory_space<smem>>
        %734 = vector.broadcast %733 : f32 to vector<8x64xf32>
        %735 = arith.select %711, %734, %706 : vector<8x64xi1>, vector<8x64xf32>
        %c-23_i32 = arith.constant -23 : i32
        %736 = vector.broadcast %c-23_i32 : i32 to vector<8x64xi32>
        %737 = arith.cmpi sle, %39, %736 : vector<8x64xi32>
        %c-31_i32 = arith.constant -31 : i32
        %738 = vector.broadcast %c-31_i32 : i32 to vector<8x64xi32>
        %739 = arith.cmpi sge, %39, %738 : vector<8x64xi32>
        %740 = arith.andi %737, %739 : vector<8x64xi1>
        %c216 = arith.constant 216 : index
        %741 = memref.load %arg2[%c216] : memref<256xf32, #tpu.memory_space<smem>>
        %742 = vector.broadcast %741 : f32 to vector<8x64xf32>
        %743 = arith.select %740, %742, %714 : vector<8x64xi1>, vector<8x64xf32>
        %c217 = arith.constant 217 : index
        %744 = memref.load %arg2[%c217] : memref<256xf32, #tpu.memory_space<smem>>
        %745 = vector.broadcast %744 : f32 to vector<8x64xf32>
        %746 = arith.select %740, %745, %717 : vector<8x64xi1>, vector<8x64xf32>
        %c218 = arith.constant 218 : index
        %747 = memref.load %arg2[%c218] : memref<256xf32, #tpu.memory_space<smem>>
        %748 = vector.broadcast %747 : f32 to vector<8x64xf32>
        %749 = arith.select %740, %748, %720 : vector<8x64xi1>, vector<8x64xf32>
        %c219 = arith.constant 219 : index
        %750 = memref.load %arg2[%c219] : memref<256xf32, #tpu.memory_space<smem>>
        %751 = vector.broadcast %750 : f32 to vector<8x64xf32>
        %752 = arith.select %740, %751, %723 : vector<8x64xi1>, vector<8x64xf32>
        %c220 = arith.constant 220 : index
        %753 = memref.load %arg2[%c220] : memref<256xf32, #tpu.memory_space<smem>>
        %754 = vector.broadcast %753 : f32 to vector<8x64xf32>
        %755 = arith.select %740, %754, %726 : vector<8x64xi1>, vector<8x64xf32>
        %c221 = arith.constant 221 : index
        %756 = memref.load %arg2[%c221] : memref<256xf32, #tpu.memory_space<smem>>
        %757 = vector.broadcast %756 : f32 to vector<8x64xf32>
        %758 = arith.select %740, %757, %729 : vector<8x64xi1>, vector<8x64xf32>
        %c222 = arith.constant 222 : index
        %759 = memref.load %arg2[%c222] : memref<256xf32, #tpu.memory_space<smem>>
        %760 = vector.broadcast %759 : f32 to vector<8x64xf32>
        %761 = arith.select %740, %760, %732 : vector<8x64xi1>, vector<8x64xf32>
        %c223 = arith.constant 223 : index
        %762 = memref.load %arg2[%c223] : memref<256xf32, #tpu.memory_space<smem>>
        %763 = vector.broadcast %762 : f32 to vector<8x64xf32>
        %764 = arith.select %740, %763, %735 : vector<8x64xi1>, vector<8x64xf32>
        %c-32_i32 = arith.constant -32 : i32
        %765 = vector.broadcast %c-32_i32 : i32 to vector<8x64xi32>
        %766 = arith.cmpi sle, %39, %765 : vector<8x64xi32>
        %c-45_i32 = arith.constant -45 : i32
        %767 = vector.broadcast %c-45_i32 : i32 to vector<8x64xi32>
        %768 = arith.cmpi sge, %39, %767 : vector<8x64xi32>
        %769 = arith.andi %766, %768 : vector<8x64xi1>
        %c224 = arith.constant 224 : index
        %770 = memref.load %arg2[%c224] : memref<256xf32, #tpu.memory_space<smem>>
        %771 = vector.broadcast %770 : f32 to vector<8x64xf32>
        %772 = arith.select %769, %771, %743 : vector<8x64xi1>, vector<8x64xf32>
        %c225 = arith.constant 225 : index
        %773 = memref.load %arg2[%c225] : memref<256xf32, #tpu.memory_space<smem>>
        %774 = vector.broadcast %773 : f32 to vector<8x64xf32>
        %775 = arith.select %769, %774, %746 : vector<8x64xi1>, vector<8x64xf32>
        %c226 = arith.constant 226 : index
        %776 = memref.load %arg2[%c226] : memref<256xf32, #tpu.memory_space<smem>>
        %777 = vector.broadcast %776 : f32 to vector<8x64xf32>
        %778 = arith.select %769, %777, %749 : vector<8x64xi1>, vector<8x64xf32>
        %c227 = arith.constant 227 : index
        %779 = memref.load %arg2[%c227] : memref<256xf32, #tpu.memory_space<smem>>
        %780 = vector.broadcast %779 : f32 to vector<8x64xf32>
        %781 = arith.select %769, %780, %752 : vector<8x64xi1>, vector<8x64xf32>
        %c228 = arith.constant 228 : index
        %782 = memref.load %arg2[%c228] : memref<256xf32, #tpu.memory_space<smem>>
        %783 = vector.broadcast %782 : f32 to vector<8x64xf32>
        %784 = arith.select %769, %783, %755 : vector<8x64xi1>, vector<8x64xf32>
        %c229 = arith.constant 229 : index
        %785 = memref.load %arg2[%c229] : memref<256xf32, #tpu.memory_space<smem>>
        %786 = vector.broadcast %785 : f32 to vector<8x64xf32>
        %787 = arith.select %769, %786, %758 : vector<8x64xi1>, vector<8x64xf32>
        %c230 = arith.constant 230 : index
        %788 = memref.load %arg2[%c230] : memref<256xf32, #tpu.memory_space<smem>>
        %789 = vector.broadcast %788 : f32 to vector<8x64xf32>
        %790 = arith.select %769, %789, %761 : vector<8x64xi1>, vector<8x64xf32>
        %c231 = arith.constant 231 : index
        %791 = memref.load %arg2[%c231] : memref<256xf32, #tpu.memory_space<smem>>
        %792 = vector.broadcast %791 : f32 to vector<8x64xf32>
        %793 = arith.select %769, %792, %764 : vector<8x64xi1>, vector<8x64xf32>
        %c-46_i32 = arith.constant -46 : i32
        %794 = vector.broadcast %c-46_i32 : i32 to vector<8x64xi32>
        %795 = arith.cmpi sle, %39, %794 : vector<8x64xi32>
        %c-63_i32 = arith.constant -63 : i32
        %796 = vector.broadcast %c-63_i32 : i32 to vector<8x64xi32>
        %797 = arith.cmpi sge, %39, %796 : vector<8x64xi32>
        %798 = arith.andi %795, %797 : vector<8x64xi1>
        %c232 = arith.constant 232 : index
        %799 = memref.load %arg2[%c232] : memref<256xf32, #tpu.memory_space<smem>>
        %800 = vector.broadcast %799 : f32 to vector<8x64xf32>
        %801 = arith.select %798, %800, %772 : vector<8x64xi1>, vector<8x64xf32>
        %c233 = arith.constant 233 : index
        %802 = memref.load %arg2[%c233] : memref<256xf32, #tpu.memory_space<smem>>
        %803 = vector.broadcast %802 : f32 to vector<8x64xf32>
        %804 = arith.select %798, %803, %775 : vector<8x64xi1>, vector<8x64xf32>
        %c234 = arith.constant 234 : index
        %805 = memref.load %arg2[%c234] : memref<256xf32, #tpu.memory_space<smem>>
        %806 = vector.broadcast %805 : f32 to vector<8x64xf32>
        %807 = arith.select %798, %806, %778 : vector<8x64xi1>, vector<8x64xf32>
        %c235 = arith.constant 235 : index
        %808 = memref.load %arg2[%c235] : memref<256xf32, #tpu.memory_space<smem>>
        %809 = vector.broadcast %808 : f32 to vector<8x64xf32>
        %810 = arith.select %798, %809, %781 : vector<8x64xi1>, vector<8x64xf32>
        %c236 = arith.constant 236 : index
        %811 = memref.load %arg2[%c236] : memref<256xf32, #tpu.memory_space<smem>>
        %812 = vector.broadcast %811 : f32 to vector<8x64xf32>
        %813 = arith.select %798, %812, %784 : vector<8x64xi1>, vector<8x64xf32>
        %c237 = arith.constant 237 : index
        %814 = memref.load %arg2[%c237] : memref<256xf32, #tpu.memory_space<smem>>
        %815 = vector.broadcast %814 : f32 to vector<8x64xf32>
        %816 = arith.select %798, %815, %787 : vector<8x64xi1>, vector<8x64xf32>
        %c238 = arith.constant 238 : index
        %817 = memref.load %arg2[%c238] : memref<256xf32, #tpu.memory_space<smem>>
        %818 = vector.broadcast %817 : f32 to vector<8x64xf32>
        %819 = arith.select %798, %818, %790 : vector<8x64xi1>, vector<8x64xf32>
        %c239 = arith.constant 239 : index
        %820 = memref.load %arg2[%c239] : memref<256xf32, #tpu.memory_space<smem>>
        %821 = vector.broadcast %820 : f32 to vector<8x64xf32>
        %822 = arith.select %798, %821, %793 : vector<8x64xi1>, vector<8x64xf32>
        %c-64_i32 = arith.constant -64 : i32
        %823 = vector.broadcast %c-64_i32 : i32 to vector<8x64xi32>
        %824 = arith.cmpi sle, %39, %823 : vector<8x64xi32>
        %c-90_i32 = arith.constant -90 : i32
        %825 = vector.broadcast %c-90_i32 : i32 to vector<8x64xi32>
        %826 = arith.cmpi sge, %39, %825 : vector<8x64xi32>
        %827 = arith.andi %824, %826 : vector<8x64xi1>
        %c240 = arith.constant 240 : index
        %828 = memref.load %arg2[%c240] : memref<256xf32, #tpu.memory_space<smem>>
        %829 = vector.broadcast %828 : f32 to vector<8x64xf32>
        %830 = arith.select %827, %829, %801 : vector<8x64xi1>, vector<8x64xf32>
        %c241 = arith.constant 241 : index
        %831 = memref.load %arg2[%c241] : memref<256xf32, #tpu.memory_space<smem>>
        %832 = vector.broadcast %831 : f32 to vector<8x64xf32>
        %833 = arith.select %827, %832, %804 : vector<8x64xi1>, vector<8x64xf32>
        %c242 = arith.constant 242 : index
        %834 = memref.load %arg2[%c242] : memref<256xf32, #tpu.memory_space<smem>>
        %835 = vector.broadcast %834 : f32 to vector<8x64xf32>
        %836 = arith.select %827, %835, %807 : vector<8x64xi1>, vector<8x64xf32>
        %c243 = arith.constant 243 : index
        %837 = memref.load %arg2[%c243] : memref<256xf32, #tpu.memory_space<smem>>
        %838 = vector.broadcast %837 : f32 to vector<8x64xf32>
        %839 = arith.select %827, %838, %810 : vector<8x64xi1>, vector<8x64xf32>
        %c244 = arith.constant 244 : index
        %840 = memref.load %arg2[%c244] : memref<256xf32, #tpu.memory_space<smem>>
        %841 = vector.broadcast %840 : f32 to vector<8x64xf32>
        %842 = arith.select %827, %841, %813 : vector<8x64xi1>, vector<8x64xf32>
        %c245 = arith.constant 245 : index
        %843 = memref.load %arg2[%c245] : memref<256xf32, #tpu.memory_space<smem>>
        %844 = vector.broadcast %843 : f32 to vector<8x64xf32>
        %845 = arith.select %827, %844, %816 : vector<8x64xi1>, vector<8x64xf32>
        %c246 = arith.constant 246 : index
        %846 = memref.load %arg2[%c246] : memref<256xf32, #tpu.memory_space<smem>>
        %847 = vector.broadcast %846 : f32 to vector<8x64xf32>
        %848 = arith.select %827, %847, %819 : vector<8x64xi1>, vector<8x64xf32>
        %c247 = arith.constant 247 : index
        %849 = memref.load %arg2[%c247] : memref<256xf32, #tpu.memory_space<smem>>
        %850 = vector.broadcast %849 : f32 to vector<8x64xf32>
        %851 = arith.select %827, %850, %822 : vector<8x64xi1>, vector<8x64xf32>
        %c-91_i32_21 = arith.constant -91 : i32
        %852 = vector.broadcast %c-91_i32_21 : i32 to vector<8x64xi32>
        %853 = arith.cmpi sle, %39, %852 : vector<8x64xi32>
        %c248 = arith.constant 248 : index
        %854 = memref.load %arg2[%c248] : memref<256xf32, #tpu.memory_space<smem>>
        %855 = vector.broadcast %854 : f32 to vector<8x64xf32>
        %856 = arith.select %853, %855, %830 : vector<8x64xi1>, vector<8x64xf32>
        %c249 = arith.constant 249 : index
        %857 = memref.load %arg2[%c249] : memref<256xf32, #tpu.memory_space<smem>>
        %858 = vector.broadcast %857 : f32 to vector<8x64xf32>
        %859 = arith.select %853, %858, %833 : vector<8x64xi1>, vector<8x64xf32>
        %c250 = arith.constant 250 : index
        %860 = memref.load %arg2[%c250] : memref<256xf32, #tpu.memory_space<smem>>
        %861 = vector.broadcast %860 : f32 to vector<8x64xf32>
        %862 = arith.select %853, %861, %836 : vector<8x64xi1>, vector<8x64xf32>
        %c251 = arith.constant 251 : index
        %863 = memref.load %arg2[%c251] : memref<256xf32, #tpu.memory_space<smem>>
        %864 = vector.broadcast %863 : f32 to vector<8x64xf32>
        %865 = arith.select %853, %864, %839 : vector<8x64xi1>, vector<8x64xf32>
        %c252 = arith.constant 252 : index
        %866 = memref.load %arg2[%c252] : memref<256xf32, #tpu.memory_space<smem>>
        %867 = vector.broadcast %866 : f32 to vector<8x64xf32>
        %868 = arith.select %853, %867, %842 : vector<8x64xi1>, vector<8x64xf32>
        %c253 = arith.constant 253 : index
        %869 = memref.load %arg2[%c253] : memref<256xf32, #tpu.memory_space<smem>>
        %870 = vector.broadcast %869 : f32 to vector<8x64xf32>
        %871 = arith.select %853, %870, %845 : vector<8x64xi1>, vector<8x64xf32>
        %c254 = arith.constant 254 : index
        %872 = memref.load %arg2[%c254] : memref<256xf32, #tpu.memory_space<smem>>
        %873 = vector.broadcast %872 : f32 to vector<8x64xf32>
        %874 = arith.select %853, %873, %848 : vector<8x64xi1>, vector<8x64xf32>
        %c255 = arith.constant 255 : index
        %875 = memref.load %arg2[%c255] : memref<256xf32, #tpu.memory_space<smem>>
        %876 = vector.broadcast %875 : f32 to vector<8x64xf32>
        %877 = arith.select %853, %876, %851 : vector<8x64xi1>, vector<8x64xf32>
        %c0_22 = arith.constant 0 : index
        %878 = arith.index_cast %36 : i32 to index
        %c0_23 = arith.constant 0 : index
        %879 = vector.load %arg3[%c0_22, %878, %c0_23] : memref<8x32x64xf32, #tpu.memory_space<vmem>>, vector<1x8x64xf32>
        %880 = vector.shape_cast %879 : vector<1x8x64xf32> to vector<8x64xf32>
        %881 = vector.shape_cast %856 : vector<8x64xf32> to vector<1x8x64xf32>
        tpu.vector_store %arg3[%c0_22, %878, %c0_23], %881 {strides = array<i32>} : memref<8x32x64xf32, #tpu.memory_space<vmem>>, vector<1x8x64xf32>,
        %c1_24 = arith.constant 1 : index
        %882 = arith.index_cast %36 : i32 to index
        %c0_25 = arith.constant 0 : index
        %883 = vector.load %arg3[%c1_24, %882, %c0_25] : memref<8x32x64xf32, #tpu.memory_space<vmem>>, vector<1x8x64xf32>
        %884 = vector.shape_cast %883 : vector<1x8x64xf32> to vector<8x64xf32>
        %885 = vector.shape_cast %859 : vector<8x64xf32> to vector<1x8x64xf32>
        tpu.vector_store %arg3[%c1_24, %882, %c0_25], %885 {strides = array<i32>} : memref<8x32x64xf32, #tpu.memory_space<vmem>>, vector<1x8x64xf32>,
        %c2_26 = arith.constant 2 : index
        %886 = arith.index_cast %36 : i32 to index
        %c0_27 = arith.constant 0 : index
        %887 = vector.load %arg3[%c2_26, %886, %c0_27] : memref<8x32x64xf32, #tpu.memory_space<vmem>>, vector<1x8x64xf32>
        %888 = vector.shape_cast %887 : vector<1x8x64xf32> to vector<8x64xf32>
        %889 = vector.shape_cast %862 : vector<8x64xf32> to vector<1x8x64xf32>
        tpu.vector_store %arg3[%c2_26, %886, %c0_27], %889 {strides = array<i32>} : memref<8x32x64xf32, #tpu.memory_space<vmem>>, vector<1x8x64xf32>,
        %c3_28 = arith.constant 3 : index
        %890 = arith.index_cast %36 : i32 to index
        %c0_29 = arith.constant 0 : index
        %891 = vector.load %arg3[%c3_28, %890, %c0_29] : memref<8x32x64xf32, #tpu.memory_space<vmem>>, vector<1x8x64xf32>
        %892 = vector.shape_cast %891 : vector<1x8x64xf32> to vector<8x64xf32>
        %893 = vector.shape_cast %865 : vector<8x64xf32> to vector<1x8x64xf32>
        tpu.vector_store %arg3[%c3_28, %890, %c0_29], %893 {strides = array<i32>} : memref<8x32x64xf32, #tpu.memory_space<vmem>>, vector<1x8x64xf32>,
        %c4_30 = arith.constant 4 : index
        %894 = arith.index_cast %36 : i32 to index
        %c0_31 = arith.constant 0 : index
        %895 = vector.load %arg3[%c4_30, %894, %c0_31] : memref<8x32x64xf32, #tpu.memory_space<vmem>>, vector<1x8x64xf32>
        %896 = vector.shape_cast %895 : vector<1x8x64xf32> to vector<8x64xf32>
        %897 = vector.shape_cast %868 : vector<8x64xf32> to vector<1x8x64xf32>
        tpu.vector_store %arg3[%c4_30, %894, %c0_31], %897 {strides = array<i32>} : memref<8x32x64xf32, #tpu.memory_space<vmem>>, vector<1x8x64xf32>,
        %c5_32 = arith.constant 5 : index
        %898 = arith.index_cast %36 : i32 to index
        %c0_33 = arith.constant 0 : index
        %899 = vector.load %arg3[%c5_32, %898, %c0_33] : memref<8x32x64xf32, #tpu.memory_space<vmem>>, vector<1x8x64xf32>
        %900 = vector.shape_cast %899 : vector<1x8x64xf32> to vector<8x64xf32>
        %901 = vector.shape_cast %871 : vector<8x64xf32> to vector<1x8x64xf32>
        tpu.vector_store %arg3[%c5_32, %898, %c0_33], %901 {strides = array<i32>} : memref<8x32x64xf32, #tpu.memory_space<vmem>>, vector<1x8x64xf32>,
        %c6_34 = arith.constant 6 : index
        %902 = arith.index_cast %36 : i32 to index
        %c0_35 = arith.constant 0 : index
        %903 = vector.load %arg3[%c6_34, %902, %c0_35] : memref<8x32x64xf32, #tpu.memory_space<vmem>>, vector<1x8x64xf32>
        %904 = vector.shape_cast %903 : vector<1x8x64xf32> to vector<8x64xf32>
        %905 = vector.shape_cast %874 : vector<8x64xf32> to vector<1x8x64xf32>
        tpu.vector_store %arg3[%c6_34, %902, %c0_35], %905 {strides = array<i32>} : memref<8x32x64xf32, #tpu.memory_space<vmem>>, vector<1x8x64xf32>,
        %c7_36 = arith.constant 7 : index
        %906 = arith.index_cast %36 : i32 to index
        %c0_37 = arith.constant 0 : index
        %907 = vector.load %arg3[%c7_36, %906, %c0_37] : memref<8x32x64xf32, #tpu.memory_space<vmem>>, vector<1x8x64xf32>
        %908 = vector.shape_cast %907 : vector<1x8x64xf32> to vector<8x64xf32>
        %909 = vector.shape_cast %877 : vector<8x64xf32> to vector<1x8x64xf32>
        tpu.vector_store %arg3[%c7_36, %906, %c0_37], %909 {strides = array<i32>} : memref<8x32x64xf32, #tpu.memory_space<vmem>>, vector<1x8x64xf32>,
      }
      %c4_i32_10 = arith.constant 4 : i32
    } else {
    }
    return
  }
  func.func @transform_0(%arg0: i32, %arg1: i32) -> i32 {
    %c0_i32 = arith.constant 0 : i32
    %c0_i32_0 = arith.constant 0 : i32
    return %c0_i32 : i32
  }
  func.func @transform_1(%arg0: i32, %arg1: i32) -> (i32, i32, i32) {
    %c0_i32 = arith.constant 0 : i32
    %c0_i32_0 = arith.constant 0 : i32
    return %c0_i32, %arg0, %arg1 : i32, i32, i32
  }
}

</mosaic_0001>

<bundles_post_ra>
// kernel: relative_position_bias.1
= control target key start
LH: loop header
LB: loop body
LE: loop exit
PB: predicated region body
PF: predicated region fallthrough
CT: control target
= control target key end

     0   :  { %s5444_s0 = inlined_call_operand.vmem [shape: f32[256], index: 0, kind: input, shape index: {}]   ;;  %s5445_s1 = inlined_call_operand.hbm [shape: f32[8,64,64], index: 1, kind: output, shape index: {}]  }
   0x1   :  { %5468 = sst [smem:[#allocation122_spill]] %s5444_s0 }
   0x2   :  { %5469 = sst [smem:[#allocation123_spill]] %s5445_s1 }
   0x3   :  { %6 = vsyncpa [#allocation4], 0 }
   0x4   :  { %7 = vsyncpa [#allocation3], 0 }
   0x5   :  { %9 = vsyncpa [#allocation3 + $0x1], 0  ;;  %s3039_s6 = smov 0   ;;  %s3041_s7 = smov 0  }
   0x6   :  { %s3043_s8 = smov 0   ;;  %s3045_s9 = smov 0  }
   0x7   :  { %s3047_s10 = smov 0   ;;  %s3049_s11 = smov 0  }
   0x8 LB: > { %5470 = sst [smem:[#allocation10_spill]] %s2987_s6  ;;  %s2188_s12 = sadd.s32 4294967295, %s3007_s11   ;;  %s3007_s11 = sphi %s3049_s11, %s15_s11   ;;  %s3003_s10 = sphi %s3047_s10, %s5877_s10   ;;  %s2999_s9 = sphi %s3045_s9, %s5876_s9   ;;  %s2995_s8 = sphi %s3043_s8, %s5875_s8   ;;  %s2991_s7 = sphi %s3041_s7, %s5874_s7   ;;  %s2987_s6 = sphi %s3039_s6, %s5873_s6  }
   0x9   : > { %5471 = sst [smem:[#allocation11_spill]] %s2991_s7  ;;  %s2189_s13 = sadd.s32 4294967294, %s3007_s11  }
   0xa   : > { %5472 = sst [smem:[#allocation12_spill]] %s2995_s8  ;;  %s27_s14 = sadd.s32 1, %s3003_s10 }
   0xb   : > { %5473 = sst [smem:[#allocation13_spill]] %s3003_s10  ;;  %s57_s15 = sadd.s32 1, %s2995_s8 }
   0xc   : > { %5474 = sst [smem:[#allocation14_spill]] %s3007_s11  ;;  %p29_p0 = scmp.ge.s32.totalorder %s27_s14, 2 }
   0xd   : > { %p67_p1 = scmp.ne.s32.totalorder %s2995_s8, %s2991_s7  ;;  %p68_p2 = scmp.eq.s32.totalorder %s2188_s12, 1 }
   0xe   : > { %p73_p3 = scmp.ne.s32.totalorder %s2991_s7, %s2987_s6  ;;  %s5879_s14 = smov (%p29_p0, %s27_s14), 0 }
   0xf   : > { %5475 = sst [smem:[#allocation15_spill]] %s5879_s14  ;;  %p3079_p4 = por %p68_p2, %p67_p1 }
  0x10   : > { %p74_p5 = scmp.eq.s32.totalorder %s2189_s13, 1  ;;  %s52_s17 = ssub.s32 %s3003_s10, %s5879_s14 }
  0x11   : > { %s5476_s16 = scalar_select %p3079_p4, 1, 0 }
  0x12   : > { %p2190_p6 = scmp.ge.s32.totalorder %s3007_s11, 1  ;;  %p55_p7 = scmp.eq.s32.totalorder %s52_s17, 0 }
  0x13   : > { %5477 = sst [smem:[#allocation16_spill]] %s5476_s16  ;;  %p3086_p8 = por %p74_p5, %p73_p3 }
  0x14   : > { %p81_p9 = scmp.lt.s32.totalorder %s3007_s11, 3  ;;  %p2843_p11 = scmp.eq.s32.totalorder %s2188_s12, 0 }
  0x15   : > { %s5478_s18 = scalar_select %p3086_p8, 1, 0 }
  0x16   : > { %s3092_s19 = scalar_select %p55_p7, %s2995_s8, %s57_s15  }
  0x17   : > { %5479 = sst [smem:[#allocation17_spill]] %s5478_s18  ;;  %p82_p10 = pnand %p2190_p6, %p81_p9 }
  0x18   : > { %5480 = sst [smem:[#allocation18_spill]] %s3092_s19  ;;  %s3021_s23 = smov [#allocation2]  }
  0x19   : > { %s5481_s0 = sld [smem:[#allocation122_spill]]  ;;  %p2835_p12 = pneg %p82_p10 }
  0x1b   : > { %p2836_p13 = pnand %p2843_p11, %p2835_p12 }
  0x1c   : > { %106 = sbr.rel (%p82_p10) target bundleno = 1033 (0x409), region = 24 }
  0x1f   : > { %s93_s22 = sshll.u32 %s5481_s0, 4  ;;  %s94_s22 = int_to_ptr.vmem [resolvable:$true] %s93_s22 }
  0x20   : > { %2838 = dma.vmem_to_smem (!%p2836_p13), %s94_s22, 32, %s3021_s23, [#allocation4]  }
  0x21   : > { %2978 = dma.done.wait (%p2843_p11), [#allocation4], 32  }
  0x22   : > { %2980 = vsyncadd (%p2843_p11), [#allocation4], 4294967264 }
  0x23   : > { %113 = sfence }
  0x24   : > { %s5452_s24 = sand.u32 1, %s2991_s7   ;;  %s3099_s25 = sshll.u32 %s2999_s9, 5 }
  0x25   : > { %5482 = sst [smem:[#allocation19_spill]] %s3099_s25  ;;  %s2194_s26 = sshll.u32 %s5452_s24, 8 }
  0x26   : > { %s3104_s27 = sadd.s32 4294967233, %s3099_s25  ;;  %s3107_s28 = sadd.s32 31, %s3099_s25 }
  0x27   : > { %p129_p0 = scmp.ge.s32.totalorder %s3104_s27, 91  ;;  %p130_p1 = scmp.le.s32.totalorder %s3107_s28, 4294967205 }
  0x28   : > { %s3111_s29 = scalar_lea.vmem [#allocation5], %s2194_s26  ;;  %p2197_p2 = scmp.lt.s32.totalorder %s3104_s27, 91 }
  0x29   : > { %5483 = sst [smem:[#allocation20_spill]] %s3111_s29 }
  0x2a   : > { %133 = sbr.rel (%p2197_p2) target bundleno = 81 (0x51), region = 32  ;;  %s2198_s30 = sld [smem:[#allocation2 + $0x78]] (!%p2197_p2) }
  0x2b   : > { %s2199_s2 = sld [smem:[#allocation2 + $0x79]] (!%p2197_p2) }
  0x2c   : > { %s2204_s3 = sld [smem:[#allocation2 + $0x7a]] (!%p2197_p2) }
  0x2d   : > { %s2209_s4 = sld [smem:[#allocation2 + $0x7b]] (!%p2197_p2) }
  0x2e   : > { %s2214_s5 = sld [smem:[#allocation2 + $0x7c]] (!%p2197_p2) }
  0x2f   : > { %vm136_vm0 = vcmask 523264   ;;  %s2219_s9 = sld [smem:[#allocation2 + $0x7d]] }
  0x30   : > { %v135_v0 = vstv %s2198_s30  ;;  %s2224_s12 = sld [smem:[#allocation2 + $0x7e]] }
  0x31   : > { %137 = vst.msk [vmem:[%s3111_s29] sm:$0xff] %vm136_vm0, %v135_v0  ;;  %v142_v1 = vstv %s2199_s2  ;;  %s2229_s13 = sld [smem:[#allocation2 + $0x7f]] }
  0x32   : > { %138 = vst.msk [vmem:[%s3111_s29 + $0x8] sm:$0xff] %vm136_vm0, %v135_v0  ;;  %v149_v2 = vstv %s2204_s3 }
  0x33   : > { %139 = vst.msk [vmem:[%s3111_s29 + $0x10] sm:$0xff] %vm136_vm0, %v135_v0  ;;  %v156_v3 = vstv %s2209_s4 }
  0x34   : > { %140 = vst.msk [vmem:[%s3111_s29 + $0x18] sm:$0xff] %vm136_vm0, %v135_v0  ;;  %v163_v4 = vstv %s2214_s5 }
  0x35   : > { %2200 = vst.msk [vmem:[%s3111_s29 + $0x20] sm:$0xff] %vm136_vm0, %v142_v1  ;;  %v170_v5 = vstv %s2219_s9 }
  0x36   : > { %2201 = vst.msk [vmem:[%s3111_s29 + $0x28] sm:$0xff] %vm136_vm0, %v142_v1  ;;  %v177_v6 = vstv %s2224_s12 }
  0x37   : > { %2202 = vst.msk [vmem:[%s3111_s29 + $0x30] sm:$0xff] %vm136_vm0, %v142_v1  ;;  %v184_v7 = vstv %s2229_s13 }
  0x38   : > { %2203 = vst.msk [vmem:[%s3111_s29 + $0x38] sm:$0xff] %vm136_vm0, %v142_v1 }
  0x39   : > { %2205 = vst.msk [vmem:[%s3111_s29 + $0x40] sm:$0xff] %vm136_vm0, %v149_v2 }
  0x3a   : > { %2206 = vst.msk [vmem:[%s3111_s29 + $0x48] sm:$0xff] %vm136_vm0, %v149_v2 }
  0x3b   : > { %2207 = vst.msk [vmem:[%s3111_s29 + $0x50] sm:$0xff] %vm136_vm0, %v149_v2 }
  0x3c   : > { %2208 = vst.msk [vmem:[%s3111_s29 + $0x58] sm:$0xff] %vm136_vm0, %v149_v2 }
  0x3d   : > { %2210 = vst.msk [vmem:[%s3111_s29 + $0x60] sm:$0xff] %vm136_vm0, %v156_v3 }
  0x3e   : > { %2211 = vst.msk [vmem:[%s3111_s29 + $0x68] sm:$0xff] %vm136_vm0, %v156_v3 }
  0x3f   : > { %2212 = vst.msk [vmem:[%s3111_s29 + $0x70] sm:$0xff] %vm136_vm0, %v156_v3 }
  0x40   : > { %2213 = vst.msk [vmem:[%s3111_s29 + $0x78] sm:$0xff] %vm136_vm0, %v156_v3 }
  0x41   : > { %2215 = vst.msk [vmem:[%s3111_s29 + $0x80] sm:$0xff] %vm136_vm0, %v163_v4 }
  0x42   : > { %2216 = vst.msk [vmem:[%s3111_s29 + $0x88] sm:$0xff] %vm136_vm0, %v163_v4 }
  0x43   : > { %2217 = vst.msk [vmem:[%s3111_s29 + $0x90] sm:$0xff] %vm136_vm0, %v163_v4 }
  0x44   : > { %2218 = vst.msk [vmem:[%s3111_s29 + $0x98] sm:$0xff] %vm136_vm0, %v163_v4 }
  0x45   : > { %2220 = vst.msk [vmem:[%s3111_s29 + $0xa0] sm:$0xff] %vm136_vm0, %v170_v5 }
  0x46   : > { %2221 = vst.msk [vmem:[%s3111_s29 + $0xa8] sm:$0xff] %vm136_vm0, %v170_v5 }
  0x47   : > { %2222 = vst.msk [vmem:[%s3111_s29 + $0xb0] sm:$0xff] %vm136_vm0, %v170_v5 }
  0x48   : > { %2223 = vst.msk [vmem:[%s3111_s29 + $0xb8] sm:$0xff] %vm136_vm0, %v170_v5 }
  0x49   : > { %2225 = vst.msk [vmem:[%s3111_s29 + $0xc0] sm:$0xff] %vm136_vm0, %v177_v6 }
  0x4a   : > { %2226 = vst.msk [vmem:[%s3111_s29 + $0xc8] sm:$0xff] %vm136_vm0, %v177_v6 }
  0x4b   : > { %2227 = vst.msk [vmem:[%s3111_s29 + $0xd0] sm:$0xff] %vm136_vm0, %v177_v6 }
  0x4c   : > { %2228 = vst.msk [vmem:[%s3111_s29 + $0xd8] sm:$0xff] %vm136_vm0, %v177_v6 }
  0x4d   : > { %2230 = vst.msk [vmem:[%s3111_s29 + $0xe0] sm:$0xff] %vm136_vm0, %v184_v7 }
  0x4e   : > { %2231 = vst.msk [vmem:[%s3111_s29 + $0xe8] sm:$0xff] %vm136_vm0, %v184_v7 }
  0x4f   : > { %2232 = vst.msk [vmem:[%s3111_s29 + $0xf0] sm:$0xff] %vm136_vm0, %v184_v7 }
  0x50   : > { %2233 = vst.msk [vmem:[%s3111_s29 + $0xf8] sm:$0xff] %vm136_vm0, %v184_v7 }
  0x51 PF: > { %p2234_p3 = scmp.gt.s32.totalorder %s3107_s28, 4294967205 }
  0x52   : > { %s2235_s15 = sld [smem:[#allocation2 + $0xf8]] (!%p2234_p3) }
  0x53   : > { %192 = sbr.rel (%p2234_p3) target bundleno = 121 (0x79), region = 36  ;;  %s2236_s17 = sld [smem:[#allocation2 + $0xf9]] (!%p2234_p3) }
  0x54   : > { %s2241_s20 = sld [smem:[#allocation2 + $0xfa]] (!%p2234_p3) }
  0x55   : > { %s2246_s21 = sld [smem:[#allocation2 + $0xfb]] (!%p2234_p3) }
  0x56   : > { %s2251_s22 = sld [smem:[#allocation2 + $0xfc]] (!%p2234_p3) }
  0x57   : > { %s2256_s23 = sld [smem:[#allocation2 + $0xfd]] (!%p2234_p3) }
  0x58   : > { %vm195_vm1 = vcmask 523264   ;;  %v194_v8 = vstv %s2235_s15  ;;  %s2261_s26 = sld [smem:[#allocation2 + $0xfe]] }
  0x59   : > { %196 = vst.msk [vmem:[%s3111_s29] sm:$0xff] %vm195_vm1, %v194_v8  ;;  %v201_v9 = vstv %s2236_s17  ;;  %s2266_s30 = sld [smem:[#allocation2 + $0xff]] }
  0x5a   : > { %197 = vst.msk [vmem:[%s3111_s29 + $0x8] sm:$0xff] %vm195_vm1, %v194_v8  ;;  %v208_v10 = vstv %s2241_s20 }
  0x5b   : > { %198 = vst.msk [vmem:[%s3111_s29 + $0x10] sm:$0xff] %vm195_vm1, %v194_v8  ;;  %v215_v11 = vstv %s2246_s21 }
  0x5c   : > { %199 = vst.msk [vmem:[%s3111_s29 + $0x18] sm:$0xff] %vm195_vm1, %v194_v8  ;;  %v222_v12 = vstv %s2251_s22 }
  0x5d   : > { %2237 = vst.msk [vmem:[%s3111_s29 + $0x20] sm:$0xff] %vm195_vm1, %v201_v9  ;;  %v229_v13 = vstv %s2256_s23 }
  0x5e   : > { %2238 = vst.msk [vmem:[%s3111_s29 + $0x28] sm:$0xff] %vm195_vm1, %v201_v9  ;;  %v236_v14 = vstv %s2261_s26 }
  0x5f   : > { %2239 = vst.msk [vmem:[%s3111_s29 + $0x30] sm:$0xff] %vm195_vm1, %v201_v9  ;;  %v243_v15 = vstv %s2266_s30 }
  0x60   : > { %2240 = vst.msk [vmem:[%s3111_s29 + $0x38] sm:$0xff] %vm195_vm1, %v201_v9 }
  0x61   : > { %2242 = vst.msk [vmem:[%s3111_s29 + $0x40] sm:$0xff] %vm195_vm1, %v208_v10 }
  0x62   : > { %2243 = vst.msk [vmem:[%s3111_s29 + $0x48] sm:$0xff] %vm195_vm1, %v208_v10 }
  0x63   : > { %2244 = vst.msk [vmem:[%s3111_s29 + $0x50] sm:$0xff] %vm195_vm1, %v208_v10 }
  0x64   : > { %2245 = vst.msk [vmem:[%s3111_s29 + $0x58] sm:$0xff] %vm195_vm1, %v208_v10 }
  0x65   : > { %2247 = vst.msk [vmem:[%s3111_s29 + $0x60] sm:$0xff] %vm195_vm1, %v215_v11 }
  0x66   : > { %2248 = vst.msk [vmem:[%s3111_s29 + $0x68] sm:$0xff] %vm195_vm1, %v215_v11 }
  0x67   : > { %2249 = vst.msk [vmem:[%s3111_s29 + $0x70] sm:$0xff] %vm195_vm1, %v215_v11 }
  0x68   : > { %2250 = vst.msk [vmem:[%s3111_s29 + $0x78] sm:$0xff] %vm195_vm1, %v215_v11 }
  0x69   : > { %2252 = vst.msk [vmem:[%s3111_s29 + $0x80] sm:$0xff] %vm195_vm1, %v222_v12 }
  0x6a   : > { %2253 = vst.msk [vmem:[%s3111_s29 + $0x88] sm:$0xff] %vm195_vm1, %v222_v12 }
  0x6b   : > { %2254 = vst.msk [vmem:[%s3111_s29 + $0x90] sm:$0xff] %vm195_vm1, %v222_v12 }
  0x6c   : > { %2255 = vst.msk [vmem:[%s3111_s29 + $0x98] sm:$0xff] %vm195_vm1, %v222_v12 }
  0x6d   : > { %2257 = vst.msk [vmem:[%s3111_s29 + $0xa0] sm:$0xff] %vm195_vm1, %v229_v13 }
  0x6e   : > { %2258 = vst.msk [vmem:[%s3111_s29 + $0xa8] sm:$0xff] %vm195_vm1, %v229_v13 }
  0x6f   : > { %2259 = vst.msk [vmem:[%s3111_s29 + $0xb0] sm:$0xff] %vm195_vm1, %v229_v13 }
  0x70   : > { %2260 = vst.msk [vmem:[%s3111_s29 + $0xb8] sm:$0xff] %vm195_vm1, %v229_v13 }
  0x71   : > { %2262 = vst.msk [vmem:[%s3111_s29 + $0xc0] sm:$0xff] %vm195_vm1, %v236_v14 }
  0x72   : > { %2263 = vst.msk [vmem:[%s3111_s29 + $0xc8] sm:$0xff] %vm195_vm1, %v236_v14 }
  0x73   : > { %2264 = vst.msk [vmem:[%s3111_s29 + $0xd0] sm:$0xff] %vm195_vm1, %v236_v14 }
  0x74   : > { %2265 = vst.msk [vmem:[%s3111_s29 + $0xd8] sm:$0xff] %vm195_vm1, %v236_v14 }
  0x75   : > { %2267 = vst.msk [vmem:[%s3111_s29 + $0xe0] sm:$0xff] %vm195_vm1, %v243_v15 }
  0x76   : > { %2268 = vst.msk [vmem:[%s3111_s29 + $0xe8] sm:$0xff] %vm195_vm1, %v243_v15 }
  0x77   : > { %2269 = vst.msk [vmem:[%s3111_s29 + $0xf0] sm:$0xff] %vm195_vm1, %v243_v15 }
  0x78   : > { %2270 = vst.msk [vmem:[%s3111_s29 + $0xf8] sm:$0xff] %vm195_vm1, %v243_v15 }
  0x79 PF: > { %p3247_p5 = por %p130_p1, %p129_p0  ;;  %p251_p6 = scmp.ge.s32.totalorder %s3104_s27, 0 }
  0x7b   : > { %p250_p7 = pneg %p3247_p5 }
  0x7d   : > { %p252_p9 = pnand %p251_p6, %p250_p7 }
  0x7e   : > { %s3263_s3 = smov (!%p252_p9), 0  }
  0x7f   : > { %255 = sbr.rel (%p252_p9) target bundleno = 273 (0x111), region = 40 }
  0x84   : > { %v256_v16 = vlaneseq }
  0x86   : > { %v3257_v17 = vshrl.u32 %v256_v16, 7  ;;  %v3259_v18 = vand.u32 127, %v256_v16 }
  0x88   : > { %v260_v19 = vsub.s32 %v3257_v17, %v3259_v18 }
  0x89 LB: >> { %s271_s4 = sld [smem:[#allocation2]]  ;;  %s2271_s9 = sshll.u32 %s3011_s3, 3  ;;  %s3011_s3 = sphi %s3263_s3, %s266_s3  }
  0x8a   : >> { %s2279_s5 = sld [smem:[#allocation2 + $0x8]]  ;;  %s268_s13 = sadd.s32 %s2271_s9, %s3099_s25 }
  0x8b   : >> { %s2287_s12 = sld [smem:[#allocation2 + $0x10]]  ;;  %v269_v20 = vstv %s268_s13  ;;  %s266_s3 = sadd.s32 1, %s3011_s3  }
  0x8c   : >> { %s2295_s15 = sld [smem:[#allocation2 + $0x18]]  ;;  %v3275_v21 = vadd.s32 %v269_v20, %v260_v19  ;;  %p263_p10 = scmp.ge.s32.totalorder %s266_s3, 4  }
  0x8d   : >> { %s2303_s17 = sld [smem:[#allocation2 + $0x20]] }
  0x8e   : >> { %s2311_s20 = sld [smem:[#allocation2 + $0x28]]  ;;  %vm287_vm2 = vcmp.eq.s32.totalorder %v3275_v21, 1  ;;  %vm312_vm3 = vcmp.eq.s32.totalorder %v3275_v21, 2  ;;  %vm337_vm4 = vcmp.eq.s32.totalorder %v3275_v21, 3  ;;  %vm362_vm5 = vcmp.eq.s32.totalorder %v3275_v21, 4 }
  0x8f   : >> { %v272_v22 = vstv %s271_s4  ;;  %s3277_s21 = sld [smem:[#allocation2 + $0x30]]  ;;  %vm5448_vm6 = vcmp.eq.s32.totalorder %v3275_v21, 5  ;;  %vm5446_vm7 = vcmp.eq.s32.totalorder %v3275_v21, 6  ;;  %vm5447_vm8 = vcmp.eq.s32.totalorder %v3275_v21, 7 }
  0x90   : >> { %v289_v23 = vstv %s2279_s5  ;;  %s3282_s22 = sld [smem:[#allocation2 + $0x38]]  ;;  %vm462_vm9 = vcmp.ge.s32.totalorder %v3275_v21, 8  ;;  %vm463_vm10 = vcmp.le.s32.totalorder %v3275_v21, 11  ;;  %vm489_vm11 = vcmp.ge.s32.totalorder %v3275_v21, 12 }
  0x91   : >> { %v290_v24 = vsel %vm287_vm2, %v289_v23, %v272_v22  ;;  %v314_v25 = vstv %s2287_s12  ;;  %s3288_s23 = sld [smem:[#allocation2 + $0x40]]  ;;  %vm490_vm12 = vcmp.le.s32.totalorder %v3275_v21, 15  ;;  %vm3311_vm13 = vmand %vm462_vm9, %vm463_vm10  ;;  %vm516_vm14 = vcmp.ge.s32.totalorder %v3275_v21, 16 }
  0x92   : >> { %v315_v26 = vsel %vm312_vm3, %v314_v25, %v290_v24  ;;  %v339_v27 = vstv %s2295_s15  ;;  %s3294_s26 = sld [smem:[#allocation2 + $0x48]]  ;;  %vm517_vm15 = vcmp.le.s32.totalorder %v3275_v21, 22  ;;  %vm3322_vm0 = vmand %vm489_vm11, %vm490_vm12  ;;  %vm543_vm1 = vcmp.ge.s32.totalorder %v3275_v21, 23 }
  0x93   : >> { %v340_v28 = vsel %vm337_vm4, %v339_v27, %v315_v26  ;;  %v364_v29 = vstv %s2303_s17  ;;  %s3300_s30 = sld [smem:[#allocation2 + $0x50]]  ;;  %vm544_vm9 = vcmp.le.s32.totalorder %v3275_v21, 31  ;;  %vm3333_vm10 = vmand %vm516_vm14, %vm517_vm15  ;;  %vm570_vm11 = vcmp.ge.s32.totalorder %v3275_v21, 32 }
  0x94   : >> { %v365_v30 = vsel %vm362_vm5, %v364_v29, %v340_v28  ;;  %v389_v31 = vstv %s2311_s20  ;;  %s3306_s4 = sld [smem:[#allocation2 + $0x58]]  ;;  %vm571_vm12 = vcmp.le.s32.totalorder %v3275_v21, 45  ;;  %vm597_vm14 = vcmp.ge.s32.totalorder %v3275_v21, 46 }
  0x95   : >> { %v390_v32 = vsel %vm5448_vm6, %v389_v31, %v365_v30  ;;  %v414_v33 = vstv %s3277_s21  ;;  %s3317_s5 = sld [smem:[#allocation2 + $0x60]]  ;;  %vm598_vm15 = vcmp.le.s32.totalorder %v3275_v21, 63  ;;  %vm624_vm6 = vcmp.ge.s32.totalorder %v3275_v21, 64 }
  0x96   : >> { %v415_v35 = vsel %vm5446_vm7, %v414_v33, %v390_v32  ;;  %v439_v36 = vstv %s3282_s22  ;;  %s3328_s12 = sld [smem:[#allocation2 + $0x68]]  ;;  %vm3342_vm7 = vmand %vm543_vm1, %vm544_vm9  ;;  %vm625_vm1 = vcmp.le.s32.totalorder %v3275_v21, 90 }
  0x97   : >> { %v440_v38 = vsel %vm5447_vm8, %v439_v36, %v415_v35  ;;  %v466_v39 = vstv %s3288_s23  ;;  %s2383_s13 = sld [smem:[#allocation2 + $0x70]]  ;;  %vm3351_vm8 = vmand %vm570_vm11, %vm571_vm12  ;;  %vm651_vm12 = vcmp.ge.s32.totalorder %v3275_v21, 91  ;;  %s3380_s23 = scalar_lea.vmem %s3111_s29, %s2271_s9 [#allocation5] }
  0x98   : >> { %v467_v41 = vsel %vm3311_vm13, %v466_v39, %v440_v38  ;;  %v493_v42 = vstv %s3294_s26  ;;  %s2391_s15 = sld [smem:[#allocation2 + $0x78]]  ;;  %vm3360_vm9 = vmand %vm597_vm14, %vm598_vm15  ;;  %vm5499_vm14 = vcmp.eq.s32.totalorder %v3275_v21, 5  ;;  %vm5500_vm15 = vcmp.eq.s32.totalorder %v3275_v21, 6 }
  0x99   : >> { %v494_v44 = vsel %vm3322_vm0, %v493_v42, %v467_v41  ;;  %v520_v45 = vstv %s3300_s30  ;;  %s2272_s17 = sld [smem:[#allocation2 + $0x1]]  ;;  %vm3367_vm11 = vmand %vm624_vm6, %vm625_vm1  ;;  %vm677_vm6 = vcmask 523264   ;;  %vm5501_vm1 = vcmp.eq.s32.totalorder %v3275_v21, 7 }
  0x9a   : >> { %v521_v47 = vsel %vm3333_vm10, %v520_v45, %v494_v44  ;;  %v547_v48 = vstv %s3306_s4  ;;  %s2280_s20 = sld [smem:[#allocation2 + $0x9]] }
  0x9b   : >> { %v548_v50 = vsel %vm3342_vm7, %v547_v48, %v521_v47  ;;  %v574_v51 = vstv %s3317_s5  ;;  %s2288_s21 = sld [smem:[#allocation2 + $0x11]] }
  0x9c   : >> { %v575_v53 = vsel %vm3351_vm8, %v574_v51, %v548_v50  ;;  %v601_v54 = vstv %s3328_s12  ;;  %s2296_s22 = sld [smem:[#allocation2 + $0x19]] }
  0x9d   : >> { %v602_v55 = vsel %vm3360_vm9, %v601_v54, %v575_v53  ;;  %v628_v56 = vstv %s2383_s13  ;;  %s2304_s26 = sld [smem:[#allocation2 + $0x21]] }
  0x9e   : >> { %v629_v57 = vsel %vm3367_vm11, %v628_v56, %v602_v55  ;;  %v653_v58 = vstv %s2391_s15  ;;  %s2312_s30 = sld [smem:[#allocation2 + $0x29]] }
  0x9f   : >> { %v654_v59 = vsel %vm651_vm12, %v653_v58, %v629_v57  ;;  %v274_v60 = vstv %s2272_s17  ;;  %s2320_s4 = sld [smem:[#allocation2 + $0x31]] }
  0xa0   : >> { %678 = vst.msk [vmem:[%s3380_s23] sm:$0xff] %vm677_vm6, %v654_v59  ;;  %v292_v61 = vstv %s2280_s20  ;;  %s2328_s5 = sld [smem:[#allocation2 + $0x39]] }
  0xa1   : >> { %v293_v62 = vsel %vm287_vm2, %v292_v61, %v274_v60  ;;  %v317_v63 = vstv %s2288_s21  ;;  %s2336_s9 = sld [smem:[#allocation2 + $0x41]] }
  0xa2   : >> { %v318_v0 = vsel %vm312_vm3, %v317_v63, %v293_v62  ;;  %v342_v1 = vstv %s2296_s22  ;;  %s2344_s12 = sld [smem:[#allocation2 + $0x49]] }
  0xa3   : >> { %v343_v2 = vsel %vm337_vm4, %v342_v1, %v318_v0  ;;  %v367_v3 = vstv %s2304_s26  ;;  %s2352_s13 = sld [smem:[#allocation2 + $0x51]] }
  0xa4   : >> { %v368_v4 = vsel %vm362_vm5, %v367_v3, %v343_v2  ;;  %v392_v5 = vstv %s2312_s30  ;;  %s2360_s15 = sld [smem:[#allocation2 + $0x59]] }
  0xa5   : >> { %v393_v6 = vsel %vm5499_vm14, %v392_v5, %v368_v4  ;;  %v417_v7 = vstv %s2320_s4  ;;  %s2368_s17 = sld [smem:[#allocation2 + $0x61]] }
  0xa6   : >> { %v418_v8 = vsel %vm5500_vm15, %v417_v7, %v393_v6  ;;  %v442_v9 = vstv %s2328_s5  ;;  %s2376_s20 = sld [smem:[#allocation2 + $0x69]] }
  0xa7   : >> { %v443_v10 = vsel %vm5501_vm1, %v442_v9, %v418_v8  ;;  %v469_v11 = vstv %s2336_s9  ;;  %s2384_s21 = sld [smem:[#allocation2 + $0x71]] }
  0xa8   : >> { %v470_v12 = vsel %vm3311_vm13, %v469_v11, %v443_v10  ;;  %v496_v13 = vstv %s2344_s12  ;;  %s2392_s22 = sld [smem:[#allocation2 + $0x79]] }
  0xa9   : >> { %v497_v14 = vsel %vm3322_vm0, %v496_v13, %v470_v12  ;;  %v523_v15 = vstv %s2352_s13  ;;  %s2273_s26 = sld [smem:[#allocation2 + $0x2]] }
  0xaa   : >> { %v524_v16 = vsel %vm3333_vm10, %v523_v15, %v497_v14  ;;  %v550_v20 = vstv %s2360_s15  ;;  %s2281_s30 = sld [smem:[#allocation2 + $0xa]] }
  0xab   : >> { %v551_v22 = vsel %vm3342_vm7, %v550_v20, %v524_v16  ;;  %v577_v23 = vstv %s2368_s17  ;;  %s2289_s4 = sld [smem:[#allocation2 + $0x12]] }
  0xac   : >> { %v578_v24 = vsel %vm3351_vm8, %v577_v23, %v551_v22  ;;  %v604_v25 = vstv %s2376_s20  ;;  %s2297_s5 = sld [smem:[#allocation2 + $0x1a]] }
  0xad   : >> { %v605_v26 = vsel %vm3360_vm9, %v604_v25, %v578_v24  ;;  %v631_v27 = vstv %s2384_s21  ;;  %s2305_s9 = sld [smem:[#allocation2 + $0x22]] }
  0xae   : >> { %v632_v28 = vsel %vm3367_vm11, %v631_v27, %v605_v26  ;;  %v656_v29 = vstv %s2392_s22  ;;  %s2313_s12 = sld [smem:[#allocation2 + $0x2a]] }
  0xaf   : >> { %v657_v30 = vsel %vm651_vm12, %v656_v29, %v632_v28  ;;  %v276_v31 = vstv %s2273_s26  ;;  %s2321_s13 = sld [smem:[#allocation2 + $0x32]] }
  0xb0   : >> { %2400 = vst.msk [vmem:[%s3380_s23 + $0x20] sm:$0xff] %vm677_vm6, %v657_v30  ;;  %v295_v32 = vstv %s2281_s30  ;;  %s2329_s15 = sld [smem:[#allocation2 + $0x3a]] }
  0xb1   : >> { %v296_v33 = vsel %vm287_vm2, %v295_v32, %v276_v31  ;;  %v320_v35 = vstv %s2289_s4  ;;  %s2337_s17 = sld [smem:[#allocation2 + $0x42]] }
  0xb2   : >> { %v321_v36 = vsel %vm312_vm3, %v320_v35, %v296_v33  ;;  %v345_v38 = vstv %s2297_s5  ;;  %s2345_s20 = sld [smem:[#allocation2 + $0x4a]] }
  0xb3   : >> { %v346_v39 = vsel %vm337_vm4, %v345_v38, %v321_v36  ;;  %v370_v41 = vstv %s2305_s9  ;;  %s2353_s21 = sld [smem:[#allocation2 + $0x52]] }
  0xb4   : >> { %v371_v42 = vsel %vm362_vm5, %v370_v41, %v346_v39  ;;  %v395_v44 = vstv %s2313_s12  ;;  %s2361_s22 = sld [smem:[#allocation2 + $0x5a]] }
  0xb5   : >> { %v396_v45 = vsel %vm5499_vm14, %v395_v44, %v371_v42  ;;  %v420_v47 = vstv %s2321_s13  ;;  %s2369_s26 = sld [smem:[#allocation2 + $0x62]] }
  0xb6   : >> { %v421_v48 = vsel %vm5500_vm15, %v420_v47, %v396_v45  ;;  %v445_v50 = vstv %s2329_s15  ;;  %s2377_s30 = sld [smem:[#allocation2 + $0x6a]] }
  0xb7   : >> { %v446_v51 = vsel %vm5501_vm1, %v445_v50, %v421_v48  ;;  %v472_v53 = vstv %s2337_s17  ;;  %s2385_s4 = sld [smem:[#allocation2 + $0x72]] }
  0xb8   : >> { %v473_v54 = vsel %vm3311_vm13, %v472_v53, %v446_v51  ;;  %v499_v55 = vstv %s2345_s20  ;;  %s2393_s5 = sld [smem:[#allocation2 + $0x7a]] }
  0xb9   : >> { %v500_v56 = vsel %vm3322_vm0, %v499_v55, %v473_v54  ;;  %v526_v57 = vstv %s2353_s21  ;;  %s2274_s9 = sld [smem:[#allocation2 + $0x3]] }
  0xba   : >> { %v527_v58 = vsel %vm3333_vm10, %v526_v57, %v500_v56  ;;  %v553_v59 = vstv %s2361_s22  ;;  %s2282_s12 = sld [smem:[#allocation2 + $0xb]] }
  0xbb   : >> { %v554_v60 = vsel %vm3342_vm7, %v553_v59, %v527_v58  ;;  %v580_v61 = vstv %s2369_s26  ;;  %s2290_s13 = sld [smem:[#allocation2 + $0x13]] }
  0xbc   : >> { %v581_v62 = vsel %vm3351_vm8, %v580_v61, %v554_v60  ;;  %v607_v63 = vstv %s2377_s30  ;;  %s2298_s15 = sld [smem:[#allocation2 + $0x1b]] }
  0xbd   : >> { %v608_v0 = vsel %vm3360_vm9, %v607_v63, %v581_v62  ;;  %v634_v1 = vstv %s2385_s4  ;;  %s2306_s17 = sld [smem:[#allocation2 + $0x23]] }
  0xbe   : >> { %v635_v2 = vsel %vm3367_vm11, %v634_v1, %v608_v0  ;;  %v659_v3 = vstv %s2393_s5  ;;  %s2314_s20 = sld [smem:[#allocation2 + $0x2b]] }
  0xbf   : >> { %v660_v4 = vsel %vm651_vm12, %v659_v3, %v635_v2  ;;  %v278_v5 = vstv %s2274_s9  ;;  %s2322_s21 = sld [smem:[#allocation2 + $0x33]] }
  0xc0   : >> { %2402 = vst.msk [vmem:[%s3380_s23 + $0x40] sm:$0xff] %vm677_vm6, %v660_v4  ;;  %v298_v6 = vstv %s2282_s12  ;;  %s2330_s22 = sld [smem:[#allocation2 + $0x3b]] }
  0xc1   : >> { %v299_v7 = vsel %vm287_vm2, %v298_v6, %v278_v5  ;;  %v323_v8 = vstv %s2290_s13  ;;  %s2338_s26 = sld [smem:[#allocation2 + $0x43]] }
  0xc2   : >> { %v324_v9 = vsel %vm312_vm3, %v323_v8, %v299_v7  ;;  %v348_v10 = vstv %s2298_s15  ;;  %s2346_s30 = sld [smem:[#allocation2 + $0x4b]] }
  0xc3   : >> { %v349_v11 = vsel %vm337_vm4, %v348_v10, %v324_v9  ;;  %v373_v12 = vstv %s2306_s17  ;;  %s2354_s4 = sld [smem:[#allocation2 + $0x53]] }
  0xc4   : >> { %v374_v13 = vsel %vm362_vm5, %v373_v12, %v349_v11  ;;  %v398_v14 = vstv %s2314_s20  ;;  %s2362_s5 = sld [smem:[#allocation2 + $0x5b]] }
  0xc5   : >> { %v399_v15 = vsel %vm5499_vm14, %v398_v14, %v374_v13  ;;  %v423_v16 = vstv %s2322_s21  ;;  %s2370_s9 = sld [smem:[#allocation2 + $0x63]] }
  0xc6   : >> { %v424_v20 = vsel %vm5500_vm15, %v423_v16, %v399_v15  ;;  %v448_v22 = vstv %s2330_s22  ;;  %s2378_s12 = sld [smem:[#allocation2 + $0x6b]] }
  0xc7   : >> { %v449_v23 = vsel %vm5501_vm1, %v448_v22, %v424_v20  ;;  %v475_v24 = vstv %s2338_s26  ;;  %s2386_s13 = sld [smem:[#allocation2 + $0x73]] }
  0xc8   : >> { %v476_v25 = vsel %vm3311_vm13, %v475_v24, %v449_v23  ;;  %v502_v26 = vstv %s2346_s30  ;;  %s2394_s15 = sld [smem:[#allocation2 + $0x7b]] }
  0xc9   : >> { %v503_v27 = vsel %vm3322_vm0, %v502_v26, %v476_v25  ;;  %v529_v28 = vstv %s2354_s4  ;;  %s2275_s17 = sld [smem:[#allocation2 + $0x4]] }
  0xca   : >> { %v530_v29 = vsel %vm3333_vm10, %v529_v28, %v503_v27  ;;  %v556_v30 = vstv %s2362_s5  ;;  %s2283_s20 = sld [smem:[#allocation2 + $0xc]] }
  0xcb   : >> { %v557_v31 = vsel %vm3342_vm7, %v556_v30, %v530_v29  ;;  %v583_v32 = vstv %s2370_s9  ;;  %s2291_s21 = sld [smem:[#allocation2 + $0x14]] }
  0xcc   : >> { %v584_v33 = vsel %vm3351_vm8, %v583_v32, %v557_v31  ;;  %v610_v35 = vstv %s2378_s12  ;;  %s2299_s22 = sld [smem:[#allocation2 + $0x1c]] }
  0xcd   : >> { %v611_v36 = vsel %vm3360_vm9, %v610_v35, %v584_v33  ;;  %v637_v38 = vstv %s2386_s13  ;;  %s2307_s26 = sld [smem:[#allocation2 + $0x24]] }
  0xce   : >> { %v638_v39 = vsel %vm3367_vm11, %v637_v38, %v611_v36  ;;  %v662_v41 = vstv %s2394_s15  ;;  %s2315_s30 = sld [smem:[#allocation2 + $0x2c]] }
  0xcf   : >> { %v663_v42 = vsel %vm651_vm12, %v662_v41, %v638_v39  ;;  %v280_v44 = vstv %s2275_s17  ;;  %s2323_s4 = sld [smem:[#allocation2 + $0x34]] }
  0xd0   : >> { %2404 = vst.msk [vmem:[%s3380_s23 + $0x60] sm:$0xff] %vm677_vm6, %v663_v42  ;;  %v301_v45 = vstv %s2283_s20  ;;  %s2331_s5 = sld [smem:[#allocation2 + $0x3c]] }
  0xd1   : >> { %v302_v47 = vsel %vm287_vm2, %v301_v45, %v280_v44  ;;  %v326_v48 = vstv %s2291_s21  ;;  %s2339_s9 = sld [smem:[#allocation2 + $0x44]] }
  0xd2   : >> { %v327_v50 = vsel %vm312_vm3, %v326_v48, %v302_v47  ;;  %v351_v51 = vstv %s2299_s22  ;;  %s2347_s12 = sld [smem:[#allocation2 + $0x4c]] }
  0xd3   : >> { %v352_v53 = vsel %vm337_vm4, %v351_v51, %v327_v50  ;;  %v376_v54 = vstv %s2307_s26  ;;  %s2355_s13 = sld [smem:[#allocation2 + $0x54]] }
  0xd4   : >> { %v377_v55 = vsel %vm362_vm5, %v376_v54, %v352_v53  ;;  %v401_v56 = vstv %s2315_s30  ;;  %s2363_s15 = sld [smem:[#allocation2 + $0x5c]] }
  0xd5   : >> { %v402_v57 = vsel %vm5499_vm14, %v401_v56, %v377_v55  ;;  %v426_v58 = vstv %s2323_s4  ;;  %s2371_s17 = sld [smem:[#allocation2 + $0x64]] }
  0xd6   : >> { %v427_v59 = vsel %vm5500_vm15, %v426_v58, %v402_v57  ;;  %v451_v60 = vstv %s2331_s5  ;;  %s2379_s20 = sld [smem:[#allocation2 + $0x6c]] }
  0xd7   : >> { %v452_v61 = vsel %vm5501_vm1, %v451_v60, %v427_v59  ;;  %v478_v62 = vstv %s2339_s9  ;;  %s2387_s21 = sld [smem:[#allocation2 + $0x74]] }
  0xd8   : >> { %v479_v63 = vsel %vm3311_vm13, %v478_v62, %v452_v61  ;;  %v505_v0 = vstv %s2347_s12  ;;  %s2395_s22 = sld [smem:[#allocation2 + $0x7c]] }
  0xd9   : >> { %v506_v1 = vsel %vm3322_vm0, %v505_v0, %v479_v63  ;;  %v532_v2 = vstv %s2355_s13  ;;  %s2276_s26 = sld [smem:[#allocation2 + $0x5]] }
  0xda   : >> { %v533_v3 = vsel %vm3333_vm10, %v532_v2, %v506_v1  ;;  %v559_v4 = vstv %s2363_s15  ;;  %s2284_s30 = sld [smem:[#allocation2 + $0xd]] }
  0xdb   : >> { %v560_v5 = vsel %vm3342_vm7, %v559_v4, %v533_v3  ;;  %v586_v6 = vstv %s2371_s17  ;;  %s2292_s4 = sld [smem:[#allocation2 + $0x15]] }
  0xdc   : >> { %v587_v7 = vsel %vm3351_vm8, %v586_v6, %v560_v5  ;;  %v613_v8 = vstv %s2379_s20  ;;  %s2300_s5 = sld [smem:[#allocation2 + $0x1d]] }
  0xdd   : >> { %v614_v9 = vsel %vm3360_vm9, %v613_v8, %v587_v7  ;;  %v640_v10 = vstv %s2387_s21  ;;  %s2308_s9 = sld [smem:[#allocation2 + $0x25]] }
  0xde   : >> { %v641_v11 = vsel %vm3367_vm11, %v640_v10, %v614_v9  ;;  %v665_v12 = vstv %s2395_s22  ;;  %s2316_s12 = sld [smem:[#allocation2 + $0x2d]] }
  0xdf   : >> { %v666_v13 = vsel %vm651_vm12, %v665_v12, %v641_v11  ;;  %v282_v14 = vstv %s2276_s26  ;;  %s2324_s13 = sld [smem:[#allocation2 + $0x35]] }
  0xe0   : >> { %2406 = vst.msk [vmem:[%s3380_s23 + $0x80] sm:$0xff] %vm677_vm6, %v666_v13  ;;  %v304_v15 = vstv %s2284_s30  ;;  %s2332_s15 = sld [smem:[#allocation2 + $0x3d]] }
  0xe1   : >> { %v305_v16 = vsel %vm287_vm2, %v304_v15, %v282_v14  ;;  %v329_v20 = vstv %s2292_s4  ;;  %s2340_s17 = sld [smem:[#allocation2 + $0x45]] }
  0xe2   : >> { %v330_v22 = vsel %vm312_vm3, %v329_v20, %v305_v16  ;;  %v354_v23 = vstv %s2300_s5  ;;  %s2348_s20 = sld [smem:[#allocation2 + $0x4d]] }
  0xe3   : >> { %v355_v24 = vsel %vm337_vm4, %v354_v23, %v330_v22  ;;  %v379_v25 = vstv %s2308_s9  ;;  %s2356_s21 = sld [smem:[#allocation2 + $0x55]] }
  0xe4   : >> { %v380_v26 = vsel %vm362_vm5, %v379_v25, %v355_v24  ;;  %v404_v27 = vstv %s2316_s12  ;;  %s2364_s22 = sld [smem:[#allocation2 + $0x5d]] }
  0xe5   : >> { %v405_v28 = vsel %vm5499_vm14, %v404_v27, %v380_v26  ;;  %v429_v29 = vstv %s2324_s13  ;;  %s2372_s26 = sld [smem:[#allocation2 + $0x65]] }
  0xe6   : >> { %v430_v30 = vsel %vm5500_vm15, %v429_v29, %v405_v28  ;;  %v454_v31 = vstv %s2332_s15  ;;  %s2380_s30 = sld [smem:[#allocation2 + $0x6d]] }
  0xe7   : >> { %v455_v32 = vsel %vm5501_vm1, %v454_v31, %v430_v30  ;;  %v481_v33 = vstv %s2340_s17  ;;  %s2388_s4 = sld [smem:[#allocation2 + $0x75]] }
  0xe8   : >> { %v482_v35 = vsel %vm3311_vm13, %v481_v33, %v455_v32  ;;  %v508_v36 = vstv %s2348_s20  ;;  %s2396_s5 = sld [smem:[#allocation2 + $0x7d]] }
  0xe9   : >> { %v509_v38 = vsel %vm3322_vm0, %v508_v36, %v482_v35  ;;  %v535_v39 = vstv %s2356_s21  ;;  %s2277_s9 = sld [smem:[#allocation2 + $0x6]] }
  0xea   : >> { %v536_v41 = vsel %vm3333_vm10, %v535_v39, %v509_v38  ;;  %v562_v42 = vstv %s2364_s22  ;;  %s2285_s12 = sld [smem:[#allocation2 + $0xe]] }
  0xeb   : >> { %v563_v44 = vsel %vm3342_vm7, %v562_v42, %v536_v41  ;;  %v589_v45 = vstv %s2372_s26  ;;  %s2293_s13 = sld [smem:[#allocation2 + $0x16]] }
  0xec   : >> { %v590_v47 = vsel %vm3351_vm8, %v589_v45, %v563_v44  ;;  %v616_v48 = vstv %s2380_s30  ;;  %s2301_s15 = sld [smem:[#allocation2 + $0x1e]] }
  0xed   : >> { %v617_v50 = vsel %vm3360_vm9, %v616_v48, %v590_v47  ;;  %v643_v51 = vstv %s2388_s4  ;;  %s2309_s17 = sld [smem:[#allocation2 + $0x26]] }
  0xee   : >> { %v644_v53 = vsel %vm3367_vm11, %v643_v51, %v617_v50  ;;  %v668_v54 = vstv %s2396_s5  ;;  %s2317_s20 = sld [smem:[#allocation2 + $0x2e]] }
  0xef   : >> { %v669_v55 = vsel %vm651_vm12, %v668_v54, %v644_v53  ;;  %v284_v56 = vstv %s2277_s9  ;;  %s2325_s21 = sld [smem:[#allocation2 + $0x36]] }
  0xf0   : >> { %2408 = vst.msk [vmem:[%s3380_s23 + $0xa0] sm:$0xff] %vm677_vm6, %v669_v55  ;;  %v307_v57 = vstv %s2285_s12  ;;  %s2333_s22 = sld [smem:[#allocation2 + $0x3e]] }
  0xf1   : >> { %v308_v58 = vsel %vm287_vm2, %v307_v57, %v284_v56  ;;  %v332_v59 = vstv %s2293_s13  ;;  %s2341_s26 = sld [smem:[#allocation2 + $0x46]] }
  0xf2   : >> { %v333_v60 = vsel %vm312_vm3, %v332_v59, %v308_v58  ;;  %v357_v61 = vstv %s2301_s15  ;;  %s2349_s30 = sld [smem:[#allocation2 + $0x4e]] }
  0xf3   : >> { %v358_v62 = vsel %vm337_vm4, %v357_v61, %v333_v60  ;;  %v382_v63 = vstv %s2309_s17  ;;  %s2357_s4 = sld [smem:[#allocation2 + $0x56]] }
  0xf4   : >> { %v383_v0 = vsel %vm362_vm5, %v382_v63, %v358_v62  ;;  %v407_v1 = vstv %s2317_s20  ;;  %s2365_s5 = sld [smem:[#allocation2 + $0x5e]] }
  0xf5   : >> { %v408_v2 = vsel %vm5499_vm14, %v407_v1, %v383_v0  ;;  %v432_v3 = vstv %s2325_s21  ;;  %s2373_s9 = sld [smem:[#allocation2 + $0x66]] }
  0xf6   : >> { %v433_v4 = vsel %vm5500_vm15, %v432_v3, %v408_v2  ;;  %v457_v5 = vstv %s2333_s22  ;;  %s2381_s12 = sld [smem:[#allocation2 + $0x6e]] }
  0xf7   : >> { %v458_v6 = vsel %vm5501_vm1, %v457_v5, %v433_v4  ;;  %v484_v7 = vstv %s2341_s26  ;;  %s2389_s13 = sld [smem:[#allocation2 + $0x76]] }
  0xf8   : >> { %v485_v8 = vsel %vm3311_vm13, %v484_v7, %v458_v6  ;;  %v511_v9 = vstv %s2349_s30  ;;  %s2397_s15 = sld [smem:[#allocation2 + $0x7e]] }
  0xf9   : >> { %v512_v10 = vsel %vm3322_vm0, %v511_v9, %v485_v8  ;;  %v538_v11 = vstv %s2357_s4  ;;  %s2278_s17 = sld [smem:[#allocation2 + $0x7]] }
  0xfa   : >> { %v539_v12 = vsel %vm3333_vm10, %v538_v11, %v512_v10  ;;  %v565_v13 = vstv %s2365_s5  ;;  %s2286_s20 = sld [smem:[#allocation2 + $0xf]] }
  0xfb   : >> { %v566_v14 = vsel %vm3342_vm7, %v565_v13, %v539_v12  ;;  %v592_v15 = vstv %s2373_s9  ;;  %s2294_s21 = sld [smem:[#allocation2 + $0x17]] }
  0xfc   : >> { %v593_v16 = vsel %vm3351_vm8, %v592_v15, %v566_v14  ;;  %v619_v20 = vstv %s2381_s12  ;;  %s2302_s22 = sld [smem:[#allocation2 + $0x1f]] }
  0xfd   : >> { %v620_v22 = vsel %vm3360_vm9, %v619_v20, %v593_v16  ;;  %v646_v23 = vstv %s2389_s13  ;;  %s2310_s26 = sld [smem:[#allocation2 + $0x27]] }
  0xfe   : >> { %v647_v24 = vsel %vm3367_vm11, %v646_v23, %v620_v22  ;;  %v671_v25 = vstv %s2397_s15  ;;  %s2318_s30 = sld [smem:[#allocation2 + $0x2f]] }
  0xff   : >> { %v672_v26 = vsel %vm651_vm12, %v671_v25, %v647_v24  ;;  %v286_v27 = vstv %s2278_s17  ;;  %s2326_s4 = sld [smem:[#allocation2 + $0x37]] }
 0x100   : >> { %2410 = vst.msk [vmem:[%s3380_s23 + $0xc0] sm:$0xff] %vm677_vm6, %v672_v26  ;;  %v310_v28 = vstv %s2286_s20  ;;  %s2334_s5 = sld [smem:[#allocation2 + $0x3f]] }
 0x101   : >> { %v311_v29 = vsel %vm287_vm2, %v310_v28, %v286_v27  ;;  %v335_v30 = vstv %s2294_s21  ;;  %s2342_s9 = sld [smem:[#allocation2 + $0x47]]  ;;  %vm5502_vm2 = vmmov %vm5500_vm15 }
 0x102   : >> { %v336_v31 = vsel %vm312_vm3, %v335_v30, %v311_v29  ;;  %v360_v32 = vstv %s2302_s22  ;;  %s2350_s12 = sld [smem:[#allocation2 + $0x4f]]  ;;  %vm5503_vm3 = vmmov %vm5501_vm1 }
 0x103   : >> { %v361_v33 = vsel %vm337_vm4, %v360_v32, %v336_v31  ;;  %v385_v35 = vstv %s2310_s26  ;;  %s2358_s13 = sld [smem:[#allocation2 + $0x57]] }
 0x104   : >> { %v386_v36 = vsel %vm362_vm5, %v385_v35, %v361_v33  ;;  %v410_v38 = vstv %s2318_s30  ;;  %s2366_s15 = sld [smem:[#allocation2 + $0x5f]] }
 0x105   : >> { %v411_v39 = vsel %vm5499_vm14, %v410_v38, %v386_v36  ;;  %v435_v41 = vstv %s2326_s4  ;;  %s2374_s17 = sld [smem:[#allocation2 + $0x67]] }
 0x106   : >> { %v436_v42 = vsel %vm5502_vm2, %v435_v41, %v411_v39  ;;  %v460_v44 = vstv %s2334_s5  ;;  %s2382_s20 = sld [smem:[#allocation2 + $0x6f]] }
 0x107   : >> { %v461_v45 = vsel %vm5503_vm3, %v460_v44, %v436_v42  ;;  %v487_v47 = vstv %s2342_s9  ;;  %s2390_s21 = sld [smem:[#allocation2 + $0x77]] }
 0x108   : >> { %v488_v48 = vsel %vm3311_vm13, %v487_v47, %v461_v45  ;;  %v514_v50 = vstv %s2350_s12  ;;  %s2398_s22 = sld [smem:[#allocation2 + $0x7f]] }
 0x109   : >> { %v515_v51 = vsel %vm3322_vm0, %v514_v50, %v488_v48  ;;  %v541_v53 = vstv %s2358_s13 }
 0x10a   : >> { %v542_v54 = vsel %vm3333_vm10, %v541_v53, %v515_v51  ;;  %v568_v55 = vstv %s2366_s15 }
 0x10b   : >> { %v569_v56 = vsel %vm3342_vm7, %v568_v55, %v542_v54  ;;  %v595_v57 = vstv %s2374_s17 }
 0x10c   : >> { %v596_v58 = vsel %vm3351_vm8, %v595_v57, %v569_v56  ;;  %v622_v34 = vstv %s2382_s20  ;;  %265 = sbr.rel (!%p263_p10) target bundleno = 137 (0x89), region = 145 }
 0x10d   : >> { %v623_v59 = vsel %vm3360_vm9, %v622_v34, %v596_v58  ;;  %v649_v60 = vstv %s2390_s21 }
 0x10e   : >> { %v650_v37 = vsel %vm3367_vm11, %v649_v60, %v623_v59  ;;  %v674_v61 = vstv %s2398_s22 }
 0x10f   : >> { %v675_v40 = vsel %vm651_vm12, %v674_v61, %v650_v37 }
 0x110   : >> { %2412 = vst.msk [vmem:[%s3380_s23 + $0xe0] sm:$0xff] %vm677_vm6, %v675_v40 }
 0x111 PF: > { %p700_p11 = scmp.lt.s32.totalorder %s3104_s27, 0  ;;  %p701_p12 = scmp.le.s32.totalorder %s3107_s28, 0 }
 0x113   : > { %p702_p13 = pnand %p701_p12, %p700_p11 }
 0x115   : > { %p703_p0 = pneg %p702_p13 }
 0x117   : > { %p704_p1 = pnand %p703_p0, %p250_p7 }
 0x118   : > { %s3628_s3 = smov (!%p704_p1), 0  }
 0x119   : > { %707 = sbr.rel (%p704_p1) target bundleno = 427 (0x1ab), region = 51 }
 0x11e   : > { %v708_v21 = vlaneseq }
 0x120   : > { %v3622_v43 = vshrl.u32 %v708_v21, 7  ;;  %v3624_v46 = vand.u32 127, %v708_v21 }
 0x122   : > { %v712_v17 = vsub.s32 %v3622_v43, %v3624_v46 }
 0x123 LB: >> { %s723_s23 = sld [smem:[#allocation2]]  ;;  %s2413_s30 = sshll.u32 %s3015_s3, 3  ;;  %s3015_s3 = sphi %s3628_s3, %s718_s3  }
 0x124   : >> { %s2421_s26 = sld [smem:[#allocation2 + $0x88]]  ;;  %s720_s5 = sadd.s32 %s2413_s30, %s3099_s25 }
 0x125   : >> { %s2429_s4 = sld [smem:[#allocation2 + $0x90]]  ;;  %v721_v18 = vstv %s720_s5  ;;  %s718_s3 = sadd.s32 1, %s3015_s3  }
 0x126   : >> { %s2437_s9 = sld [smem:[#allocation2 + $0x98]]  ;;  %v3640_v19 = vadd.s32 %v721_v18, %v712_v17  ;;  %p715_p2 = scmp.ge.s32.totalorder %s718_s3, 4  }
 0x127   : >> { %s2445_s12 = sld [smem:[#allocation2 + $0xa0]] }
 0x128   : >> { %s2453_s13 = sld [smem:[#allocation2 + $0xa8]]  ;;  %vm739_vm4 = vcmp.eq.s32.totalorder %v3640_v19, 4294967295  ;;  %vm764_vm5 = vcmp.eq.s32.totalorder %v3640_v19, 4294967294  ;;  %vm789_vm7 = vcmp.eq.s32.totalorder %v3640_v19, 4294967293  ;;  %vm814_vm8 = vcmp.eq.s32.totalorder %v3640_v19, 4294967292 }
 0x129   : >> { %v724_v49 = vstv %s723_s23  ;;  %s3642_s15 = sld [smem:[#allocation2 + $0xb0]]  ;;  %vm5451_vm13 = vcmp.eq.s32.totalorder %v3640_v19, 4294967291  ;;  %vm5449_vm0 = vcmp.eq.s32.totalorder %v3640_v19, 4294967290  ;;  %vm5450_vm10 = vcmp.eq.s32.totalorder %v3640_v19, 4294967289 }
 0x12a   : >> { %v741_v52 = vstv %s2421_s26  ;;  %s3647_s17 = sld [smem:[#allocation2 + $0xb8]]  ;;  %vm914_vm9 = vcmp.le.s32.totalorder %v3640_v19, 4294967288  ;;  %vm915_vm11 = vcmp.ge.s32.totalorder %v3640_v19, 4294967285  ;;  %vm941_vm12 = vcmp.le.s32.totalorder %v3640_v19, 4294967284 }
 0x12b   : >> { %v742_v62 = vsel %vm739_vm4, %v741_v52, %v724_v49  ;;  %v766_v63 = vstv %s2429_s4  ;;  %s3653_s20 = sld [smem:[#allocation2 + $0xc0]]  ;;  %vm942_vm6 = vcmp.ge.s32.totalorder %v3640_v19, 4294967281  ;;  %vm3676_vm15 = vmand %vm914_vm9, %vm915_vm11  ;;  %vm968_vm1 = vcmp.le.s32.totalorder %v3640_v19, 4294967280 }
 0x12c   : >> { %v767_v0 = vsel %vm764_vm5, %v766_v63, %v742_v62  ;;  %v791_v1 = vstv %s2437_s9  ;;  %s3659_s21 = sld [smem:[#allocation2 + $0xc8]]  ;;  %vm969_vm14 = vcmp.ge.s32.totalorder %v3640_v19, 4294967274  ;;  %vm3687_vm2 = vmand %vm941_vm12, %vm942_vm6  ;;  %vm995_vm3 = vcmp.le.s32.totalorder %v3640_v19, 4294967273 }
 0x12d   : >> { %v792_v2 = vsel %vm789_vm7, %v791_v1, %v767_v0  ;;  %v816_v3 = vstv %s2445_s12  ;;  %s3665_s22 = sld [smem:[#allocation2 + $0xd0]]  ;;  %vm996_vm9 = vcmp.ge.s32.totalorder %v3640_v19, 4294967265  ;;  %vm3698_vm11 = vmand %vm968_vm1, %vm969_vm14  ;;  %vm1022_vm12 = vcmp.le.s32.totalorder %v3640_v19, 4294967264 }
 0x12e   : >> { %v817_v4 = vsel %vm814_vm8, %v816_v3, %v792_v2  ;;  %v841_v5 = vstv %s2453_s13  ;;  %s3671_s23 = sld [smem:[#allocation2 + $0xd8]]  ;;  %vm1023_vm6 = vcmp.ge.s32.totalorder %v3640_v19, 4294967251  ;;  %vm1049_vm1 = vcmp.le.s32.totalorder %v3640_v19, 4294967250 }
 0x12f   : >> { %v842_v6 = vsel %vm5451_vm13, %v841_v5, %v817_v4  ;;  %v866_v7 = vstv %s3642_s15  ;;  %s3682_s26 = sld [smem:[#allocation2 + $0xe0]]  ;;  %vm1050_vm14 = vcmp.ge.s32.totalorder %v3640_v19, 4294967233  ;;  %vm1076_vm13 = vcmp.le.s32.totalorder %v3640_v19, 4294967232 }
 0x130   : >> { %v867_v9 = vsel %vm5449_vm0, %v866_v7, %v842_v6  ;;  %v891_v10 = vstv %s3647_s17  ;;  %s3693_s4 = sld [smem:[#allocation2 + $0xe8]]  ;;  %vm3707_vm0 = vmand %vm995_vm3, %vm996_vm9  ;;  %vm1077_vm3 = vcmp.ge.s32.totalorder %v3640_v19, 4294967206 }
 0x131   : >> { %v892_v12 = vsel %vm5450_vm10, %v891_v10, %v867_v9  ;;  %v918_v13 = vstv %s3653_s20  ;;  %s2525_s5 = sld [smem:[#allocation2 + $0xf0]]  ;;  %vm3716_vm10 = vmand %vm1022_vm12, %vm1023_vm6  ;;  %vm1103_vm6 = vcmp.le.s32.totalorder %v3640_v19, 4294967205  ;;  %s3745_s20 = scalar_lea.vmem %s3111_s29, %s2413_s30 [#allocation5] }
 0x132   : >> { %v919_v15 = vsel %vm3676_vm15, %v918_v13, %v892_v12  ;;  %v945_v16 = vstv %s3659_s21  ;;  %s2533_s9 = sld [smem:[#allocation2 + $0xf8]]  ;;  %vm3725_vm9 = vmand %vm1049_vm1, %vm1050_vm14  ;;  %vm5518_vm1 = vcmp.eq.s32.totalorder %v3640_v19, 4294967291  ;;  %vm5519_vm14 = vcmp.eq.s32.totalorder %v3640_v19, 4294967290 }
 0x133   : >> { %v946_v22 = vsel %vm3687_vm2, %v945_v16, %v919_v15  ;;  %v972_v23 = vstv %s3665_s22  ;;  %s2414_s12 = sld [smem:[#allocation2 + $0x1]]  ;;  %vm3732_vm12 = vmand %vm1076_vm13, %vm1077_vm3  ;;  %vm1129_vm13 = vcmask 523264   ;;  %vm5520_vm3 = vcmp.eq.s32.totalorder %v3640_v19, 4294967289 }
 0x134   : >> { %v973_v25 = vsel %vm3698_vm11, %v972_v23, %v946_v22  ;;  %v999_v26 = vstv %s3671_s23  ;;  %s2422_s13 = sld [smem:[#allocation2 + $0x89]] }
 0x135   : >> { %v1000_v28 = vsel %vm3707_vm0, %v999_v26, %v973_v25  ;;  %v1026_v29 = vstv %s3682_s26  ;;  %s2430_s15 = sld [smem:[#allocation2 + $0x91]] }
 0x136   : >> { %v1027_v31 = vsel %vm3716_vm10, %v1026_v29, %v1000_v28  ;;  %v1053_v32 = vstv %s3693_s4  ;;  %s2438_s17 = sld [smem:[#allocation2 + $0x99]] }
 0x137   : >> { %v1054_v33 = vsel %vm3725_vm9, %v1053_v32, %v1027_v31  ;;  %v1080_v35 = vstv %s2525_s5  ;;  %s2446_s21 = sld [smem:[#allocation2 + $0xa1]] }
 0x138   : >> { %v1081_v36 = vsel %vm3732_vm12, %v1080_v35, %v1054_v33  ;;  %v1105_v38 = vstv %s2533_s9  ;;  %s2454_s22 = sld [smem:[#allocation2 + $0xa9]] }
 0x139   : >> { %v1106_v39 = vsel %vm1103_vm6, %v1105_v38, %v1081_v36  ;;  %v726_v41 = vstv %s2414_s12  ;;  %s2462_s23 = sld [smem:[#allocation2 + $0xb1]] }
 0x13a   : >> { %1130 = vst.msk [vmem:[%s3745_s20] sm:$0xff] %vm1129_vm13, %v1106_v39  ;;  %v744_v42 = vstv %s2422_s13  ;;  %s2470_s26 = sld [smem:[#allocation2 + $0xb9]] }
 0x13b   : >> { %v745_v44 = vsel %vm739_vm4, %v744_v42, %v726_v41  ;;  %v769_v45 = vstv %s2430_s15  ;;  %s2478_s30 = sld [smem:[#allocation2 + $0xc1]] }
 0x13c   : >> { %v770_v47 = vsel %vm764_vm5, %v769_v45, %v745_v44  ;;  %v794_v48 = vstv %s2438_s17  ;;  %s2486_s4 = sld [smem:[#allocation2 + $0xc9]] }
 0x13d   : >> { %v795_v50 = vsel %vm789_vm7, %v794_v48, %v770_v47  ;;  %v819_v51 = vstv %s2446_s21  ;;  %s2494_s5 = sld [smem:[#allocation2 + $0xd1]] }
 0x13e   : >> { %v820_v53 = vsel %vm814_vm8, %v819_v51, %v795_v50  ;;  %v844_v54 = vstv %s2454_s22  ;;  %s2502_s9 = sld [smem:[#allocation2 + $0xd9]] }
 0x13f   : >> { %v845_v55 = vsel %vm5518_vm1, %v844_v54, %v820_v53  ;;  %v869_v56 = vstv %s2462_s23  ;;  %s2510_s12 = sld [smem:[#allocation2 + $0xe1]] }
 0x140   : >> { %v870_v57 = vsel %vm5519_vm14, %v869_v56, %v845_v55  ;;  %v894_v58 = vstv %s2470_s26  ;;  %s2518_s13 = sld [smem:[#allocation2 + $0xe9]] }
 0x141   : >> { %v895_v34 = vsel %vm5520_vm3, %v894_v58, %v870_v57  ;;  %v921_v59 = vstv %s2478_s30  ;;  %s2526_s15 = sld [smem:[#allocation2 + $0xf1]] }
 0x142   : >> { %v922_v60 = vsel %vm3676_vm15, %v921_v59, %v895_v34  ;;  %v948_v37 = vstv %s2486_s4  ;;  %s2534_s17 = sld [smem:[#allocation2 + $0xf9]] }
 0x143   : >> { %v949_v61 = vsel %vm3687_vm2, %v948_v37, %v922_v60  ;;  %v975_v40 = vstv %s2494_s5  ;;  %s2415_s21 = sld [smem:[#allocation2 + $0x2]] }
 0x144   : >> { %v976_v21 = vsel %vm3698_vm11, %v975_v40, %v949_v61  ;;  %v1002_v18 = vstv %s2502_s9  ;;  %s2423_s22 = sld [smem:[#allocation2 + $0x8a]] }
 0x145   : >> { %v1003_v49 = vsel %vm3707_vm0, %v1002_v18, %v976_v21  ;;  %v1029_v52 = vstv %s2510_s12  ;;  %s2431_s23 = sld [smem:[#allocation2 + $0x92]] }
 0x146   : >> { %v1030_v62 = vsel %vm3716_vm10, %v1029_v52, %v1003_v49  ;;  %v1056_v63 = vstv %s2518_s13  ;;  %s2439_s26 = sld [smem:[#allocation2 + $0x9a]] }
 0x147   : >> { %v1057_v0 = vsel %vm3725_vm9, %v1056_v63, %v1030_v62  ;;  %v1083_v1 = vstv %s2526_s15  ;;  %s2447_s30 = sld [smem:[#allocation2 + $0xa2]] }
 0x148   : >> { %v1084_v2 = vsel %vm3732_vm12, %v1083_v1, %v1057_v0  ;;  %v1108_v3 = vstv %s2534_s17  ;;  %s2455_s4 = sld [smem:[#allocation2 + $0xaa]] }
 0x149   : >> { %v1109_v4 = vsel %vm1103_vm6, %v1108_v3, %v1084_v2  ;;  %v728_v5 = vstv %s2415_s21  ;;  %s2463_s5 = sld [smem:[#allocation2 + $0xb2]] }
 0x14a   : >> { %2542 = vst.msk [vmem:[%s3745_s20 + $0x20] sm:$0xff] %vm1129_vm13, %v1109_v4  ;;  %v747_v6 = vstv %s2423_s22  ;;  %s2471_s9 = sld [smem:[#allocation2 + $0xba]] }
 0x14b   : >> { %v748_v7 = vsel %vm739_vm4, %v747_v6, %v728_v5  ;;  %v772_v9 = vstv %s2431_s23  ;;  %s2479_s12 = sld [smem:[#allocation2 + $0xc2]] }
 0x14c   : >> { %v773_v10 = vsel %vm764_vm5, %v772_v9, %v748_v7  ;;  %v797_v12 = vstv %s2439_s26  ;;  %s2487_s13 = sld [smem:[#allocation2 + $0xca]] }
 0x14d   : >> { %v798_v13 = vsel %vm789_vm7, %v797_v12, %v773_v10  ;;  %v822_v15 = vstv %s2447_s30  ;;  %s2495_s15 = sld [smem:[#allocation2 + $0xd2]] }
 0x14e   : >> { %v823_v16 = vsel %vm814_vm8, %v822_v15, %v798_v13  ;;  %v847_v22 = vstv %s2455_s4  ;;  %s2503_s17 = sld [smem:[#allocation2 + $0xda]] }
 0x14f   : >> { %v848_v23 = vsel %vm5518_vm1, %v847_v22, %v823_v16  ;;  %v872_v25 = vstv %s2463_s5  ;;  %s2511_s21 = sld [smem:[#allocation2 + $0xe2]] }
 0x150   : >> { %v873_v26 = vsel %vm5519_vm14, %v872_v25, %v848_v23  ;;  %v897_v28 = vstv %s2471_s9  ;;  %s2519_s22 = sld [smem:[#allocation2 + $0xea]] }
 0x151   : >> { %v898_v29 = vsel %vm5520_vm3, %v897_v28, %v873_v26  ;;  %v924_v31 = vstv %s2479_s12  ;;  %s2527_s23 = sld [smem:[#allocation2 + $0xf2]] }
 0x152   : >> { %v925_v32 = vsel %vm3676_vm15, %v924_v31, %v898_v29  ;;  %v951_v33 = vstv %s2487_s13  ;;  %s2535_s26 = sld [smem:[#allocation2 + $0xfa]] }
 0x153   : >> { %v952_v35 = vsel %vm3687_vm2, %v951_v33, %v925_v32  ;;  %v978_v36 = vstv %s2495_s15  ;;  %s2416_s30 = sld [smem:[#allocation2 + $0x3]] }
 0x154   : >> { %v979_v38 = vsel %vm3698_vm11, %v978_v36, %v952_v35  ;;  %v1005_v39 = vstv %s2503_s17  ;;  %s2424_s4 = sld [smem:[#allocation2 + $0x8b]] }
 0x155   : >> { %v1006_v41 = vsel %vm3707_vm0, %v1005_v39, %v979_v38  ;;  %v1032_v42 = vstv %s2511_s21  ;;  %s2432_s5 = sld [smem:[#allocation2 + $0x93]] }
 0x156   : >> { %v1033_v44 = vsel %vm3716_vm10, %v1032_v42, %v1006_v41  ;;  %v1059_v45 = vstv %s2519_s22  ;;  %s2440_s9 = sld [smem:[#allocation2 + $0x9b]] }
 0x157   : >> { %v1060_v47 = vsel %vm3725_vm9, %v1059_v45, %v1033_v44  ;;  %v1086_v48 = vstv %s2527_s23  ;;  %s2448_s12 = sld [smem:[#allocation2 + $0xa3]] }
 0x158   : >> { %v1087_v50 = vsel %vm3732_vm12, %v1086_v48, %v1060_v47  ;;  %v1111_v51 = vstv %s2535_s26  ;;  %s2456_s13 = sld [smem:[#allocation2 + $0xab]] }
 0x159   : >> { %v1112_v53 = vsel %vm1103_vm6, %v1111_v51, %v1087_v50  ;;  %v730_v54 = vstv %s2416_s30  ;;  %s2464_s15 = sld [smem:[#allocation2 + $0xb3]] }
 0x15a   : >> { %2544 = vst.msk [vmem:[%s3745_s20 + $0x40] sm:$0xff] %vm1129_vm13, %v1112_v53  ;;  %v750_v55 = vstv %s2424_s4  ;;  %s2472_s17 = sld [smem:[#allocation2 + $0xbb]] }
 0x15b   : >> { %v751_v56 = vsel %vm739_vm4, %v750_v55, %v730_v54  ;;  %v775_v57 = vstv %s2432_s5  ;;  %s2480_s21 = sld [smem:[#allocation2 + $0xc3]] }
 0x15c   : >> { %v776_v58 = vsel %vm764_vm5, %v775_v57, %v751_v56  ;;  %v800_v34 = vstv %s2440_s9  ;;  %s2488_s22 = sld [smem:[#allocation2 + $0xcb]] }
 0x15d   : >> { %v801_v59 = vsel %vm789_vm7, %v800_v34, %v776_v58  ;;  %v825_v60 = vstv %s2448_s12  ;;  %s2496_s23 = sld [smem:[#allocation2 + $0xd3]] }
 0x15e   : >> { %v826_v37 = vsel %vm814_vm8, %v825_v60, %v801_v59  ;;  %v850_v61 = vstv %s2456_s13  ;;  %s2504_s26 = sld [smem:[#allocation2 + $0xdb]] }
 0x15f   : >> { %v851_v40 = vsel %vm5518_vm1, %v850_v61, %v826_v37  ;;  %v875_v21 = vstv %s2464_s15  ;;  %s2512_s30 = sld [smem:[#allocation2 + $0xe3]] }
 0x160   : >> { %v876_v18 = vsel %vm5519_vm14, %v875_v21, %v851_v40  ;;  %v900_v49 = vstv %s2472_s17  ;;  %s2520_s4 = sld [smem:[#allocation2 + $0xeb]] }
 0x161   : >> { %v901_v52 = vsel %vm5520_vm3, %v900_v49, %v876_v18  ;;  %v927_v62 = vstv %s2480_s21  ;;  %s2528_s5 = sld [smem:[#allocation2 + $0xf3]] }
 0x162   : >> { %v928_v63 = vsel %vm3676_vm15, %v927_v62, %v901_v52  ;;  %v954_v0 = vstv %s2488_s22  ;;  %s2536_s9 = sld [smem:[#allocation2 + $0xfb]] }
 0x163   : >> { %v955_v1 = vsel %vm3687_vm2, %v954_v0, %v928_v63  ;;  %v981_v2 = vstv %s2496_s23  ;;  %s2417_s12 = sld [smem:[#allocation2 + $0x4]] }
 0x164   : >> { %v982_v3 = vsel %vm3698_vm11, %v981_v2, %v955_v1  ;;  %v1008_v4 = vstv %s2504_s26  ;;  %s2425_s13 = sld [smem:[#allocation2 + $0x8c]] }
 0x165   : >> { %v1009_v5 = vsel %vm3707_vm0, %v1008_v4, %v982_v3  ;;  %v1035_v6 = vstv %s2512_s30  ;;  %s2433_s15 = sld [smem:[#allocation2 + $0x94]] }
 0x166   : >> { %v1036_v7 = vsel %vm3716_vm10, %v1035_v6, %v1009_v5  ;;  %v1062_v9 = vstv %s2520_s4  ;;  %s2441_s17 = sld [smem:[#allocation2 + $0x9c]] }
 0x167   : >> { %v1063_v10 = vsel %vm3725_vm9, %v1062_v9, %v1036_v7  ;;  %v1089_v12 = vstv %s2528_s5  ;;  %s2449_s21 = sld [smem:[#allocation2 + $0xa4]] }
 0x168   : >> { %v1090_v13 = vsel %vm3732_vm12, %v1089_v12, %v1063_v10  ;;  %v1114_v15 = vstv %s2536_s9  ;;  %s2457_s22 = sld [smem:[#allocation2 + $0xac]] }
 0x169   : >> { %v1115_v16 = vsel %vm1103_vm6, %v1114_v15, %v1090_v13  ;;  %v732_v22 = vstv %s2417_s12  ;;  %s2465_s23 = sld [smem:[#allocation2 + $0xb4]] }
 0x16a   : >> { %2546 = vst.msk [vmem:[%s3745_s20 + $0x60] sm:$0xff] %vm1129_vm13, %v1115_v16  ;;  %v753_v23 = vstv %s2425_s13  ;;  %s2473_s26 = sld [smem:[#allocation2 + $0xbc]] }
 0x16b   : >> { %v754_v25 = vsel %vm739_vm4, %v753_v23, %v732_v22  ;;  %v778_v26 = vstv %s2433_s15  ;;  %s2481_s30 = sld [smem:[#allocation2 + $0xc4]] }
 0x16c   : >> { %v779_v28 = vsel %vm764_vm5, %v778_v26, %v754_v25  ;;  %v803_v29 = vstv %s2441_s17  ;;  %s2489_s4 = sld [smem:[#allocation2 + $0xcc]] }
 0x16d   : >> { %v804_v31 = vsel %vm789_vm7, %v803_v29, %v779_v28  ;;  %v828_v32 = vstv %s2449_s21  ;;  %s2497_s5 = sld [smem:[#allocation2 + $0xd4]] }
 0x16e   : >> { %v829_v33 = vsel %vm814_vm8, %v828_v32, %v804_v31  ;;  %v853_v35 = vstv %s2457_s22  ;;  %s2505_s9 = sld [smem:[#allocation2 + $0xdc]] }
 0x16f   : >> { %v854_v36 = vsel %vm5518_vm1, %v853_v35, %v829_v33  ;;  %v878_v38 = vstv %s2465_s23  ;;  %s2513_s12 = sld [smem:[#allocation2 + $0xe4]] }
 0x170   : >> { %v879_v39 = vsel %vm5519_vm14, %v878_v38, %v854_v36  ;;  %v903_v41 = vstv %s2473_s26  ;;  %s2521_s13 = sld [smem:[#allocation2 + $0xec]] }
 0x171   : >> { %v904_v42 = vsel %vm5520_vm3, %v903_v41, %v879_v39  ;;  %v930_v44 = vstv %s2481_s30  ;;  %s2529_s15 = sld [smem:[#allocation2 + $0xf4]] }
 0x172   : >> { %v931_v45 = vsel %vm3676_vm15, %v930_v44, %v904_v42  ;;  %v957_v47 = vstv %s2489_s4  ;;  %s2537_s17 = sld [smem:[#allocation2 + $0xfc]] }
 0x173   : >> { %v958_v48 = vsel %vm3687_vm2, %v957_v47, %v931_v45  ;;  %v984_v50 = vstv %s2497_s5  ;;  %s2418_s21 = sld [smem:[#allocation2 + $0x5]] }
 0x174   : >> { %v985_v51 = vsel %vm3698_vm11, %v984_v50, %v958_v48  ;;  %v1011_v53 = vstv %s2505_s9  ;;  %s2426_s22 = sld [smem:[#allocation2 + $0x8d]] }
 0x175   : >> { %v1012_v54 = vsel %vm3707_vm0, %v1011_v53, %v985_v51  ;;  %v1038_v55 = vstv %s2513_s12  ;;  %s2434_s23 = sld [smem:[#allocation2 + $0x95]] }
 0x176   : >> { %v1039_v56 = vsel %vm3716_vm10, %v1038_v55, %v1012_v54  ;;  %v1065_v57 = vstv %s2521_s13  ;;  %s2442_s26 = sld [smem:[#allocation2 + $0x9d]] }
 0x177   : >> { %v1066_v58 = vsel %vm3725_vm9, %v1065_v57, %v1039_v56  ;;  %v1092_v34 = vstv %s2529_s15  ;;  %s2450_s30 = sld [smem:[#allocation2 + $0xa5]] }
 0x178   : >> { %v1093_v59 = vsel %vm3732_vm12, %v1092_v34, %v1066_v58  ;;  %v1117_v60 = vstv %s2537_s17  ;;  %s2458_s4 = sld [smem:[#allocation2 + $0xad]] }
 0x179   : >> { %v1118_v37 = vsel %vm1103_vm6, %v1117_v60, %v1093_v59  ;;  %v734_v61 = vstv %s2418_s21  ;;  %s2466_s5 = sld [smem:[#allocation2 + $0xb5]] }
 0x17a   : >> { %2548 = vst.msk [vmem:[%s3745_s20 + $0x80] sm:$0xff] %vm1129_vm13, %v1118_v37  ;;  %v756_v40 = vstv %s2426_s22  ;;  %s2474_s9 = sld [smem:[#allocation2 + $0xbd]] }
 0x17b   : >> { %v757_v21 = vsel %vm739_vm4, %v756_v40, %v734_v61  ;;  %v781_v18 = vstv %s2434_s23  ;;  %s2482_s12 = sld [smem:[#allocation2 + $0xc5]] }
 0x17c   : >> { %v782_v49 = vsel %vm764_vm5, %v781_v18, %v757_v21  ;;  %v806_v52 = vstv %s2442_s26  ;;  %s2490_s13 = sld [smem:[#allocation2 + $0xcd]] }
 0x17d   : >> { %v807_v62 = vsel %vm789_vm7, %v806_v52, %v782_v49  ;;  %v831_v63 = vstv %s2450_s30  ;;  %s2498_s15 = sld [smem:[#allocation2 + $0xd5]] }
 0x17e   : >> { %v832_v0 = vsel %vm814_vm8, %v831_v63, %v807_v62  ;;  %v856_v1 = vstv %s2458_s4  ;;  %s2506_s17 = sld [smem:[#allocation2 + $0xdd]] }
 0x17f   : >> { %v857_v2 = vsel %vm5518_vm1, %v856_v1, %v832_v0  ;;  %v881_v3 = vstv %s2466_s5  ;;  %s2514_s21 = sld [smem:[#allocation2 + $0xe5]] }
 0x180   : >> { %v882_v4 = vsel %vm5519_vm14, %v881_v3, %v857_v2  ;;  %v906_v5 = vstv %s2474_s9  ;;  %s2522_s22 = sld [smem:[#allocation2 + $0xed]] }
 0x181   : >> { %v907_v6 = vsel %vm5520_vm3, %v906_v5, %v882_v4  ;;  %v933_v7 = vstv %s2482_s12  ;;  %s2530_s23 = sld [smem:[#allocation2 + $0xf5]] }
 0x182   : >> { %v934_v9 = vsel %vm3676_vm15, %v933_v7, %v907_v6  ;;  %v960_v10 = vstv %s2490_s13  ;;  %s2538_s26 = sld [smem:[#allocation2 + $0xfd]] }
 0x183   : >> { %v961_v12 = vsel %vm3687_vm2, %v960_v10, %v934_v9  ;;  %v987_v13 = vstv %s2498_s15  ;;  %s2419_s30 = sld [smem:[#allocation2 + $0x6]] }
 0x184   : >> { %v988_v15 = vsel %vm3698_vm11, %v987_v13, %v961_v12  ;;  %v1014_v16 = vstv %s2506_s17  ;;  %s2427_s4 = sld [smem:[#allocation2 + $0x8e]] }
 0x185   : >> { %v1015_v22 = vsel %vm3707_vm0, %v1014_v16, %v988_v15  ;;  %v1041_v23 = vstv %s2514_s21  ;;  %s2435_s5 = sld [smem:[#allocation2 + $0x96]] }
 0x186   : >> { %v1042_v25 = vsel %vm3716_vm10, %v1041_v23, %v1015_v22  ;;  %v1068_v26 = vstv %s2522_s22  ;;  %s2443_s9 = sld [smem:[#allocation2 + $0x9e]] }
 0x187   : >> { %v1069_v28 = vsel %vm3725_vm9, %v1068_v26, %v1042_v25  ;;  %v1095_v29 = vstv %s2530_s23  ;;  %s2451_s12 = sld [smem:[#allocation2 + $0xa6]] }
 0x188   : >> { %v1096_v31 = vsel %vm3732_vm12, %v1095_v29, %v1069_v28  ;;  %v1120_v32 = vstv %s2538_s26  ;;  %s2459_s13 = sld [smem:[#allocation2 + $0xae]] }
 0x189   : >> { %v1121_v33 = vsel %vm1103_vm6, %v1120_v32, %v1096_v31  ;;  %v736_v35 = vstv %s2419_s30  ;;  %s2467_s15 = sld [smem:[#allocation2 + $0xb6]] }
 0x18a   : >> { %2550 = vst.msk [vmem:[%s3745_s20 + $0xa0] sm:$0xff] %vm1129_vm13, %v1121_v33  ;;  %v759_v36 = vstv %s2427_s4  ;;  %s2475_s17 = sld [smem:[#allocation2 + $0xbe]] }
 0x18b   : >> { %v760_v38 = vsel %vm739_vm4, %v759_v36, %v736_v35  ;;  %v784_v39 = vstv %s2435_s5  ;;  %s2483_s21 = sld [smem:[#allocation2 + $0xc6]] }
 0x18c   : >> { %v785_v41 = vsel %vm764_vm5, %v784_v39, %v760_v38  ;;  %v809_v42 = vstv %s2443_s9  ;;  %s2491_s22 = sld [smem:[#allocation2 + $0xce]] }
 0x18d   : >> { %v810_v44 = vsel %vm789_vm7, %v809_v42, %v785_v41  ;;  %v834_v45 = vstv %s2451_s12  ;;  %s2499_s23 = sld [smem:[#allocation2 + $0xd6]] }
 0x18e   : >> { %v835_v47 = vsel %vm814_vm8, %v834_v45, %v810_v44  ;;  %v859_v48 = vstv %s2459_s13  ;;  %s2507_s26 = sld [smem:[#allocation2 + $0xde]] }
 0x18f   : >> { %v860_v50 = vsel %vm5518_vm1, %v859_v48, %v835_v47  ;;  %v884_v51 = vstv %s2467_s15  ;;  %s2515_s30 = sld [smem:[#allocation2 + $0xe6]] }
 0x190   : >> { %v885_v53 = vsel %vm5519_vm14, %v884_v51, %v860_v50  ;;  %v909_v54 = vstv %s2475_s17  ;;  %s2523_s4 = sld [smem:[#allocation2 + $0xee]] }
 0x191   : >> { %v910_v55 = vsel %vm5520_vm3, %v909_v54, %v885_v53  ;;  %v936_v56 = vstv %s2483_s21  ;;  %s2531_s5 = sld [smem:[#allocation2 + $0xf6]] }
 0x192   : >> { %v937_v57 = vsel %vm3676_vm15, %v936_v56, %v910_v55  ;;  %v963_v58 = vstv %s2491_s22  ;;  %s2539_s9 = sld [smem:[#allocation2 + $0xfe]] }
 0x193   : >> { %v964_v34 = vsel %vm3687_vm2, %v963_v58, %v937_v57  ;;  %v990_v59 = vstv %s2499_s23  ;;  %s2420_s12 = sld [smem:[#allocation2 + $0x7]] }
 0x194   : >> { %v991_v60 = vsel %vm3698_vm11, %v990_v59, %v964_v34  ;;  %v1017_v37 = vstv %s2507_s26  ;;  %s2428_s13 = sld [smem:[#allocation2 + $0x8f]] }
 0x195   : >> { %v1018_v61 = vsel %vm3707_vm0, %v1017_v37, %v991_v60  ;;  %v1044_v40 = vstv %s2515_s30  ;;  %s2436_s15 = sld [smem:[#allocation2 + $0x97]] }
 0x196   : >> { %v1045_v21 = vsel %vm3716_vm10, %v1044_v40, %v1018_v61  ;;  %v1071_v18 = vstv %s2523_s4  ;;  %s2444_s17 = sld [smem:[#allocation2 + $0x9f]] }
 0x197   : >> { %v1072_v49 = vsel %vm3725_vm9, %v1071_v18, %v1045_v21  ;;  %v1098_v52 = vstv %s2531_s5  ;;  %s2452_s21 = sld [smem:[#allocation2 + $0xa7]] }
 0x198   : >> { %v1099_v62 = vsel %vm3732_vm12, %v1098_v52, %v1072_v49  ;;  %v1123_v63 = vstv %s2539_s9  ;;  %s2460_s22 = sld [smem:[#allocation2 + $0xaf]] }
 0x199   : >> { %v1124_v0 = vsel %vm1103_vm6, %v1123_v63, %v1099_v62  ;;  %v738_v1 = vstv %s2420_s12  ;;  %s2468_s23 = sld [smem:[#allocation2 + $0xb7]] }
 0x19a   : >> { %2552 = vst.msk [vmem:[%s3745_s20 + $0xc0] sm:$0xff] %vm1129_vm13, %v1124_v0  ;;  %v762_v2 = vstv %s2428_s13  ;;  %s2476_s26 = sld [smem:[#allocation2 + $0xbf]] }
 0x19b   : >> { %v763_v3 = vsel %vm739_vm4, %v762_v2, %v738_v1  ;;  %v787_v4 = vstv %s2436_s15  ;;  %s2484_s30 = sld [smem:[#allocation2 + $0xc7]]  ;;  %vm5521_vm4 = vmmov %vm5519_vm14 }
 0x19c   : >> { %v788_v5 = vsel %vm764_vm5, %v787_v4, %v763_v3  ;;  %v812_v6 = vstv %s2444_s17  ;;  %s2492_s4 = sld [smem:[#allocation2 + $0xcf]]  ;;  %vm5522_vm5 = vmmov %vm5520_vm3 }
 0x19d   : >> { %v813_v7 = vsel %vm789_vm7, %v812_v6, %v788_v5  ;;  %v837_v9 = vstv %s2452_s21  ;;  %s2500_s5 = sld [smem:[#allocation2 + $0xd7]] }
 0x19e   : >> { %v838_v10 = vsel %vm814_vm8, %v837_v9, %v813_v7  ;;  %v862_v12 = vstv %s2460_s22  ;;  %s2508_s9 = sld [smem:[#allocation2 + $0xdf]] }
 0x19f   : >> { %v863_v13 = vsel %vm5518_vm1, %v862_v12, %v838_v10  ;;  %v887_v15 = vstv %s2468_s23  ;;  %s2516_s12 = sld [smem:[#allocation2 + $0xe7]] }
 0x1a0   : >> { %v888_v16 = vsel %vm5521_vm4, %v887_v15, %v863_v13  ;;  %v912_v22 = vstv %s2476_s26  ;;  %s2524_s13 = sld [smem:[#allocation2 + $0xef]] }
 0x1a1   : >> { %v913_v23 = vsel %vm5522_vm5, %v912_v22, %v888_v16  ;;  %v939_v25 = vstv %s2484_s30  ;;  %s2532_s15 = sld [smem:[#allocation2 + $0xf7]] }
 0x1a2   : >> { %v940_v26 = vsel %vm3676_vm15, %v939_v25, %v913_v23  ;;  %v966_v28 = vstv %s2492_s4  ;;  %s2540_s17 = sld [smem:[#allocation2 + $0xff]] }
 0x1a3   : >> { %v967_v29 = vsel %vm3687_vm2, %v966_v28, %v940_v26  ;;  %v993_v31 = vstv %s2500_s5 }
 0x1a4   : >> { %v994_v32 = vsel %vm3698_vm11, %v993_v31, %v967_v29  ;;  %v1020_v33 = vstv %s2508_s9 }
 0x1a5   : >> { %v1021_v35 = vsel %vm3707_vm0, %v1020_v33, %v994_v32  ;;  %v1047_v36 = vstv %s2516_s12 }
 0x1a6   : >> { %v1048_v38 = vsel %vm3716_vm10, %v1047_v36, %v1021_v35  ;;  %v1074_v8 = vstv %s2524_s13  ;;  %717 = sbr.rel (!%p715_p2) target bundleno = 291 (0x123), region = 156 }
 0x1a7   : >> { %v1075_v39 = vsel %vm3725_vm9, %v1074_v8, %v1048_v38  ;;  %v1101_v41 = vstv %s2532_s15 }
 0x1a8   : >> { %v1102_v11 = vsel %vm3732_vm12, %v1101_v41, %v1075_v39  ;;  %v1126_v42 = vstv %s2540_s17 }
 0x1a9   : >> { %v1127_v14 = vsel %vm1103_vm6, %v1126_v42, %v1102_v11 }
 0x1aa   : >> { %2554 = vst.msk [vmem:[%s3745_s20 + $0xe0] sm:$0xff] %vm1129_vm13, %v1127_v14 }
 0x1ab PF: > { %p1152_p3 = scmp.gt.s32.totalorder %s3107_s28, 0 }
 0x1ad   : > { %p1153_p6 = pnand %p1152_p3, %p700_p11 }
 0x1af   : > { %p1154_p9 = pneg %p1153_p6 }
 0x1b1   : > { %p1155_p10 = pnand %p1154_p9, %p250_p7 }
 0x1b2   : > { %s3992_s3 = smov (!%p1155_p10), 0  }
 0x1b3   : > { %1158 = sbr.rel (%p1155_p10) target bundleno = 1014 (0x3f6), region = 62 }
 0x1b8   : > { %v1159_v19 = vlaneseq }
 0x1ba   : > { %v3986_v20 = vshrl.u32 %v1159_v19, 7  ;;  %v3988_v24 = vand.u32 127, %v1159_v19 }
 0x1bc   : > { %v1163_v27 = vsub.s32 %v3986_v20, %v3988_v24 }
 0x1bd LB: >> { %5523 = sst [smem:[#allocation21_spill]] %s3019_s3  ;;  %s3019_s3 = sphi %s3992_s3, %s1169_s3  }
 0x1be   : >> { %s3997_s27 = sld [smem:[#allocation2]] }
 0x1bf   : >> { %s3999_s28 = sld [smem:[#allocation2 + $0x1]] }
 0x1c0   : >> { %s4001_s2 = sld [smem:[#allocation2 + $0x2]] }
 0x1c1   : >> { %s4003_s20 = sld [smem:[#allocation2 + $0x3]] }
 0x1c2   : >> { %s4005_s21 = sld [smem:[#allocation2 + $0x4]] }
 0x1c3   : >> { %s4007_s22 = sld [smem:[#allocation2 + $0x5]] }
 0x1c4   : >> { %s4009_s23 = sld [smem:[#allocation2 + $0x6]]  ;;  %v1175_v17 = vstv %s3997_s27 }
 0x1c5   : >> { %s4011_s26 = sld [smem:[#allocation2 + $0x7]]  ;;  %v1177_v30 = vstv %s3999_s28 }
 0x1c6   : >> { %s4013_s30 = sld [smem:[#allocation2 + $0x8]]  ;;  %v1179_v45 = vstv %s4001_s2 }
 0x1c7   : >> { %s4015_s4 = sld [smem:[#allocation2 + $0x9]]  ;;  %v1181_v47 = vstv %s4003_s20 }
 0x1c8   : >> { %s4017_s5 = sld [smem:[#allocation2 + $0xa]]  ;;  %v1183_v48 = vstv %s4005_s21 }
 0x1c9   : >> { %s4019_s9 = sld [smem:[#allocation2 + $0xb]]  ;;  %v1185_v51 = vstv %s4007_s22 }
 0x1ca   : >> { %s4021_s12 = sld [smem:[#allocation2 + $0xc]]  ;;  %v1187_v53 = vstv %s4009_s23 }
 0x1cb   : >> { %s4023_s13 = sld [smem:[#allocation2 + $0xd]]  ;;  %v1189_v56 = vstv %s4011_s26 }
 0x1cc   : >> { %s4025_s15 = sld [smem:[#allocation2 + $0xe]]  ;;  %v1192_v44 = vstv %s4013_s30 }
 0x1cd   : >> { %s4027_s17 = sld [smem:[#allocation2 + $0xf]]  ;;  %v1195_v50 = vstv %s4015_s4 }
 0x1ce   : >> { %s4029_s24 = sld [smem:[#allocation2 + $0x10]]  ;;  %v1198_v54 = vstv %s4017_s5 }
 0x1cf   : >> { %s4031_s0 = sld [smem:[#allocation2 + $0x11]]  ;;  %v1201_v55 = vstv %s4019_s9 }
 0x1d0   : >> { %s4033_s14 = sld [smem:[#allocation2 + $0x12]]  ;;  %v1204_v58 = vstv %s4021_s12 }
 0x1d1   : >> { %s4035_s10 = sld [smem:[#allocation2 + $0x13]]  ;;  %v1207_v34 = vstv %s4023_s13 }
 0x1d2   : >> { %s4037_s19 = sld [smem:[#allocation2 + $0x14]]  ;;  %v1210_v60 = vstv %s4025_s15 }
 0x1d3   : >> { %s4039_s8 = sld [smem:[#allocation2 + $0x15]]  ;;  %v1213_v37 = vstv %s4027_s17 }
 0x1d4   : >> { %s4041_s18 = sld [smem:[#allocation2 + $0x16]]  ;;  %v1217_v61 = vstv %s4029_s24 }
 0x1d5   : >> { %s4043_s6 = sld [smem:[#allocation2 + $0x17]]  ;;  %v1220_v18 = vstv %s4031_s0 }
 0x1d6   : >> { %5524 = sst [smem:[#allocation22_spill]] %s4033_s14 }
 0x1d7   : >> { %5525 = sst [smem:[#allocation23_spill]] %s4035_s10 }
 0x1d8   : >> { %5526 = sst [smem:[#allocation24_spill]] %s4037_s19 }
 0x1d9   : >> { %5527 = sst [smem:[#allocation25_spill]] %s4039_s8 }
 0x1da   : >> { %5528 = sst [smem:[#allocation26_spill]] %s4041_s18 }
 0x1db   : >> { %5529 = sst [smem:[#allocation27_spill]] %s4043_s6 }
 0x1dc   : >> { %s4045_s11 = sld [smem:[#allocation2 + $0x18]] }
 0x1dd   : >> { %s4047_s16 = sld [smem:[#allocation2 + $0x19]] }
 0x1de   : >> { %s4049_s1 = sld [smem:[#allocation2 + $0x1a]] }
 0x1df   : >> { %s4051_s7 = sld [smem:[#allocation2 + $0x1b]] }
 0x1e0   : >> { %s4053_s29 = sld [smem:[#allocation2 + $0x1c]] }
 0x1e1   : >> { %s4055_s14 = sld [smem:[#allocation2 + $0x1d]] }
 0x1e2   : >> { %5530 = sst [smem:[#allocation28_spill]] %s4045_s11 }
 0x1e3   : >> { %5531 = sst [smem:[#allocation29_spill]] %s4047_s16 }
 0x1e4   : >> { %5532 = sst [smem:[#allocation30_spill]] %s4049_s1 }
 0x1e5   : >> { %5533 = sst [smem:[#allocation31_spill]] %s4051_s7 }
 0x1e6   : >> { %5534 = sst [smem:[#allocation32_spill]] %s4053_s29 }
 0x1e7   : >> { %5535 = sst [smem:[#allocation33_spill]] %s4055_s14 }
 0x1e8   : >> { %s4057_s10 = sld [smem:[#allocation2 + $0x1e]] }
 0x1e9   : >> { %s4059_s19 = sld [smem:[#allocation2 + $0x1f]] }
 0x1ea   : >> { %s4061_s8 = sld [smem:[#allocation2 + $0x20]] }
 0x1eb   : >> { %s4063_s18 = sld [smem:[#allocation2 + $0x21]] }
 0x1ec   : >> { %s4065_s6 = sld [smem:[#allocation2 + $0x22]] }
 0x1ed   : >> { %s4067_s11 = sld [smem:[#allocation2 + $0x23]] }
 0x1ee   : >> { %5536 = sst [smem:[#allocation34_spill]] %s4057_s10 }
 0x1ef   : >> { %5537 = sst [smem:[#allocation35_spill]] %s4059_s19 }
 0x1f0   : >> { %5538 = sst [smem:[#allocation36_spill]] %s4061_s8 }
 0x1f1   : >> { %5539 = sst [smem:[#allocation37_spill]] %s4063_s18 }
 0x1f2   : >> { %5540 = sst [smem:[#allocation38_spill]] %s4065_s6 }
 0x1f3   : >> { %5541 = sst [smem:[#allocation39_spill]] %s4067_s11 }
 0x1f4   : >> { %s4069_s16 = sld [smem:[#allocation2 + $0x24]] }
 0x1f5   : >> { %s4071_s1 = sld [smem:[#allocation2 + $0x25]] }
 0x1f6   : >> { %s4073_s7 = sld [smem:[#allocation2 + $0x26]] }
 0x1f7   : >> { %s4075_s29 = sld [smem:[#allocation2 + $0x27]] }
 0x1f8   : >> { %s4077_s14 = sld [smem:[#allocation2 + $0x28]] }
 0x1f9   : >> { %s4079_s10 = sld [smem:[#allocation2 + $0x29]] }
 0x1fa   : >> { %5542 = sst [smem:[#allocation40_spill]] %s4069_s16 }
 0x1fb   : >> { %5543 = sst [smem:[#allocation41_spill]] %s4071_s1 }
 0x1fc   : >> { %5544 = sst [smem:[#allocation42_spill]] %s4073_s7 }
 0x1fd   : >> { %5545 = sst [smem:[#allocation43_spill]] %s4075_s29 }
 0x1fe   : >> { %5546 = sst [smem:[#allocation44_spill]] %s4077_s14 }
 0x1ff   : >> { %5547 = sst [smem:[#allocation45_spill]] %s4079_s10 }
 0x200   : >> { %s4081_s19 = sld [smem:[#allocation2 + $0x2a]] }
 0x201   : >> { %s4083_s8 = sld [smem:[#allocation2 + $0x2b]] }
 0x202   : >> { %s4085_s18 = sld [smem:[#allocation2 + $0x2c]] }
 0x203   : >> { %s4087_s6 = sld [smem:[#allocation2 + $0x2d]] }
 0x204   : >> { %s4089_s11 = sld [smem:[#allocation2 + $0x2e]] }
 0x205   : >> { %s4091_s16 = sld [smem:[#allocation2 + $0x2f]] }
 0x206   : >> { %5548 = sst [smem:[#allocation46_spill]] %s4081_s19 }
 0x207   : >> { %5549 = sst [smem:[#allocation47_spill]] %s4083_s8 }
 0x208   : >> { %5550 = sst [smem:[#allocation48_spill]] %s4085_s18 }
 0x209   : >> { %5551 = sst [smem:[#allocation49_spill]] %s4087_s6 }
 0x20a   : >> { %5552 = sst [smem:[#allocation50_spill]] %s4089_s11 }
 0x20b   : >> { %5553 = sst [smem:[#allocation51_spill]] %s4091_s16 }
 0x20c   : >> { %s4093_s1 = sld [smem:[#allocation2 + $0x30]] }
 0x20d   : >> { %s4095_s7 = sld [smem:[#allocation2 + $0x31]] }
 0x20e   : >> { %s4097_s29 = sld [smem:[#allocation2 + $0x32]] }
 0x20f   : >> { %s4099_s14 = sld [smem:[#allocation2 + $0x33]] }
 0x210   : >> { %s4101_s10 = sld [smem:[#allocation2 + $0x34]] }
 0x211   : >> { %s4103_s19 = sld [smem:[#allocation2 + $0x35]] }
 0x212   : >> { %5554 = sst [smem:[#allocation52_spill]] %s4093_s1 }
 0x213   : >> { %5555 = sst [smem:[#allocation53_spill]] %s4095_s7 }
 0x214   : >> { %5556 = sst [smem:[#allocation54_spill]] %s4097_s29 }
 0x215   : >> { %5557 = sst [smem:[#allocation55_spill]] %s4099_s14 }
 0x216   : >> { %5558 = sst [smem:[#allocation56_spill]] %s4101_s10 }
 0x217   : >> { %5559 = sst [smem:[#allocation57_spill]] %s4103_s19 }
 0x218   : >> { %s4105_s8 = sld [smem:[#allocation2 + $0x36]] }
 0x219   : >> { %s4107_s18 = sld [smem:[#allocation2 + $0x37]] }
 0x21a   : >> { %s4109_s6 = sld [smem:[#allocation2 + $0x38]] }
 0x21b   : >> { %s4111_s11 = sld [smem:[#allocation2 + $0x39]] }
 0x21c   : >> { %s4113_s16 = sld [smem:[#allocation2 + $0x3a]] }
 0x21d   : >> { %s4115_s1 = sld [smem:[#allocation2 + $0x3b]] }
 0x21e   : >> { %5560 = sst [smem:[#allocation58_spill]] %s4105_s8 }
 0x21f   : >> { %5561 = sst [smem:[#allocation59_spill]] %s4107_s18 }
 0x220   : >> { %5562 = sst [smem:[#allocation60_spill]] %s4109_s6 }
 0x221   : >> { %5563 = sst [smem:[#allocation61_spill]] %s4111_s11 }
 0x222   : >> { %5564 = sst [smem:[#allocation62_spill]] %s4113_s16 }
 0x223   : >> { %5565 = sst [smem:[#allocation63_spill]] %s4115_s1 }
 0x224   : >> { %s4117_s7 = sld [smem:[#allocation2 + $0x3c]] }
 0x225   : >> { %s4119_s29 = sld [smem:[#allocation2 + $0x3d]] }
 0x226   : >> { %s4121_s14 = sld [smem:[#allocation2 + $0x3e]] }
 0x227   : >> { %s4123_s10 = sld [smem:[#allocation2 + $0x3f]] }
 0x228   : >> { %s4125_s19 = sld [smem:[#allocation2 + $0x40]] }
 0x229   : >> { %s4127_s8 = sld [smem:[#allocation2 + $0x41]] }
 0x22a   : >> { %5566 = sst [smem:[#allocation64_spill]] %s4117_s7 }
 0x22b   : >> { %5567 = sst [smem:[#allocation65_spill]] %s4119_s29 }
 0x22c   : >> { %5568 = sst [smem:[#allocation66_spill]] %s4121_s14 }
 0x22d   : >> { %5569 = sst [smem:[#allocation67_spill]] %s4123_s10 }
 0x22e   : >> { %5570 = sst [smem:[#allocation68_spill]] %s4125_s19 }
 0x22f   : >> { %5571 = sst [smem:[#allocation69_spill]] %s4127_s8 }
 0x230   : >> { %s4129_s18 = sld [smem:[#allocation2 + $0x42]] }
 0x231   : >> { %s4131_s6 = sld [smem:[#allocation2 + $0x43]] }
 0x232   : >> { %s4133_s11 = sld [smem:[#allocation2 + $0x44]] }
 0x233   : >> { %s4135_s16 = sld [smem:[#allocation2 + $0x45]] }
 0x234   : >> { %s4137_s1 = sld [smem:[#allocation2 + $0x46]] }
 0x235   : >> { %s4139_s7 = sld [smem:[#allocation2 + $0x47]] }
 0x236   : >> { %5572 = sst [smem:[#allocation70_spill]] %s4129_s18 }
 0x237   : >> { %5573 = sst [smem:[#allocation71_spill]] %s4131_s6 }
 0x238   : >> { %5574 = sst [smem:[#allocation72_spill]] %s4133_s11 }
 0x239   : >> { %5575 = sst [smem:[#allocation73_spill]] %s4135_s16 }
 0x23a   : >> { %5576 = sst [smem:[#allocation74_spill]] %s4137_s1 }
 0x23b   : >> { %5577 = sst [smem:[#allocation75_spill]] %s4139_s7 }
 0x23c   : >> { %s4141_s29 = sld [smem:[#allocation2 + $0x48]] }
 0x23d   : >> { %s4143_s14 = sld [smem:[#allocation2 + $0x49]] }
 0x23e   : >> { %s4145_s10 = sld [smem:[#allocation2 + $0x4a]] }
 0x23f   : >> { %s4147_s19 = sld [smem:[#allocation2 + $0x4b]] }
 0x240   : >> { %s4149_s8 = sld [smem:[#allocation2 + $0x4c]] }
 0x241   : >> { %s4151_s18 = sld [smem:[#allocation2 + $0x4d]] }
 0x242   : >> { %5578 = sst [smem:[#allocation76_spill]] %s4141_s29 }
 0x243   : >> { %5579 = sst [smem:[#allocation77_spill]] %s4143_s14 }
 0x244   : >> { %5580 = sst [smem:[#allocation78_spill]] %s4145_s10 }
 0x245   : >> { %5581 = sst [smem:[#allocation79_spill]] %s4147_s19 }
 0x246   : >> { %5582 = sst [smem:[#allocation80_spill]] %s4149_s8 }
 0x247   : >> { %5583 = sst [smem:[#allocation81_spill]] %s4151_s18 }
 0x248   : >> { %s4153_s6 = sld [smem:[#allocation2 + $0x4e]] }
 0x249   : >> { %s4155_s11 = sld [smem:[#allocation2 + $0x4f]] }
 0x24a   : >> { %s4157_s16 = sld [smem:[#allocation2 + $0x50]] }
 0x24b   : >> { %s4159_s1 = sld [smem:[#allocation2 + $0x51]] }
 0x24c   : >> { %s4161_s7 = sld [smem:[#allocation2 + $0x52]] }
 0x24d   : >> { %s4163_s29 = sld [smem:[#allocation2 + $0x53]] }
 0x24e   : >> { %5584 = sst [smem:[#allocation82_spill]] %s4153_s6 }
 0x24f   : >> { %5585 = sst [smem:[#allocation83_spill]] %s4155_s11 }
 0x250   : >> { %5586 = sst [smem:[#allocation84_spill]] %s4157_s16 }
 0x251   : >> { %5587 = sst [smem:[#allocation85_spill]] %s4159_s1 }
 0x252   : >> { %5588 = sst [smem:[#allocation86_spill]] %s4161_s7 }
 0x253   : >> { %5589 = sst [smem:[#allocation87_spill]] %s4163_s29 }
 0x254   : >> { %s4165_s14 = sld [smem:[#allocation2 + $0x54]] }
 0x255   : >> { %s4167_s10 = sld [smem:[#allocation2 + $0x55]] }
 0x256   : >> { %s4169_s19 = sld [smem:[#allocation2 + $0x56]] }
 0x257   : >> { %s4171_s8 = sld [smem:[#allocation2 + $0x57]] }
 0x258   : >> { %s4173_s18 = sld [smem:[#allocation2 + $0x58]] }
 0x259   : >> { %s4175_s6 = sld [smem:[#allocation2 + $0x59]] }
 0x25a   : >> { %5590 = sst [smem:[#allocation88_spill]] %s4165_s14 }
 0x25b   : >> { %5591 = sst [smem:[#allocation89_spill]] %s4167_s10 }
 0x25c   : >> { %5592 = sst [smem:[#allocation90_spill]] %s4169_s19 }
 0x25d   : >> { %5593 = sst [smem:[#allocation91_spill]] %s4171_s8 }
 0x25e   : >> { %5594 = sst [smem:[#allocation92_spill]] %s4173_s18 }
 0x25f   : >> { %5595 = sst [smem:[#allocation93_spill]] %s4175_s6 }
 0x260   : >> { %s4177_s11 = sld [smem:[#allocation2 + $0x5a]] }
 0x261   : >> { %s4179_s16 = sld [smem:[#allocation2 + $0x5b]] }
 0x262   : >> { %s4181_s1 = sld [smem:[#allocation2 + $0x5c]] }
 0x263   : >> { %s4183_s7 = sld [smem:[#allocation2 + $0x5d]] }
 0x264   : >> { %s4185_s29 = sld [smem:[#allocation2 + $0x5e]] }
 0x265   : >> { %s4187_s14 = sld [smem:[#allocation2 + $0x5f]] }
 0x266   : >> { %5596 = sst [smem:[#allocation94_spill]] %s4177_s11 }
 0x267   : >> { %5597 = sst [smem:[#allocation95_spill]] %s4179_s16 }
 0x268   : >> { %5598 = sst [smem:[#allocation96_spill]] %s4181_s1 }
 0x269   : >> { %5599 = sst [smem:[#allocation97_spill]] %s4183_s7 }
 0x26a   : >> { %5600 = sst [smem:[#allocation98_spill]] %s4185_s29 }
 0x26b   : >> { %5601 = sst [smem:[#allocation99_spill]] %s4187_s14 }
 0x26c   : >> { %s4189_s10 = sld [smem:[#allocation2 + $0x60]] }
 0x26d   : >> { %s4191_s19 = sld [smem:[#allocation2 + $0x61]] }
 0x26e   : >> { %s4193_s8 = sld [smem:[#allocation2 + $0x62]] }
 0x26f   : >> { %s4195_s18 = sld [smem:[#allocation2 + $0x63]] }
 0x270   : >> { %s4197_s6 = sld [smem:[#allocation2 + $0x64]] }
 0x271   : >> { %s4199_s11 = sld [smem:[#allocation2 + $0x65]] }
 0x272   : >> { %5602 = sst [smem:[#allocation100_spill]] %s4189_s10 }
 0x273   : >> { %5603 = sst [smem:[#allocation101_spill]] %s4191_s19 }
 0x274   : >> { %5604 = sst [smem:[#allocation102_spill]] %s4193_s8 }
 0x275   : >> { %5605 = sst [smem:[#allocation103_spill]] %s4195_s18 }
 0x276   : >> { %5606 = sst [smem:[#allocation104_spill]] %s4197_s6 }
 0x277   : >> { %5607 = sst [smem:[#allocation105_spill]] %s4199_s11 }
 0x278   : >> { %s4201_s1 = sld [smem:[#allocation2 + $0x66]] }
 0x279   : >> { %s4203_s7 = sld [smem:[#allocation2 + $0x67]] }
 0x27a   : >> { %s4205_s29 = sld [smem:[#allocation2 + $0x68]] }
 0x27b   : >> { %s4207_s14 = sld [smem:[#allocation2 + $0x69]] }
 0x27c   : >> { %s5612_s25 = sld [smem:[#allocation19_spill]] }
 0x27d   : >> { %s4209_s19 = sld [smem:[#allocation2 + $0x6a]] }
 0x27e   : >> { %5608 = sst [smem:[#allocation106_spill]] %s4201_s1 }
 0x27f   : >> { %5609 = sst [smem:[#allocation107_spill]] %s4203_s7 }
 0x280   : >> { %5610 = sst [smem:[#allocation108_spill]] %s4205_s29 }
 0x281   : >> { %5611 = sst [smem:[#allocation109_spill]] %s4207_s14 }
 0x282   : >> { %s4211_s8 = sld [smem:[#allocation2 + $0x6b]] }
 0x283   : >> { %5613 = sst [smem:[#allocation110_spill]] %s4209_s19  ;;  %s5464_s19 = sshll.u32 %s3019_s3, 3 }
 0x284   : >> { %s4213_s18 = sld [smem:[#allocation2 + $0x6c]] }
 0x285   : >> { %s4215_s6 = sld [smem:[#allocation2 + $0x6d]] }
 0x286   : >> { %s4217_s11 = sld [smem:[#allocation2 + $0x6e]] }
 0x287   : >> { %s4219_s10 = sld [smem:[#allocation2 + $0x6f]] }
 0x288   : >> { %5614 = sst [smem:[#allocation111_spill]] %s4211_s8 }
 0x289   : >> { %s4221_s1 = sld [smem:[#allocation2 + $0x70]] }
 0x28a   : >> { %5615 = sst [smem:[#allocation112_spill]] %s4213_s18 }
 0x28b   : >> { %s4223_s7 = sld [smem:[#allocation2 + $0x71]] }
 0x28c   : >> { %5616 = sst [smem:[#allocation113_spill]] %s4217_s11 }
 0x28d   : >> { %5617 = sst [smem:[#allocation114_spill]] %s4219_s10  ;;  %s1171_s10 = sadd.s32 %s5464_s19, %s5612_s25 }
 0x28e   : >> { %s4225_s29 = sld [smem:[#allocation2 + $0x72]]  ;;  %v1172_v43 = vstv %s1171_s10 }
 0x28f   : >> { %5618 = sst [smem:[#allocation115_spill]] %s4221_s1  ;;  %v4256_v46 = vadd.s32 %v1172_v43, %v1163_v27 }
 0x290   : >> { %s4227_s14 = sld [smem:[#allocation2 + $0x73]] }
 0x291   : >> { %5619 = sst [smem:[#allocation116_spill]] %s4223_s7  ;;  %vm1190_vm7 = vcmp.eq.s32.totalorder %v4256_v46, 1  ;;  %vm1215_vm8 = vcmp.eq.s32.totalorder %v4256_v46, 2  ;;  %vm1240_vm0 = vcmp.eq.s32.totalorder %v4256_v46, 3  ;;  %vm1265_vm10 = vcmp.eq.s32.totalorder %v4256_v46, 4 }
 0x292   : >> { %s4229_s16 = sld [smem:[#allocation2 + $0x74]]  ;;  %v1193_v57 = vsel %vm1190_vm7, %v1192_v44, %v1175_v17  ;;  %v1196_v59 = vsel %vm1190_vm7, %v1195_v50, %v1177_v30  ;;  %v1199_v40 = vsel %vm1190_vm7, %v1198_v54, %v1179_v45  ;;  %v1202_v21 = vsel %vm1190_vm7, %v1201_v55, %v1181_v47 }
 0x293   : >> { %s4232_s8 = sld [smem:[#allocation2 + $0x75]]  ;;  %v1205_v52 = vsel %vm1190_vm7, %v1204_v58, %v1183_v48  ;;  %v1208_v62 = vsel %vm1190_vm7, %v1207_v34, %v1185_v51  ;;  %v1211_v1 = vsel %vm1190_vm7, %v1210_v60, %v1187_v53  ;;  %v1214_v2 = vsel %vm1190_vm7, %v1213_v37, %v1189_v56 }
 0x294   : >> { %5620 = sst [smem:[#allocation117_spill]] %s4225_s29  ;;  %v1218_v3 = vsel %vm1215_vm8, %v1217_v61, %v1193_v57  ;;  %v1221_v5 = vsel %vm1215_vm8, %v1220_v18, %v1196_v59  ;;  %vm1290_vm15 = vcmp.eq.s32.totalorder %v4256_v46, 5  ;;  %vm1315_vm2 = vcmp.eq.s32.totalorder %v4256_v46, 6 }
 0x295   : >> { %s4234_s18 = sld [smem:[#allocation2 + $0x76]]  ;;  %vm1340_vm11 = vcmp.eq.s32.totalorder %v4256_v46, 7  ;;  %vm1365_vm9 = vcmp.ge.s32.totalorder %v4256_v46, 8  ;;  %vm1366_vm12 = vcmp.le.s32.totalorder %v4256_v46, 11  ;;  %vm1392_vm6 = vcmp.ge.s32.totalorder %v4256_v46, 12 }
 0x296   : >> { %s4236_s11 = sld [smem:[#allocation2 + $0x77]]  ;;  %vm1393_vm13 = vcmp.le.s32.totalorder %v4256_v46, 15  ;;  %vm1419_vm14 = vcmp.ge.s32.totalorder %v4256_v46, 16  ;;  %vm1420_vm3 = vcmp.le.s32.totalorder %v4256_v46, 22  ;;  %vm4503_vm1 = vmand %vm1365_vm9, %vm1366_vm12  ;;  %vm1446_vm4 = vcmp.ge.s32.totalorder %v4256_v46, 23 }
 0x297   : >> { %s4241_s1 = sld [smem:[#allocation2 + $0x78]]  ;;  %vm1447_vm5 = vcmp.le.s32.totalorder %v4256_v46, 31  ;;  %vm4553_vm7 = vmand %vm1392_vm6, %vm1393_vm13  ;;  %vm1527_vm9 = vcmp.ge.s32.totalorder %v4256_v46, 64  ;;  %vm1528_vm12 = vcmp.le.s32.totalorder %v4256_v46, 90 }
 0x298   : >> { %5621 = sst [smem:[#allocation118_spill]] %s4229_s16 }
 0x299   : >> { %5622 = sst [smem:[#allocation119_spill]] %s4232_s8 }
 0x29a   : >> { %s4243_s7 = sld [smem:[#allocation2 + $0x79]] }
 0x29b   : >> { %5623 = sst [smem:[#allocation120_spill]] %s4234_s18 }
 0x29c   : >> { %s4245_s29 = sld [smem:[#allocation2 + $0x7a]] }
 0x29d   : >> { %s4247_s16 = sld [smem:[#allocation2 + $0x7b]] }
 0x29e   : >> { %s4249_s8 = sld [smem:[#allocation2 + $0x7c]] }
 0x29f   : >> { %s4251_s18 = sld [smem:[#allocation2 + $0x7d]] }
 0x2a0   : >> { %s4258_s19 = sld [smem:[#allocation2 + $0x7e]] }
 0x2a1   : >> { %s4260_s25 = sld [smem:[#allocation2 + $0x7f]] }
 0x2a2   : >> { %s4262_s10 = sld [smem:[#allocation2 + $0x88]] }
 0x2a3   : >> { %s4265_s3 = sld [smem:[#allocation2 + $0x89]] }
 0x2a4   : >> { %s4278_s27 = sld [smem:[#allocation2 + $0x8b]] }
 0x2a5   : >> { %s5625_s28 = sld [smem:[#allocation22_spill]] }
 0x2a6   : >> { %5624 = sst [smem:[#allocation121_spill]] %s4258_s19 }
 0x2a7   : >> { %s4271_s19 = sld [smem:[#allocation2 + $0x8a]] }
 0x2a8   : >> { %s4284_s30 = sld [smem:[#allocation2 + $0x8c]] }
 0x2a9   : >> { %s5626_s2 = sld [smem:[#allocation23_spill]] }
 0x2aa   : >> { %s5627_s20 = sld [smem:[#allocation24_spill]] }
 0x2ab   : >> { %s4291_s21 = sld [smem:[#allocation2 + $0x8d]]  ;;  %v1223_v49 = vstv %s5625_s28 }
 0x2ac   : >> { %s5628_s22 = sld [smem:[#allocation25_spill]]  ;;  %v1224_v6 = vsel %vm1215_vm8, %v1223_v49, %v1199_v40 }
 0x2ad   : >> { %s4299_s23 = sld [smem:[#allocation2 + $0x8e]] }
 0x2ae   : >> { %s5629_s26 = sld [smem:[#allocation26_spill]] }
 0x2af   : >> { %s5630_s4 = sld [smem:[#allocation27_spill]]  ;;  %v1226_v63 = vstv %s5626_s2 }
 0x2b0   : >> { %s4307_s5 = sld [smem:[#allocation2 + $0x8f]]  ;;  %v1229_v0 = vstv %s5627_s20  ;;  %v1227_v10 = vsel %vm1215_vm8, %v1226_v63, %v1202_v21 }
 0x2b1   : >> { %s5631_s24 = sld [smem:[#allocation28_spill]]  ;;  %v1230_v12 = vsel %vm1215_vm8, %v1229_v0, %v1205_v52 }
 0x2b2   : >> { %s5632_s9 = sld [smem:[#allocation29_spill]]  ;;  %v1232_v4 = vstv %s5628_s22 }
 0x2b3   : >> { %s4315_s12 = sld [smem:[#allocation2 + $0x90]]  ;;  %v1233_v16 = vsel %vm1215_vm8, %v1232_v4, %v1208_v62 }
 0x2b4   : >> { %s5634_s0 = sld [smem:[#allocation30_spill]]  ;;  %v1235_v7 = vstv %s5629_s26 }
 0x2b5   : >> { %s5635_s13 = sld [smem:[#allocation31_spill]]  ;;  %v1238_v9 = vstv %s5630_s4  ;;  %v1236_v26 = vsel %vm1215_vm8, %v1235_v7, %v1211_v1 }
 0x2b6   : >> { %s5636_s15 = sld [smem:[#allocation32_spill]]  ;;  %v1239_v28 = vsel %vm1215_vm8, %v1238_v9, %v1214_v2  ;;  %vm1473_vm8 = vcmp.ge.s32.totalorder %v4256_v46, 32 }
 0x2b7   : >> { %s4324_s17 = sld [smem:[#allocation2 + $0x91]]  ;;  %v1242_v13 = vstv %s5631_s24 }
 0x2b8   : >> { %s5638_s28 = sld [smem:[#allocation33_spill]]  ;;  %v1245_v15 = vstv %s5632_s9  ;;  %v1243_v32 = vsel %vm1240_vm0, %v1242_v13, %v1218_v3 }
 0x2b9   : >> { %5633 = sst [smem:[#allocation22_spill]] %s4315_s12  ;;  %v1246_v33 = vsel %vm1240_vm0, %v1245_v15, %v1221_v5 }
 0x2ba   : >> { %s5639_s2 = sld [smem:[#allocation34_spill]]  ;;  %v1248_v22 = vstv %s5634_s0 }
 0x2bb   : >> { %s4333_s20 = sld [smem:[#allocation2 + $0x92]]  ;;  %v1251_v23 = vstv %s5635_s13  ;;  %v1249_v38 = vsel %vm1240_vm0, %v1248_v22, %v1224_v6 }
 0x2bc   : >> { %s5641_s22 = sld [smem:[#allocation35_spill]]  ;;  %v1254_v25 = vstv %s5636_s15  ;;  %v1252_v8 = vsel %vm1240_vm0, %v1251_v23, %v1227_v10 }
 0x2bd   : >> { %5637 = sst [smem:[#allocation23_spill]] %s4324_s17  ;;  %v1255_v39 = vsel %vm1240_vm0, %v1254_v25, %v1230_v12 }
 0x2be   : >> { %s5642_s17 = sld [smem:[#allocation36_spill]]  ;;  %v1257_v29 = vstv %s5638_s28 }
 0x2bf   : >> { %s4341_s12 = sld [smem:[#allocation2 + $0x93]]  ;;  %v1258_v11 = vsel %vm1240_vm0, %v1257_v29, %v1233_v16 }
 0x2c0   : >> { %s5644_s26 = sld [smem:[#allocation37_spill]]  ;;  %v1260_v31 = vstv %s5639_s2 }
 0x2c1   : >> { %5640 = sst [smem:[#allocation24_spill]] %s4333_s20  ;;  %v1261_v42 = vsel %vm1240_vm0, %v1260_v31, %v1236_v26 }
 0x2c2   : >> { %s4348_s4 = sld [smem:[#allocation2 + $0x94]]  ;;  %v1263_v35 = vstv %s5641_s22 }
 0x2c3   : >> { %s5646_s24 = sld [smem:[#allocation38_spill]]  ;;  %v1264_v43 = vsel %vm1240_vm0, %v1263_v35, %v1239_v28  ;;  %vm1474_vm0 = vcmp.le.s32.totalorder %v4256_v46, 45 }
 0x2c4   : >> { %s5647_s9 = sld [smem:[#allocation39_spill]]  ;;  %v1267_v36 = vstv %s5642_s17  ;;  %vm4679_vm6 = vmand %vm1473_vm8, %vm1474_vm0  ;;  %vm1679_vm8 = vcmp.eq.s32.totalorder %v4256_v46, 4294967291  ;;  %vm1704_vm0 = vcmp.eq.s32.totalorder %v4256_v46, 4294967290 }
 0x2c5   : >> { %5643 = sst [smem:[#allocation25_spill]] %s4341_s12  ;;  %v1268_v17 = vsel %vm1265_vm10, %v1267_v36, %v1243_v32 }
 0x2c6   : >> { %s4356_s12 = sld [smem:[#allocation2 + $0x95]]  ;;  %v1270_v41 = vstv %s5644_s26 }
 0x2c7   : >> { %s5649_s0 = sld [smem:[#allocation40_spill]]  ;;  %v1271_v45 = vsel %vm1265_vm10, %v1270_v41, %v1246_v33 }
 0x2c8   : >> { %5645 = sst [smem:[#allocation26_spill]] %s4348_s4 }
 0x2c9   : >> { %s5650_s13 = sld [smem:[#allocation41_spill]]  ;;  %v1273_v14 = vstv %s5646_s24 }
 0x2ca   : >> { %s4364_s15 = sld [smem:[#allocation2 + $0x96]]  ;;  %v1276_v19 = vstv %s5647_s9  ;;  %v1274_v51 = vsel %vm1265_vm10, %v1273_v14, %v1249_v38 }
 0x2cb   : >> { %s5652_s28 = sld [smem:[#allocation42_spill]]  ;;  %v1277_v53 = vsel %vm1265_vm10, %v1276_v19, %v1252_v8 }
 0x2cc   : >> { %5648 = sst [smem:[#allocation27_spill]] %s4356_s12 }
 0x2cd   : >> { %s5653_s2 = sld [smem:[#allocation43_spill]]  ;;  %v1279_v30 = vstv %s5649_s0 }
 0x2ce   : >> { %s5654_s12 = sld [smem:[#allocation44_spill]]  ;;  %v1280_v56 = vsel %vm1265_vm10, %v1279_v30, %v1255_v39 }
 0x2cf   : >> { %s4374_s22 = sld [smem:[#allocation2 + $0x97]]  ;;  %v1282_v44 = vstv %s5650_s13 }
 0x2d0   : >> { %5651 = sst [smem:[#allocation28_spill]] %s4364_s15  ;;  %v1283_v57 = vsel %vm1265_vm10, %v1282_v44, %v1258_v11 }
 0x2d1   : >> { %s5656_s17 = sld [smem:[#allocation45_spill]]  ;;  %v1285_v47 = vstv %s5652_s28 }
 0x2d2   : >> { %s5657_s15 = sld [smem:[#allocation46_spill]]  ;;  %v1286_v59 = vsel %vm1265_vm10, %v1285_v47, %v1261_v42 }
 0x2d3   : >> { %s4382_s4 = sld [smem:[#allocation2 + $0x98]]  ;;  %v1288_v48 = vstv %s5653_s2 }
 0x2d4   : >> { %s4390_s26 = sld [smem:[#allocation2 + $0x99]]  ;;  %v1292_v50 = vstv %s5654_s12  ;;  %v1289_v60 = vsel %vm1265_vm10, %v1288_v48, %v1264_v43  ;;  %vm4587_vm10 = vmand %vm1419_vm14, %vm1420_vm3  ;;  %vm1554_vm14 = vcmp.ge.s32.totalorder %v4256_v46, 91 }
 0x2d5   : >> { %5655 = sst [smem:[#allocation29_spill]] %s4374_s22  ;;  %v1293_v37 = vsel %vm1290_vm15, %v1292_v50, %v1268_v17  ;;  %vm4752_vm3 = vmand %vm1527_vm9, %vm1528_vm12  ;;  %vm1782_vm9 = vcmp.ge.s32.totalorder %v4256_v46, 4294967281  ;;  %vm1808_vm12 = vcmp.le.s32.totalorder %v4256_v46, 4294967280 }
 0x2d6   : >> { %s5660_s22 = sld [smem:[#allocation47_spill]] }
 0x2d7   : >> { %s5661_s24 = sld [smem:[#allocation48_spill]]  ;;  %v1295_v54 = vstv %s5656_s17 }
 0x2d8   : >> { %s4398_s9 = sld [smem:[#allocation2 + $0x9a]]  ;;  %v1298_v55 = vstv %s5657_s15  ;;  %v1296_v40 = vsel %vm1290_vm15, %v1295_v54, %v1271_v45 }
 0x2d9   : >> { %5658 = sst [smem:[#allocation30_spill]] %s4382_s4  ;;  %v1299_v21 = vsel %vm1290_vm15, %v1298_v55, %v1274_v51 }
 0x2da   : >> { %5659 = sst [smem:[#allocation31_spill]] %s4390_s26 }
 0x2db   : >> { %s5663_s4 = sld [smem:[#allocation49_spill]] }
 0x2dc   : >> { %s5664_s0 = sld [smem:[#allocation50_spill]]  ;;  %v1301_v58 = vstv %s5660_s22 }
 0x2dd   : >> { %s5665_s13 = sld [smem:[#allocation51_spill]]  ;;  %v1304_v34 = vstv %s5661_s24  ;;  %v1302_v52 = vsel %vm1290_vm15, %v1301_v58, %v1277_v53 }
 0x2de   : >> { %5662 = sst [smem:[#allocation32_spill]] %s4398_s9  ;;  %v1305_v62 = vsel %vm1290_vm15, %v1304_v34, %v1280_v56 }
 0x2df   : >> { %s4408_s12 = sld [smem:[#allocation2 + $0x9b]] }
 0x2e0   : >> { %s5667_s28 = sld [smem:[#allocation52_spill]] }
 0x2e1   : >> { %s5668_s2 = sld [smem:[#allocation53_spill]]  ;;  %v1307_v61 = vstv %s5663_s4 }
 0x2e2   : >> { %s4416_s17 = sld [smem:[#allocation2 + $0x9c]]  ;;  %v1310_v18 = vstv %s5664_s0  ;;  %v1308_v1 = vsel %vm1290_vm15, %v1307_v61, %v1283_v57 }
 0x2e3   : >> { %s5670_s15 = sld [smem:[#allocation54_spill]]  ;;  %v1313_v49 = vstv %s5665_s13  ;;  %v1311_v5 = vsel %vm1290_vm15, %v1310_v18, %v1286_v59 }
 0x2e4   : >> { %s5672_s9 = sld [smem:[#allocation56_spill]]  ;;  %v1314_v6 = vsel %vm1290_vm15, %v1313_v49, %v1289_v60  ;;  %vm1500_vm15 = vcmp.ge.s32.totalorder %v4256_v46, 46 }
 0x2e5   : >> { %5666 = sst [smem:[#allocation33_spill]] %s4408_s12 }
 0x2e6   : >> { %s5671_s12 = sld [smem:[#allocation55_spill]]  ;;  %v1317_v63 = vstv %s5667_s28 }
 0x2e7   : >> { %s4425_s26 = sld [smem:[#allocation2 + $0x9d]]  ;;  %v1320_v0 = vstv %s5668_s2  ;;  %v1318_v10 = vsel %vm1315_vm2, %v1317_v63, %v1293_v37 }
 0x2e8   : >> { %5669 = sst [smem:[#allocation34_spill]] %s4416_s17  ;;  %v1321_v12 = vsel %vm1315_vm2, %v1320_v0, %v1296_v40 }
 0x2e9   : >> { %s5674_s22 = sld [smem:[#allocation57_spill]]  ;;  %v1323_v2 = vstv %s5670_s15 }
 0x2ea   : >> { %s4433_s24 = sld [smem:[#allocation2 + $0x9e]]  ;;  %v1329_v4 = vstv %s5672_s9  ;;  %v1324_v16 = vsel %vm1315_vm2, %v1323_v2, %v1299_v21 }
 0x2eb   : >> { %s5675_s17 = sld [smem:[#allocation58_spill]]  ;;  %v1330_v23 = vsel %vm1315_vm2, %v1329_v4, %v1305_v62 }
 0x2ec   : >> { %s5676_s4 = sld [smem:[#allocation59_spill]]  ;;  %v1326_v3 = vstv %s5671_s12 }
 0x2ed   : >> { %5673 = sst [smem:[#allocation35_spill]] %s4425_s26  ;;  %v1327_v22 = vsel %vm1315_vm2, %v1326_v3, %v1302_v52 }
 0x2ee   : >> { %s4441_s26 = sld [smem:[#allocation2 + $0x9f]] }
 0x2ef   : >> { %s5678_s20 = sld [smem:[#allocation60_spill]]  ;;  %v1332_v7 = vstv %s5674_s22 }
 0x2f0   : >> { %s5679_s0 = sld [smem:[#allocation61_spill]]  ;;  %v1333_v26 = vsel %vm1315_vm2, %v1332_v7, %v1308_v1 }
 0x2f1   : >> { %s4450_s13 = sld [smem:[#allocation2 + $0xa0]]  ;;  %v1335_v9 = vstv %s5675_s17 }
 0x2f2   : >> { %s5681_s28 = sld [smem:[#allocation62_spill]]  ;;  %v1338_v13 = vstv %s5676_s4  ;;  %v1336_v28 = vsel %vm1315_vm2, %v1335_v9, %v1311_v5 }
 0x2f3   : >> { %s4458_s2 = sld [smem:[#allocation2 + $0xa1]]  ;;  %v1339_v32 = vsel %vm1315_vm2, %v1338_v13, %v1314_v6  ;;  %vm1501_vm2 = vcmp.le.s32.totalorder %v4256_v46, 63 }
 0x2f4   : >> { %5677 = sst [smem:[#allocation36_spill]] %s4441_s26  ;;  %vm4711_vm13 = vmand %vm1500_vm15, %vm1501_vm2  ;;  %vm1754_vm15 = vcmp.le.s32.totalorder %v4256_v46, 4294967288  ;;  %vm1755_vm2 = vcmp.ge.s32.totalorder %v4256_v46, 4294967285 }
 0x2f5   : >> { %s5683_s9 = sld [smem:[#allocation63_spill]]  ;;  %v1342_v15 = vstv %s5678_s20 }
 0x2f6   : >> { %s5684_s12 = sld [smem:[#allocation64_spill]]  ;;  %v1345_v25 = vstv %s5679_s0  ;;  %v1343_v33 = vsel %vm1340_vm11, %v1342_v15, %v1318_v10 }
 0x2f7   : >> { %5680 = sst [smem:[#allocation37_spill]] %s4450_s13  ;;  %v1346_v38 = vsel %vm1340_vm11, %v1345_v25, %v1321_v12 }
 0x2f8   : >> { %s4466_s15 = sld [smem:[#allocation2 + $0xa2]]  ;;  %v1348_v29 = vstv %s5681_s28 }
 0x2f9   : >> { %5682 = sst [smem:[#allocation38_spill]] %s4458_s2  ;;  %v1349_v42 = vsel %vm1340_vm11, %v1348_v29, %v1324_v16 }
 0x2fa   : >> { %s5686_s13 = sld [smem:[#allocation65_spill]] }
 0x2fb   : >> { %s5687_s17 = sld [smem:[#allocation66_spill]]  ;;  %v1351_v31 = vstv %s5683_s9 }
 0x2fc   : >> { %s5688_s22 = sld [smem:[#allocation67_spill]]  ;;  %v1354_v35 = vstv %s5684_s12  ;;  %v1352_v14 = vsel %vm1340_vm11, %v1351_v31, %v1327_v22 }
 0x2fd   : >> { %s5689_s20 = sld [smem:[#allocation68_spill]]  ;;  %v1355_v17 = vsel %vm1340_vm11, %v1354_v35, %v1330_v23 }
 0x2fe   : >> { %5685 = sst [smem:[#allocation39_spill]] %s4466_s15 }
 0x2ff   : >> { %s4477_s4 = sld [smem:[#allocation2 + $0xa3]] }
 0x300   : >> { %s5691_s15 = sld [smem:[#allocation69_spill]]  ;;  %v1357_v36 = vstv %s5686_s13 }
 0x301   : >> { %s5692_s2 = sld [smem:[#allocation70_spill]]  ;;  %v1360_v8 = vstv %s5687_s17  ;;  %v1358_v30 = vsel %vm1340_vm11, %v1357_v36, %v1333_v26 }
 0x302   : >> { %s4485_s26 = sld [smem:[#allocation2 + $0xa4]]  ;;  %v1363_v39 = vstv %s5688_s22  ;;  %v1361_v47 = vsel %vm1340_vm11, %v1360_v8, %v1336_v28 }
 0x303   : >> { %s4493_s0 = sld [smem:[#allocation2 + $0xa5]]  ;;  %v1369_v11 = vstv %s5689_s20  ;;  %v1364_v48 = vsel %vm1340_vm11, %v1363_v39, %v1339_v32  ;;  %vm4629_vm11 = vmand %vm1446_vm4, %vm1447_vm5  ;;  %vm1604_vm4 = vcmp.eq.s32.totalorder %v4256_v46, 4294967294  ;;  %vm1629_vm5 = vcmp.eq.s32.totalorder %v4256_v46, 4294967293 }
 0x304   : >> { %s5696_s28 = sld [smem:[#allocation72_spill]]  ;;  %v1370_v50 = vsel %vm4503_vm1, %v1369_v11, %v1343_v33 }
 0x305   : >> { %5690 = sst [smem:[#allocation40_spill]] %s4477_s4 }
 0x306   : >> { %s5695_s4 = sld [smem:[#allocation71_spill]]  ;;  %v1372_v19 = vstv %s5691_s15 }
 0x307   : >> { %s4508_s9 = sld [smem:[#allocation2 + $0xa6]]  ;;  %v1375_v43 = vstv %s5692_s2  ;;  %v1373_v53 = vsel %vm4503_vm1, %v1372_v19, %v1346_v38 }
 0x308   : >> { %5693 = sst [smem:[#allocation41_spill]] %s4485_s26  ;;  %v1376_v54 = vsel %vm4503_vm1, %v1375_v43, %v1349_v42 }
 0x309   : >> { %5694 = sst [smem:[#allocation42_spill]] %s4493_s0 }
 0x30a   : >> { %s5700_s13 = sld [smem:[#allocation73_spill]]  ;;  %v1381_v45 = vstv %s5696_s28 }
 0x30b   : >> { %s5701_s12 = sld [smem:[#allocation74_spill]]  ;;  %v1382_v58 = vsel %vm4503_vm1, %v1381_v45, %v1355_v17 }
 0x30c   : >> { %s5702_s17 = sld [smem:[#allocation75_spill]]  ;;  %v1378_v44 = vstv %s5695_s4 }
 0x30d   : >> { %5699 = sst [smem:[#allocation43_spill]] %s4508_s9  ;;  %v1379_v57 = vsel %vm4503_vm1, %v1378_v44, %v1352_v14 }
 0x30e   : >> { %s4518_s22 = sld [smem:[#allocation2 + $0xa7]] }
 0x30f   : >> { %s5704_s20 = sld [smem:[#allocation76_spill]] }
 0x310   : >> { %s5705_s9 = sld [smem:[#allocation77_spill]]  ;;  %v1384_v51 = vstv %s5700_s13 }
 0x311   : >> { %s4526_s15 = sld [smem:[#allocation2 + $0xa8]]  ;;  %v1387_v55 = vstv %s5701_s12  ;;  %v1385_v37 = vsel %vm4503_vm1, %v1384_v51, %v1358_v30 }
 0x312   : >> { %s5707_s2 = sld [smem:[#allocation78_spill]]  ;;  %v1390_v56 = vstv %s5702_s17  ;;  %v1388_v18 = vsel %vm4503_vm1, %v1387_v55, %v1361_v47 }
 0x313   : >> { %s5709_s0 = sld [smem:[#allocation80_spill]]  ;;  %v1391_v49 = vsel %vm4503_vm1, %v1390_v56, %v1364_v48  ;;  %vm1579_vm1 = vcmp.eq.s32.totalorder %v4256_v46, 4294967295 }
 0x314   : >> { %5703 = sst [smem:[#allocation44_spill]] %s4518_s22 }
 0x315   : >> { %s5708_s22 = sld [smem:[#allocation79_spill]]  ;;  %v1396_v59 = vstv %s5704_s20 }
 0x316   : >> { %s4535_s26 = sld [smem:[#allocation2 + $0xa9]]  ;;  %v1399_v60 = vstv %s5705_s9  ;;  %v1397_v63 = vsel %vm4553_vm7, %v1396_v59, %v1370_v50 }
 0x317   : >> { %5706 = sst [smem:[#allocation45_spill]] %s4526_s15  ;;  %v1400_v0 = vsel %vm4553_vm7, %v1399_v60, %v1373_v53 }
 0x318   : >> { %s4543_s4 = sld [smem:[#allocation2 + $0xaa]]  ;;  %v1402_v61 = vstv %s5707_s2 }
 0x319   : >> { %s5712_s28 = sld [smem:[#allocation81_spill]]  ;;  %v1408_v21 = vstv %s5709_s0  ;;  %v1403_v4 = vsel %vm4553_vm7, %v1402_v61, %v1376_v54 }
 0x31a   : >> { %s5713_s13 = sld [smem:[#allocation82_spill]]  ;;  %v1409_v6 = vsel %vm4553_vm7, %v1408_v21, %v1382_v58 }
 0x31b   : >> { %s5716_s12 = sld [smem:[#allocation83_spill]]  ;;  %v1405_v40 = vstv %s5708_s22 }
 0x31c   : >> { %5710 = sst [smem:[#allocation46_spill]] %s4535_s26  ;;  %v1406_v5 = vsel %vm4553_vm7, %v1405_v40, %v1379_v57 }
 0x31d   : >> { %s4559_s17 = sld [smem:[#allocation2 + $0xab]] }
 0x31e   : >> { %5711 = sst [smem:[#allocation47_spill]] %s4543_s4 }
 0x31f   : >> { %s5718_s4 = sld [smem:[#allocation84_spill]]  ;;  %v1411_v52 = vstv %s5712_s28 }
 0x320   : >> { %s5719_s26 = sld [smem:[#allocation85_spill]]  ;;  %v1414_v62 = vstv %s5713_s13  ;;  %v1412_v9 = vsel %vm4553_vm7, %v1411_v52, %v1385_v37 }
 0x321   : >> { %s4568_s15 = sld [smem:[#allocation2 + $0xac]]  ;;  %v1417_v1 = vstv %s5716_s12  ;;  %v1415_v10 = vsel %vm4553_vm7, %v1414_v62, %v1388_v18 }
 0x322   : >> { %s4576_s9 = sld [smem:[#allocation2 + $0xad]]  ;;  %v1418_v15 = vsel %vm4553_vm7, %v1417_v1, %v1391_v49  ;;  %vm1654_vm7 = vcmp.eq.s32.totalorder %v4256_v46, 4294967292 }
 0x323   : >> { %5717 = sst [smem:[#allocation48_spill]] %s4559_s17 }
 0x324   : >> { %s5722_s0 = sld [smem:[#allocation86_spill]] }
 0x325   : >> { %s5723_s22 = sld [smem:[#allocation87_spill]]  ;;  %v1423_v3 = vstv %s5718_s4 }
 0x326   : >> { %s5726_s20 = sld [smem:[#allocation88_spill]]  ;;  %v1426_v7 = vstv %s5719_s26  ;;  %v1424_v16 = vsel %vm4587_vm10, %v1423_v3, %v1397_v63 }
 0x327   : >> { %5720 = sst [smem:[#allocation49_spill]] %s4568_s15  ;;  %v1427_v25 = vsel %vm4587_vm10, %v1426_v7, %v1400_v0 }
 0x328   : >> { %5721 = sst [smem:[#allocation50_spill]] %s4576_s9 }
 0x329   : >> { %s4592_s2 = sld [smem:[#allocation2 + $0xae]] }
 0x32a   : >> { %s5728_s28 = sld [smem:[#allocation89_spill]]  ;;  %v1429_v12 = vstv %s5722_s0 }
 0x32b   : >> { %s5729_s13 = sld [smem:[#allocation90_spill]]  ;;  %v1432_v13 = vstv %s5723_s22  ;;  %v1430_v32 = vsel %vm4587_vm10, %v1429_v12, %v1403_v4 }
 0x32c   : >> { %s5730_s12 = sld [smem:[#allocation91_spill]]  ;;  %v1435_v22 = vstv %s5726_s20  ;;  %v1433_v33 = vsel %vm4587_vm10, %v1432_v13, %v1406_v5 }
 0x32d   : >> { %s5731_s4 = sld [smem:[#allocation92_spill]]  ;;  %v1436_v38 = vsel %vm4587_vm10, %v1435_v22, %v1409_v6  ;;  %v1519_v6 = vstv %s4215_s6 }
 0x32e   : >> { %s4603_s9 = sld [smem:[#allocation2 + $0xaf]] }
 0x32f   : >> { %5727 = sst [smem:[#allocation51_spill]] %s4592_s2 }
 0x330   : >> { %s5733_s2 = sld [smem:[#allocation93_spill]]  ;;  %v1438_v23 = vstv %s5728_s28 }
 0x331   : >> { %s5734_s15 = sld [smem:[#allocation94_spill]]  ;;  %v1441_v26 = vstv %s5729_s13  ;;  %v1439_v8 = vsel %vm4587_vm10, %v1438_v23, %v1412_v9 }
 0x332   : >> { %s4611_s17 = sld [smem:[#allocation2 + $0xb0]]  ;;  %v1444_v28 = vstv %s5730_s12  ;;  %v1442_v11 = vsel %vm4587_vm10, %v1441_v26, %v1415_v10 }
 0x333   : >> { %s4619_s26 = sld [smem:[#allocation2 + $0xb1]]  ;;  %v1450_v31 = vstv %s5731_s4  ;;  %v1445_v42 = vsel %vm4587_vm10, %v1444_v28, %v1418_v15  ;;  %v1540_v28 = vstv %s4227_s14  ;;  %vm1729_vm10 = vcmp.eq.s32.totalorder %v4256_v46, 4294967289 }
 0x334   : >> { %5732 = sst [smem:[#allocation52_spill]] %s4603_s9  ;;  %v1451_v14 = vsel %vm4629_vm11, %v1450_v31, %v1424_v16 }
 0x335   : >> { %s5737_s9 = sld [smem:[#allocation95_spill]] }
 0x336   : >> { %s5738_s0 = sld [smem:[#allocation96_spill]]  ;;  %v1453_v35 = vstv %s5733_s2 }
 0x337   : >> { %s4634_s22 = sld [smem:[#allocation2 + $0xb2]]  ;;  %v1456_v36 = vstv %s5734_s15  ;;  %v1454_v43 = vsel %vm4629_vm11, %v1453_v35, %v1427_v25 }
 0x338   : >> { %5735 = sst [smem:[#allocation53_spill]] %s4611_s17  ;;  %v1457_v17 = vsel %vm4629_vm11, %v1456_v36, %v1430_v32 }
 0x339   : >> { %5736 = sst [smem:[#allocation54_spill]] %s4619_s26 }
 0x33a   : >> { %s5742_s20 = sld [smem:[#allocation97_spill]] }
 0x33b   : >> { %s5743_s28 = sld [smem:[#allocation98_spill]]  ;;  %v1459_v39 = vstv %s5737_s9 }
 0x33c   : >> { %s5744_s13 = sld [smem:[#allocation99_spill]]  ;;  %v1462_v41 = vstv %s5738_s0  ;;  %v1460_v45 = vsel %vm4629_vm11, %v1459_v39, %v1433_v33  ;;  %v1552_v39 = vstv %s4236_s11 }
 0x33d   : >> { %5741 = sst [smem:[#allocation55_spill]] %s4634_s22  ;;  %v1463_v47 = vsel %vm4629_vm11, %v1462_v41, %v1436_v38 }
 0x33e   : >> { %s4644_s12 = sld [smem:[#allocation2 + $0xb3]] }
 0x33f   : >> { %s5746_s4 = sld [smem:[#allocation100_spill]] }
 0x340   : >> { %s5747_s22 = sld [smem:[#allocation101_spill]]  ;;  %v1465_v19 = vstv %s5742_s20 }
 0x341   : >> { %s4652_s2 = sld [smem:[#allocation2 + $0xb4]]  ;;  %v1468_v30 = vstv %s5743_s28  ;;  %v1466_v53 = vsel %vm4629_vm11, %v1465_v19, %v1439_v8 }
 0x342   : >> { %s5749_s15 = sld [smem:[#allocation102_spill]]  ;;  %v1471_v44 = vstv %s5744_s13  ;;  %v1469_v57 = vsel %vm4629_vm11, %v1468_v30, %v1442_v11  ;;  %v1568_v30 = vstv %s4249_s8 }
 0x343   : >> { %s5751_s26 = sld [smem:[#allocation104_spill]]  ;;  %v1472_v58 = vsel %vm4629_vm11, %v1471_v44, %v1445_v42  ;;  %v1556_v42 = vstv %s4241_s1  ;;  %vm1781_vm11 = vcmp.le.s32.totalorder %v4256_v46, 4294967284 }
 0x344   : >> { %5745 = sst [smem:[#allocation56_spill]] %s4644_s12 }
 0x345   : >> { %s5750_s12 = sld [smem:[#allocation103_spill]]  ;;  %v1477_v50 = vstv %s5746_s4 }
 0x346   : >> { %s4661_s17 = sld [smem:[#allocation2 + $0xb5]]  ;;  %v1480_v51 = vstv %s5747_s22  ;;  %v1478_v60 = vsel %vm4679_vm6, %v1477_v50, %v1451_v14  ;;  %v1559_v14 = vstv %s4243_s7 }
 0x347   : >> { %5748 = sst [smem:[#allocation57_spill]] %s4652_s2  ;;  %v1481_v37 = vsel %vm4679_vm6, %v1480_v51, %v1454_v43  ;;  %v1562_v43 = vstv %s4245_s29 }
 0x348   : >> { %s5753_s9 = sld [smem:[#allocation105_spill]]  ;;  %v1483_v54 = vstv %s5749_s15 }
 0x349   : >> { %s5754_s0 = sld [smem:[#allocation106_spill]]  ;;  %v1489_v56 = vstv %s5751_s26  ;;  %v1484_v18 = vsel %vm4679_vm6, %v1483_v54, %v1457_v17  ;;  %v1565_v17 = vstv %s4247_s16  ;;  %v1581_v54 = vstv %s4262_s10 }
 0x34a   : >> { %s4669_s2 = sld [smem:[#allocation2 + $0xb6]]  ;;  %v1490_v52 = vsel %vm4679_vm6, %v1489_v56, %v1463_v47  ;;  %v1571_v47 = vstv %s4251_s18 }
 0x34b   : >> { %s5758_s20 = sld [smem:[#allocation107_spill]]  ;;  %v1486_v55 = vstv %s5750_s12 }
 0x34c   : >> { %5752 = sst [smem:[#allocation58_spill]] %s4661_s17  ;;  %v1487_v49 = vsel %vm4679_vm6, %v1486_v55, %v1460_v45 }
 0x34d   : >> { %s5759_s28 = sld [smem:[#allocation108_spill]] }
 0x34e   : >> { %s4685_s13 = sld [smem:[#allocation2 + $0xb7]]  ;;  %v1492_v34 = vstv %s5753_s9 }
 0x34f   : >> { %s4692_s17 = sld [smem:[#allocation2 + $0xb8]]  ;;  %v1495_v59 = vstv %s5754_s0  ;;  %v1493_v63 = vsel %vm4679_vm6, %v1492_v34, %v1466_v53  ;;  %v1577_v53 = vstv %s4260_s25 }
 0x350   : >> { %5755 = sst [smem:[#allocation59_spill]] %s4669_s2  ;;  %v1496_v0 = vsel %vm4679_vm6, %v1495_v59, %v1469_v57  ;;  %v1520_v26 = vsel %vm4711_vm13, %v1519_v6, %v1493_v63 }
 0x351   : >> { %s5761_s2 = sld [smem:[#allocation109_spill]]  ;;  %v1498_v61 = vstv %s5758_s20 }
 0x352   : >> { %s5762_s22 = sld [smem:[#allocation110_spill]]  ;;  %v1499_v3 = vsel %vm4679_vm6, %v1498_v61, %v1472_v58  ;;  %v1584_v58 = vstv %s4265_s3  ;;  %vm1809_vm6 = vcmp.ge.s32.totalorder %v4256_v46, 4294967274 }
 0x353   : >> { %s4700_s4 = sld [smem:[#allocation2 + $0xb9]]  ;;  %v1504_v21 = vstv %s5759_s28 }
 0x354   : >> { %5760 = sst [smem:[#allocation60_spill]] %s4685_s13  ;;  %v1505_v4 = vsel %vm4711_vm13, %v1504_v21, %v1478_v60  ;;  %v1587_v60 = vstv %s4271_s19  ;;  %v1593_v21 = vstv %s4284_s30 }
 0x355   : >> { %s5764_s13 = sld [smem:[#allocation111_spill]] }
 0x356   : >> { %s5767_s26 = sld [smem:[#allocation112_spill]] }
 0x357   : >> { %s4716_s12 = sld [smem:[#allocation2 + $0xba]]  ;;  %v1507_v62 = vstv %s5761_s2 }
 0x358   : >> { %s5769_s15 = sld [smem:[#allocation113_spill]]  ;;  %v1510_v1 = vstv %s5762_s22  ;;  %v1508_v7 = vsel %vm4711_vm13, %v1507_v62, %v1481_v37  ;;  %v1590_v37 = vstv %s4278_s27  ;;  %v1602_v62 = vstv %s4307_s5 }
 0x359   : >> { %5763 = sst [smem:[#allocation61_spill]] %s4700_s4  ;;  %v1511_v15 = vsel %vm4711_vm13, %v1510_v1, %v1484_v18  ;;  %v1596_v18 = vstv %s4291_s21 }
 0x35a   : >> { %s5770_s9 = sld [smem:[#allocation114_spill]] }
 0x35b   : >> { %s5771_s0 = sld [smem:[#allocation115_spill]]  ;;  %v1513_v2 = vstv %s5764_s13 }
 0x35c   : >> { %s4726_s20 = sld [smem:[#allocation2 + $0xbb]]  ;;  %v1516_v5 = vstv %s5767_s26  ;;  %v1514_v16 = vsel %vm4711_vm13, %v1513_v2, %v1487_v49 }
 0x35d   : >> { %5768 = sst [smem:[#allocation62_spill]] %s4716_s12  ;;  %v1517_v25 = vsel %vm4711_vm13, %v1516_v5, %v1490_v52  ;;  %v1541_v41 = vsel %vm4752_vm3, %v1540_v28, %v1514_v16  ;;  %v1599_v52 = vstv %s4299_s23 }
 0x35e   : >> { %s5773_s28 = sld [smem:[#allocation116_spill]]  ;;  %v1522_v9 = vstv %s5769_s15  ;;  %v1566_v56 = vsel %vm1554_vm14, %v1565_v17, %v1541_v41 }
 0x35f   : >> { %s4734_s12 = sld [smem:[#allocation2 + $0xbc]]  ;;  %v1523_v31 = vsel %vm4711_vm13, %v1522_v9, %v1496_v0  ;;  %v1591_v1 = vsel %vm1579_vm1, %v1590_v37, %v1566_v56 }
 0x360   : >> { %s5774_s4 = sld [smem:[#allocation117_spill]]  ;;  %v1525_v10 = vstv %s5770_s9 }
 0x361   : >> { %s4742_s2 = sld [smem:[#allocation2 + $0xbd]]  ;;  %v1531_v13 = vstv %s5771_s0  ;;  %v1526_v32 = vsel %vm4711_vm13, %v1525_v10, %v1499_v3  ;;  %vm5061_vm13 = vmand %vm1754_vm15, %vm1755_vm2  ;;  %vm1916_vm15 = vcmp.le.s32.totalorder %v4256_v46, 4294967232  ;;  %vm1917_vm2 = vcmp.ge.s32.totalorder %v4256_v46, 4294967206 }
 0x362   : >> { %5772 = sst [smem:[#allocation63_spill]] %s4726_s20  ;;  %v1532_v33 = vsel %vm4752_vm3, %v1531_v13, %v1505_v4  ;;  %v1553_v45 = vsel %vm4752_vm3, %v1552_v39, %v1526_v32  ;;  %v1649_v39 = vstv %s4433_s24 }
 0x363   : >> { %s5775_s20 = sld [smem:[#allocation118_spill]]  ;;  %v1557_v50 = vsel %vm1554_vm14, %v1556_v42, %v1532_v33  ;;  %v1578_v61 = vsel %vm1554_vm14, %v1577_v53, %v1553_v45 }
 0x364   : >> { %s5778_s6 = sld [smem:[#allocation119_spill]]  ;;  %v1534_v22 = vstv %s5773_s28  ;;  %v1582_v40 = vsel %vm1579_vm1, %v1581_v54, %v1557_v50  ;;  %v1603_v10 = vsel %vm1579_vm1, %v1602_v62, %v1578_v61 }
 0x365   : >> { %s4758_s13 = sld [smem:[#allocation2 + $0xbe]]  ;;  %v1535_v36 = vsel %vm4752_vm3, %v1534_v22, %v1508_v7 }
 0x366   : >> { %s5779_s22 = sld [smem:[#allocation120_spill]]  ;;  %v1537_v23 = vstv %s5774_s4  ;;  %v1560_v51 = vsel %vm1554_vm14, %v1559_v14, %v1535_v36 }
 0x367   : >> { %s4766_s26 = sld [smem:[#allocation2 + $0xbf]]  ;;  %v1538_v38 = vsel %vm4752_vm3, %v1537_v23, %v1511_v15  ;;  %v1585_v49 = vsel %vm1579_vm1, %v1584_v58, %v1560_v51 }
 0x368   : >> { %s4774_s15 = sld [smem:[#allocation2 + $0xc0]]  ;;  %v1563_v55 = vsel %vm1554_vm14, %v1562_v43, %v1538_v38 }
 0x369   : >> { %v1543_v29 = vstv %s5775_s20  ;;  %s4783_s4 = sld [smem:[#allocation2 + $0xc1]]  ;;  %v1588_v0 = vsel %vm1579_vm1, %v1587_v60, %v1563_v55 }
 0x36a   : >> { %v1546_v35 = vstv %s5778_s6  ;;  %s5780_s14 = sld [smem:[#allocation121_spill]]  ;;  %v1544_v11 = vsel %vm4752_vm3, %v1543_v29, %v1517_v25 }
 0x36b   : >> { %s4792_s9 = sld [smem:[#allocation2 + $0xc2]]  ;;  %v1547_v19 = vsel %vm4752_vm3, %v1546_v35, %v1520_v26  ;;  %v1569_v57 = vsel %vm1554_vm14, %v1568_v30, %v1544_v11 }
 0x36c   : >> { %v1549_v8 = vstv %s5779_s22  ;;  %s4800_s0 = sld [smem:[#allocation2 + $0xc3]]  ;;  %v1572_v34 = vsel %vm1554_vm14, %v1571_v47, %v1547_v19  ;;  %v1594_v4 = vsel %vm1579_vm1, %v1593_v21, %v1569_v57 }
 0x36d   : >> { %s4807_s11 = sld [smem:[#allocation2 + $0xc4]]  ;;  %v1550_v44 = vsel %vm4752_vm3, %v1549_v8, %v1523_v31  ;;  %v1597_v5 = vsel %vm1579_vm1, %v1596_v18, %v1572_v34  ;;  %vm1836_vm3 = vcmp.ge.s32.totalorder %v4256_v46, 4294967265 }
 0x36e   : >> { %s4815_s1 = sld [smem:[#allocation2 + $0xc5]] }
 0x36f   : >> { %s4823_s7 = sld [smem:[#allocation2 + $0xc6]] }
 0x370   : >> { %v1574_v48 = vstv %s5780_s14  ;;  %s5781_s8 = sld [smem:[#allocation22_spill]] }
 0x371   : >> { %s4833_s16 = sld [smem:[#allocation2 + $0xc7]]  ;;  %v1575_v59 = vsel %vm1554_vm14, %v1574_v48, %v1550_v44  ;;  %vm1835_vm14 = vcmp.le.s32.totalorder %v4256_v46, 4294967273 }
 0x372   : >> { %s5782_s18 = sld [smem:[#allocation23_spill]]  ;;  %v1600_v9 = vsel %vm1579_vm1, %v1599_v52, %v1575_v59  ;;  %vm5111_vm1 = vmand %vm1781_vm11, %vm1782_vm9  ;;  %vm1943_vm9 = vcmp.le.s32.totalorder %v4256_v46, 4294967205 }
 0x373   : >> { %s5783_s25 = sld [smem:[#allocation24_spill]] }
 0x374   : >> { %s4841_s29 = sld [smem:[#allocation2 + $0xc8]] }
 0x375   : >> { %s5784_s3 = sld [smem:[#allocation25_spill]] }
 0x376   : >> { %s5785_s10 = sld [smem:[#allocation26_spill]]  ;;  %v1606_v63 = vstv %s5781_s8 }
 0x377   : >> { %s4849_s20 = sld [smem:[#allocation2 + $0xc9]]  ;;  %v1607_v12 = vsel %vm1604_vm4, %v1606_v63, %v1582_v40 }
 0x378   : >> { %s5786_s19 = sld [smem:[#allocation27_spill]]  ;;  %v1609_v2 = vstv %s5782_s18 }
 0x379   : >> { %s4857_s27 = sld [smem:[#allocation2 + $0xca]]  ;;  %v1612_v3 = vstv %s5783_s25  ;;  %v1610_v15 = vsel %vm1604_vm4, %v1609_v2, %v1585_v49 }
 0x37a   : >> { %s5787_s30 = sld [smem:[#allocation28_spill]]  ;;  %v1613_v16 = vsel %vm1604_vm4, %v1612_v3, %v1588_v0 }
 0x37b   : >> { %s5788_s21 = sld [smem:[#allocation29_spill]]  ;;  %v1615_v6 = vstv %s5784_s3 }
 0x37c   : >> { %s4865_s28 = sld [smem:[#allocation2 + $0xcb]]  ;;  %v1618_v7 = vstv %s5785_s10  ;;  %v1616_v25 = vsel %vm1604_vm4, %v1615_v6, %v1591_v1 }
 0x37d   : >> { %s5789_s23 = sld [smem:[#allocation30_spill]]  ;;  %v1619_v26 = vsel %vm1604_vm4, %v1618_v7, %v1594_v4 }
 0x37e   : >> { %s5790_s5 = sld [smem:[#allocation31_spill]]  ;;  %v1621_v13 = vstv %s5786_s19 }
 0x37f   : >> { %s4873_s6 = sld [smem:[#allocation2 + $0xcc]]  ;;  %v1622_v31 = vsel %vm1604_vm4, %v1621_v13, %v1597_v5 }
 0x380   : >> { %s5791_s22 = sld [smem:[#allocation32_spill]]  ;;  %v1624_v22 = vstv %s5787_s30 }
 0x381   : >> { %s5792_s14 = sld [smem:[#allocation33_spill]]  ;;  %v1627_v23 = vstv %s5788_s21  ;;  %v1625_v36 = vsel %vm1604_vm4, %v1624_v22, %v1600_v9 }
 0x382   : >> { %s5793_s8 = sld [smem:[#allocation34_spill]]  ;;  %v1628_v38 = vsel %vm1604_vm4, %v1627_v23, %v1603_v10  ;;  %v1650_v45 = vsel %vm1629_vm5, %v1649_v39, %v1625_v36  ;;  %vm1862_vm4 = vcmp.le.s32.totalorder %v4256_v46, 4294967264 }
 0x383   : >> { %s4882_s18 = sld [smem:[#allocation2 + $0xcd]]  ;;  %v1631_v28 = vstv %s5789_s23 }
 0x384   : >> { %s5795_s25 = sld [smem:[#allocation35_spill]]  ;;  %v1634_v29 = vstv %s5790_s5  ;;  %v1632_v41 = vsel %vm1629_vm5, %v1631_v28, %v1607_v12 }
 0x385   : >> { %s4891_s3 = sld [smem:[#allocation2 + $0xce]]  ;;  %v1635_v11 = vsel %vm1629_vm5, %v1634_v29, %v1610_v15  ;;  %v1731_v29 = vstv %s4692_s17 }
 0x386   : >> { %s5796_s10 = sld [smem:[#allocation36_spill]]  ;;  %v1637_v32 = vstv %s5791_s22 }
 0x387   : >> { %s5797_s19 = sld [smem:[#allocation37_spill]]  ;;  %v1640_v33 = vstv %s5792_s14  ;;  %v1638_v19 = vsel %vm1629_vm5, %v1637_v32, %v1613_v16 }
 0x388   : >> { %s5799_s30 = sld [smem:[#allocation38_spill]]  ;;  %v1643_v35 = vstv %s5793_s8  ;;  %v1641_v43 = vsel %vm1629_vm5, %v1640_v33, %v1616_v25 }
 0x389   : >> { %5794 = sst [smem:[#allocation64_spill]] %s4882_s18  ;;  %v1644_v17 = vsel %vm1629_vm5, %v1643_v35, %v1619_v26 }
 0x38a   : >> { %s4899_s18 = sld [smem:[#allocation2 + $0xcf]]  ;;  %v1646_v8 = vstv %s5795_s25 }
 0x38b   : >> { %s4906_s21 = sld [smem:[#allocation2 + $0xd0]]  ;;  %v1647_v44 = vsel %vm1629_vm5, %v1646_v8, %v1622_v31 }
 0x38c   : >> { %s5801_s23 = sld [smem:[#allocation39_spill]]  ;;  %v1652_v42 = vstv %s5796_s10 }
 0x38d   : >> { %s5802_s5 = sld [smem:[#allocation40_spill]]  ;;  %v1656_v14 = vstv %s5797_s19  ;;  %v1653_v50 = vsel %vm1629_vm5, %v1652_v42, %v1628_v38  ;;  %v1743_v42 = vstv %s4734_s12  ;;  %vm1863_vm5 = vcmp.ge.s32.totalorder %v4256_v46, 4294967251 }
 0x38e   : >> { %s5804_s22 = sld [smem:[#allocation41_spill]]  ;;  %v1659_v30 = vstv %s5799_s30  ;;  %v1657_v51 = vsel %vm1654_vm7, %v1656_v14, %v1632_v41  ;;  %v1746_v14 = vstv %s4742_s2  ;;  %vm5237_vm11 = vmand %vm1862_vm4, %vm1863_vm5 }
 0x38f   : >> { %s5805_s14 = sld [smem:[#allocation42_spill]]  ;;  %v1660_v55 = vsel %vm1654_vm7, %v1659_v30, %v1635_v11 }
 0x390   : >> { %5798 = sst [smem:[#allocation65_spill]] %s4899_s18 }
 0x391   : >> { %5800 = sst [smem:[#allocation66_spill]] %s4906_s21 }
 0x392   : >> { %s4914_s18 = sld [smem:[#allocation2 + $0xd1]]  ;;  %v1662_v47 = vstv %s5801_s23 }
 0x393   : >> { %s4922_s8 = sld [smem:[#allocation2 + $0xd2]]  ;;  %v1665_v48 = vstv %s5802_s5  ;;  %v1663_v34 = vsel %vm1654_vm7, %v1662_v47, %v1638_v19 }
 0x394   : >> { %s5807_s24 = sld [smem:[#allocation43_spill]]  ;;  %v1668_v53 = vstv %s5804_s22  ;;  %v1666_v59 = vsel %vm1654_vm7, %v1665_v48, %v1641_v43  ;;  %v1749_v43 = vstv %s4758_s13  ;;  %v1761_v48 = vstv %s4783_s4 }
 0x395   : >> { %s5808_s25 = sld [smem:[#allocation44_spill]]  ;;  %v1671_v54 = vstv %s5805_s14  ;;  %v1669_v61 = vsel %vm1654_vm7, %v1668_v53, %v1644_v17  ;;  %v1752_v17 = vstv %s4766_s26 }
 0x396   : >> { %s4932_s10 = sld [smem:[#allocation2 + $0xd3]]  ;;  %v1672_v40 = vsel %vm1654_vm7, %v1671_v54, %v1647_v44  ;;  %v1758_v44 = vstv %s4774_s15  ;;  %v1767_v54 = vstv %s4800_s0 }
 0x397   : >> { %s5811_s19 = sld [smem:[#allocation46_spill]] }
 0x398   : >> { %5803 = sst [smem:[#allocation67_spill]] %s4914_s18 }
 0x399   : >> { %5806 = sst [smem:[#allocation68_spill]] %s4922_s8 }
 0x39a   : >> { %s5809_s18 = sld [smem:[#allocation45_spill]]  ;;  %v1674_v56 = vstv %s5807_s24 }
 0x39b   : >> { %s5812_s8 = sld [smem:[#allocation47_spill]]  ;;  %v1677_v57 = vstv %s5808_s25  ;;  %v1675_v49 = vsel %vm1654_vm7, %v1674_v56, %v1650_v45 }
 0x39c   : >> { %5810 = sst [smem:[#allocation69_spill]] %s4932_s10  ;;  %v1678_v52 = vsel %vm1654_vm7, %v1677_v57, %v1653_v50  ;;  %v1764_v50 = vstv %s4792_s9  ;;  %vm5145_vm7 = vmand %vm1808_vm12, %vm1809_vm6  ;;  %vm1969_vm6 = vcmask 523264  }
 0x39d   : >> { %s4940_s21 = sld [smem:[#allocation2 + $0xd4]]  ;;  %v1684_v60 = vstv %s5811_s19 }
 0x39e   : >> { %s4948_s30 = sld [smem:[#allocation2 + $0xd5]]  ;;  %v1685_v0 = vsel %vm1679_vm8, %v1684_v60, %v1660_v55  ;;  %v1770_v55 = vstv %s4807_s11 }
 0x39f   : >> { %s5815_s10 = sld [smem:[#allocation48_spill]] }
 0x3a0   : >> { %s5816_s23 = sld [smem:[#allocation49_spill]]  ;;  %v1681_v58 = vstv %s5809_s18 }
 0x3a1   : >> { %s4956_s5 = sld [smem:[#allocation2 + $0xd6]]  ;;  %v1687_v37 = vstv %s5812_s8  ;;  %v1682_v62 = vsel %vm1679_vm8, %v1681_v58, %v1657_v51 }
 0x3a2   : >> { %s5819_s22 = sld [smem:[#allocation51_spill]]  ;;  %v1688_v1 = vsel %vm1679_vm8, %v1687_v37, %v1663_v34  ;;  %v1773_v34 = vstv %s4815_s1  ;;  %v1776_v37 = vstv %s4823_s7 }
 0x3a3   : >> { %5813 = sst [smem:[#allocation70_spill]] %s4940_s21 }
 0x3a4   : >> { %5814 = sst [smem:[#allocation71_spill]] %s4948_s30 }
 0x3a5   : >> { %s5818_s21 = sld [smem:[#allocation50_spill]]  ;;  %v1690_v21 = vstv %s5815_s10 }
 0x3a6   : >> { %s5820_s14 = sld [smem:[#allocation52_spill]]  ;;  %v1693_v18 = vstv %s5816_s23  ;;  %v1691_v4 = vsel %vm1679_vm8, %v1690_v21, %v1666_v59 }
 0x3a7   : >> { %5817 = sst [smem:[#allocation72_spill]] %s4956_s5  ;;  %v1694_v5 = vsel %vm1679_vm8, %v1693_v18, %v1669_v61  ;;  %v1779_v61 = vstv %s4833_s16 }
 0x3a8   : >> { %s4966_s18 = sld [smem:[#allocation2 + $0xd7]]  ;;  %v1699_v2 = vstv %s5819_s22 }
 0x3a9   : >> { %s5822_s24 = sld [smem:[#allocation53_spill]]  ;;  %v1700_v15 = vsel %vm1679_vm8, %v1699_v2, %v1675_v49  ;;  %v1785_v49 = vstv %s4841_s29 }
 0x3aa   : >> { %s5823_s25 = sld [smem:[#allocation54_spill]] }
 0x3ab   : >> { %s4974_s19 = sld [smem:[#allocation2 + $0xd8]]  ;;  %v1696_v63 = vstv %s5818_s21 }
 0x3ac   : >> { %s5825_s8 = sld [smem:[#allocation55_spill]]  ;;  %v1702_v3 = vstv %s5820_s14  ;;  %v1697_v9 = vsel %vm1679_vm8, %v1696_v63, %v1672_v40  ;;  %v1791_v63 = vstv %s4857_s27 }
 0x3ad   : >> { %s5827_s5 = sld [smem:[#allocation57_spill]]  ;;  %v1703_v16 = vsel %vm1679_vm8, %v1702_v3, %v1678_v52  ;;  %v1788_v52 = vstv %s4849_s20  ;;  %vm1889_vm8 = vcmp.le.s32.totalorder %v4256_v46, 4294967250 }
 0x3ae   : >> { %5821 = sst [smem:[#allocation73_spill]] %s4966_s18 }
 0x3af   : >> { %s5826_s18 = sld [smem:[#allocation56_spill]]  ;;  %v1706_v6 = vstv %s5822_s24 }
 0x3b0   : >> { %s4983_s30 = sld [smem:[#allocation2 + $0xd9]]  ;;  %v1709_v7 = vstv %s5823_s25  ;;  %v1707_v25 = vsel %vm1704_vm0, %v1706_v6, %v1682_v62 }
 0x3b1   : >> { %5824 = sst [smem:[#allocation74_spill]] %s4974_s19  ;;  %v1710_v26 = vsel %vm1704_vm0, %v1709_v7, %v1685_v0  ;;  %v1732_v11 = vsel %vm1729_vm10, %v1731_v29, %v1707_v25  ;;  %v1794_v0 = vstv %s4865_s28 }
 0x3b2   : >> { %s5829_s10 = sld [smem:[#allocation58_spill]]  ;;  %v1712_v10 = vstv %s5825_s8  ;;  %v1759_v58 = vsel %vm5061_vm13, %v1758_v44, %v1732_v11 }
 0x3b3   : >> { %s4991_s23 = sld [smem:[#allocation2 + $0xda]]  ;;  %v1718_v13 = vstv %s5827_s5  ;;  %v1713_v31 = vsel %vm1704_vm0, %v1712_v10, %v1688_v1  ;;  %v1797_v1 = vstv %s4873_s6  ;;  %v1786_v6 = vsel %vm5111_vm1, %v1785_v49, %v1759_v58 }
 0x3b4   : >> { %s5830_s19 = sld [smem:[#allocation59_spill]]  ;;  %v1719_v33 = vsel %vm1704_vm0, %v1718_v13, %v1694_v5  ;;  %v1803_v5 = vstv %s4891_s3 }
 0x3b5   : >> { %s5831_s21 = sld [smem:[#allocation60_spill]]  ;;  %v1715_v12 = vstv %s5826_s18  ;;  %v1744_v51 = vsel %vm1729_vm10, %v1743_v42, %v1719_v33 }
 0x3b6   : >> { %5828 = sst [smem:[#allocation75_spill]] %s4983_s30  ;;  %v1716_v32 = vsel %vm1704_vm0, %v1715_v12, %v1691_v4  ;;  %v1771_v21 = vsel %vm5061_vm13, %v1770_v55, %v1744_v51 }
 0x3b7   : >> { %s4999_s30 = sld [smem:[#allocation2 + $0xdb]] }
 0x3b8   : >> { %s5832_s22 = sld [smem:[#allocation61_spill]]  ;;  %v1721_v22 = vstv %s5829_s10 }
 0x3b9   : >> { %s5008_s14 = sld [smem:[#allocation2 + $0xdc]]  ;;  %v1722_v36 = vsel %vm1704_vm0, %v1721_v22, %v1697_v9 }
 0x3ba   : >> { %v1724_v23 = vstv %s5830_s19  ;;  %s5833_s24 = sld [smem:[#allocation62_spill]]  ;;  %v1747_v53 = vsel %vm1729_vm10, %v1746_v14, %v1722_v36  ;;  %v1845_v14 = vstv %s4991_s23 }
 0x3bb   : >> { %s5016_s25 = sld [smem:[#allocation2 + $0xdd]]  ;;  %v1727_v28 = vstv %s5831_s21  ;;  %v1725_v38 = vsel %vm1704_vm0, %v1724_v23, %v1700_v15  ;;  %v1774_v62 = vsel %vm5061_vm13, %v1773_v34, %v1747_v53 }
 0x3bc   : >> { %s5834_s5 = sld [smem:[#allocation63_spill]]  ;;  %v1728_v41 = vsel %vm1704_vm0, %v1727_v28, %v1703_v16  ;;  %v1750_v56 = vsel %vm1729_vm10, %v1749_v43, %v1725_v38  ;;  %v1798_v16 = vsel %vm5111_vm1, %v1797_v1, %v1771_v21  ;;  %vm1890_vm0 = vcmp.ge.s32.totalorder %v4256_v46, 4294967233 }
 0x3bd   : >> { %s5024_s18 = sld [smem:[#allocation2 + $0xde]]  ;;  %v1753_v57 = vsel %vm1729_vm10, %v1752_v17, %v1728_v41  ;;  %v1777_v2 = vsel %vm5061_vm13, %v1776_v37, %v1750_v56  ;;  %v1848_v17 = vstv %s4999_s30  ;;  %vm5269_vm12 = vmand %vm1889_vm8, %vm1890_vm0 }
 0x3be   : >> { %v1734_v35 = vstv %s5832_s22  ;;  %s5035_s17 = sld [smem:[#allocation2 + $0xdf]]  ;;  %v1780_v3 = vsel %vm5061_vm13, %v1779_v61, %v1753_v57  ;;  %v1804_v25 = vsel %vm5111_vm1, %v1803_v5, %v1777_v2 }
 0x3bf   : >> { %s5043_s19 = sld [smem:[#allocation2 + $0xe0]]  ;;  %v1735_v19 = vsel %vm1729_vm10, %v1734_v35, %v1710_v26  ;;  %v1851_v30 = vstv %s5008_s14 }
 0x3c0   : >> { %v1737_v8 = vstv %s5833_s24  ;;  %s5051_s8 = sld [smem:[#allocation2 + $0xe1]]  ;;  %v1762_v59 = vsel %vm5061_vm13, %v1761_v48, %v1735_v19 }
 0x3c1   : >> { %s5066_s12 = sld [smem:[#allocation2 + $0xe2]]  ;;  %v1738_v45 = vsel %vm1729_vm10, %v1737_v8, %v1713_v31  ;;  %v1789_v7 = vsel %vm5111_vm1, %v1788_v52, %v1762_v59  ;;  %v1854_v48 = vstv %s5016_s25 }
 0x3c2   : >> { %v1740_v39 = vstv %s5834_s5  ;;  %s5076_s2 = sld [smem:[#allocation2 + $0xe3]]  ;;  %v1765_v60 = vsel %vm5061_vm13, %v1764_v50, %v1738_v45 }
 0x3c3   : >> { %v1741_v47 = vsel %vm1729_vm10, %v1740_v39, %v1716_v32  ;;  %s5084_s13 = sld [smem:[#allocation2 + $0xe4]]  ;;  %v1792_v13 = vsel %vm5111_vm1, %v1791_v63, %v1765_v60  ;;  %vm5187_vm10 = vmand %vm1835_vm14, %vm1836_vm3  ;;  %v1857_v53 = vstv %s5024_s18 }
 0x3c4   : >> { %s5093_s26 = sld [smem:[#allocation2 + $0xe5]]  ;;  %v1768_v40 = vsel %vm5061_vm13, %v1767_v54, %v1741_v47  ;;  %v1860_v54 = vstv %s5035_s17  ;;  %vm5301_vm13 = vmand %vm1916_vm15, %vm1917_vm2 }
 0x3c5   : >> { %s5101_s15 = sld [smem:[#allocation2 + $0xe6]]  ;;  %v1795_v15 = vsel %vm5111_vm1, %v1794_v0, %v1768_v40  ;;  %v1866_v58 = vstv %s5043_s19 }
 0x3c6   : >> { %s5837_s4 = sld [smem:[#allocation64_spill]]  ;;  %v1869_v34 = vstv %s5051_s8 }
 0x3c7   : >> { %s5840_s9 = sld [smem:[#allocation65_spill]]  ;;  %v1872_v60 = vstv %s5066_s12 }
 0x3c8   : >> { %s5117_s0 = sld [smem:[#allocation2 + $0xe7]]  ;;  %v1875_v37 = vstv %s5076_s2 }
 0x3c9   : >> { %s5841_s11 = sld [smem:[#allocation66_spill]]  ;;  %v1878_v61 = vstv %s5084_s13 }
 0x3ca   : >> { %s5842_s1 = sld [smem:[#allocation67_spill]]  ;;  %v1881_v18 = vstv %s5093_s26 }
 0x3cb   : >> { %s5126_s7 = sld [smem:[#allocation2 + $0xe8]]  ;;  %v1884_v49 = vstv %s5101_s15 }
 0x3cc   : >> { %v1800_v4 = vstv %s5837_s4  ;;  %s5134_s16 = sld [smem:[#allocation2 + $0xe9]] }
 0x3cd   : >> { %s5843_s29 = sld [smem:[#allocation68_spill]]  ;;  %v1806_v9 = vstv %s5840_s9  ;;  %v1801_v23 = vsel %vm5111_vm1, %v1800_v4, %v1774_v62 }
 0x3ce   : >> { %s5844_s20 = sld [smem:[#allocation69_spill]]  ;;  %v1807_v29 = vsel %vm5111_vm1, %v1806_v9, %v1780_v3 }
 0x3cf   : >> { %v1812_v12 = vstv %s5841_s11  ;;  %s5847_s27 = sld [smem:[#allocation70_spill]] }
 0x3d0   : >> { %s5150_s28 = sld [smem:[#allocation2 + $0xea]]  ;;  %v1815_v22 = vstv %s5842_s1  ;;  %v1813_v31 = vsel %vm5145_vm7, %v1812_v12, %v1786_v6 }
 0x3d1   : >> { %s5848_s6 = sld [smem:[#allocation71_spill]]  ;;  %v1816_v35 = vsel %vm5145_vm7, %v1815_v22, %v1789_v7  ;;  %v1893_v0 = vstv %s5126_s7  ;;  %v1887_v7 = vstv %s5117_s0 }
 0x3d2   : >> { %s5849_s3 = sld [smem:[#allocation72_spill]]  ;;  %v1896_v4 = vstv %s5134_s16 }
 0x3d3   : >> { %s5850_s10 = sld [smem:[#allocation73_spill]]  ;;  %v1818_v26 = vstv %s5843_s29 }
 0x3d4   : >> { %s5851_s21 = sld [smem:[#allocation74_spill]]  ;;  %v1821_v28 = vstv %s5844_s20  ;;  %v1819_v41 = vsel %vm5145_vm7, %v1818_v26, %v1792_v13 }
 0x3d5   : >> { %s5161_s22 = sld [smem:[#allocation2 + $0xeb]]  ;;  %v1824_v32 = vstv %s5847_s27  ;;  %v1822_v11 = vsel %vm5145_vm7, %v1821_v28, %v1795_v15  ;;  %v1846_v51 = vsel %vm5187_vm10, %v1845_v14, %v1819_v41 }
 0x3d6   : >> { %s5169_s24 = sld [smem:[#allocation2 + $0xec]]  ;;  %v1825_v19 = vsel %vm5145_vm7, %v1824_v32, %v1798_v16  ;;  %v1849_v55 = vsel %vm5187_vm10, %v1848_v17, %v1822_v11  ;;  %v1873_v1 = vsel %vm5237_vm11, %v1872_v60, %v1846_v51  ;;  %v1899_v9 = vstv %s5150_s28 }
 0x3d7   : >> { %s5852_s5 = sld [smem:[#allocation75_spill]]  ;;  %v1827_v33 = vstv %s5848_s6  ;;  %v1852_v56 = vsel %vm5187_vm10, %v1851_v30, %v1825_v19  ;;  %v1876_v2 = vsel %vm5237_vm11, %v1875_v37, %v1849_v55 }
 0x3d8   : >> { %s5177_s4 = sld [smem:[#allocation2 + $0xed]]  ;;  %v1830_v36 = vstv %s5849_s3  ;;  %v1828_v43 = vsel %vm5145_vm7, %v1827_v33, %v1801_v23  ;;  %v1879_v3 = vsel %vm5237_vm11, %v1878_v61, %v1852_v56 }
 0x3d9   : >> { %v1833_v38 = vstv %s5850_s10  ;;  %s5192_s9 = sld [smem:[#allocation2 + $0xee]]  ;;  %v1831_v44 = vsel %vm5145_vm7, %v1830_v36, %v1804_v25  ;;  %v1855_v59 = vsel %vm5187_vm10, %v1854_v48, %v1828_v43 }
 0x3da   : >> { %v1839_v39 = vstv %s5851_s21  ;;  %s5202_s11 = sld [smem:[#allocation2 + $0xef]]  ;;  %v1834_v45 = vsel %vm5145_vm7, %v1833_v38, %v1807_v29  ;;  %v1858_v40 = vsel %vm5187_vm10, %v1857_v53, %v1831_v44  ;;  %v1882_v5 = vsel %vm5237_vm11, %v1881_v18, %v1855_v59 }
 0x3db   : >> { %s5210_s1 = sld [smem:[#allocation2 + $0xf0]]  ;;  %v1840_v47 = vsel %vm5187_vm10, %v1839_v39, %v1813_v31  ;;  %v1861_v21 = vsel %vm5187_vm10, %v1860_v54, %v1834_v45  ;;  %v1885_v6 = vsel %vm5237_vm11, %v1884_v49, %v1858_v40  ;;  %v1902_v12 = vstv %s5161_s22 }
 0x3dc   : >> { %s5219_s23 = sld [smem:[#allocation2 + $0xf1]]  ;;  %v1867_v52 = vsel %vm5237_vm11, %v1866_v58, %v1840_v47  ;;  %v1905_v13 = vstv %s5169_s24  ;;  %v1888_v28 = vsel %vm5237_vm11, %v1887_v7, %v1861_v21  ;;  %v1900_v29 = vsel %vm5269_vm12, %v1899_v9, %v1873_v1 }
 0x3dd   : >> { %v1842_v42 = vstv %s5852_s5  ;;  %s5227_s30 = sld [smem:[#allocation2 + $0xf2]]  ;;  %v1894_v10 = vsel %vm5269_vm12, %v1893_v0, %v1867_v52  ;;  %v1903_v33 = vsel %vm5269_vm12, %v1902_v12, %v1876_v2 }
 0x3de   : >> { %v1843_v50 = vsel %vm5187_vm10, %v1842_v42, %v1816_v35  ;;  %s5243_s14 = sld [smem:[#allocation2 + $0xf3]]  ;;  %v1908_v23 = vstv %s5177_s4  ;;  %v1906_v35 = vsel %vm5269_vm12, %v1905_v13, %v1879_v3 }
 0x3df   : >> { %s5250_s25 = sld [smem:[#allocation2 + $0xf4]]  ;;  %v1870_v62 = vsel %vm5237_vm11, %v1869_v34, %v1843_v50  ;;  %v1911_v25 = vstv %s5192_s9  ;;  %v1909_v8 = vsel %vm5269_vm12, %v1908_v23, %v1882_v5 }
 0x3e0   : >> { %s5259_s18 = sld [smem:[#allocation2 + $0xf5]]  ;;  %v1897_v22 = vsel %vm5269_vm12, %v1896_v4, %v1870_v62  ;;  %v1914_v31 = vstv %s5202_s11  ;;  %v1912_v39 = vsel %vm5269_vm12, %v1911_v25, %v1885_v6 }
 0x3e1   : >> { %s5274_s17 = sld [smem:[#allocation2 + $0xf6]]  ;;  %v1920_v16 = vstv %s5210_s1  ;;  %v1915_v42 = vsel %vm5269_vm12, %v1914_v31, %v1888_v28 }
 0x3e2   : >> { %s5283_s19 = sld [smem:[#allocation2 + $0xf7]]  ;;  %v1923_v26 = vstv %s5219_s23  ;;  %v1921_v36 = vsel %vm5301_vm13, %v1920_v16, %v1894_v10 }
 0x3e3   : >> { %s5291_s8 = sld [smem:[#allocation2 + $0xf8]]  ;;  %v1926_v32 = vstv %s5227_s30  ;;  %v1924_v41 = vsel %vm5301_vm13, %v1923_v26, %v1897_v22 }
 0x3e4   : >> { %s5306_s12 = sld [smem:[#allocation2 + $0xf9]]  ;;  %v1929_v38 = vstv %s5243_s14  ;;  %v1927_v14 = vsel %vm5301_vm13, %v1926_v32, %v1900_v29 }
 0x3e5   : >> { %s5313_s2 = sld [smem:[#allocation2 + $0xfa]]  ;;  %v1932_v11 = vstv %s5250_s25  ;;  %v1930_v17 = vsel %vm5301_vm13, %v1929_v38, %v1903_v33 }
 0x3e6   : >> { %s5861_s13 = sld [smem:[#allocation21_spill]]  ;;  %v1935_v19 = vstv %s5259_s18  ;;  %v1933_v47 = vsel %vm5301_vm13, %v1932_v11, %v1906_v35 }
 0x3e7   : >> { %s5862_s26 = sld [smem:[#allocation20_spill]]  ;;  %v1938_v30 = vstv %s5274_s17  ;;  %v1936_v53 = vsel %vm5301_vm13, %v1935_v19, %v1909_v8 }
 0x3e8   : >> { %s5321_s15 = sld [smem:[#allocation2 + $0xfb]]  ;;  %v1941_v48 = vstv %s5283_s19  ;;  %v1939_v56 = vsel %vm5301_vm13, %v1938_v30, %v1912_v39 }
 0x3e9   : >> { %s5330_s0 = sld [smem:[#allocation2 + $0xfc]]  ;;  %v1945_v43 = vstv %s5291_s8  ;;  %v1942_v34 = vsel %vm5301_vm13, %v1941_v48, %v1915_v42 }
 0x3ea   : >> { %s2800_s7 = sld [smem:[#allocation2 + $0xfd]]  ;;  %v1946_v44 = vsel %vm1943_vm9, %v1945_v43, %v1921_v36  ;;  %v1948_v45 = vstv %s5306_s12 }
 0x3eb   : >> { %s2801_s20 = sld [smem:[#allocation2 + $0xfe]]  ;;  %v1949_v50 = vsel %vm1943_vm9, %v1948_v45, %v1924_v41  ;;  %v1951_v51 = vstv %s5313_s2 }
 0x3ec   : >> { %s5863_s16 = sshll.u32 %s5861_s13, 3  ;;  %s2802_s27 = sld [smem:[#allocation2 + $0xff]]  ;;  %v1952_v54 = vsel %vm1943_vm9, %v1951_v51, %v1927_v14 }
 0x3ed   : >> { %s5342_s29 = scalar_lea.vmem %s5862_s26, %s5863_s16  ;;  %s1169_s3 = sadd.s32 1, %s5861_s13  }
 0x3ee   : >> { %1970 = vst.msk [vmem:[%s5342_s29] sm:$0xff] %vm1969_vm6, %v1946_v44  ;;  %v1954_v55 = vstv %s5321_s15  ;;  %p1166_p5 = scmp.ge.s32.totalorder %s1169_s3, 4  }
 0x3ef   : >> { %2804 = vst.msk [vmem:[%s5342_s29 + $0x20] sm:$0xff] %vm1969_vm6, %v1949_v50  ;;  %v1955_v57 = vsel %vm1943_vm9, %v1954_v55, %v1930_v17  ;;  %v1957_v58 = vstv %s5330_s0 }
 0x3f0   : >> { %2806 = vst.msk [vmem:[%s5342_s29 + $0x40] sm:$0xff] %vm1969_vm6, %v1952_v54  ;;  %v1958_v59 = vsel %vm1943_vm9, %v1957_v58, %v1933_v47  ;;  %v1960_v60 = vstv %s2800_s7 }
 0x3f1   : >> { %2808 = vst.msk [vmem:[%s5342_s29 + $0x60] sm:$0xff] %vm1969_vm6, %v1955_v57  ;;  %v1961_v37 = vsel %vm1943_vm9, %v1960_v60, %v1936_v53  ;;  %v1963_v61 = vstv %s2801_s20  ;;  %1168 = sbr.rel (!%p1166_p5) target bundleno = 445 (0x1bd), region = 167 }
 0x3f2   : >> { %2810 = vst.msk [vmem:[%s5342_s29 + $0x80] sm:$0xff] %vm1969_vm6, %v1958_v59  ;;  %v1964_v40 = vsel %vm1943_vm9, %v1963_v61, %v1939_v56  ;;  %v1966_v21 = vstv %s2802_s27 }
 0x3f3   : >> { %2812 = vst.msk [vmem:[%s5342_s29 + $0xa0] sm:$0xff] %vm1969_vm6, %v1961_v37  ;;  %v1967_v18 = vsel %vm1943_vm9, %v1966_v21, %v1942_v34 }
 0x3f4   : >> { %2814 = vst.msk [vmem:[%s5342_s29 + $0xc0] sm:$0xff] %vm1969_vm6, %v1964_v40 }
 0x3f5   : >> { %2816 = vst.msk [vmem:[%s5342_s29 + $0xe0] sm:$0xff] %vm1969_vm6, %v1967_v18 }
 0x3f6 PF: > { %s5864_s28 = sld [smem:[#allocation11_spill]] }
 0x3fc   : > { %s5865_s6 = sand.u32 1, %s5864_s28  }
 0x3fd   : > { %s1993_s10 = scalar_lea.sflag [#allocation3], %s5865_s6 }
 0x3fe   : > { %s5866_s21 = sld [smem:[#allocation19_spill]]  ;;  %s3022_s23 = smov 512  }
 0x3ff   : > { %s5867_s5 = sld [smem:[#allocation123_spill]]  ;;  %s3023_s30 = smov 1024  }
 0x400   : > { %s5868_s4 = sld [smem:[#allocation20_spill]]  ;;  %s3024_s14 = smov 4  }
 0x401   : > { %2827 = sst [smem:[#allocation7]] (%p3079_p4), %s3022_s23  ;;  %s3025_s25 = smov 128  }
 0x402   : > { %2828 = sst [smem:[#allocation7 + $0x1]] (%p3079_p4), %s3023_s30  ;;  %s3026_s18 = smov 8  }
 0x403   : > { %2829 = sst [smem:[#allocation7 + $0x2]] (%p3079_p4), %s3024_s14  ;;  %s3027_s17 = smov [#allocation6]  }
 0x404   : > { %2830 = sst [smem:[#allocation7 + $0x3]] (%p3079_p4), %s3025_s25  ;;  %s3028_s19 = smov 0  }
 0x405   : > { %s2005_s11 = scalar_lea.hbm %s5867_s5, %s5866_s21  ;;  %2831 = sst [smem:[#allocation7 + $0x4]] (%p3079_p4), %s3025_s25 }
 0x406   : > { %s2016_s1 = sshll.u32 %s5868_s4, 4  ;;  %s2018_s3 = sshll.u32 %s2005_s11, 4  ;;  %s2017_s1 = int_to_ptr.vmem [resolvable:$true] %s2016_s1  ;;  %s2019_s3 = int_to_ptr.hbm [resolvable:$true] %s2018_s3 }
 0x407   : > { %2832 = sst [smem:[#allocation7 + $0x5]] (%p3079_p4), %s3026_s18 }
 0x408   : > { %2833 = dma.general (%p3079_p4), %s2017_s1, 4096, %s2019_s3, %s1993_s10, %s3027_s17, [#allocation7], %s3028_s19, 0  }
 0x409 PF: > { %s5870_s8 = sld [smem:[#allocation14_spill]] }
 0x40a   : > { %s5871_s12 = sld [smem:[#allocation10_spill]] }
 0x40f   : > { %p2845_p7 = scmp.ge.s32.totalorder %s5870_s8, 2 }
 0x410   : > { %s2046_s13 = sand.u32 1, %s5871_s12  }
 0x411   : > { %p2840_p11 = pnand %p2845_p7, %p3086_p8  ;;  %s2047_s26 = scalar_lea.sflag [#allocation3], %s2046_s13 }
 0x413   : > { %p2841_p12 = pneg %p2840_p11 }
 0x415   : > { %2982 = dma.done.wait (%p2841_p12), %s2047_s26, 4096  }
 0x416   : > { %2984 = vsyncadd (%p2841_p12), %s2047_s26, 4294963200  ;;  %s15_s11 = sadd.s32 1, %s5870_s8   ;;  %s5873_s6 = sld [smem:[#allocation11_spill]] }
 0x417   : > { %p12_p13 = scmp.ge.s32.totalorder %s15_s11, 4   ;;  %s5874_s7 = sld [smem:[#allocation12_spill]] }
 0x418   : > { %s5875_s8 = sld [smem:[#allocation18_spill]] }
 0x419   : > { %s5876_s9 = sld [smem:[#allocation13_spill]]  ;;  %14 = sbr.rel (!%p12_p13) target bundleno = 8 (0x8), region = 178 }
 0x41a   : > { %s5877_s10 = sld [smem:[#allocation15_spill]] }
 0x41e   :  { %2053 = vsyncpa [#allocation3], 1 }
 0x41f   :  { %2055 = vsyncpa [#allocation3 + $0x1], 1 }
 0x420   :  { %2056 = vsyncpa [#allocation4], 1 }
 0x421   :  { %2058 = vsyncpa [#allocation4 + $0x1], 1 }

</bundles_post_ra>
